<compile_context>
chip_gen: v7x
topology: tpu7x:2x2x1
jax: 0.10.0
libtpu: 0.0.40
codegen_flags: <defaults>
</compile_context>

<pallas_src>
import jax
import jax.numpy as jnp
from jax.experimental import pallas as pl
from jax.experimental.pallas import tpu as pltpu

MLPS = [64, 64, 64, 128, 1024]          # PointNet channel schedule
FCS = [1024, 1204, 512, 512, 256, 7]    # decoder FC schedule (in_dim2 = 2048)
LANE = 128
SUBLANE = 8


def _round_up(x, m):
    return ((x + m - 1) // m) * m


# --------------------------------------------------------------------------
# Fused kernel: PointNet encoder on both clouds + max-pool + concat + decoder.
# Decoder weights live in HBM and are streamed with manual DMAs that overlap
# the encoder compute (the model is weight-DMA bound at this problem size).
# --------------------------------------------------------------------------
def _make_fused_kernel(n_enc, n_dec, B, N):
    def kernel(xy_ref, *refs):
        idx = 0
        enc_w, enc_b = [], []
        for _ in range(n_enc):
            enc_w.append(refs[idx])
            enc_b.append(refs[idx + 1])
            idx += 2
        dec_b = list(refs[idx:idx + n_dec]); idx += n_dec
        dec_w_hbm = list(refs[idx:idx + n_dec]); idx += n_dec
        pose_ref = refs[idx]; idx += 1
        wbufs = list(refs[idx:idx + n_dec]); idx += n_dec
        sems = refs[idx]

        # 1) Kick off every decoder-weight DMA right away (usage order).
        #    They stream from HBM while the encoder matmuls run below.
        copies = []
        for i in range(n_dec):
            cp = pltpu.make_async_copy(dec_w_hbm[i], wbufs[i], sems.at[i])
            cp.start()
            copies.append(cp)

        # 2) PointNet encoder: 5 x (1x1 conv == matmul) + bias + ReLU.
        #    xy_ref is (ROWS, C_pad) with ROWS = n_clouds_padded * N.
        h = xy_ref[...]
        for i in range(n_enc):
            h = jnp.dot(h.astype(jnp.bfloat16), enc_w[i][...],
                        preferred_element_type=jnp.float32) + enc_b[i][...]
            h = jnp.maximum(h, 0.0)

        # 3) Per-cloud global max-pool over points (torch.max(x, dim=2)),
        #    then concat encoder(x) / encoder(y) features -> (B, 2048).
        rows, feat_dim = h.shape
        nc = rows // N
        feats = jnp.max(h.reshape(nc, N, feat_dim), axis=1)       # (nc, feat)
        g = jnp.concatenate([feats[0:B, :], feats[B:2 * B, :]], axis=1)

        # 4) Decoder: 6 FC layers, bf16 x bf16 MXU with f32 accumulation.
        #    Wait on each weight only right before its matmul.
        for i in range(n_dec):
            copies[i].wait()
            g = jnp.dot(g.astype(jnp.bfloat16), wbufs[i][...],
                        preferred_element_type=jnp.float32) + dec_b[i][...]
            if i != n_dec - 1:
                g = jnp.maximum(g, 0.0)

        pose_ref[...] = g                                          # (B, 128)

    return kernel


def fused_forward_features(x_bnc, y_bnc, enc_params, dec_params):
    """Encoder(x) + encoder(y) + concat + decoder in one pallas_call.

    x_bnc, y_bnc: (B, N, C) f32.  Returns the raw decoder output, lane-padded
    to the last layer's padded width (first 7 columns are valid).
    """
    B, N, C = x_bnc.shape
    n_enc, n_dec = len(enc_params), len(dec_params)
    C_pad = enc_params[0][0].shape[0]          # first conv weight is channel-padded
    assert C_pad >= C

    # stack both clouds on the batch axis, pad clouds to a sublane multiple
    # (8 clouds x 16 points = 128 matmul rows -> full MXU row tile); zero pad
    # rows/channels are exact and their features are never used.
    xy = jnp.concatenate([x_bnc, y_bnc], axis=0)                   # (2B, N, C)
    nc_pad = _round_up(2 * B, SUBLANE)
    xy = jnp.pad(xy, ((0, nc_pad - 2 * B), (0, 0), (0, C_pad - C)))
    rows = nc_pad * N
    xy2 = xy.reshape(rows, C_pad)

    args = [xy2]
    in_specs = [pl.BlockSpec((rows, C_pad), lambda i: (0, 0))]
    for (w, b) in enc_params:                  # small bf16 weights: auto-DMA
        args += [w, b]
        in_specs.append(pl.BlockSpec(w.shape, lambda i: (0, 0)))
        in_specs.append(pl.BlockSpec(b.shape, lambda i: (0, 0)))
    for (_, b) in dec_params:                  # decoder biases: auto-DMA (tiny)
        args.append(b)
        in_specs.append(pl.BlockSpec(b.shape, lambda i: (0, 0)))
    for (w, _) in dec_params:                  # decoder weights: stay in HBM
        args.append(w)
        in_specs.append(pl.BlockSpec(memory_space=pl.ANY))

    out_dim = dec_params[-1][0].shape[1]       # lane-padded (128)
    scratch_shapes = [pltpu.VMEM(w.shape, w.dtype) for (w, _) in dec_params]
    scratch_shapes.append(pltpu.SemaphoreType.DMA((n_dec,)))

    return pl.pallas_call(
        _make_fused_kernel(n_enc, n_dec, B, N),
        grid=(1,),
        in_specs=in_specs,
        out_specs=pl.BlockSpec((B, out_dim), lambda i: (0, 0)),
        out_shape=jax.ShapeDtypeStruct((B, out_dim), jnp.float32),
        scratch_shapes=scratch_shapes,
        compiler_params=pltpu.CompilerParams(
            dimension_semantics=("arbitrary",),
            vmem_limit_bytes=32 << 20),
    )(*args)


# --------------------------------------------------------------------------
# Pose tail (tiny): quaternion -> rotation matrix, point transform.  Plain
# JAX on ~200 floats; fuses into one or two XLA fusions.
# --------------------------------------------------------------------------
def batch_quat2mat(q):
    w, x, y, z = q[:, 0], q[:, 1], q[:, 2], q[:, 3]
    row0 = jnp.stack([1 - 2 * (y * y + z * z), 2 * (x * y - z * w), 2 * (x * z + y * w)], -1)
    row1 = jnp.stack([2 * (x * y + z * w), 1 - 2 * (x * x + z * z), 2 * (y * z - x * w)], -1)
    row2 = jnp.stack([2 * (x * z - y * w), 2 * (y * z + x * w), 1 - 2 * (x * x + y * y)], -1)
    return jnp.stack([row0, row1, row2], axis=1)                   # (B, 3, 3)


# --------------------------------------------------------------------------
# Full forward (mirrors Benchmark.forward)
# --------------------------------------------------------------------------
def benchmark_forward(x, y, enc_params, dec_params):
    # x, y: (B, C_in, N) channels-first, as in PyTorch
    x_bnc = jnp.transpose(x, (0, 2, 1)).astype(jnp.float32)        # (B, N, C)
    y_bnc = jnp.transpose(y, (0, 2, 1)).astype(jnp.float32)

    pose = fused_forward_features(x_bnc, y_bnc, enc_params, dec_params)
    out = pose[:, :7]                                              # strip lane pad
    batch_t = out[:, :3]
    quat = out[:, 3:7]
    quat = quat / jnp.linalg.norm(quat, axis=1, keepdims=True)
    batch_R = batch_quat2mat(quat)                                 # (B, 3, 3)

    # transformed = pts @ R^T + t
    transformed_x = jnp.einsum('bnk,bjk->bnj', x_bnc, batch_R) + batch_t[:, None, :]
    return batch_R, batch_t, transformed_x


# --------------------------------------------------------------------------
# Deterministic synthetic parameters (shapes from the module __init__).
# Weight values are rounded to the bf16 grid so the bf16 kernel weights and
# the f32 reference use numerically identical parameters.
# --------------------------------------------------------------------------
def init_params(key, in_dim1, in_dim2=2048):
    enc_params, dec_params = [], []
    c_in = in_dim1
    for c_out in MLPS:
        key, k1, k2 = jax.random.split(key, 3)
        w = jax.random.normal(k1, (c_in, c_out), jnp.float32) * jnp.sqrt(2.0 / c_in)
        w = w.astype(jnp.bfloat16).astype(jnp.float32)
        b = jax.random.normal(k2, (1, c_out), jnp.float32) * 0.02
        enc_params.append((w, b))
        c_in = c_out
    d_in = in_dim2
    for i, d_out in enumerate(FCS):
        key, k1, k2 = jax.random.split(key, 3)
        w = jax.random.normal(k1, (d_in, d_out), jnp.float32) * jnp.sqrt(1.0 / d_in)
        w = w.astype(jnp.bfloat16).astype(jnp.float32)
        b = jax.random.normal(k2, (1, d_out), jnp.float32) * 0.02
        if i == len(FCS) - 1:
            # identity-quaternion bias keeps the normalization well-conditioned
            b = b + jnp.array([[0., 0., 0., 1., 0., 0., 0.]], jnp.float32)
        dec_params.append((w, b))
        d_in = d_out
    return enc_params, dec_params


def to_kernel_params(enc_params, dec_params):
    """Cast weights to bf16; pad encoder input channels to >=8 and decoder
    dims to lane multiples.  All padding is exact zeros."""
    enc_k = []
    for li, (w, b) in enumerate(enc_params):
        if li == 0:
            c_in = w.shape[0]
            c_pad = max(SUBLANE, _round_up(c_in, SUBLANE))
            w = jnp.pad(w, ((0, c_pad - c_in), (0, 0)))
        enc_k.append((w.astype(jnp.bfloat16), b))
    dec_k = []
    prev_pad = 0
    for (w, b) in dec_params:
        d_in, d_out = w.shape
        out_pad = _round_up(d_out, LANE) - d_out       # 1204->1280, 7->128
        w = jnp.pad(w, ((0, prev_pad), (0, out_pad)))
        b = jnp.pad(b, ((0, 0), (0, out_pad)))
        dec_k.append((w.astype(jnp.bfloat16), b))
        prev_pad = out_pad
    return enc_k, dec_k


# --------------------------------------------------------------------------
# Pure-JAX reference (sanity check)
# --------------------------------------------------------------------------
def reference_forward(x, y, enc_params, dec_params):
    hp = jax.lax.Precision.HIGHEST

    def enc(p):
        h = jnp.transpose(p, (0, 2, 1)).astype(jnp.float32)
        for (w, b) in enc_params:
            h = jnp.maximum(jnp.einsum('bnc,cd->bnd', h, w, precision=hp) + b, 0.0)
        return jnp.max(h, axis=1)

    h = jnp.concatenate([enc(x), enc(y)], axis=1)
    for i, (w, b) in enumerate(dec_params):
        h = jnp.dot(h, w, precision=hp) + b
        if i != len(dec_params) - 1:
            h = jnp.maximum(h, 0.0)
    out = h
    batch_t = out[:, :3]
    quat = out[:, 3:]
    quat = quat / jnp.linalg.norm(quat, axis=1, keepdims=True)
    batch_R = batch_quat2mat(quat)
    pts = jnp.transpose(x, (0, 2, 1)).astype(jnp.float32)
    transformed_x = jnp.einsum('bnk,bjk->bnj', pts, batch_R, precision=hp) + batch_t[:, None, :]
    return batch_R, batch_t, transformed_x


if __name__ == "__main__":
    B, C_in, N = 2, 3, 16                     # in_dim1 = 3, 16 points per cloud
    key = jax.random.PRNGKey(0)
    kx, ky, kp = jax.random.split(key, 3)
    x = jax.random.normal(kx, (B, C_in, N), jnp.float32)
    y = jax.random.normal(ky, (B, C_in, N), jnp.float32)
    enc_params, dec_params = init_params(kp, C_in)
    enc_k, dec_k = to_kernel_params(enc_params, dec_params)   # once, outside jit

    fwd = jax.jit(benchmark_forward)
    R, t, tx = fwd(x, y, enc_k, dec_k)
    jax.block_until_ready((R, t, tx))

    assert R.shape == (B, 3, 3) and t.shape == (B, 3) and tx.shape == (B, N, 3)
    assert bool(jnp.all(jnp.isfinite(R)) & jnp.all(jnp.isfinite(t)) & jnp.all(jnp.isfinite(tx)))

    R_ref, t_ref, tx_ref = reference_forward(x, y, enc_params, dec_params)
    for got, ref in ((R, R_ref), (t, t_ref), (tx, tx_ref)):
        assert jnp.allclose(got, ref, rtol=2e-2, atol=2e-2), "mismatch vs reference"

    print("KERNEL_OK")
</pallas_src>

<mosaic_0001>
module attributes {stable_mosaic.version = 11 : i64} {
  func.func @kernel(%arg0: i32, %arg1: memref<128x8xf32, #tpu.memory_space<vmem>>, %arg2: memref<8x64xbf16, #tpu.memory_space<vmem>>, %arg3: memref<1x64xf32, #tpu.memory_space<vmem>>, %arg4: memref<64x64xbf16, #tpu.memory_space<vmem>>, %arg5: memref<1x64xf32, #tpu.memory_space<vmem>>, %arg6: memref<64x64xbf16, #tpu.memory_space<vmem>>, %arg7: memref<1x64xf32, #tpu.memory_space<vmem>>, %arg8: memref<64x128xbf16, #tpu.memory_space<vmem>>, %arg9: memref<1x128xf32, #tpu.memory_space<vmem>>, %arg10: memref<128x1024xbf16, #tpu.memory_space<vmem>>, %arg11: memref<1x1024xf32, #tpu.memory_space<vmem>>, %arg12: memref<1x1024xf32, #tpu.memory_space<vmem>>, %arg13: memref<1x1280xf32, #tpu.memory_space<vmem>>, %arg14: memref<1x512xf32, #tpu.memory_space<vmem>>, %arg15: memref<1x512xf32, #tpu.memory_space<vmem>>, %arg16: memref<1x256xf32, #tpu.memory_space<vmem>>, %arg17: memref<1x128xf32, #tpu.memory_space<vmem>>, %arg18: memref<2048x1024xbf16, #tpu.memory_space<any>>, %arg19: memref<1024x1280xbf16, #tpu.memory_space<any>>, %arg20: memref<1280x512xbf16, #tpu.memory_space<any>>, %arg21: memref<512x512xbf16, #tpu.memory_space<any>>, %arg22: memref<512x256xbf16, #tpu.memory_space<any>>, %arg23: memref<256x128xbf16, #tpu.memory_space<any>>, %arg24: memref<2x128xf32, #tpu.memory_space<vmem>>, %arg25: memref<2048x1024xbf16, #tpu.memory_space<vmem>>, %arg26: memref<1024x1280xbf16, #tpu.memory_space<vmem>>, %arg27: memref<1280x512xbf16, #tpu.memory_space<vmem>>, %arg28: memref<512x512xbf16, #tpu.memory_space<vmem>>, %arg29: memref<512x256xbf16, #tpu.memory_space<vmem>>, %arg30: memref<256x128xbf16, #tpu.memory_space<vmem>>, %arg31: memref<6x!tpu.dma_semaphore, #tpu.memory_space<semaphore_mem>>) attributes {dimension_semantics = [#tpu.dimension_semantics<arbitrary>], iteration_bounds = array<i64: 1>, scalar_prefetch = 0 : i64, scratch_operands = 7 : i64, tpu.core_type = #tpu.core_type<tc>, window_params = [{pipeline_mode = #tpu.pipeline_mode<synchronous>, transform_indices = @transform_0, window_bounds = array<i64: 128, 8>}, {pipeline_mode = #tpu.pipeline_mode<synchronous>, transform_indices = @transform_1, window_bounds = array<i64: 8, 64>}, {pipeline_mode = #tpu.pipeline_mode<synchronous>, transform_indices = @transform_2, window_bounds = array<i64: 1, 64>}, {pipeline_mode = #tpu.pipeline_mode<synchronous>, transform_indices = @transform_3, window_bounds = array<i64: 64, 64>}, {pipeline_mode = #tpu.pipeline_mode<synchronous>, transform_indices = @transform_4, window_bounds = array<i64: 1, 64>}, {pipeline_mode = #tpu.pipeline_mode<synchronous>, transform_indices = @transform_5, window_bounds = array<i64: 64, 64>}, {pipeline_mode = #tpu.pipeline_mode<synchronous>, transform_indices = @transform_6, window_bounds = array<i64: 1, 64>}, {pipeline_mode = #tpu.pipeline_mode<synchronous>, transform_indices = @transform_7, window_bounds = array<i64: 64, 128>}, {pipeline_mode = #tpu.pipeline_mode<synchronous>, transform_indices = @transform_8, window_bounds = array<i64: 1, 128>}, {pipeline_mode = #tpu.pipeline_mode<synchronous>, transform_indices = @transform_9, window_bounds = array<i64: 128, 1024>}, {pipeline_mode = #tpu.pipeline_mode<synchronous>, transform_indices = @transform_10, window_bounds = array<i64: 1, 1024>}, {pipeline_mode = #tpu.pipeline_mode<synchronous>, transform_indices = @transform_11, window_bounds = array<i64: 1, 1024>}, {pipeline_mode = #tpu.pipeline_mode<synchronous>, transform_indices = @transform_12, window_bounds = array<i64: 1, 1280>}, {pipeline_mode = #tpu.pipeline_mode<synchronous>, transform_indices = @transform_13, window_bounds = array<i64: 1, 512>}, {pipeline_mode = #tpu.pipeline_mode<synchronous>, transform_indices = @transform_14, window_bounds = array<i64: 1, 512>}, {pipeline_mode = #tpu.pipeline_mode<synchronous>, transform_indices = @transform_15, window_bounds = array<i64: 1, 256>}, {pipeline_mode = #tpu.pipeline_mode<synchronous>, transform_indices = @transform_16, window_bounds = array<i64: 1, 128>}, {}, {}, {}, {}, {}, {}, {pipeline_mode = #tpu.pipeline_mode<synchronous>, transform_indices = @transform_23, window_bounds = array<i64: 2, 128>}]} {
    %c0_i32 = arith.constant 0 : i32
    %0 = tpu.memref_slice %arg31[%c0_i32] : memref<6x!tpu.dma_semaphore, #tpu.memory_space<semaphore_mem>> -> memref<1x!tpu.dma_semaphore, #tpu.memory_space<semaphore_mem>>
    %1 = tpu.memref_squeeze %0 : memref<1x!tpu.dma_semaphore, #tpu.memory_space<semaphore_mem>> -> memref<!tpu.dma_semaphore, #tpu.memory_space<semaphore_mem>>
    tpu.enqueue_dma source(%arg18 : memref<2048x1024xbf16, #tpu.memory_space<any>>) target(%arg25 : memref<2048x1024xbf16, #tpu.memory_space<vmem>>) target_semaphore(%1 : memref<!tpu.dma_semaphore, #tpu.memory_space<semaphore_mem>>)
    %c1_i32 = arith.constant 1 : i32
    %2 = tpu.memref_slice %arg31[%c1_i32] : memref<6x!tpu.dma_semaphore, #tpu.memory_space<semaphore_mem>> -> memref<1x!tpu.dma_semaphore, #tpu.memory_space<semaphore_mem>>
    %3 = tpu.memref_squeeze %2 : memref<1x!tpu.dma_semaphore, #tpu.memory_space<semaphore_mem>> -> memref<!tpu.dma_semaphore, #tpu.memory_space<semaphore_mem>>
    tpu.enqueue_dma source(%arg19 : memref<1024x1280xbf16, #tpu.memory_space<any>>) target(%arg26 : memref<1024x1280xbf16, #tpu.memory_space<vmem>>) target_semaphore(%3 : memref<!tpu.dma_semaphore, #tpu.memory_space<semaphore_mem>>)
    %c2_i32 = arith.constant 2 : i32
    %4 = tpu.memref_slice %arg31[%c2_i32] : memref<6x!tpu.dma_semaphore, #tpu.memory_space<semaphore_mem>> -> memref<1x!tpu.dma_semaphore, #tpu.memory_space<semaphore_mem>>
    %5 = tpu.memref_squeeze %4 : memref<1x!tpu.dma_semaphore, #tpu.memory_space<semaphore_mem>> -> memref<!tpu.dma_semaphore, #tpu.memory_space<semaphore_mem>>
    tpu.enqueue_dma source(%arg20 : memref<1280x512xbf16, #tpu.memory_space<any>>) target(%arg27 : memref<1280x512xbf16, #tpu.memory_space<vmem>>) target_semaphore(%5 : memref<!tpu.dma_semaphore, #tpu.memory_space<semaphore_mem>>)
    %c3_i32 = arith.constant 3 : i32
    %6 = tpu.memref_slice %arg31[%c3_i32] : memref<6x!tpu.dma_semaphore, #tpu.memory_space<semaphore_mem>> -> memref<1x!tpu.dma_semaphore, #tpu.memory_space<semaphore_mem>>
    %7 = tpu.memref_squeeze %6 : memref<1x!tpu.dma_semaphore, #tpu.memory_space<semaphore_mem>> -> memref<!tpu.dma_semaphore, #tpu.memory_space<semaphore_mem>>
    tpu.enqueue_dma source(%arg21 : memref<512x512xbf16, #tpu.memory_space<any>>) target(%arg28 : memref<512x512xbf16, #tpu.memory_space<vmem>>) target_semaphore(%7 : memref<!tpu.dma_semaphore, #tpu.memory_space<semaphore_mem>>)
    %c4_i32 = arith.constant 4 : i32
    %8 = tpu.memref_slice %arg31[%c4_i32] : memref<6x!tpu.dma_semaphore, #tpu.memory_space<semaphore_mem>> -> memref<1x!tpu.dma_semaphore, #tpu.memory_space<semaphore_mem>>
    %9 = tpu.memref_squeeze %8 : memref<1x!tpu.dma_semaphore, #tpu.memory_space<semaphore_mem>> -> memref<!tpu.dma_semaphore, #tpu.memory_space<semaphore_mem>>
    tpu.enqueue_dma source(%arg22 : memref<512x256xbf16, #tpu.memory_space<any>>) target(%arg29 : memref<512x256xbf16, #tpu.memory_space<vmem>>) target_semaphore(%9 : memref<!tpu.dma_semaphore, #tpu.memory_space<semaphore_mem>>)
    %c5_i32 = arith.constant 5 : i32
    %10 = tpu.memref_slice %arg31[%c5_i32] : memref<6x!tpu.dma_semaphore, #tpu.memory_space<semaphore_mem>> -> memref<1x!tpu.dma_semaphore, #tpu.memory_space<semaphore_mem>>
    %11 = tpu.memref_squeeze %10 : memref<1x!tpu.dma_semaphore, #tpu.memory_space<semaphore_mem>> -> memref<!tpu.dma_semaphore, #tpu.memory_space<semaphore_mem>>
    tpu.enqueue_dma source(%arg23 : memref<256x128xbf16, #tpu.memory_space<any>>) target(%arg30 : memref<256x128xbf16, #tpu.memory_space<vmem>>) target_semaphore(%11 : memref<!tpu.dma_semaphore, #tpu.memory_space<semaphore_mem>>)
    %c0 = arith.constant 0 : index
    %c0_0 = arith.constant 0 : index
    %12 = vector.load %arg1[%c0, %c0_0] : memref<128x8xf32, #tpu.memory_space<vmem>>, vector<128x8xf32>
    %13 = arith.truncf %12 : vector<128x8xf32> to vector<128x8xbf16>
    %c0_1 = arith.constant 0 : index
    %c0_2 = arith.constant 0 : index
    %14 = vector.load %arg2[%c0_1, %c0_2] : memref<8x64xbf16, #tpu.memory_space<vmem>>, vector<8x64xbf16>
    %cst = arith.constant dense<0.000000e+00> : vector<128x64xf32>
    %15 = tpu.matmul %13, %14, %cst {dimension_numbers = #tpu.dot_dimension_numbers<[1], [0], [0], [1], [0, 0, 1, 1], [], []>} : vector<128x8xbf16>, vector<8x64xbf16>, vector<128x64xf32> -> vector<128x64xf32>
    %c0_3 = arith.constant 0 : index
    %c0_4 = arith.constant 0 : index
    %16 = vector.load %arg3[%c0_3, %c0_4] : memref<1x64xf32, #tpu.memory_space<vmem>>, vector<1x64xf32>
    %17 = vector.broadcast %16 : vector<1x64xf32> to vector<128x64xf32>
    %18 = arith.addf %15, %17 : vector<128x64xf32>
    %cst_5 = arith.constant 0.000000e+00 : f32
    %19 = vector.broadcast %cst_5 : f32 to vector<128x64xf32>
    %20 = arith.maximumf %18, %19 : vector<128x64xf32>
    %21 = arith.truncf %20 : vector<128x64xf32> to vector<128x64xbf16>
    %c0_6 = arith.constant 0 : index
    %c0_7 = arith.constant 0 : index
    %22 = vector.load %arg4[%c0_6, %c0_7] : memref<64x64xbf16, #tpu.memory_space<vmem>>, vector<64x64xbf16>
    %cst_8 = arith.constant dense<0.000000e+00> : vector<128x64xf32>
    %23 = tpu.matmul %21, %22, %cst_8 {dimension_numbers = #tpu.dot_dimension_numbers<[1], [0], [0], [1], [0, 0, 1, 1], [], []>} : vector<128x64xbf16>, vector<64x64xbf16>, vector<128x64xf32> -> vector<128x64xf32>
    %c0_9 = arith.constant 0 : index
    %c0_10 = arith.constant 0 : index
    %24 = vector.load %arg5[%c0_9, %c0_10] : memref<1x64xf32, #tpu.memory_space<vmem>>, vector<1x64xf32>
    %25 = vector.broadcast %24 : vector<1x64xf32> to vector<128x64xf32>
    %26 = arith.addf %23, %25 : vector<128x64xf32>
    %cst_11 = arith.constant 0.000000e+00 : f32
    %27 = vector.broadcast %cst_11 : f32 to vector<128x64xf32>
    %28 = arith.maximumf %26, %27 : vector<128x64xf32>
    %29 = arith.truncf %28 : vector<128x64xf32> to vector<128x64xbf16>
    %c0_12 = arith.constant 0 : index
    %c0_13 = arith.constant 0 : index
    %30 = vector.load %arg6[%c0_12, %c0_13] : memref<64x64xbf16, #tpu.memory_space<vmem>>, vector<64x64xbf16>
    %cst_14 = arith.constant dense<0.000000e+00> : vector<128x64xf32>
    %31 = tpu.matmul %29, %30, %cst_14 {dimension_numbers = #tpu.dot_dimension_numbers<[1], [0], [0], [1], [0, 0, 1, 1], [], []>} : vector<128x64xbf16>, vector<64x64xbf16>, vector<128x64xf32> -> vector<128x64xf32>
    %c0_15 = arith.constant 0 : index
    %c0_16 = arith.constant 0 : index
    %32 = vector.load %arg7[%c0_15, %c0_16] : memref<1x64xf32, #tpu.memory_space<vmem>>, vector<1x64xf32>
    %33 = vector.broadcast %32 : vector<1x64xf32> to vector<128x64xf32>
    %34 = arith.addf %31, %33 : vector<128x64xf32>
    %cst_17 = arith.constant 0.000000e+00 : f32
    %35 = vector.broadcast %cst_17 : f32 to vector<128x64xf32>
    %36 = arith.maximumf %34, %35 : vector<128x64xf32>
    %37 = arith.truncf %36 : vector<128x64xf32> to vector<128x64xbf16>
    %c0_18 = arith.constant 0 : index
    %c0_19 = arith.constant 0 : index
    %38 = vector.load %arg8[%c0_18, %c0_19] : memref<64x128xbf16, #tpu.memory_space<vmem>>, vector<64x128xbf16>
    %cst_20 = arith.constant dense<0.000000e+00> : vector<128x128xf32>
    %39 = tpu.matmul %37, %38, %cst_20 {dimension_numbers = #tpu.dot_dimension_numbers<[1], [0], [0], [1], [0, 0, 1, 1], [], []>} : vector<128x64xbf16>, vector<64x128xbf16>, vector<128x128xf32> -> vector<128x128xf32>
    %c0_21 = arith.constant 0 : index
    %c0_22 = arith.constant 0 : index
    %40 = vector.load %arg9[%c0_21, %c0_22] : memref<1x128xf32, #tpu.memory_space<vmem>>, vector<1x128xf32>
    %41 = vector.broadcast %40 : vector<1x128xf32> to vector<128x128xf32>
    %42 = arith.addf %39, %41 : vector<128x128xf32>
    %cst_23 = arith.constant 0.000000e+00 : f32
    %43 = vector.broadcast %cst_23 : f32 to vector<128x128xf32>
    %44 = arith.maximumf %42, %43 : vector<128x128xf32>
    %45 = arith.truncf %44 : vector<128x128xf32> to vector<128x128xbf16>
    %c0_24 = arith.constant 0 : index
    %c0_25 = arith.constant 0 : index
    %46 = vector.load %arg10[%c0_24, %c0_25] : memref<128x1024xbf16, #tpu.memory_space<vmem>>, vector<128x1024xbf16>
    %cst_26 = arith.constant dense<0.000000e+00> : vector<128x1024xf32>
    %47 = tpu.matmul %45, %46, %cst_26 {dimension_numbers = #tpu.dot_dimension_numbers<[1], [0], [0], [1], [0, 0, 1, 1], [], []>} : vector<128x128xbf16>, vector<128x1024xbf16>, vector<128x1024xf32> -> vector<128x1024xf32>
    %c0_27 = arith.constant 0 : index
    %c0_28 = arith.constant 0 : index
    %48 = vector.load %arg11[%c0_27, %c0_28] : memref<1x1024xf32, #tpu.memory_space<vmem>>, vector<1x1024xf32>
    %49 = vector.broadcast %48 : vector<1x1024xf32> to vector<128x1024xf32>
    %50 = arith.addf %47, %49 : vector<128x1024xf32>
    %cst_29 = arith.constant 0.000000e+00 : f32
    %51 = vector.broadcast %cst_29 : f32 to vector<128x1024xf32>
    %52 = arith.maximumf %50, %51 : vector<128x1024xf32>
    %53 = vector.shape_cast %52 : vector<128x1024xf32> to vector<8x16x1024xf32>
    %cst_30 = arith.constant dense<0xFF800000> : vector<8x1024xf32>
    %54 = vector.multi_reduction <maximumf>, %53, %cst_30 [1] : vector<8x16x1024xf32> to vector<8x1024xf32>
    %55 = vector.extract_strided_slice %54 {offsets = [0, 0], sizes = [2, 1024], strides = [1, 1]} : vector<8x1024xf32> to vector<2x1024xf32>
    %56 = vector.extract_strided_slice %54 {offsets = [2, 0], sizes = [2, 1024], strides = [1, 1]} : vector<8x1024xf32> to vector<2x1024xf32>
    %57 = tpu.concatenate %55, %56 in 1 : vector<2x1024xf32>, vector<2x1024xf32> -> vector<2x2048xf32>
    %c0_i32_31 = arith.constant 0 : i32
    %58 = tpu.memref_slice %arg31[%c0_i32_31] : memref<6x!tpu.dma_semaphore, #tpu.memory_space<semaphore_mem>> -> memref<1x!tpu.dma_semaphore, #tpu.memory_space<semaphore_mem>>
    %59 = tpu.memref_squeeze %58 : memref<1x!tpu.dma_semaphore, #tpu.memory_space<semaphore_mem>> -> memref<!tpu.dma_semaphore, #tpu.memory_space<semaphore_mem>>
    tpu.wait_dma2 semaphore(%59 : memref<!tpu.dma_semaphore, #tpu.memory_space<semaphore_mem>>) src(%arg18 : memref<2048x1024xbf16, #tpu.memory_space<any>>) dst(%arg25 : memref<2048x1024xbf16, #tpu.memory_space<vmem>>)
    %60 = arith.truncf %57 : vector<2x2048xf32> to vector<2x2048xbf16>
    %c0_32 = arith.constant 0 : index
    %c0_33 = arith.constant 0 : index
    %61 = vector.load %arg25[%c0_32, %c0_33] : memref<2048x1024xbf16, #tpu.memory_space<vmem>>, vector<2048x1024xbf16>
    %cst_34 = arith.constant dense<0.000000e+00> : vector<2x1024xf32>
    %62 = tpu.matmul %60, %61, %cst_34 {dimension_numbers = #tpu.dot_dimension_numbers<[1], [0], [0], [1], [0, 0, 1, 1], [], []>} : vector<2x2048xbf16>, vector<2048x1024xbf16>, vector<2x1024xf32> -> vector<2x1024xf32>
    %c0_35 = arith.constant 0 : index
    %c0_36 = arith.constant 0 : index
    %63 = vector.load %arg12[%c0_35, %c0_36] : memref<1x1024xf32, #tpu.memory_space<vmem>>, vector<1x1024xf32>
    %64 = vector.broadcast %63 : vector<1x1024xf32> to vector<2x1024xf32>
    %65 = arith.addf %62, %64 : vector<2x1024xf32>
    %cst_37 = arith.constant 0.000000e+00 : f32
    %66 = vector.broadcast %cst_37 : f32 to vector<2x1024xf32>
    %67 = arith.maximumf %65, %66 : vector<2x1024xf32>
    %c1_i32_38 = arith.constant 1 : i32
    %68 = tpu.memref_slice %arg31[%c1_i32_38] : memref<6x!tpu.dma_semaphore, #tpu.memory_space<semaphore_mem>> -> memref<1x!tpu.dma_semaphore, #tpu.memory_space<semaphore_mem>>
    %69 = tpu.memref_squeeze %68 : memref<1x!tpu.dma_semaphore, #tpu.memory_space<semaphore_mem>> -> memref<!tpu.dma_semaphore, #tpu.memory_space<semaphore_mem>>
    tpu.wait_dma2 semaphore(%69 : memref<!tpu.dma_semaphore, #tpu.memory_space<semaphore_mem>>) src(%arg19 : memref<1024x1280xbf16, #tpu.memory_space<any>>) dst(%arg26 : memref<1024x1280xbf16, #tpu.memory_space<vmem>>)
    %70 = arith.truncf %67 : vector<2x1024xf32> to vector<2x1024xbf16>
    %c0_39 = arith.constant 0 : index
    %c0_40 = arith.constant 0 : index
    %71 = vector.load %arg26[%c0_39, %c0_40] : memref<1024x1280xbf16, #tpu.memory_space<vmem>>, vector<1024x1280xbf16>
    %cst_41 = arith.constant dense<0.000000e+00> : vector<2x1280xf32>
    %72 = tpu.matmul %70, %71, %cst_41 {dimension_numbers = #tpu.dot_dimension_numbers<[1], [0], [0], [1], [0, 0, 1, 1], [], []>} : vector<2x1024xbf16>, vector<1024x1280xbf16>, vector<2x1280xf32> -> vector<2x1280xf32>
    %c0_42 = arith.constant 0 : index
    %c0_43 = arith.constant 0 : index
    %73 = vector.load %arg13[%c0_42, %c0_43] : memref<1x1280xf32, #tpu.memory_space<vmem>>, vector<1x1280xf32>
    %74 = vector.broadcast %73 : vector<1x1280xf32> to vector<2x1280xf32>
    %75 = arith.addf %72, %74 : vector<2x1280xf32>
    %cst_44 = arith.constant 0.000000e+00 : f32
    %76 = vector.broadcast %cst_44 : f32 to vector<2x1280xf32>
    %77 = arith.maximumf %75, %76 : vector<2x1280xf32>
    %c2_i32_45 = arith.constant 2 : i32
    %78 = tpu.memref_slice %arg31[%c2_i32_45] : memref<6x!tpu.dma_semaphore, #tpu.memory_space<semaphore_mem>> -> memref<1x!tpu.dma_semaphore, #tpu.memory_space<semaphore_mem>>
    %79 = tpu.memref_squeeze %78 : memref<1x!tpu.dma_semaphore, #tpu.memory_space<semaphore_mem>> -> memref<!tpu.dma_semaphore, #tpu.memory_space<semaphore_mem>>
    tpu.wait_dma2 semaphore(%79 : memref<!tpu.dma_semaphore, #tpu.memory_space<semaphore_mem>>) src(%arg20 : memref<1280x512xbf16, #tpu.memory_space<any>>) dst(%arg27 : memref<1280x512xbf16, #tpu.memory_space<vmem>>)
    %80 = arith.truncf %77 : vector<2x1280xf32> to vector<2x1280xbf16>
    %c0_46 = arith.constant 0 : index
    %c0_47 = arith.constant 0 : index
    %81 = vector.load %arg27[%c0_46, %c0_47] : memref<1280x512xbf16, #tpu.memory_space<vmem>>, vector<1280x512xbf16>
    %cst_48 = arith.constant dense<0.000000e+00> : vector<2x512xf32>
    %82 = tpu.matmul %80, %81, %cst_48 {dimension_numbers = #tpu.dot_dimension_numbers<[1], [0], [0], [1], [0, 0, 1, 1], [], []>} : vector<2x1280xbf16>, vector<1280x512xbf16>, vector<2x512xf32> -> vector<2x512xf32>
    %c0_49 = arith.constant 0 : index
    %c0_50 = arith.constant 0 : index
    %83 = vector.load %arg14[%c0_49, %c0_50] : memref<1x512xf32, #tpu.memory_space<vmem>>, vector<1x512xf32>
    %84 = vector.broadcast %83 : vector<1x512xf32> to vector<2x512xf32>
    %85 = arith.addf %82, %84 : vector<2x512xf32>
    %cst_51 = arith.constant 0.000000e+00 : f32
    %86 = vector.broadcast %cst_51 : f32 to vector<2x512xf32>
    %87 = arith.maximumf %85, %86 : vector<2x512xf32>
    %c3_i32_52 = arith.constant 3 : i32
    %88 = tpu.memref_slice %arg31[%c3_i32_52] : memref<6x!tpu.dma_semaphore, #tpu.memory_space<semaphore_mem>> -> memref<1x!tpu.dma_semaphore, #tpu.memory_space<semaphore_mem>>
    %89 = tpu.memref_squeeze %88 : memref<1x!tpu.dma_semaphore, #tpu.memory_space<semaphore_mem>> -> memref<!tpu.dma_semaphore, #tpu.memory_space<semaphore_mem>>
    tpu.wait_dma2 semaphore(%89 : memref<!tpu.dma_semaphore, #tpu.memory_space<semaphore_mem>>) src(%arg21 : memref<512x512xbf16, #tpu.memory_space<any>>) dst(%arg28 : memref<512x512xbf16, #tpu.memory_space<vmem>>)
    %90 = arith.truncf %87 : vector<2x512xf32> to vector<2x512xbf16>
    %c0_53 = arith.constant 0 : index
    %c0_54 = arith.constant 0 : index
    %91 = vector.load %arg28[%c0_53, %c0_54] : memref<512x512xbf16, #tpu.memory_space<vmem>>, vector<512x512xbf16>
    %cst_55 = arith.constant dense<0.000000e+00> : vector<2x512xf32>
    %92 = tpu.matmul %90, %91, %cst_55 {dimension_numbers = #tpu.dot_dimension_numbers<[1], [0], [0], [1], [0, 0, 1, 1], [], []>} : vector<2x512xbf16>, vector<512x512xbf16>, vector<2x512xf32> -> vector<2x512xf32>
    %c0_56 = arith.constant 0 : index
    %c0_57 = arith.constant 0 : index
    %93 = vector.load %arg15[%c0_56, %c0_57] : memref<1x512xf32, #tpu.memory_space<vmem>>, vector<1x512xf32>
    %94 = vector.broadcast %93 : vector<1x512xf32> to vector<2x512xf32>
    %95 = arith.addf %92, %94 : vector<2x512xf32>
    %cst_58 = arith.constant 0.000000e+00 : f32
    %96 = vector.broadcast %cst_58 : f32 to vector<2x512xf32>
    %97 = arith.maximumf %95, %96 : vector<2x512xf32>
    %c4_i32_59 = arith.constant 4 : i32
    %98 = tpu.memref_slice %arg31[%c4_i32_59] : memref<6x!tpu.dma_semaphore, #tpu.memory_space<semaphore_mem>> -> memref<1x!tpu.dma_semaphore, #tpu.memory_space<semaphore_mem>>
    %99 = tpu.memref_squeeze %98 : memref<1x!tpu.dma_semaphore, #tpu.memory_space<semaphore_mem>> -> memref<!tpu.dma_semaphore, #tpu.memory_space<semaphore_mem>>
    tpu.wait_dma2 semaphore(%99 : memref<!tpu.dma_semaphore, #tpu.memory_space<semaphore_mem>>) src(%arg22 : memref<512x256xbf16, #tpu.memory_space<any>>) dst(%arg29 : memref<512x256xbf16, #tpu.memory_space<vmem>>)
    %100 = arith.truncf %97 : vector<2x512xf32> to vector<2x512xbf16>
    %c0_60 = arith.constant 0 : index
    %c0_61 = arith.constant 0 : index
    %101 = vector.load %arg29[%c0_60, %c0_61] : memref<512x256xbf16, #tpu.memory_space<vmem>>, vector<512x256xbf16>
    %cst_62 = arith.constant dense<0.000000e+00> : vector<2x256xf32>
    %102 = tpu.matmul %100, %101, %cst_62 {dimension_numbers = #tpu.dot_dimension_numbers<[1], [0], [0], [1], [0, 0, 1, 1], [], []>} : vector<2x512xbf16>, vector<512x256xbf16>, vector<2x256xf32> -> vector<2x256xf32>
    %c0_63 = arith.constant 0 : index
    %c0_64 = arith.constant 0 : index
    %103 = vector.load %arg16[%c0_63, %c0_64] : memref<1x256xf32, #tpu.memory_space<vmem>>, vector<1x256xf32>
    %104 = vector.broadcast %103 : vector<1x256xf32> to vector<2x256xf32>
    %105 = arith.addf %102, %104 : vector<2x256xf32>
    %cst_65 = arith.constant 0.000000e+00 : f32
    %106 = vector.broadcast %cst_65 : f32 to vector<2x256xf32>
    %107 = arith.maximumf %105, %106 : vector<2x256xf32>
    %c5_i32_66 = arith.constant 5 : i32
    %108 = tpu.memref_slice %arg31[%c5_i32_66] : memref<6x!tpu.dma_semaphore, #tpu.memory_space<semaphore_mem>> -> memref<1x!tpu.dma_semaphore, #tpu.memory_space<semaphore_mem>>
    %109 = tpu.memref_squeeze %108 : memref<1x!tpu.dma_semaphore, #tpu.memory_space<semaphore_mem>> -> memref<!tpu.dma_semaphore, #tpu.memory_space<semaphore_mem>>
    tpu.wait_dma2 semaphore(%109 : memref<!tpu.dma_semaphore, #tpu.memory_space<semaphore_mem>>) src(%arg23 : memref<256x128xbf16, #tpu.memory_space<any>>) dst(%arg30 : memref<256x128xbf16, #tpu.memory_space<vmem>>)
    %110 = arith.truncf %107 : vector<2x256xf32> to vector<2x256xbf16>
    %c0_67 = arith.constant 0 : index
    %c0_68 = arith.constant 0 : index
    %111 = vector.load %arg30[%c0_67, %c0_68] : memref<256x128xbf16, #tpu.memory_space<vmem>>, vector<256x128xbf16>
    %cst_69 = arith.constant dense<0.000000e+00> : vector<2x128xf32>
    %112 = tpu.matmul %110, %111, %cst_69 {dimension_numbers = #tpu.dot_dimension_numbers<[1], [0], [0], [1], [0, 0, 1, 1], [], []>} : vector<2x256xbf16>, vector<256x128xbf16>, vector<2x128xf32> -> vector<2x128xf32>
    %c0_70 = arith.constant 0 : index
    %c0_71 = arith.constant 0 : index
    %113 = vector.load %arg17[%c0_70, %c0_71] : memref<1x128xf32, #tpu.memory_space<vmem>>, vector<1x128xf32>
    %114 = vector.broadcast %113 : vector<1x128xf32> to vector<2x128xf32>
    %115 = arith.addf %112, %114 : vector<2x128xf32>
    %c0_72 = arith.constant 0 : index
    %c0_73 = arith.constant 0 : index
    %116 = vector.load %arg24[%c0_72, %c0_73] : memref<2x128xf32, #tpu.memory_space<vmem>>, vector<2x128xf32>
    tpu.vector_store %arg24[%c0_72, %c0_73], %115 {strides = array<i32>} : memref<2x128xf32, #tpu.memory_space<vmem>>, vector<2x128xf32>,
    return
  }
  func.func @transform_0(%arg0: i32) -> (i32, i32) {
    %c0_i32 = arith.constant 0 : i32
    %c0_i32_0 = arith.constant 0 : i32
    %c0_i32_1 = arith.constant 0 : i32
    return %c0_i32, %c0_i32_0 : i32, i32
  }
  func.func @transform_1(%arg0: i32) -> (i32, i32) {
    %c0_i32 = arith.constant 0 : i32
    %c0_i32_0 = arith.constant 0 : i32
    %c0_i32_1 = arith.constant 0 : i32
    return %c0_i32, %c0_i32_0 : i32, i32
  }
  func.func @transform_2(%arg0: i32) -> (i32, i32) {
    %c0_i32 = arith.constant 0 : i32
    %c0_i32_0 = arith.constant 0 : i32
    %c0_i32_1 = arith.constant 0 : i32
    return %c0_i32, %c0_i32_0 : i32, i32
  }
  func.func @transform_3(%arg0: i32) -> (i32, i32) {
    %c0_i32 = arith.constant 0 : i32
    %c0_i32_0 = arith.constant 0 : i32
    %c0_i32_1 = arith.constant 0 : i32
    return %c0_i32, %c0_i32_0 : i32, i32
  }
  func.func @transform_4(%arg0: i32) -> (i32, i32) {
    %c0_i32 = arith.constant 0 : i32
    %c0_i32_0 = arith.constant 0 : i32
    %c0_i32_1 = arith.constant 0 : i32
    return %c0_i32, %c0_i32_0 : i32, i32
  }
  func.func @transform_5(%arg0: i32) -> (i32, i32) {
    %c0_i32 = arith.constant 0 : i32
    %c0_i32_0 = arith.constant 0 : i32
    %c0_i32_1 = arith.constant 0 : i32
    return %c0_i32, %c0_i32_0 : i32, i32
  }
  func.func @transform_6(%arg0: i32) -> (i32, i32) {
    %c0_i32 = arith.constant 0 : i32
    %c0_i32_0 = arith.constant 0 : i32
    %c0_i32_1 = arith.constant 0 : i32
    return %c0_i32, %c0_i32_0 : i32, i32
  }
  func.func @transform_7(%arg0: i32) -> (i32, i32) {
    %c0_i32 = arith.constant 0 : i32
    %c0_i32_0 = arith.constant 0 : i32
    %c0_i32_1 = arith.constant 0 : i32
    return %c0_i32, %c0_i32_0 : i32, i32
  }
  func.func @transform_8(%arg0: i32) -> (i32, i32) {
    %c0_i32 = arith.constant 0 : i32
    %c0_i32_0 = arith.constant 0 : i32
    %c0_i32_1 = arith.constant 0 : i32
    return %c0_i32, %c0_i32_0 : i32, i32
  }
  func.func @transform_9(%arg0: i32) -> (i32, i32) {
    %c0_i32 = arith.constant 0 : i32
    %c0_i32_0 = arith.constant 0 : i32
    %c0_i32_1 = arith.constant 0 : i32
    return %c0_i32, %c0_i32_0 : i32, i32
  }
  func.func @transform_10(%arg0: i32) -> (i32, i32) {
    %c0_i32 = arith.constant 0 : i32
    %c0_i32_0 = arith.constant 0 : i32
    %c0_i32_1 = arith.constant 0 : i32
    return %c0_i32, %c0_i32_0 : i32, i32
  }
  func.func @transform_11(%arg0: i32) -> (i32, i32) {
    %c0_i32 = arith.constant 0 : i32
    %c0_i32_0 = arith.constant 0 : i32
    %c0_i32_1 = arith.constant 0 : i32
    return %c0_i32, %c0_i32_0 : i32, i32
  }
  func.func @transform_12(%arg0: i32) -> (i32, i32) {
    %c0_i32 = arith.constant 0 : i32
    %c0_i32_0 = arith.constant 0 : i32
    %c0_i32_1 = arith.constant 0 : i32
    return %c0_i32, %c0_i32_0 : i32, i32
  }
  func.func @transform_13(%arg0: i32) -> (i32, i32) {
    %c0_i32 = arith.constant 0 : i32
    %c0_i32_0 = arith.constant 0 : i32
    %c0_i32_1 = arith.constant 0 : i32
    return %c0_i32, %c0_i32_0 : i32, i32
  }
  func.func @transform_14(%arg0: i32) -> (i32, i32) {
    %c0_i32 = arith.constant 0 : i32
    %c0_i32_0 = arith.constant 0 : i32
    %c0_i32_1 = arith.constant 0 : i32
    return %c0_i32, %c0_i32_0 : i32, i32
  }
  func.func @transform_15(%arg0: i32) -> (i32, i32) {
    %c0_i32 = arith.constant 0 : i32
    %c0_i32_0 = arith.constant 0 : i32
    %c0_i32_1 = arith.constant 0 : i32
    return %c0_i32, %c0_i32_0 : i32, i32
  }
  func.func @transform_16(%arg0: i32) -> (i32, i32) {
    %c0_i32 = arith.constant 0 : i32
    %c0_i32_0 = arith.constant 0 : i32
    %c0_i32_1 = arith.constant 0 : i32
    return %c0_i32, %c0_i32_0 : i32, i32
  }
  func.func @transform_23(%arg0: i32) -> (i32, i32) {
    %c0_i32 = arith.constant 0 : i32
    %c0_i32_0 = arith.constant 0 : i32
    %c0_i32_1 = arith.constant 0 : i32
    return %c0_i32, %c0_i32_0 : i32, i32
  }
}

</mosaic_0001>

<bundles_post_ra>
// kernel: benchmark_forward.1
= control target key start
LH: loop header
LB: loop body
LE: loop exit
PB: predicated region body
PF: predicated region fallthrough
CT: control target
= control target key end

     0   :  { %s9897_s0 = inlined_call_operand.vmem [shape: f32[128,8], index: 0, kind: input, shape index: {}]   ;;  %s9898_s1 = inlined_call_operand.hbm [shape: bf16[8,64], index: 1, kind: input, shape index: {}]   ;;  %s9899_s2 = inlined_call_operand.hbm [shape: f32[1,64], index: 2, kind: input, shape index: {}]   ;;  %s9900_s3 = inlined_call_operand.hbm [shape: bf16[64,64], index: 3, kind: input, shape index: {}]   ;;  %s9901_s4 = inlined_call_operand.hbm [shape: f32[1,64], index: 4, kind: input, shape index: {}]   ;;  %s9902_s5 = inlined_call_operand.hbm [shape: bf16[64,64], index: 5, kind: input, shape index: {}]   ;;  %s9903_s6 = inlined_call_operand.hbm [shape: f32[1,64], index: 6, kind: input, shape index: {}]   ;;  %s9904_s7 = inlined_call_operand.hbm [shape: bf16[64,128], index: 7, kind: input, shape index: {}]   ;;  %s9905_s8 = inlined_call_operand.hbm [shape: f32[1,128], index: 8, kind: input, shape index: {}]   ;;  %s9906_s9 = inlined_call_operand.hbm [shape: bf16[128,1024], index: 9, kind: input, shape index: {}]   ;;  %s9907_s10 = inlined_call_operand.hbm [shape: f32[1,1024], index: 10, kind: input, shape index: {}]   ;;  %s9908_s11 = inlined_call_operand.hbm [shape: f32[1,1024], index: 11, kind: input, shape index: {}]   ;;  %s9909_s12 = inlined_call_operand.hbm [shape: f32[1,1280], index: 12, kind: input, shape index: {}]   ;;  %s9910_s13 = inlined_call_operand.hbm [shape: f32[1,512], index: 13, kind: input, shape index: {}]   ;;  %s9911_s14 = inlined_call_operand.hbm [shape: f32[1,512], index: 14, kind: input, shape index: {}]   ;;  %s9912_s15 = inlined_call_operand.hbm [shape: f32[1,256], index: 15, kind: input, shape index: {}]   ;;  %s9913_s16 = inlined_call_operand.hbm [shape: f32[1,128], index: 16, kind: input, shape index: {}]   ;;  %s9914_s17 = inlined_call_operand.hbm [shape: bf16[2048,1024], index: 17, kind: input, shape index: {}]   ;;  %s9915_s18 = inlined_call_operand.hbm [shape: bf16[1024,1280], index: 18, kind: input, shape index: {}]   ;;  %s9916_s19 = inlined_call_operand.hbm [shape: bf16[1280,512], index: 19, kind: input, shape index: {}]   ;;  %s9917_s20 = inlined_call_operand.hbm [shape: bf16[512,512], index: 20, kind: input, shape index: {}]   ;;  %s9918_s21 = inlined_call_operand.hbm [shape: bf16[512,256], index: 21, kind: input, shape index: {}]   ;;  %s9919_s22 = inlined_call_operand.hbm [shape: bf16[256,128], index: 22, kind: input, shape index: {}]   ;;  %s9920_s23 = inlined_call_operand.vmem [shape: f32[2,128], index: 23, kind: output, shape index: {}]  }
   0x1   :  { %9929 = sst [smem:[#allocation63_spill]] %s9897_s0 }
   0x2   :  { %9930 = sst [smem:[#allocation64_spill]] %s9898_s1 }
   0x3   :  { %9931 = sst [smem:[#allocation65_spill]] %s9899_s2 }
   0x4   :  { %9932 = sst [smem:[#allocation66_spill]] %s9900_s3 }
   0x5   :  { %9933 = sst [smem:[#allocation67_spill]] %s9901_s4 }
   0x6   :  { %9934 = sst [smem:[#allocation68_spill]] %s9902_s5 }
   0x7   :  { %9935 = sst [smem:[#allocation69_spill]] %s9903_s6 }
   0x8   :  { %9936 = sst [smem:[#allocation70_spill]] %s9904_s7 }
   0x9   :  { %9937 = sst [smem:[#allocation71_spill]] %s9920_s23 }
   0xa   :  { %28 = vsyncpa [#allocation10], 0 }
   0xb   :  { %29 = vsyncpa [#allocation12], 0 }
   0xc   :  { %30 = vsyncpa [#allocation15], 0 }
   0xd   :  { %31 = vsyncpa [#allocation18], 0 }
   0xe   :  { %32 = vsyncpa [#allocation21], 0 }
   0xf   :  { %33 = vsyncpa [#allocation24], 0 }
  0x10   :  { %34 = vsyncpa [#allocation27], 0 }
  0x11   :  { %35 = vsyncpa [#allocation30], 0 }
  0x12   :  { %36 = vsyncpa [#allocation33], 0  ;;  %s8667_s4 = smov [#allocation11]   ;;  %s8668_s24 = smov [#allocation14]  }
  0x13   :  { %s55_s30 = sshll.u32 %s8667_s4, 4  ;;  %s77_s25 = sshll.u32 %s8668_s24, 4  ;;  %s56_s30 = int_to_ptr.vmem [resolvable:$true] %s55_s30  ;;  %s78_s25 = int_to_ptr.vmem [resolvable:$true] %s77_s25 }
  0x14   :  { %s9938_s26 = sld [smem:[#allocation65_spill]] }
  0x1a   :  { %s8263_s2 = scalar_lea.hbm %s9938_s26, 16 }
  0x1b   :  { %p8264_p0 = scmp.ne.s32.totalorder %s9938_s26, %s8263_s2  ;;  %p8267_p1 = scmp.lt.u32.totalorder %s8263_s2, %s9938_s26 }
  0x1d   :  { %p8269_p2 = pnand %p8267_p1, %p8264_p0 }
  0x1f   :  { %8272 = shalt.err (!%p8269_p2)
}
  0x20   :  { %s8273_s29 = scalar_lea.vmem %s56_s30, 16  ;;  %s8277_s3 = scalar_lea.vmem %s56_s30, 32 }
  0x21   :  { %p8274_p3 = scmp.ne.s32.totalorder %s56_s30, %s8273_s29  ;;  %p8278_p4 = scmp.lt.s32.totalorder %s56_s30, %s56_s30 }
  0x22   :  { %p8279_p5 = scmp.lt.s32.totalorder %s8277_s3, %s8273_s29 }
  0x24   :  { %p8280_p6 = por %p8279_p5, %p8278_p4 }
  0x26   :  { %p8281_p7 = pnand %p8280_p6, %p8274_p3 }
  0x28   :  { %8284 = shalt.err (!%p8281_p7)
}
  0x29   :  { %58 = dma.hbm_to_vmem [thread:$0]  %s9938_s26, 16, %s56_s30, [#allocation12]  }
  0x2a   :  { %s9939_s1 = sld [smem:[#allocation67_spill]] }
  0x30   :  { %s8285_s6 = scalar_lea.hbm %s9939_s1, 16 }
  0x31   :  { %p8286_p8 = scmp.ne.s32.totalorder %s9939_s1, %s8285_s6  ;;  %p8289_p9 = scmp.lt.u32.totalorder %s8285_s6, %s9939_s1 }
  0x33   :  { %p8291_p10 = pnand %p8289_p9, %p8286_p8 }
  0x35   :  { %8294 = shalt.err (!%p8291_p10)
}
  0x36   :  { %s8295_s29 = scalar_lea.vmem %s78_s25, 16  ;;  %s8299_s3 = scalar_lea.vmem %s78_s25, 32 }
  0x37   :  { %p8296_p11 = scmp.ne.s32.totalorder %s78_s25, %s8295_s29  ;;  %p8300_p12 = scmp.lt.s32.totalorder %s78_s25, %s78_s25 }
  0x38   :  { %p8301_p13 = scmp.lt.s32.totalorder %s8299_s3, %s8295_s29 }
  0x3a   :  { %p8302_p0 = por %p8301_p13, %p8300_p12 }
  0x3c   :  { %p8303_p1 = pnand %p8302_p0, %p8296_p11 }
  0x3e   :  { %8306 = shalt.err (!%p8303_p1)
}
  0x3f   :  { %80 = dma.hbm_to_vmem [thread:$0]  %s9939_s1, 16, %s78_s25, [#allocation15]  }
  0x40   :  { %s8669_s0 = smov [#allocation17]   ;;  %s8670_s24 = smov [#allocation20]  }
  0x41   :  { %s99_s4 = sshll.u32 %s8669_s0, 4  ;;  %s121_s5 = sshll.u32 %s8670_s24, 4  ;;  %s100_s4 = int_to_ptr.vmem [resolvable:$true] %s99_s4  ;;  %s122_s5 = int_to_ptr.vmem [resolvable:$true] %s121_s5 }
  0x42   :  { %s9940_s2 = sld [smem:[#allocation69_spill]] }
  0x48   :  { %s8307_s7 = scalar_lea.hbm %s9940_s2, 16 }
  0x49   :  { %p8308_p2 = scmp.ne.s32.totalorder %s9940_s2, %s8307_s7  ;;  %p8311_p3 = scmp.lt.u32.totalorder %s8307_s7, %s9940_s2 }
  0x4b   :  { %p8313_p4 = pnand %p8311_p3, %p8308_p2 }
  0x4d   :  { %8316 = shalt.err (!%p8313_p4)
}
  0x4e   :  { %s8317_s25 = scalar_lea.vmem %s100_s4, 16  ;;  %s8321_s1 = scalar_lea.vmem %s100_s4, 32 }
  0x4f   :  { %p8318_p5 = scmp.ne.s32.totalorder %s100_s4, %s8317_s25  ;;  %p8322_p6 = scmp.lt.s32.totalorder %s100_s4, %s100_s4 }
  0x50   :  { %p8323_p7 = scmp.lt.s32.totalorder %s8321_s1, %s8317_s25 }
  0x52   :  { %p8324_p8 = por %p8323_p7, %p8322_p6 }
  0x54   :  { %p8325_p9 = pnand %p8324_p8, %p8318_p5 }
  0x56   :  { %8328 = shalt.err (!%p8325_p9)
}
  0x57   :  { %102 = dma.hbm_to_vmem [thread:$0]  %s9940_s2, 16, %s100_s4, [#allocation18]  }
  0x58   :  { %s8329_s24 = scalar_lea.hbm %s9905_s8, 16 }
  0x59   :  { %p8330_p10 = scmp.ne.s32.totalorder %s9905_s8, %s8329_s24  ;;  %p8333_p11 = scmp.lt.u32.totalorder %s8329_s24, %s9905_s8 }
  0x5b   :  { %p8335_p12 = pnand %p8333_p11, %p8330_p10 }
  0x5d   :  { %8338 = shalt.err (!%p8335_p12)
}
  0x5e   :  { %s8339_s29 = scalar_lea.vmem %s122_s5, 16  ;;  %s8343_s3 = scalar_lea.vmem %s122_s5, 32 }
  0x5f   :  { %p8340_p13 = scmp.ne.s32.totalorder %s122_s5, %s8339_s29  ;;  %p8344_p0 = scmp.lt.s32.totalorder %s122_s5, %s122_s5 }
  0x60   :  { %p8345_p1 = scmp.lt.s32.totalorder %s8343_s3, %s8339_s29 }
  0x62   :  { %p8346_p2 = por %p8345_p1, %p8344_p0 }
  0x64   :  { %p8347_p3 = pnand %p8346_p2, %p8340_p13 }
  0x66   :  { %8350 = shalt.err (!%p8347_p3)
}
  0x67   :  { %124 = dma.hbm_to_vmem [thread:$0]  %s9905_s8, 16, %s122_s5, [#allocation21]  }
  0x68   :  { %s8671_s25 = smov [#allocation23]   ;;  %s8672_s30 = smov [#allocation26]  }
  0x69   :  { %s143_s1 = sshll.u32 %s8671_s25, 4  ;;  %s163_s26 = sshll.u32 %s8672_s30, 4  ;;  %s144_s1 = int_to_ptr.vmem [resolvable:$true] %s143_s1  ;;  %s164_s26 = int_to_ptr.vmem [resolvable:$true] %s163_s26 }
  0x6a   :  { %s8351_s24 = scalar_lea.hbm %s9907_s10, 128 }
  0x6b   :  { %p8352_p4 = scmp.ne.s32.totalorder %s9907_s10, %s8351_s24  ;;  %p8355_p5 = scmp.lt.u32.totalorder %s8351_s24, %s9907_s10 }
  0x6d   :  { %p8357_p6 = pnand %p8355_p5, %p8352_p4 }
  0x6f   :  { %8360 = shalt.err (!%p8357_p6)
}
  0x70   :  { %s8361_s8 = scalar_lea.vmem %s144_s1, 128  ;;  %p8366_p8 = scmp.lt.s32.totalorder %s144_s1, %s144_s1 }
  0x71   :  { %p8362_p7 = scmp.ne.s32.totalorder %s144_s1, %s8361_s8  ;;  %p8367_p9 = scmp.lt.s32.totalorder %s8361_s8, %s8361_s8 }
  0x73   :  { %p8368_p10 = por %p8367_p9, %p8366_p8 }
  0x75   :  { %p8369_p11 = pnand %p8368_p10, %p8362_p7 }
  0x77   :  { %8372 = shalt.err (!%p8369_p11)
}
  0x78   :  { %146 = dma.hbm_to_vmem [thread:$0]  %s9907_s10, 128, %s144_s1, [#allocation24]  }
  0x79   :  { %s8373_s2 = scalar_lea.hbm %s9909_s12, 160 }
  0x7a   :  { %p8374_p12 = scmp.ne.s32.totalorder %s9909_s12, %s8373_s2  ;;  %p8377_p13 = scmp.lt.u32.totalorder %s8373_s2, %s9909_s12 }
  0x7c   :  { %p8379_p0 = pnand %p8377_p13, %p8374_p12 }
  0x7e   :  { %8382 = shalt.err (!%p8379_p0)
}
  0x7f   :  { %s8383_s24 = scalar_lea.vmem %s164_s26, 160  ;;  %p8388_p2 = scmp.lt.s32.totalorder %s164_s26, %s164_s26 }
  0x80   :  { %p8384_p1 = scmp.ne.s32.totalorder %s164_s26, %s8383_s24  ;;  %p8389_p3 = scmp.lt.s32.totalorder %s8383_s24, %s8383_s24 }
  0x82   :  { %p8390_p4 = por %p8389_p3, %p8388_p2 }
  0x84   :  { %p8391_p5 = pnand %p8390_p4, %p8384_p1 }
  0x86   :  { %8394 = shalt.err (!%p8391_p5)
}
  0x87   :  { %166 = dma.hbm_to_vmem [thread:$0]  %s9909_s12, 160, %s164_s26, [#allocation27]  }
  0x88   :  { %s8673_s6 = smov [#allocation29]   ;;  %s8674_s7 = smov [#allocation9]  }
  0x89   :  { %s183_s27 = sshll.u32 %s8673_s6, 4  ;;  %s45_s28 = sshll.u32 %s8674_s7, 4  ;;  %s184_s27 = int_to_ptr.vmem [resolvable:$true] %s183_s27  ;;  %s46_s28 = int_to_ptr.vmem [resolvable:$true] %s45_s28 }
  0x8a   :  { %s8395_s29 = scalar_lea.hbm %s9911_s14, 64 }
  0x8b   :  { %p8396_p6 = scmp.ne.s32.totalorder %s9911_s14, %s8395_s29  ;;  %p8399_p7 = scmp.lt.u32.totalorder %s8395_s29, %s9911_s14 }
  0x8d   :  { %p8401_p8 = pnand %p8399_p7, %p8396_p6 }
  0x8f   :  { %8404 = shalt.err (!%p8401_p8)
}
  0x90   :  { %s8405_s12 = scalar_lea.vmem %s184_s27, 64  ;;  %p8410_p10 = scmp.lt.s32.totalorder %s184_s27, %s184_s27 }
  0x91   :  { %p8406_p9 = scmp.ne.s32.totalorder %s184_s27, %s8405_s12  ;;  %p8411_p11 = scmp.lt.s32.totalorder %s8405_s12, %s8405_s12 }
  0x93   :  { %p8412_p12 = por %p8411_p11, %p8410_p10 }
  0x95   :  { %p8413_p13 = pnand %p8412_p12, %p8406_p9 }
  0x97   :  { %8416 = shalt.err (!%p8413_p13)
}
  0x98   :  { %186 = dma.hbm_to_vmem [thread:$0]  %s9911_s14, 64, %s184_s27, [#allocation30]  }
  0x99   :  { %s9941_s24 = sld [smem:[#allocation64_spill]] }
  0x9f   :  { %s8417_s10 = scalar_lea.hbm %s9941_s24, 64 }
  0xa0   :  { %p8418_p0 = scmp.ne.s32.totalorder %s9941_s24, %s8417_s10  ;;  %p8421_p1 = scmp.lt.u32.totalorder %s8417_s10, %s9941_s24 }
  0xa2   :  { %p8423_p2 = pnand %p8421_p1, %p8418_p0 }
  0xa4   :  { %8426 = shalt.err (!%p8423_p2)
}
  0xa5   :  { %s8427_s5 = scalar_lea.vmem %s46_s28, 64  ;;  %p8432_p4 = scmp.lt.s32.totalorder %s46_s28, %s46_s28 }
  0xa6   :  { %p8428_p3 = scmp.ne.s32.totalorder %s46_s28, %s8427_s5  ;;  %p8433_p5 = scmp.lt.s32.totalorder %s8427_s5, %s8427_s5 }
  0xa8   :  { %p8434_p6 = por %p8433_p5, %p8432_p4 }
  0xaa   :  { %p8435_p7 = pnand %p8434_p6, %p8428_p3 }
  0xac   :  { %8438 = shalt.err (!%p8435_p7)
}
  0xad   :  { %48 = dma.hbm_to_vmem [thread:$0]  %s9941_s24, 64, %s46_s28, [#allocation10]  }
  0xae   :  { %s8675_s29 = smov [#allocation13]   ;;  %s9942_s25 = sld [smem:[#allocation66_spill]] }
  0xaf   :  { %s64_s3 = sshll.u32 %s8675_s29, 4  ;;  %s65_s3 = int_to_ptr.vmem [resolvable:$true] %s64_s3 }
  0xb4   :  { %s8439_s12 = scalar_lea.hbm %s9942_s25, 512 }
  0xb5   :  { %p8440_p8 = scmp.ne.s32.totalorder %s9942_s25, %s8439_s12  ;;  %p8443_p9 = scmp.lt.u32.totalorder %s8439_s12, %s9942_s25 }
  0xb7   :  { %p8445_p10 = pnand %p8443_p9, %p8440_p8 }
  0xb9   :  { %8448 = shalt.err (!%p8445_p10)
}
  0xba   :  { %s8449_s10 = scalar_lea.vmem %s65_s3, 512  ;;  %p8454_p12 = scmp.lt.s32.totalorder %s65_s3, %s65_s3 }
  0xbb   :  { %p8450_p11 = scmp.ne.s32.totalorder %s65_s3, %s8449_s10  ;;  %p8455_p13 = scmp.lt.s32.totalorder %s8449_s10, %s8449_s10 }
  0xbd   :  { %p8456_p0 = por %p8455_p13, %p8454_p12 }
  0xbf   :  { %p8457_p1 = pnand %p8456_p0, %p8450_p11 }
  0xc1   :  { %8460 = shalt.err (!%p8457_p1)
}
  0xc2   :  { %s8676_s28 = smov 64   ;;  %s8677_s24 = smov 4  }
  0xc3   :  { %70 = dma.hbm_to_vmem [thread:$0]  %s9942_s25, 512, %s65_s3, [#allocation12], %s8676_s28, %s8676_s28, %s8677_s24  }
  0xc4   :  { %s8678_s7 = smov [#allocation16]   ;;  %s8679_s5 = smov [#allocation19]  }
  0xc5   :  { %s86_s8 = sshll.u32 %s8678_s7, 4  ;;  %s108_s14 = sshll.u32 %s8679_s5, 4  ;;  %s87_s8 = int_to_ptr.vmem [resolvable:$true] %s86_s8  ;;  %s109_s14 = int_to_ptr.vmem [resolvable:$true] %s108_s14 }
  0xc6   :  { %s9943_s4 = sld [smem:[#allocation68_spill]] }
  0xcc   :  { %s8461_s2 = scalar_lea.hbm %s9943_s4, 512 }
  0xcd   :  { %p8462_p2 = scmp.ne.s32.totalorder %s9943_s4, %s8461_s2  ;;  %p8465_p3 = scmp.lt.u32.totalorder %s8461_s2, %s9943_s4 }
  0xcf   :  { %p8467_p4 = pnand %p8465_p3, %p8462_p2 }
  0xd1   :  { %8470 = shalt.err (!%p8467_p4)
}
  0xd2   :  { %s8471_s3 = scalar_lea.vmem %s87_s8, 512  ;;  %p8476_p6 = scmp.lt.s32.totalorder %s87_s8, %s87_s8 }
  0xd3   :  { %p8472_p5 = scmp.ne.s32.totalorder %s87_s8, %s8471_s3  ;;  %p8477_p7 = scmp.lt.s32.totalorder %s8471_s3, %s8471_s3 }
  0xd5   :  { %p8478_p8 = por %p8477_p7, %p8476_p6 }
  0xd7   :  { %p8479_p9 = pnand %p8478_p8, %p8472_p5 }
  0xd9   :  { %8482 = shalt.err (!%p8479_p9)
}
  0xda   :  { %92 = dma.hbm_to_vmem [thread:$0]  %s9943_s4, 512, %s87_s8, [#allocation15], %s8676_s28, %s8676_s28, %s8677_s24  }
  0xdb   :  { %s9944_s6 = sld [smem:[#allocation70_spill]] }
  0xe1   :  { %s8483_s7 = scalar_lea.hbm %s9944_s6, 512 }
  0xe2   :  { %p8484_p10 = scmp.ne.s32.totalorder %s9944_s6, %s8483_s7  ;;  %p8487_p11 = scmp.lt.u32.totalorder %s8483_s7, %s9944_s6 }
  0xe4   :  { %p8489_p12 = pnand %p8487_p11, %p8484_p10 }
  0xe6   :  { %8492 = shalt.err (!%p8489_p12)
}
  0xe7   :  { %s8493_s12 = scalar_lea.vmem %s109_s14, 512  ;;  %p8498_p0 = scmp.lt.s32.totalorder %s109_s14, %s109_s14 }
  0xe8   :  { %p8494_p13 = scmp.ne.s32.totalorder %s109_s14, %s8493_s12  ;;  %p8499_p1 = scmp.lt.s32.totalorder %s8493_s12, %s8493_s12 }
  0xea   :  { %p8500_p2 = por %p8499_p1, %p8498_p0 }
  0xec   :  { %p8501_p3 = pnand %p8500_p2, %p8494_p13 }
  0xee   :  { %8504 = shalt.err (!%p8501_p3)
}
  0xef   :  { %114 = dma.hbm_to_vmem [thread:$0]  %s9944_s6, 512, %s109_s14, [#allocation18], %s8676_s28, %s8676_s28, %s8677_s24  }
  0xf0   :  { %s8680_s26 = smov [#allocation22]   ;;  %s8505_s25 = scalar_lea.hbm %s9906_s9, 8192 }
  0xf1   :  { %s130_s30 = sshll.u32 %s8680_s26, 4  ;;  %p8506_p4 = scmp.ne.s32.totalorder %s9906_s9, %s8505_s25  ;;  %s131_s30 = int_to_ptr.vmem [resolvable:$true] %s130_s30 }
  0xf2   :  { %p8509_p5 = scmp.lt.u32.totalorder %s8505_s25, %s9906_s9 }
  0xf4   :  { %p8511_p6 = pnand %p8509_p5, %p8506_p4 }
  0xf6   :  { %8514 = shalt.err (!%p8511_p6)
}
  0xf7   :  { %s8515_s5 = scalar_lea.vmem %s131_s30, 8192  ;;  %p8520_p8 = scmp.lt.s32.totalorder %s131_s30, %s131_s30 }
  0xf8   :  { %p8516_p7 = scmp.ne.s32.totalorder %s131_s30, %s8515_s5  ;;  %p8521_p9 = scmp.lt.s32.totalorder %s8515_s5, %s8515_s5 }
  0xfa   :  { %p8522_p10 = por %p8521_p9, %p8520_p8 }
  0xfc   :  { %p8523_p11 = pnand %p8522_p10, %p8516_p7 }
  0xfe   :  { %8526 = shalt.err (!%p8523_p11)
}
  0xff   :  { %s8681_s14 = smov 512   ;;  %s8682_s6 = smov 32  }
 0x100   :  { %136 = dma.hbm_to_vmem [thread:$0]  %s9906_s9, 8192, %s131_s30, [#allocation21], %s8681_s14, %s8681_s14, %s8682_s6  }
 0x101   :  { %s8683_s2 = smov [#allocation25]   ;;  %s8684_s8 = smov [#allocation28]  }
 0x102   :  { %s153_s12 = sshll.u32 %s8683_s2, 4  ;;  %s173_s4 = sshll.u32 %s8684_s8, 4  ;;  %s154_s12 = int_to_ptr.vmem [resolvable:$true] %s153_s12  ;;  %s174_s4 = int_to_ptr.vmem [resolvable:$true] %s173_s4 }
 0x103   :  { %s8527_s3 = scalar_lea.hbm %s9908_s11, 128 }
 0x104   :  { %p8528_p12 = scmp.ne.s32.totalorder %s9908_s11, %s8527_s3  ;;  %p8531_p13 = scmp.lt.u32.totalorder %s8527_s3, %s9908_s11 }
 0x106   :  { %p8533_p0 = pnand %p8531_p13, %p8528_p12 }
 0x108   :  { %8536 = shalt.err (!%p8533_p0)
}
 0x109   :  { %s8537_s9 = scalar_lea.vmem %s154_s12, 128  ;;  %p8542_p2 = scmp.lt.s32.totalorder %s154_s12, %s154_s12 }
 0x10a   :  { %p8538_p1 = scmp.ne.s32.totalorder %s154_s12, %s8537_s9  ;;  %p8543_p3 = scmp.lt.s32.totalorder %s8537_s9, %s8537_s9 }
 0x10c   :  { %p8544_p4 = por %p8543_p3, %p8542_p2 }
 0x10e   :  { %p8545_p5 = pnand %p8544_p4, %p8538_p1 }
 0x110   :  { %8548 = shalt.err (!%p8545_p5)
}
 0x111   :  { %156 = dma.hbm_to_vmem [thread:$0]  %s9908_s11, 128, %s154_s12, [#allocation24]  }
 0x112   :  { %s8549_s27 = scalar_lea.hbm %s9910_s13, 64 }
 0x113   :  { %p8550_p6 = scmp.ne.s32.totalorder %s9910_s13, %s8549_s27  ;;  %p8553_p7 = scmp.lt.u32.totalorder %s8549_s27, %s9910_s13 }
 0x115   :  { %p8555_p8 = pnand %p8553_p7, %p8550_p6 }
 0x117   :  { %8558 = shalt.err (!%p8555_p8)
}
 0x118   :  { %s8559_s23 = scalar_lea.vmem %s174_s4, 64  ;;  %p8564_p10 = scmp.lt.s32.totalorder %s174_s4, %s174_s4 }
 0x119   :  { %p8560_p9 = scmp.ne.s32.totalorder %s174_s4, %s8559_s23  ;;  %p8565_p11 = scmp.lt.s32.totalorder %s8559_s23, %s8559_s23 }
 0x11b   :  { %p8566_p12 = por %p8565_p11, %p8564_p10 }
 0x11d   :  { %p8567_p13 = pnand %p8566_p12, %p8560_p9 }
 0x11f   :  { %8570 = shalt.err (!%p8567_p13)
}
 0x120   :  { %176 = dma.hbm_to_vmem [thread:$0]  %s9910_s13, 64, %s174_s4, [#allocation27]  }
 0x121   :  { %s8685_s3 = smov [#allocation31]   ;;  %s8686_s0 = smov [#allocation32]  }
 0x122   :  { %s193_s25 = sshll.u32 %s8685_s3, 4  ;;  %s203_s10 = sshll.u32 %s8686_s0, 4  ;;  %s194_s25 = int_to_ptr.vmem [resolvable:$true] %s193_s25  ;;  %s204_s10 = int_to_ptr.vmem [resolvable:$true] %s203_s10 }
 0x123   :  { %s8571_s30 = scalar_lea.hbm %s9912_s15, 32 }
 0x124   :  { %p8572_p0 = scmp.ne.s32.totalorder %s9912_s15, %s8571_s30  ;;  %p8575_p1 = scmp.lt.u32.totalorder %s8571_s30, %s9912_s15 }
 0x126   :  { %p8577_p2 = pnand %p8575_p1, %p8572_p0 }
 0x128   :  { %8580 = shalt.err (!%p8577_p2)
}
 0x129   :  { %s8581_s13 = scalar_lea.vmem %s194_s25, 32  ;;  %p8586_p4 = scmp.lt.s32.totalorder %s194_s25, %s194_s25 }
 0x12a   :  { %p8582_p3 = scmp.ne.s32.totalorder %s194_s25, %s8581_s13  ;;  %p8587_p5 = scmp.lt.s32.totalorder %s8581_s13, %s8581_s13 }
 0x12c   :  { %p8588_p6 = por %p8587_p5, %p8586_p4 }
 0x12e   :  { %p8589_p7 = pnand %p8588_p6, %p8582_p3 }
 0x130   :  { %8592 = shalt.err (!%p8589_p7)
}
 0x131   :  { %196 = dma.hbm_to_vmem [thread:$0]  %s9912_s15, 32, %s194_s25, [#allocation30]  }
 0x132   :  { %s8593_s26 = scalar_lea.hbm %s9913_s16, 16 }
 0x133   :  { %p8594_p8 = scmp.ne.s32.totalorder %s9913_s16, %s8593_s26  ;;  %p8597_p9 = scmp.lt.u32.totalorder %s8593_s26, %s9913_s16 }
 0x135   :  { %p8599_p10 = pnand %p8597_p9, %p8594_p8 }
 0x137   :  { %8602 = shalt.err (!%p8599_p10)
}
 0x138   :  { %s8603_s0 = scalar_lea.vmem %s204_s10, 16  ;;  %s8607_s1 = scalar_lea.vmem %s204_s10, 32 }
 0x139   :  { %p8604_p11 = scmp.ne.s32.totalorder %s204_s10, %s8603_s0  ;;  %p8608_p12 = scmp.lt.s32.totalorder %s204_s10, %s204_s10 }
 0x13a   :  { %p8609_p13 = scmp.lt.s32.totalorder %s8607_s1, %s8603_s0 }
 0x13c   :  { %p8610_p0 = por %p8609_p13, %p8608_p12 }
 0x13e   :  { %p8611_p1 = pnand %p8610_p0, %p8604_p11 }
 0x140   :  { %8614 = shalt.err (!%p8611_p1)
}
 0x141   :  { %206 = dma.hbm_to_vmem [thread:$0]  %s9913_s16, 16, %s204_s10, [#allocation33]  }
 0x142   :  { %8637 = dma.done.wait [#allocation10], 64  }
 0x143   :  { %8638 = vsyncadd [#allocation10], 4294967232 }
 0x144   :  { %8639 = dma.done.wait [#allocation12], 528  }
 0x145   :  { %8640 = vsyncadd [#allocation12], 4294966768 }
 0x146   :  { %8641 = dma.done.wait [#allocation15], 528  }
 0x147   :  { %8642 = vsyncadd [#allocation15], 4294966768 }
 0x148   :  { %8643 = dma.done.wait [#allocation18], 528  }
 0x149   :  { %8644 = vsyncadd [#allocation18], 4294966768 }
 0x14a   :  { %8645 = dma.done.wait [#allocation21], 8208  }
 0x14b   :  { %8646 = vsyncadd [#allocation21], 4294959088 }
 0x14c   :  { %8647 = dma.done.wait [#allocation24], 256  }
 0x14d   :  { %8648 = vsyncadd [#allocation24], 4294967040 }
 0x14e   :  { %8649 = dma.done.wait [#allocation27], 224  }
 0x14f   :  { %8650 = vsyncadd [#allocation27], 4294967072 }
 0x150   :  { %8651 = dma.done.wait [#allocation30], 96  }
 0x151   :  { %8652 = vsyncadd [#allocation30], 4294967200 }
 0x152   :  { %8653 = dma.done.wait [#allocation33], 16  }
 0x153   :  { %8654 = vsyncadd [#allocation33], 4294967280  ;;  %s260_s9 = sld [smem:[#allocation0]]   ;;  %s8687_s16 = smov 1024   ;;  %vm500_vm0 = vcmask 1043456   ;;  %vm475_vm1 = vcmask 64512  }
 0x154   :  { %272 = sst [smem:[#allocation35]] %s8687_s16  ;;  %s8688_s10 = smov 8   ;;  %vm664_vm2 = vcmask 523264  }
 0x155   :  { %274 = sst [smem:[#allocation35 + $0x1]] %s8687_s16  ;;  %s8689_s30 = smov 128  }
 0x156   :  { %276 = sst [smem:[#allocation35 + $0x2]] %s8688_s10  ;;  %s8690_s7 = smov [#allocation2]  }
 0x157   :  { %278 = sst [smem:[#allocation35 + $0x3]] %s8676_s28  ;;  %s268_s5 = sshll.u32 %s8690_s7, 4  ;;  %s269_s5 = int_to_ptr.vmem [resolvable:$true] %s268_s5 }
 0x158   :  { %280 = sst [smem:[#allocation35 + $0x4]] %s8689_s30  ;;  %s8691_s6 = smov 2  }
 0x159   :  { %282 = sst [smem:[#allocation35 + $0x5]] %s8691_s6  ;;  %s7674_s27 = sshll.u32 %s260_s9, 26 }
 0x15a   :  { %284 = sst [smem:[#allocation35 + $0x6]] %s8681_s14  ;;  %s9039_s13 = sadd.s32 134217728, %s7674_s27 }
 0x15b   :  { %286 = sst [smem:[#allocation35 + $0x7]] %s8676_s28  ;;  %s8692_s4 = smov [#allocation8]  }
 0x15c   :  { %288 = sst [smem:[#allocation35 + $0x8]] %s8677_s24  ;;  %s8693_s29 = smov [#allocation34]  }
 0x15d   :  { %290 = dma.general %s9914_s17, 131072, %s269_s5, %s8692_s4, %s8693_s29, [#allocation35], %s9039_s13, 0  }
 0x15e   :  { %s8694_s26 = smov 1280   ;;  %s8695_s23 = smov 10  }
 0x15f   :  { %307 = sst [smem:[#allocation37]] %s8694_s26  ;;  %s8696_s11 = smov [#allocation3]  }
 0x160   :  { %309 = sst [smem:[#allocation37 + $0x1]] %s8694_s26  ;;  %s303_s12 = sshll.u32 %s8696_s11, 4  ;;  %s304_s12 = int_to_ptr.vmem [resolvable:$true] %s303_s12 }
 0x161   :  { %311 = sst [smem:[#allocation37 + $0x2]] %s8695_s23  ;;  %s8697_s3 = smov 640  }
 0x162   :  { %313 = sst [smem:[#allocation37 + $0x3]] %s8676_s28  ;;  %s8698_s17 = smov [#allocation8 + $0x1]  }
 0x163   :  { %315 = sst [smem:[#allocation37 + $0x4]] %s8689_s30  ;;  %s8699_s0 = smov [#allocation36]  }
 0x164   :  { %317 = sst [smem:[#allocation37 + $0x5]] %s8691_s6  ;;  %s8700_s25 = smov [#allocation4]  }
 0x165   :  { %319 = sst [smem:[#allocation37 + $0x6]] %s8697_s3  ;;  %s338_s9 = sshll.u32 %s8700_s25, 4  ;;  %s339_s9 = int_to_ptr.vmem [resolvable:$true] %s338_s9 }
 0x166   :  { %321 = sst [smem:[#allocation37 + $0x7]] %s8676_s28  ;;  %s8701_s16 = smov 256  }
 0x167   :  { %323 = sst [smem:[#allocation37 + $0x8]] %s8677_s24  ;;  %s8703_s10 = smov [#allocation38]  }
 0x168   :  { %325 = dma.general %s9915_s18, 81920, %s304_s12, %s8698_s17, %s8699_s0, [#allocation37], %s9039_s13, 0  }
 0x169   :  { %342 = sst [smem:[#allocation39]] %s8681_s14  ;;  %s8702_s18 = smov [#allocation8 + $0x2]  }
 0x16a   :  { %344 = sst [smem:[#allocation39 + $0x1]] %s8681_s14  ;;  %s8704_s27 = smov [#allocation5]  }
 0x16b   :  { %346 = sst [smem:[#allocation39 + $0x2]] %s8677_s24  ;;  %s373_s4 = sshll.u32 %s8704_s27, 4  ;;  %s374_s4 = int_to_ptr.vmem [resolvable:$true] %s373_s4 }
 0x16c   :  { %348 = sst [smem:[#allocation39 + $0x3]] %s8676_s28  ;;  %s8706_s29 = smov [#allocation40]  }
 0x16d   :  { %350 = sst [smem:[#allocation39 + $0x4]] %s8689_s30  ;;  %s8707_s8 = smov [#allocation6]  }
 0x16e   :  { %352 = sst [smem:[#allocation39 + $0x5]] %s8691_s6  ;;  %s408_s26 = sshll.u32 %s8707_s8, 4  ;;  %s409_s26 = int_to_ptr.vmem [resolvable:$true] %s408_s26 }
 0x16f   :  { %354 = sst [smem:[#allocation39 + $0x6]] %s8701_s16  ;;  %s8709_s23 = smov [#allocation42]  }
 0x170   :  { %356 = sst [smem:[#allocation39 + $0x7]] %s8676_s28 }
 0x171   :  { %358 = sst [smem:[#allocation39 + $0x8]] %s8677_s24 }
 0x172   :  { %360 = dma.general %s9916_s19, 40960, %s339_s9, %s8702_s18, %s8703_s10, [#allocation39], %s9039_s13, 0  }
 0x173   :  { %377 = sst [smem:[#allocation41]] %s8681_s14  ;;  %s8705_s19 = smov [#allocation8 + $0x3]  }
 0x174   :  { %379 = sst [smem:[#allocation41 + $0x1]] %s8681_s14 }
 0x175   :  { %381 = sst [smem:[#allocation41 + $0x2]] %s8677_s24 }
 0x176   :  { %383 = sst [smem:[#allocation41 + $0x3]] %s8676_s28 }
 0x177   :  { %385 = sst [smem:[#allocation41 + $0x4]] %s8689_s30 }
 0x178   :  { %387 = sst [smem:[#allocation41 + $0x5]] %s8691_s6 }
 0x179   :  { %389 = sst [smem:[#allocation41 + $0x6]] %s8701_s16 }
 0x17a   :  { %391 = sst [smem:[#allocation41 + $0x7]] %s8676_s28 }
 0x17b   :  { %393 = sst [smem:[#allocation41 + $0x8]] %s8677_s24 }
 0x17c   :  { %395 = dma.general %s9917_s20, 16384, %s374_s4, %s8705_s19, %s8706_s29, [#allocation41], %s9039_s13, 0  }
 0x17d   :  { %412 = sst [smem:[#allocation43]] %s8701_s16  ;;  %s8708_s20 = smov [#allocation8 + $0x4]  }
 0x17e   :  { %414 = sst [smem:[#allocation43 + $0x1]] %s8701_s16 }
 0x17f   :  { %416 = sst [smem:[#allocation43 + $0x2]] %s8691_s6 }
 0x180   :  { %418 = sst [smem:[#allocation43 + $0x3]] %s8676_s28 }
 0x181   :  { %420 = sst [smem:[#allocation43 + $0x4]] %s8689_s30 }
 0x182   :  { %422 = sst [smem:[#allocation43 + $0x5]] %s8691_s6 }
 0x183   :  { %424 = sst [smem:[#allocation43 + $0x6]] %s8689_s30  ;;  %s8615_s30 = scalar_lea.hbm %s9919_s22, 2048 }
 0x184   :  { %426 = sst [smem:[#allocation43 + $0x7]] %s8676_s28  ;;  %p8616_p2 = scmp.ne.s32.totalorder %s9919_s22, %s8615_s30 }
 0x185   :  { %428 = sst [smem:[#allocation43 + $0x8]] %s8677_s24  ;;  %p8619_p3 = scmp.lt.u32.totalorder %s8615_s30, %s9919_s22 }
 0x186   :  { %430 = dma.general %s9918_s21, 8192, %s409_s26, %s8708_s20, %s8709_s23, [#allocation43], %s9039_s13, 0  }
 0x187   :  { %v467_v0 = vld [vmem:[#allocation9] sm:$0xf]  ;;  %s9945_s0 = sld [smem:[#allocation63_spill]]  ;;  %v8250_v15 = vld [vmem:[#allocation13] sm:$0xff]   ;;  %v8251_v16 = vld [vmem:[#allocation13 + $0x8] sm:$0xff]   ;;  %p8621_p4 = pnand %p8619_p3, %p8616_p2 }
 0x188   :  { %8204 = vmatprep.subr.msk.bf16.mxu0 %vm500_vm0, %v467_v0  ;;  %v502_v3 = vsel %vm500_vm0, %v467_v0, 0  ;;  %7888 = vmatprep.subr.bf16.mxu1 %v8250_v15  ;;  %v8252_v28 = vld [vmem:[#allocation13 + $0x10] sm:$0xff]   ;;  %v8253_v29 = vld [vmem:[#allocation13 + $0x18] sm:$0xff]   ;;  %v8254_v30 = vld [vmem:[#allocation16] sm:$0xff]  }
 0x189   :  { %7871 = vmatpush3.bf16.msra.mxu0 %v502_v3  ;;  %7889 = vmatpush3.bf16.msra.mxu1 %v8250_v15  ;;  %v9147_v31 = vld [vmem:[#allocation11] ss:$0 sm:$0xff]  ;;  %v8255_v49 = vld [vmem:[#allocation16 + $0x8] sm:$0xff]   ;;  %v8256_v58 = vld [vmem:[#allocation16 + $0x10] sm:$0xff]  }
 0x18a   :  { %7890 = vmatprep.subr.bf16.mxu1 %v8251_v16 }
 0x18d   :  { %v443_v1 = vld [vmem:[%s9945_s0] sm:$0xff]  ;;  %v444_v2 = vld [vmem:[%s9945_s0 + $0x8] sm:$0xff]  ;;  %v445_v5 = vld [vmem:[%s9945_s0 + $0x10] sm:$0xff]  ;;  %7891 = vmatpush3.bf16.msra.mxu1 %v8251_v16 }
 0x18e   :  { %v459_v4 = vpack.c.bf16 %v444_v2, %v443_v1  ;;  %v446_v6 = vld [vmem:[%s9945_s0 + $0x18] sm:$0xff]  ;;  %v447_v7 = vld [vmem:[%s9945_s0 + $0x20] sm:$0xff]  ;;  %v448_v9 = vld [vmem:[%s9945_s0 + $0x28] sm:$0xff]  ;;  %7892 = vmatprep.subr.bf16.mxu1 %v8252_v28 }
 0x18f   :  { %v460_v8 = vpack.c.bf16 %v446_v6, %v445_v5  ;;  %v461_v10 = vpack.c.bf16 %v448_v9, %v447_v7  ;;  %v449_v11 = vld [vmem:[%s9945_s0 + $0x30] sm:$0xff]  ;;  %v450_v12 = vld [vmem:[%s9945_s0 + $0x38] sm:$0xff]  ;;  %v451_v13 = vld [vmem:[%s9945_s0 + $0x40] sm:$0xff] }
 0x190   :  { %7872 = vmatprep.mubr.msk.bf16.mxu0 %vm475_vm1, %v459_v4  ;;  %v452_v14 = vld [vmem:[%s9945_s0 + $0x48] sm:$0xff]  ;;  %v462_v17 = vpack.c.bf16 %v450_v12, %v449_v11  ;;  %v453_v19 = vld [vmem:[%s9945_s0 + $0x50] sm:$0xff]  ;;  %v454_v20 = vld [vmem:[%s9945_s0 + $0x58] sm:$0xff] }
 0x191   :  { %7873 = vmatmul.mubr.msk.bf16.vlgmr.msra.gmra.mrb[0].mxu0 %vm475_vm1, %v460_v8  ;;  %v463_v18 = vpack.c.bf16 %v452_v14, %v451_v13  ;;  %v455_v21 = vld [vmem:[%s9945_s0 + $0x60] sm:$0xff]  ;;  %v456_v22 = vld [vmem:[%s9945_s0 + $0x68] sm:$0xff]  ;;  %v464_v23 = vpack.c.bf16 %v454_v20, %v453_v19  ;;  %v457_v25 = vld [vmem:[%s9945_s0 + $0x70] sm:$0xff]  ;;  %7893 = vmatpush3.bf16.msra.mxu1 %v8252_v28 }
 0x192   :  { %7876 = vmatprep.mubr.msk.bf16.mxu0 %vm475_vm1, %v461_v10  ;;  %v465_v24 = vpack.c.bf16 %v456_v22, %v455_v21  ;;  %v458_v26 = vld [vmem:[%s9945_s0 + $0x78] sm:$0xff]  ;;  %7894 = vmatprep.subr.bf16.mxu1 %v8253_v29  ;;  %v9173_v28 = vld [vmem:[#allocation14] ss:$0 sm:$0xff]  ;;  %s8711_s0 = smov [#allocation7]  }
 0x193   :  { %v466_v27 = vpack.c.bf16 %v458_v26, %v457_v25  ;;  %v8257_v26 = vld [vmem:[#allocation16 + $0x18] sm:$0xff]   ;;  %s439_s6 = sshll.u32 %s8711_s0, 4  ;;  %s440_s6 = int_to_ptr.vmem [resolvable:$true] %s439_s6 }
 0x195   :  { %7895 = vmatpush3.bf16.msra.mxu1 %v8253_v29 }
 0x196   :  { %7912 = vmatprep.subr.bf16.mxu1 %v8254_v30 }
 0x199   :  { %7877 = vmatmul.mubr.msk.bf16.gmra.mrb[4].mxu0 %vm475_vm1, %v462_v17 }
 0x19a   :  { %7880 = vmatprep.mubr.msk.bf16.mxu0 %vm475_vm1, %v463_v18 }
 0x1a1   :  { %7881 = vmatmul.mubr.msk.bf16.gmra.mrb[8].mxu0 %vm475_vm1, %v464_v23 }
 0x1a2   :  { %7884 = vmatprep.mubr.msk.bf16.mxu0 %vm475_vm1, %v465_v24 }
 0x1a9   :  { %7885 = vmatmul.mubr.msk.bf16.gmra.mrb[12].mxu0 %vm475_vm1, %v466_v27  ;;  %v8258_v27 = vld [vmem:[#allocation19] sm:$0xff]  }
 0x264   :  { %v7874_v32 = vpop.f32.mrb[0].mxu0 }
 0x265   :  { %v547_v33 = vadd.f32 %v7874_v32, %v9147_v31  ;;  %v538_v34 = vpop.f32.mrb[1].mxu0 }
 0x266   :  { %v539_v35 = vadd.f32 %v9147_v31, %v538_v34  ;;  %v7875_v36 = vpop.f32.mrb[2].mxu0 }
 0x267   :  { %v550_v37 = vadd.f32 %v7875_v36, %v9147_v31  ;;  %v541_v38 = vpop.f32.mrb[3].mxu0  ;;  %v603_v40 = vmax.f32 %v547_v33, 0.0 }
 0x268   :  { %v542_v39 = vadd.f32 %v9147_v31, %v541_v38  ;;  %v601_v42 = vmax.f32 %v539_v35, 0.0 }
 0x269   :  { %v604_v41 = vmax.f32 %v550_v37, 0.0 }
 0x26a   :  { %v602_v43 = vmax.f32 %v542_v39, 0.0 }
 0x26b   :  { %v618_v44 = vpack.c.bf16 %v604_v41, %v603_v40 }
 0x26c   :  { %v7878_v45 = vpop.f32.mrb[4].mxu0  ;;  %v617_v46 = vpack.c.bf16 %v602_v43, %v601_v42 }
 0x26d   :  { %v563_v47 = vadd.f32 %v7878_v45, %v9147_v31  ;;  %v554_v48 = vpop.f32.mrb[5].mxu0 }
 0x26e   :  { %v555_v50 = vadd.f32 %v9147_v31, %v554_v48  ;;  %v7879_v51 = vpop.f32.mrb[6].mxu0  ;;  %7896 = vmatprep.mubr.msk.bf16.mxu1 %vm664_vm2, %v617_v46  ;;  %v8259_v46 = vld [vmem:[#allocation19 + $0x8] sm:$0xff]  }
 0x26f   :  { %v607_v52 = vmax.f32 %v563_v47, 0.0  ;;  %v566_v53 = vadd.f32 %v7879_v51, %v9147_v31  ;;  %v557_v54 = vpop.f32.mrb[7].mxu0  ;;  %7897 = vmatmul.mubr.msk.bf16.vlgmr.msra.gmra.mrb[0].mxu1 %vm664_vm2, %v618_v44 }
 0x270   :  { %v605_v55 = vmax.f32 %v555_v50, 0.0  ;;  %v558_v56 = vadd.f32 %v9147_v31, %v557_v54  ;;  %7913 = vmatpush3.bf16.msra.mxu1 %v8254_v30 }
 0x271   :  { %v608_v57 = vmax.f32 %v566_v53, 0.0  ;;  %7914 = vmatprep.subr.bf16.mxu1 %v8255_v49 }
 0x272   :  { %v606_v59 = vmax.f32 %v558_v56, 0.0 }
 0x273   :  { %v620_v60 = vpack.c.bf16 %v608_v57, %v607_v52 }
 0x274   :  { %v619_v61 = vpack.c.bf16 %v606_v59, %v605_v55  ;;  %v7882_v62 = vpop.f32.mrb[8].mxu0  ;;  %7915 = vmatpush3.bf16.msra.mxu1 %v8255_v49  ;;  %v8260_v55 = vld [vmem:[#allocation19 + $0x10] sm:$0xff]  }
 0x275   :  { %v579_v63 = vadd.f32 %v7882_v62, %v9147_v31  ;;  %v570_v0 = vpop.f32.mrb[9].mxu0  ;;  %7916 = vmatprep.subr.bf16.mxu1 %v8256_v58 }
 0x276   :  { %v571_v1 = vadd.f32 %v9147_v31, %v570_v0  ;;  %7900 = vmatprep.mubr.msk.bf16.mxu1 %vm664_vm2, %v619_v61  ;;  %v7883_v2 = vpop.f32.mrb[10].mxu0 }
 0x277   :  { %v611_v3 = vmax.f32 %v579_v63, 0.0  ;;  %v582_v4 = vadd.f32 %v7883_v2, %v9147_v31  ;;  %7901 = vmatmul.mubr.msk.bf16.gmra.mrb[4].mxu1 %vm664_vm2, %v620_v60  ;;  %v573_v5 = vpop.f32.mrb[11].mxu0 }
 0x278   :  { %v609_v6 = vmax.f32 %v571_v1, 0.0  ;;  %v574_v7 = vadd.f32 %v9147_v31, %v573_v5  ;;  %7917 = vmatpush3.bf16.msra.mxu1 %v8256_v58 }
 0x279   :  { %v612_v8 = vmax.f32 %v582_v4, 0.0  ;;  %7918 = vmatprep.subr.bf16.mxu1 %v8257_v26 }
 0x27a   :  { %v610_v9 = vmax.f32 %v574_v7, 0.0 }
 0x27b   :  { %v622_v10 = vpack.c.bf16 %v612_v8, %v611_v3 }
 0x27c   :  { %v621_v11 = vpack.c.bf16 %v610_v9, %v609_v6  ;;  %v7886_v12 = vpop.f32.mrb[12].mxu0  ;;  %7919 = vmatpush3.bf16.msra.mxu1 %v8257_v26  ;;  %v9199_v26 = vld [vmem:[#allocation22 + $0x8] sm:$0xff] }
 0x27d   :  { %v595_v13 = vadd.f32 %v7886_v12, %v9147_v31  ;;  %v586_v14 = vpop.f32.mrb[13].mxu0  ;;  %7936 = vmatprep.subr.bf16.mxu1 %v8258_v27 }
 0x27e   :  { %7904 = vmatprep.mubr.msk.bf16.mxu1 %vm664_vm2, %v621_v11  ;;  %v587_v15 = vadd.f32 %v9147_v31, %v586_v14  ;;  %v7887_v16 = vpop.f32.mrb[14].mxu0 }
 0x27f   :  { %7905 = vmatmul.mubr.msk.bf16.gmra.mrb[8].mxu1 %vm664_vm2, %v622_v10  ;;  %v615_v17 = vmax.f32 %v595_v13, 0.0  ;;  %v598_v18 = vadd.f32 %v7887_v16, %v9147_v31  ;;  %v589_v19 = vpop.f32.mrb[15].mxu0 }
 0x280   :  { %v613_v20 = vmax.f32 %v587_v15, 0.0  ;;  %v590_v21 = vadd.f32 %v9147_v31, %v589_v19 }
 0x281   :  { %v616_v22 = vmax.f32 %v598_v18, 0.0 }
 0x282   :  { %v614_v23 = vmax.f32 %v590_v21, 0.0 }
 0x283   :  { %v624_v24 = vpack.c.bf16 %v616_v22, %v615_v17 }
 0x284   :  { %v623_v25 = vpack.c.bf16 %v614_v23, %v613_v20  ;;  %v8261_v23 = vld [vmem:[#allocation19 + $0x18] sm:$0xff]  }
 0x286   :  { %7908 = vmatprep.mubr.msk.bf16.mxu1 %vm664_vm2, %v623_v25  ;;  %v1182_v25 = vld [vmem:[#allocation22 + $0x20] sm:$0xff] }
 0x287   :  { %7909 = vmatmul.mubr.msk.bf16.gmra.mrb[12].mxu1 %vm664_vm2, %v624_v24  ;;  %v1178_v24 = vld [vmem:[#allocation22] sm:$0xff] }
 0x342   :  { %v7898_v29 = vpop.f32.mrb[0].mxu1 }
 0x343   :  { %v732_v30 = vadd.f32 %v7898_v29, %v9173_v28  ;;  %v723_v32 = vpop.f32.mrb[1].mxu1  ;;  %v7733_v29 = vcombine.high %v1178_v24, %v1182_v25 }
 0x344   :  { %v724_v31 = vadd.f32 %v9173_v28, %v723_v32  ;;  %v7899_v33 = vpop.f32.mrb[2].mxu1  ;;  %v1190_v32 = vld [vmem:[#allocation22 + $0x60] sm:$0xff] }
 0x345   :  { %v735_v34 = vadd.f32 %v7899_v33, %v9173_v28  ;;  %v726_v35 = vpop.f32.mrb[3].mxu1  ;;  %v788_v37 = vmax.f32 %v732_v30, 0.0  ;;  %v9201_v30 = vld [vmem:[#allocation22 + $0x28] sm:$0xff]  ;;  %1604 = vmatprep.subr.bf16.mxu0 %v7733_v29 }
 0x346   :  { %v727_v36 = vadd.f32 %v9173_v28, %v726_v35  ;;  %v786_v39 = vmax.f32 %v724_v31, 0.0  ;;  %v7734_v31 = vcombine.low %v9199_v26, %v9201_v30  ;;  %v7735_v33 = vcombine.high %v9199_v26, %v9201_v30  ;;  %v1194_v35 = vld [vmem:[#allocation22 + $0x80] sm:$0xff] }
 0x347   :  { %v789_v38 = vmax.f32 %v735_v34, 0.0 }
 0x348   :  { %v787_v40 = vmax.f32 %v727_v36, 0.0  ;;  %v1198_v36 = vld [vmem:[#allocation22 + $0xa0] sm:$0xff] }
 0x349   :  { %v803_v41 = vpack.c.bf16 %v789_v38, %v788_v37  ;;  %v7749_v38 = vcombine.high %v1194_v35, %v1198_v36 }
 0x34a   :  { %v802_v42 = vpack.c.bf16 %v787_v40, %v786_v39  ;;  %v7902_v43 = vpop.f32.mrb[4].mxu1  ;;  %v1202_v39 = vld [vmem:[#allocation22 + $0xc0] sm:$0xff] }
 0x34b   :  { %v748_v44 = vadd.f32 %v7902_v43, %v9173_v28  ;;  %v739_v45 = vpop.f32.mrb[5].mxu1  ;;  %v1206_v40 = vld [vmem:[#allocation22 + $0xe0] sm:$0xff] }
 0x34c   :  { %v740_v47 = vadd.f32 %v9173_v28, %v739_v45  ;;  %v7903_v48 = vpop.f32.mrb[6].mxu1  ;;  %7920 = vmatprep.mubr.msk.bf16.mxu1 %vm664_vm2, %v802_v42  ;;  %v7757_v42 = vcombine.high %v1202_v39, %v1206_v40  ;;  %v1210_v43 = vld [vmem:[#allocation22 + $0x100] sm:$0xff]  ;;  %v7756_v45 = vcombine.low %v1202_v39, %v1206_v40 }
 0x34d   :  { %v792_v49 = vmax.f32 %v748_v44, 0.0  ;;  %v751_v50 = vadd.f32 %v7903_v48, %v9173_v28  ;;  %v742_v51 = vpop.f32.mrb[7].mxu1  ;;  %7921 = vmatmul.mubr.msk.bf16.vlgmr.msra.gmra.mrb[16].mxu1 %vm664_vm2, %v803_v41  ;;  %v7748_v41 = vcombine.low %v1194_v35, %v1198_v36  ;;  %v1214_v44 = vld [vmem:[#allocation22 + $0x120] sm:$0xff] }
 0x34e   :  { %v790_v52 = vmax.f32 %v740_v47, 0.0  ;;  %v743_v53 = vadd.f32 %v9173_v28, %v742_v51  ;;  %7937 = vmatpush3.bf16.msra.mxu1 %v8258_v27  ;;  %v7732_v27 = vcombine.low %v1178_v24, %v1182_v25  ;;  %v1218_v47 = vld [vmem:[#allocation22 + $0x140] sm:$0xff] }
 0x34f   :  { %v793_v54 = vmax.f32 %v751_v50, 0.0  ;;  %7938 = vmatprep.subr.bf16.mxu1 %v8259_v46  ;;  %v1222_v48 = vld [vmem:[#allocation22 + $0x160] sm:$0xff] }
 0x350   :  { %v791_v56 = vmax.f32 %v743_v53, 0.0  ;;  %1605 = vmatpush1.bf16.msra.mxu0 %v7732_v27  ;;  %v7773_v50 = vcombine.high %v1218_v47, %v1222_v48  ;;  %v7772_v51 = vcombine.low %v1218_v47, %v1222_v48 }
 0x351   :  { %v805_v57 = vpack.c.bf16 %v793_v54, %v792_v49  ;;  %v7764_v49 = vcombine.low %v1210_v43, %v1214_v44 }
 0x352   :  { %v804_v58 = vpack.c.bf16 %v791_v56, %v790_v52  ;;  %v7906_v59 = vpop.f32.mrb[8].mxu1  ;;  %7939 = vmatpush3.bf16.msra.mxu1 %v8259_v46  ;;  %v7765_v46 = vcombine.high %v1210_v43, %v1214_v44  ;;  %v9207_v52 = vld [vmem:[#allocation17] ss:$0 sm:$0xff]  ;;  %v1219_v44 = vld [vmem:[#allocation22 + $0x148] sm:$0xff] }
 0x353   :  { %v764_v60 = vadd.f32 %v7906_v59, %v9173_v28  ;;  %v755_v61 = vpop.f32.mrb[9].mxu1  ;;  %7940 = vmatprep.subr.bf16.mxu1 %v8260_v55 }
 0x354   :  { %v756_v62 = vadd.f32 %v9173_v28, %v755_v61  ;;  %7924 = vmatprep.mubr.msk.bf16.mxu1 %vm664_vm2, %v804_v58  ;;  %v7907_v63 = vpop.f32.mrb[10].mxu1 }
 0x355   :  { %v796_v0 = vmax.f32 %v764_v60, 0.0  ;;  %v767_v1 = vadd.f32 %v7907_v63, %v9173_v28  ;;  %7925 = vmatmul.mubr.msk.bf16.gmra.mrb[20].mxu1 %vm664_vm2, %v805_v57  ;;  %v758_v2 = vpop.f32.mrb[11].mxu1 }
 0x356   :  { %v794_v3 = vmax.f32 %v756_v62, 0.0  ;;  %v759_v4 = vadd.f32 %v9173_v28, %v758_v2  ;;  %7941 = vmatpush3.bf16.msra.mxu1 %v8260_v55  ;;  %v1191_v2 = vld [vmem:[#allocation22 + $0x68] sm:$0xff] }
 0x357   :  { %v797_v5 = vmax.f32 %v767_v1, 0.0  ;;  %7942 = vmatprep.subr.bf16.mxu1 %v8261_v23  ;;  %v1187_v1 = vld [vmem:[#allocation22 + $0x48] sm:$0xff] }
 0x358   :  { %v795_v6 = vmax.f32 %v759_v4, 0.0 }
 0x359   :  { %v807_v7 = vpack.c.bf16 %v797_v5, %v796_v0 }
 0x35a   :  { %v806_v8 = vpack.c.bf16 %v795_v6, %v794_v3  ;;  %v7910_v9 = vpop.f32.mrb[12].mxu1  ;;  %7943 = vmatpush3.bf16.msra.mxu1 %v8261_v23  ;;  %v1207_v23 = vld [vmem:[#allocation22 + $0xe8] sm:$0xff] }
 0x35b   :  { %v780_v10 = vadd.f32 %v7910_v9, %v9173_v28  ;;  %v771_v11 = vpop.f32.mrb[13].mxu1  ;;  %1701 = vmatprep.subr.bf16.mxu1 %v7735_v33  ;;  %v1211_v33 = vld [vmem:[#allocation22 + $0x108] sm:$0xff] }
 0x35c   :  { %7928 = vmatprep.mubr.msk.bf16.mxu1 %vm664_vm2, %v806_v8  ;;  %v772_v12 = vadd.f32 %v9173_v28, %v771_v11  ;;  %v7911_v13 = vpop.f32.mrb[14].mxu1  ;;  %v7743_v8 = vcombine.high %v1187_v1, %v1191_v2  ;;  %v1195_v11 = vld [vmem:[#allocation22 + $0x88] sm:$0xff] }
 0x35d   :  { %7929 = vmatmul.mubr.msk.bf16.gmra.mrb[24].mxu1 %vm664_vm2, %v807_v7  ;;  %v800_v14 = vmax.f32 %v780_v10, 0.0  ;;  %v783_v15 = vadd.f32 %v7911_v13, %v9173_v28  ;;  %v774_v16 = vpop.f32.mrb[15].mxu1 }
 0x35e   :  { %v798_v17 = vmax.f32 %v772_v12, 0.0  ;;  %v775_v18 = vadd.f32 %v9173_v28, %v774_v16  ;;  %v1186_v28 = vld [vmem:[#allocation22 + $0x40] sm:$0xff]  ;;  %v1199_v12 = vld [vmem:[#allocation22 + $0xa8] sm:$0xff]  ;;  %v7742_v16 = vcombine.low %v1187_v1, %v1191_v2 }
 0x35f   :  { %v801_v19 = vmax.f32 %v783_v15, 0.0  ;;  %v7741_v34 = vcombine.high %v1186_v28, %v1190_v32  ;;  %v7740_v37 = vcombine.low %v1186_v28, %v1190_v32  ;;  %v7750_v29 = vcombine.low %v1195_v11, %v1199_v12  ;;  %v1226_v2 = vld [vmem:[#allocation22 + $0x180] sm:$0xff] }
 0x360   :  { %v799_v20 = vmax.f32 %v775_v18, 0.0 }
 0x361   :  { %v809_v21 = vpack.c.bf16 %v801_v19, %v800_v14  ;;  %1606 = vmatprep.subr.bf16.mxu0 %v7741_v34  ;;  %v7751_v19 = vcombine.high %v1195_v11, %v1199_v12  ;;  %v1215_v34 = vld [vmem:[#allocation22 + $0x128] sm:$0xff] }
 0x362   :  { %v808_v22 = vpack.c.bf16 %v799_v20, %v798_v17  ;;  %1607 = vmatpush1.bf16.msra.mxu0 %v7740_v37  ;;  %v1235_v11 = vld [vmem:[#allocation22 + $0x1c8] sm:$0xff] }
 0x363   :  { %1608 = vmatprep.subr.bf16.mxu0 %v7749_v38 }
 0x364   :  { %7932 = vmatprep.mubr.msk.bf16.mxu1 %vm664_vm2, %v808_v22  ;;  %v1203_v22 = vld [vmem:[#allocation22 + $0xc8] sm:$0xff] }
 0x365   :  { %7933 = vmatmul.mubr.msk.bf16.gmra.mrb[28].mxu1 %vm664_vm2, %v809_v21  ;;  %v7759_v26 = vcombine.high %v1203_v22, %v1207_v23  ;;  %v7758_v40 = vcombine.low %v1203_v22, %v1207_v23  ;;  %v1185_v23 = vld [vmem:[#allocation22 + $0x38] sm:$0xff] }
 0x366   :  { %1609 = vmatpush1.bf16.msra.mxu0 %v7748_v41 }
 0x367   :  { %1610 = vmatprep.subr.bf16.mxu0 %v7757_v42  ;;  %v7767_v42 = vcombine.high %v1211_v33, %v1215_v34 }
 0x36a   :  { %1611 = vmatpush1.bf16.msra.mxu0 %v7756_v45  ;;  %v1223_v45 = vld [vmem:[#allocation22 + $0x168] sm:$0xff] }
 0x36b   :  { %1612 = vmatprep.subr.bf16.mxu0 %v7765_v46 }
 0x36e   :  { %1613 = vmatpush1.bf16.msra.mxu0 %v7764_v49  ;;  %v7766_v49 = vcombine.low %v1211_v33, %v1215_v34 }
 0x36f   :  { %1614 = vmatprep.subr.bf16.mxu0 %v7773_v50 }
 0x372   :  { %1615 = vmatpush1.bf16.msra.mxu0 %v7772_v51 }
 0x420   :  { %v7922_v53 = vpop.f32.mrb[16].mxu1 }
 0x421   :  { %v916_v54 = vadd.f32 %v7922_v53, %v9207_v52  ;;  %v907_v55 = vpop.f32.mrb[17].mxu1  ;;  %v7775_v53 = vcombine.high %v1219_v44, %v1223_v45 }
 0x422   :  { %v908_v56 = vadd.f32 %v9207_v52, %v907_v55  ;;  %v7923_v57 = vpop.f32.mrb[18].mxu1 }
 0x423   :  { %v919_v58 = vadd.f32 %v7923_v57, %v9207_v52  ;;  %v910_v59 = vpop.f32.mrb[19].mxu1  ;;  %v972_v61 = vmax.f32 %v916_v54, 0.0 }
 0x424   :  { %v911_v60 = vadd.f32 %v9207_v52, %v910_v59  ;;  %v970_v63 = vmax.f32 %v908_v56, 0.0 }
 0x425   :  { %v973_v62 = vmax.f32 %v919_v58, 0.0 }
 0x426   :  { %v971_v0 = vmax.f32 %v911_v60, 0.0 }
 0x427   :  { %v987_v3 = vpack.c.bf16 %v973_v62, %v972_v61  ;;  %v7774_v61 = vcombine.low %v1219_v44, %v1223_v45 }
 0x428   :  { %v986_v4 = vpack.c.bf16 %v971_v0, %v970_v63  ;;  %v7926_v5 = vpop.f32.mrb[20].mxu1 }
 0x429   :  { %v932_v6 = vadd.f32 %v7926_v5, %v9207_v52  ;;  %v923_v7 = vpop.f32.mrb[21].mxu1 }
 0x42a   :  { %v924_v9 = vadd.f32 %v9207_v52, %v923_v7  ;;  %v7927_v10 = vpop.f32.mrb[22].mxu1  ;;  %7944 = vmatprep.mubr.msk.bf16.mxu1 %vm664_vm2, %v986_v4  ;;  %v1227_v4 = vld [vmem:[#allocation22 + $0x188] sm:$0xff] }
 0x42b   :  { %v935_v13 = vadd.f32 %v7927_v10, %v9207_v52  ;;  %v926_v14 = vpop.f32.mrb[23].mxu1  ;;  %7945 = vmatmul.mubr.msk.bf16.vlgmr.msra.gmra.mrb[32].mxu1 %vm664_vm2, %v987_v3  ;;  %v976_v17 = vmax.f32 %v932_v6, 0.0  ;;  %v1230_v3 = vld [vmem:[#allocation22 + $0x1a0] sm:$0xff]  ;;  %v1231_v6 = vld [vmem:[#allocation22 + $0x1a8] sm:$0xff] }
 0x42c   :  { %v927_v15 = vadd.f32 %v9207_v52, %v926_v14  ;;  %1702 = vmatpush1.bf16.msra.mxu1 %v7734_v31  ;;  %v974_v20 = vmax.f32 %v924_v9, 0.0  ;;  %v7781_v5 = vcombine.high %v1226_v2, %v1230_v3  ;;  %v7780_v7 = vcombine.low %v1226_v2, %v1230_v3  ;;  %v1234_v9 = vld [vmem:[#allocation22 + $0x1c0] sm:$0xff]  ;;  %v1204_v2 = vld [vmem:[#allocation22 + $0xd0] sm:$0xff] }
 0x42d   :  { %v977_v18 = vmax.f32 %v935_v13, 0.0  ;;  %1703 = vmatprep.subr.bf16.mxu1 %v7743_v8  ;;  %v7782_v8 = vcombine.low %v1227_v4, %v1231_v6  ;;  %v1238_v10 = vld [vmem:[#allocation22 + $0x1e0] sm:$0xff]  ;;  %v1239_v13 = vld [vmem:[#allocation22 + $0x1e8] sm:$0xff] }
 0x42e   :  { %v975_v21 = vmax.f32 %v927_v15, 0.0  ;;  %1616 = vmatprep.subr.bf16.mxu0 %v7781_v5  ;;  %v7789_v12 = vcombine.high %v1234_v9, %v1238_v10  ;;  %v7788_v14 = vcombine.low %v1234_v9, %v1238_v10  ;;  %v7790_v15 = vcombine.low %v1235_v11, %v1239_v13  ;;  %v1208_v5 = vld [vmem:[#allocation22 + $0xf0] sm:$0xff] }
 0x42f   :  { %v989_v24 = vpack.c.bf16 %v977_v18, %v976_v17  ;;  %1617 = vmatpush1.bf16.msra.mxu0 %v7780_v7  ;;  %v8710_v17 = vmov 0   ;;  %v1180_v18 = vld [vmem:[#allocation22 + $0x10] sm:$0xff]  ;;  %v1209_v7 = vld [vmem:[#allocation22 + $0xf8] sm:$0xff] }
 0x430   :  { %v988_v25 = vpack.c.bf16 %v975_v21, %v974_v20  ;;  %v7930_v27 = vpop.f32.mrb[24].mxu1  ;;  %1704 = vmatpush1.bf16.msra.mxu1 %v7742_v16  ;;  %v7791_v16 = vcombine.high %v1235_v11, %v1239_v13  ;;  %1618 = vmatprep.subr.bf16.mxu0 %v7789_v12  ;;  %v1181_v20 = vld [vmem:[#allocation22 + $0x18] sm:$0xff] }
 0x431   :  { %v948_v28 = vadd.f32 %v7930_v27, %v9207_v52  ;;  %v939_v32 = vpop.f32.mrb[25].mxu1  ;;  %1705 = vmatprep.subr.bf16.mxu1 %v7751_v19  ;;  %1636 = vmatprep.mubr.bf16.mxu0 %v8710_v17  ;;  %v1184_v19 = vld [vmem:[#allocation22 + $0x30] sm:$0xff]  ;;  %v9238_v27 = vld [vmem:[#allocation20] ss:$0 sm:$0xff] }
 0x432   :  { %v940_v30 = vadd.f32 %v9207_v52, %v939_v32  ;;  %7948 = vmatprep.mubr.msk.bf16.mxu1 %vm664_vm2, %v988_v25  ;;  %v7931_v31 = vpop.f32.mrb[26].mxu1  ;;  %v7736_v21 = vcombine.low %v1180_v18, %v1184_v19  ;;  %v7737_v22 = vcombine.high %v1180_v18, %v1184_v19  ;;  %v7739_v25 = vcombine.high %v1181_v20, %v1185_v23 }
 0x433   :  { %v980_v35 = vmax.f32 %v948_v28, 0.0  ;;  %v951_v36 = vadd.f32 %v7931_v31, %v9207_v52  ;;  %7949 = vmatmul.mubr.msk.bf16.gmra.mrb[36].mxu1 %vm664_vm2, %v989_v24  ;;  %v942_v37 = vpop.f32.mrb[27].mxu1  ;;  %1619 = vmatpush1.bf16.msra.mxu0 %v7788_v14  ;;  %v7738_v24 = vcombine.low %v1181_v20, %v1185_v23  ;;  %v7761_v14 = vcombine.high %v1204_v2, %v1208_v5  ;;  %v1216_v20 = vld [vmem:[#allocation22 + $0x130] sm:$0xff] }
 0x434   :  { %v978_v38 = vmax.f32 %v940_v30, 0.0  ;;  %v943_v39 = vadd.f32 %v9207_v52, %v942_v37  ;;  %1706 = vmatpush1.bf16.msra.mxu1 %v7750_v29  ;;  %1798 = vmatprep.subr.bf16.mxu0 %v7737_v22  ;;  %v1188_v37 = vld [vmem:[#allocation22 + $0x50] sm:$0xff]  ;;  %v1217_v22 = vld [vmem:[#allocation22 + $0x138] sm:$0xff] }
 0x435   :  { %v981_v41 = vmax.f32 %v951_v36, 0.0  ;;  %1707 = vmatprep.subr.bf16.mxu1 %v7759_v26 }
 0x436   :  { %v979_v43 = vmax.f32 %v943_v39, 0.0 }
 0x437   :  { %v991_v46 = vpack.c.bf16 %v981_v41, %v980_v35  ;;  %v1189_v41 = vld [vmem:[#allocation22 + $0x58] sm:$0xff] }
 0x438   :  { %v990_v47 = vpack.c.bf16 %v979_v43, %v978_v38  ;;  %v7934_v48 = vpop.f32.mrb[28].mxu1  ;;  %1708 = vmatpush1.bf16.msra.mxu1 %v7758_v40  ;;  %v1192_v40 = vld [vmem:[#allocation22 + $0x70] sm:$0xff] }
 0x439   :  { %v964_v50 = vadd.f32 %v7934_v48, %v9207_v52  ;;  %v955_v51 = vpop.f32.mrb[29].mxu1  ;;  %1709 = vmatprep.subr.bf16.mxu1 %v7767_v42  ;;  %v1193_v42 = vld [vmem:[#allocation22 + $0x78] sm:$0xff] }
 0x43a   :  { %7952 = vmatprep.mubr.msk.bf16.mxu1 %vm664_vm2, %v990_v47  ;;  %v956_v54 = vadd.f32 %v9207_v52, %v955_v51  ;;  %v7935_v55 = vpop.f32.mrb[30].mxu1  ;;  %v1200_v51 = vld [vmem:[#allocation22 + $0xb0] sm:$0xff] }
 0x43b   :  { %7953 = vmatmul.mubr.msk.bf16.gmra.mrb[40].mxu1 %vm664_vm2, %v991_v46  ;;  %v984_v56 = vmax.f32 %v964_v50, 0.0  ;;  %v967_v57 = vadd.f32 %v7935_v55, %v9207_v52  ;;  %v958_v58 = vpop.f32.mrb[31].mxu1  ;;  %v1196_v46 = vld [vmem:[#allocation22 + $0x90] sm:$0xff]  ;;  %v7747_v50 = vcombine.high %v1189_v41, %v1193_v42 }
 0x43c   :  { %v982_v59 = vmax.f32 %v956_v54, 0.0  ;;  %v959_v60 = vadd.f32 %v9207_v52, %v958_v58  ;;  %1710 = vmatpush1.bf16.msra.mxu1 %v7766_v49  ;;  %v7783_v52 = vcombine.high %v1227_v4, %v1231_v6  ;;  %v7745_v49 = vcombine.high %v1188_v37, %v1192_v40  ;;  %v1201_v54 = vld [vmem:[#allocation22 + $0xb8] sm:$0xff] }
 0x43d   :  { %v985_v62 = vmax.f32 %v967_v57, 0.0  ;;  %1711 = vmatprep.subr.bf16.mxu1 %v7775_v53  ;;  %v1197_v53 = vld [vmem:[#allocation22 + $0x98] sm:$0xff]  ;;  %v7752_v10 = vcombine.low %v1196_v46, %v1200_v51 }
 0x43e   :  { %v983_v63 = vmax.f32 %v959_v60, 0.0  ;;  %v7746_v60 = vcombine.low %v1189_v41, %v1193_v42  ;;  %v1205_v6 = vld [vmem:[#allocation22 + $0xd8] sm:$0xff]  ;;  %v7754_v11 = vcombine.low %v1197_v53, %v1201_v54 }
 0x43f   :  { %v993_v0 = vpack.c.bf16 %v985_v62, %v984_v56  ;;  %v7753_v62 = vcombine.high %v1196_v46, %v1200_v51 }
 0x440   :  { %v992_v1 = vpack.c.bf16 %v983_v63, %v982_v59  ;;  %1712 = vmatpush1.bf16.msra.mxu1 %v7774_v61  ;;  %v7744_v59 = vcombine.low %v1188_v37, %v1192_v40  ;;  %v7755_v63 = vcombine.high %v1197_v53, %v1201_v54  ;;  %v1221_v37 = vld [vmem:[#allocation22 + $0x158] sm:$0xff]  ;;  %v1232_v54 = vld [vmem:[#allocation22 + $0x1b0] sm:$0xff] }
 0x441   :  { %1713 = vmatprep.subr.bf16.mxu1 %v7783_v52 }
 0x442   :  { %7956 = vmatprep.mubr.msk.bf16.mxu1 %vm664_vm2, %v992_v1 }
 0x443   :  { %7957 = vmatmul.mubr.msk.bf16.gmra.mrb[44].mxu1 %vm664_vm2, %v993_v0 }
 0x444   :  { %1714 = vmatpush1.bf16.msra.mxu1 %v7782_v8  ;;  %1733 = vmatprep.mubr.bf16.mxu1 %v8710_v17 }
 0x445   :  { %1715 = vmatprep.subr.bf16.mxu1 %v7791_v16  ;;  %v1212_v16 = vld [vmem:[#allocation22 + $0x110] sm:$0xff] }
 0x446   :  { %v7768_v42 = vcombine.low %v1212_v16, %v1216_v20 }
 0x448   :  { %1716 = vmatpush1.bf16.msra.mxu1 %v7790_v15  ;;  %v7763_v15 = vcombine.high %v1205_v6, %v1209_v7 }
 0x449   :  { %1895 = vmatprep.subr.bf16.mxu1 %v7739_v25 }
 0x4fe   :  { %v7946_v29 = vpop.f32.mrb[32].mxu1 }
 0x4ff   :  { %v1100_v28 = vadd.f32 %v7946_v29, %v9238_v27  ;;  %v1091_v32 = vpop.f32.mrb[33].mxu1 }
 0x500   :  { %v1092_v26 = vadd.f32 %v9238_v27, %v1091_v32  ;;  %v7947_v30 = vpop.f32.mrb[34].mxu1  ;;  %v7760_v32 = vcombine.low %v1204_v2, %v1208_v5  ;;  %v1240_v5 = vld [vmem:[#allocation22 + $0x1f0] sm:$0xff] }
 0x501   :  { %v1103_v31 = vadd.f32 %v7947_v30, %v9238_v27  ;;  %v1094_v33 = vpop.f32.mrb[35].mxu1  ;;  %v1156_v35 = vmax.f32 %v1100_v28, 0.0 }
 0x502   :  { %v1095_v34 = vadd.f32 %v9238_v27, %v1094_v33  ;;  %v1154_v38 = vmax.f32 %v1092_v26, 0.0  ;;  %v7762_v26 = vcombine.low %v1205_v6, %v1209_v7  ;;  %v1237_v6 = vld [vmem:[#allocation22 + $0x1d8] sm:$0xff] }
 0x503   :  { %v1157_v36 = vmax.f32 %v1103_v31, 0.0  ;;  %v7769_v31 = vcombine.high %v1212_v16, %v1216_v20  ;;  %v1241_v7 = vld [vmem:[#allocation22 + $0x1f8] sm:$0xff]  ;;  %v9336_v16 = vld [vmem:[#allocation23] sm:$0xff] }
 0x504   :  { %v1155_v39 = vmax.f32 %v1095_v34, 0.0  ;;  %v1220_v34 = vld [vmem:[#allocation22 + $0x150] sm:$0xff] }
 0x505   :  { %v9244_v43 = vpack.c.bf16 %v1157_v36, %v1156_v35  ;;  %v1224_v36 = vld [vmem:[#allocation22 + $0x170] sm:$0xff] }
 0x506   :  { %v9246_v44 = vpack.c.bf16 %v1155_v39, %v1154_v38  ;;  %v7950_v45 = vpop.f32.mrb[36].mxu1  ;;  %v1225_v38 = vld [vmem:[#allocation22 + $0x178] sm:$0xff] }
 0x507   :  { %v1116_v47 = vadd.f32 %v7950_v45, %v9238_v27  ;;  %v1107_v48 = vpop.f32.mrb[37].mxu1 }
 0x508   :  { %v1108_v55 = vadd.f32 %v9238_v27, %v1107_v48  ;;  %v7951_v56 = vpop.f32.mrb[38].mxu1  ;;  %1637 = vmatmul.mubr.bf16.vlgmr.msra.gmra.mrb[16].mxu0 %v9246_v44  ;;  %1734 = vmatmul.mubr.bf16.vlgmr.msra.gmra.mrb[48].mxu1 %v9246_v44  ;;  %v7777_v48 = vcombine.high %v1220_v34, %v1224_v36 }
 0x509   :  { %v1119_v57 = vadd.f32 %v7951_v56, %v9238_v27  ;;  %1799 = vmatpush1.bf16.msra.mxu0 %v7736_v21  ;;  %1896 = vmatpush1.bf16.msra.mxu1 %v7738_v24  ;;  %v1110_v58 = vpop.f32.mrb[39].mxu1  ;;  %v1160_v0 = vmax.f32 %v1116_v47, 0.0  ;;  %v1213_v21 = vld [vmem:[#allocation22 + $0x118] sm:$0xff] }
 0x50a   :  { %v1111_v61 = vadd.f32 %v9238_v27, %v1110_v58  ;;  %1646 = vmatprep.mubr.bf16.mxu0 %v8710_v17  ;;  %1743 = vmatprep.mubr.bf16.mxu1 %v8710_v17  ;;  %v1158_v3 = vmax.f32 %v1108_v55, 0.0  ;;  %v7771_v33 = vcombine.high %v1213_v21, %v1217_v22  ;;  %v7770_v45 = vcombine.low %v1213_v21, %v1217_v22  ;;  %v1229_v55 = vld [vmem:[#allocation22 + $0x198] sm:$0xff] }
 0x50b   :  { %v1161_v1 = vmax.f32 %v1119_v57, 0.0  ;;  %1800 = vmatprep.subr.bf16.mxu0 %v7745_v49  ;;  %1897 = vmatprep.subr.bf16.mxu1 %v7747_v50  ;;  %v7779_v49 = vcombine.high %v1221_v37, %v1225_v38  ;;  %v1228_v50 = vld [vmem:[#allocation22 + $0x190] sm:$0xff]  ;;  %v1233_v56 = vld [vmem:[#allocation22 + $0x1b8] sm:$0xff] }
 0x50c   :  { %v1159_v4 = vmax.f32 %v1111_v61, 0.0  ;;  %v7787_v2 = vcombine.high %v1229_v55, %v1233_v56 }
 0x50d   :  { %v9256_v8 = vpack.c.bf16 %v1161_v1, %v1160_v0  ;;  %1801 = vmatpush1.bf16.msra.mxu0 %v7744_v59  ;;  %1898 = vmatpush1.bf16.msra.mxu1 %v7746_v60  ;;  %v7785_v1 = vcombine.high %v1228_v50, %v1232_v54 }
 0x50e   :  { %v9258_v52 = vpack.c.bf16 %v1159_v4, %v1158_v3  ;;  %v7954_v9 = vpop.f32.mrb[40].mxu1  ;;  %1802 = vmatprep.subr.bf16.mxu0 %v7753_v62  ;;  %1899 = vmatprep.subr.bf16.mxu1 %v7755_v63  ;;  %v7776_v62 = vcombine.low %v1220_v34, %v1224_v36  ;;  %v7778_v63 = vcombine.low %v1221_v37, %v1225_v38  ;;  %v1236_v3 = vld [vmem:[#allocation22 + $0x1d0] sm:$0xff] }
 0x50f   :  { %v1132_v12 = vadd.f32 %v7954_v9, %v9238_v27  ;;  %v1123_v13 = vpop.f32.mrb[41].mxu1 }
 0x510   :  { %v1124_v18 = vadd.f32 %v9238_v27, %v1123_v13  ;;  %1647 = vmatmul.mubr.bf16.gmra.mrb[20].mxu0 %v9244_v43  ;;  %1744 = vmatmul.mubr.bf16.gmra.mrb[52].mxu1 %v9244_v43  ;;  %v7955_v19 = vpop.f32.mrb[42].mxu1  ;;  %v7795_v13 = vcombine.high %v1237_v6, %v1241_v7 }
 0x511   :  { %v1164_v23 = vmax.f32 %v1132_v12, 0.0  ;;  %v1135_v24 = vadd.f32 %v7955_v19, %v9238_v27  ;;  %v1126_v25 = vpop.f32.mrb[43].mxu1  ;;  %1656 = vmatprep.mubr.bf16.mxu0 %v8710_v17  ;;  %1753 = vmatprep.mubr.bf16.mxu1 %v8710_v17  ;;  %v7793_v12 = vcombine.high %v1236_v3, %v1240_v5 }
 0x512   :  { %v1162_v29 = vmax.f32 %v1124_v18, 0.0  ;;  %v1127_v28 = vadd.f32 %v9238_v27, %v1126_v25  ;;  %1803 = vmatpush1.bf16.msra.mxu0 %v7752_v10  ;;  %1900 = vmatpush1.bf16.msra.mxu1 %v7754_v11  ;;  %v7786_v11 = vcombine.low %v1229_v55, %v1233_v56 }
 0x513   :  { %v1165_v30 = vmax.f32 %v1135_v24, 0.0  ;;  %1804 = vmatprep.subr.bf16.mxu0 %v7761_v14  ;;  %1901 = vmatprep.subr.bf16.mxu1 %v7763_v15  ;;  %v7792_v14 = vcombine.low %v1236_v3, %v1240_v5  ;;  %v7794_v15 = vcombine.low %v1237_v6, %v1241_v7 }
 0x514   :  { %v1163_v35 = vmax.f32 %v1127_v28, 0.0 }
 0x515   :  { %v9268_v39 = vpack.c.bf16 %v1165_v30, %v1164_v23 }
 0x516   :  { %v9270_v40 = vpack.c.bf16 %v1163_v35, %v1162_v29  ;;  %v7958_v41 = vpop.f32.mrb[44].mxu1  ;;  %1805 = vmatpush1.bf16.msra.mxu0 %v7760_v32  ;;  %1902 = vmatpush1.bf16.msra.mxu1 %v7762_v26 }
 0x517   :  { %v1148_v46 = vadd.f32 %v7958_v41, %v9238_v27  ;;  %v1139_v47 = vpop.f32.mrb[45].mxu1  ;;  %1806 = vmatprep.subr.bf16.mxu0 %v7769_v31  ;;  %1903 = vmatprep.subr.bf16.mxu1 %v7771_v33 }
 0x518   :  { %1657 = vmatmul.mubr.bf16.gmra.mrb[24].mxu0 %v9258_v52  ;;  %1754 = vmatmul.mubr.bf16.gmra.mrb[56].mxu1 %v9258_v52  ;;  %v1140_v51 = vadd.f32 %v9238_v27, %v1139_v47  ;;  %v7959_v53 = vpop.f32.mrb[46].mxu1 }
 0x519   :  { %v1168_v57 = vmax.f32 %v1148_v46, 0.0  ;;  %1666 = vmatprep.mubr.bf16.mxu0 %v8710_v17  ;;  %1763 = vmatprep.mubr.bf16.mxu1 %v8710_v17  ;;  %v1151_v58 = vadd.f32 %v7959_v53, %v9238_v27  ;;  %v1142_v59 = vpop.f32.mrb[47].mxu1 }
 0x51a   :  { %v1166_v60 = vmax.f32 %v1140_v51, 0.0  ;;  %v1143_v61 = vadd.f32 %v9238_v27, %v1142_v59  ;;  %1807 = vmatpush1.bf16.msra.mxu0 %v7768_v42  ;;  %1904 = vmatpush1.bf16.msra.mxu1 %v7770_v45  ;;  %v7784_v27 = vcombine.low %v1228_v50, %v1232_v54 }
 0x51b   :  { %v1169_v0 = vmax.f32 %v1151_v58, 0.0  ;;  %1808 = vmatprep.subr.bf16.mxu0 %v7777_v48  ;;  %1905 = vmatprep.subr.bf16.mxu1 %v7779_v49 }
 0x51c   :  { %v1167_v4 = vmax.f32 %v1143_v61, 0.0 }
 0x51d   :  { %v9280_v9 = vpack.c.bf16 %v1169_v0, %v1168_v57 }
 0x51e   :  { %v1176_v10 = vpack.c.bf16 %v1167_v4, %v1166_v60  ;;  %1809 = vmatpush1.bf16.msra.mxu0 %v7776_v62  ;;  %1906 = vmatpush1.bf16.msra.mxu1 %v7778_v63 }
 0x51f   :  { %1810 = vmatprep.subr.bf16.mxu0 %v7785_v1  ;;  %1907 = vmatprep.subr.bf16.mxu1 %v7787_v2 }
 0x520   :  { %1667 = vmatmul.mubr.bf16.gmra.mrb[28].mxu0 %v9256_v8  ;;  %1764 = vmatmul.mubr.bf16.gmra.mrb[60].mxu1 %v9256_v8 }
 0x521   :  { %1676 = vmatprep.mubr.bf16.mxu0 %v8710_v17  ;;  %1773 = vmatprep.mubr.bf16.mxu1 %v8710_v17 }
 0x522   :  { %1811 = vmatpush1.bf16.msra.mxu0 %v7784_v27  ;;  %1908 = vmatpush1.bf16.msra.mxu1 %v7786_v11 }
 0x523   :  { %1812 = vmatprep.subr.bf16.mxu0 %v7793_v12  ;;  %1909 = vmatprep.subr.bf16.mxu1 %v7795_v13 }
 0x526   :  { %1813 = vmatpush1.bf16.msra.mxu0 %v7792_v14  ;;  %1910 = vmatpush1.bf16.msra.mxu1 %v7794_v15 }
 0x528   :  { %1677 = vmatmul.mubr.bf16.gmra.mrb[32].mxu0 %v9270_v40  ;;  %1774 = vmatmul.mubr.bf16.gmra.mrb[64].mxu1 %v9270_v40 }
 0x529   :  { %1682 = vmatprep.mubr.bf16.mxu0 %v8710_v17  ;;  %1779 = vmatprep.mubr.bf16.mxu1 %v8710_v17 }
 0x530   :  { %1683 = vmatmul.mubr.bf16.gmra.mrb[36].mxu0 %v9268_v39  ;;  %1780 = vmatmul.mubr.bf16.gmra.mrb[68].mxu1 %v9268_v39 }
 0x531   :  { %1688 = vmatprep.mubr.bf16.mxu0 %v8710_v17  ;;  %1785 = vmatprep.mubr.bf16.mxu1 %v8710_v17 }
 0x538   :  { %1689 = vmatmul.mubr.bf16.gmra.mrb[40].mxu0 %v1176_v10  ;;  %1786 = vmatmul.mubr.bf16.gmra.mrb[72].mxu1 %v1176_v10 }
 0x539   :  { %1694 = vmatprep.mubr.bf16.mxu0 %v8710_v17  ;;  %1791 = vmatprep.mubr.bf16.mxu1 %v8710_v17 }
 0x540   :  { %1695 = vmatmul.mubr.bf16.gmra.mrb[44].mxu0 %v9280_v9  ;;  %1792 = vmatmul.mubr.bf16.gmra.mrb[76].mxu1 %v9280_v9 }
 0x541   :  { %1830 = vmatprep.mubr.bf16.mxu0 %v8710_v17  ;;  %1927 = vmatprep.mubr.bf16.mxu1 %v8710_v17 }
 0x548   :  { %1831 = vmatmul.mubr.bf16.vlgmr.msra.gmra.mrb[48].mxu0 %v9246_v44  ;;  %1928 = vmatmul.mubr.bf16.vlgmr.msra.gmra.mrb[80].mxu1 %v9246_v44 }
 0x549   :  { %1840 = vmatprep.mubr.bf16.mxu0 %v8710_v17  ;;  %1937 = vmatprep.mubr.bf16.mxu1 %v8710_v17 }
 0x550   :  { %1841 = vmatmul.mubr.bf16.gmra.mrb[52].mxu0 %v9244_v43  ;;  %1938 = vmatmul.mubr.bf16.gmra.mrb[84].mxu1 %v9244_v43  ;;  %v1244_v43 = vlaneseq }
 0x551   :  { %1850 = vmatprep.mubr.bf16.mxu0 %v8710_v17  ;;  %1947 = vmatprep.mubr.bf16.mxu1 %v8710_v17 }
 0x552   :  { %v9328_v44 = vshrl.u32 %v1244_v43, 7 }
 0x554   :  { %v9339_v18 = vsub.s32 1, %v9328_v44 }
 0x558   :  { %1851 = vmatmul.mubr.bf16.gmra.mrb[56].mxu0 %v9258_v52  ;;  %1948 = vmatmul.mubr.bf16.gmra.mrb[88].mxu1 %v9258_v52  ;;  %v9334_v52 = vsub.s32 2, %v9328_v44 }
 0x559   :  { %1860 = vmatprep.mubr.bf16.mxu0 %v8710_v17  ;;  %1957 = vmatprep.mubr.bf16.mxu1 %v8710_v17 }
 0x55a   :  { %v9350_v20 = vrot.slane %v9336_v16, %v9334_v52 }
 0x560   :  { %1861 = vmatmul.mubr.bf16.gmra.mrb[60].mxu0 %v9256_v8  ;;  %1958 = vmatmul.mubr.bf16.gmra.mrb[92].mxu1 %v9256_v8  ;;  %v9331_v8 = vsub.s32 0, %v9328_v44 }
 0x561   :  { %1870 = vmatprep.mubr.bf16.mxu0 %v8710_v17  ;;  %1967 = vmatprep.mubr.bf16.mxu1 %v8710_v17 }
 0x562   :  { %v9346_v19 = vrot.slane %v9336_v16, %v9331_v8 }
 0x568   :  { %1871 = vmatmul.mubr.bf16.gmra.mrb[64].mxu0 %v9270_v40  ;;  %1968 = vmatmul.mubr.bf16.gmra.mrb[96].mxu1 %v9270_v40 }
 0x569   :  { %1876 = vmatprep.mubr.bf16.mxu0 %v8710_v17  ;;  %1973 = vmatprep.mubr.bf16.mxu1 %v8710_v17 }
 0x570   :  { %1877 = vmatmul.mubr.bf16.gmra.mrb[68].mxu0 %v9268_v39  ;;  %1974 = vmatmul.mubr.bf16.gmra.mrb[100].mxu1 %v9268_v39 }
 0x571   :  { %1882 = vmatprep.mubr.bf16.mxu0 %v8710_v17  ;;  %1979 = vmatprep.mubr.bf16.mxu1 %v8710_v17 }
 0x578   :  { %1883 = vmatmul.mubr.bf16.gmra.mrb[72].mxu0 %v1176_v10  ;;  %1980 = vmatmul.mubr.bf16.gmra.mrb[104].mxu1 %v1176_v10 }
 0x579   :  { %1888 = vmatprep.mubr.bf16.mxu0 %v8710_v17  ;;  %1985 = vmatprep.mubr.bf16.mxu1 %v8710_v17  ;;  %v9342_v17 = vsub.s32 3, %v9328_v44 }
 0x580   :  { %1889 = vmatmul.mubr.bf16.gmra.mrb[76].mxu0 %v9280_v9  ;;  %1986 = vmatmul.mubr.bf16.gmra.mrb[108].mxu1 %v9280_v9 }
 0x581   :  { %8624 = shalt.err (!%p8621_p4)  }
 0x582   :  { %s8625_s9 = scalar_lea.vmem %s440_s6, 2048  ;;  %p8630_p6 = scmp.lt.s32.totalorder %s440_s6, %s440_s6 }
 0x583   :  { %p8626_p5 = scmp.ne.s32.totalorder %s440_s6, %s8625_s9  ;;  %p8631_p7 = scmp.lt.s32.totalorder %s8625_s9, %s8625_s9 }
 0x585   :  { %p8632_p8 = por %p8631_p7, %p8630_p6 }
 0x587   :  { %p8633_p9 = pnand %p8632_p8, %p8626_p5 }
 0x589   :  { %8636 = shalt.err (!%p8633_p9)  }
 0x58a   :  { %442 = dma.hbm_to_vmem [thread:$0]  %s9919_s22, 2048, %s440_s6, [#allocation8 + $0x5]  ;;  %v9366_v21 = vrot.slane %v9336_v16, %v9339_v18  ;;  %v9370_v22 = vrot.slane %v9336_v16, %v9342_v17  ;;  %vm2296_vm3 = vcmask 1041409  }
 0x5db   :  { %v1638_v23 = vpop.f32.mrb[16].mxu0  ;;  %v1735_v24 = vpop.f32.mrb[48].mxu1 }
 0x5dc   :  { %v1639_v25 = vadd.f32 %v1638_v23, %v9346_v19  ;;  %v1736_v29 = vadd.f32 %v1735_v24, %v9350_v20  ;;  %v1640_v28 = vpop.f32.mrb[17].mxu0  ;;  %v1737_v32 = vpop.f32.mrb[49].mxu1 }
 0x5dd   :  { %v1641_v26 = vadd.f32 %v1640_v28, %v9366_v21  ;;  %v1738_v30 = vadd.f32 %v1737_v32, %v9370_v22  ;;  %v1642_v31 = vpop.f32.mrb[18].mxu0  ;;  %v1739_v33 = vpop.f32.mrb[50].mxu1 }
 0x5de   :  { %v1643_v34 = vadd.f32 %v1642_v31, %v9346_v19  ;;  %v1740_v35 = vadd.f32 %v1739_v33, %v9350_v20  ;;  %v1644_v36 = vpop.f32.mrb[19].mxu0  ;;  %v1741_v37 = vpop.f32.mrb[51].mxu1  ;;  %v1992_v40 = vmax.f32 %v1639_v25, 0.0  ;;  %v1994_v41 = vmax.f32 %v1736_v29, 0.0 }
 0x5df   :  { %v1645_v38 = vadd.f32 %v1644_v36, %v9366_v21  ;;  %v1742_v39 = vadd.f32 %v1741_v37, %v9370_v22  ;;  %v1993_v46 = vmax.f32 %v1641_v26, 0.0  ;;  %v1995_v47 = vmax.f32 %v1738_v30, 0.0 }
 0x5e0   :  { %v2000_v42 = vmax.f32 %v1643_v34, 0.0  ;;  %v2002_v45 = vmax.f32 %v1740_v35, 0.0 }
 0x5e1   :  { %v2001_v48 = vmax.f32 %v1645_v38, 0.0  ;;  %v2003_v49 = vmax.f32 %v1742_v39, 0.0 }
 0x5e2   :  { %v2056_v50 = vmax.f32 %v1992_v40, %v2000_v42  ;;  %v2070_v51 = vmax.f32 %v1994_v41, %v2002_v45 }
 0x5e3   :  { %v2063_v53 = vmax.f32 %v1993_v46, %v2001_v48  ;;  %v2077_v54 = vmax.f32 %v1995_v47, %v2003_v49  ;;  %v1648_v55 = vpop.f32.mrb[20].mxu0  ;;  %v1745_v56 = vpop.f32.mrb[52].mxu1 }
 0x5e4   :  { %v2057_v57 = vrot.slane %v2056_v50, 4  ;;  %v2071_v58 = vrot.slane %v2070_v51, 4  ;;  %v1649_v59 = vadd.f32 %v1648_v55, %v9346_v19  ;;  %v1746_v60 = vadd.f32 %v1745_v56, %v9350_v20  ;;  %v1650_v61 = vpop.f32.mrb[21].mxu0  ;;  %v1747_v62 = vpop.f32.mrb[53].mxu1 }
 0x5e5   :  { %v2064_v63 = vrot.slane %v2063_v53, 4  ;;  %v2078_v0 = vrot.slane %v2077_v54, 4  ;;  %v1651_v1 = vadd.f32 %v1650_v61, %v9366_v21  ;;  %v1748_v2 = vadd.f32 %v1747_v62, %v9370_v22  ;;  %v1652_v3 = vpop.f32.mrb[22].mxu0  ;;  %v1749_v4 = vpop.f32.mrb[54].mxu1 }
 0x5e6   :  { %v2058_v5 = vmax.f32 %v2056_v50, %v2057_v57  ;;  %v2072_v6 = vmax.f32 %v2070_v51, %v2071_v58  ;;  %v2008_v7 = vmax.f32 %v1649_v59, 0.0  ;;  %v2010_v9 = vmax.f32 %v1746_v60, 0.0  ;;  %v1654_v10 = vpop.f32.mrb[23].mxu0  ;;  %v1751_v27 = vpop.f32.mrb[55].mxu1 }
 0x5e7   :  { %v2065_v11 = vmax.f32 %v2063_v53, %v2064_v63  ;;  %v2079_v12 = vmax.f32 %v2077_v54, %v2078_v0  ;;  %v2009_v13 = vmax.f32 %v1651_v1, 0.0  ;;  %v2011_v14 = vmax.f32 %v1748_v2, 0.0 }
 0x5e8   :  { %v2059_v15 = vrot.slane %v2058_v5, 2  ;;  %v2073_v43 = vrot.slane %v2072_v6, 2  ;;  %v1653_v23 = vadd.f32 %v1652_v3, %v9346_v19  ;;  %v1750_v24 = vadd.f32 %v1749_v4, %v9350_v20 }
 0x5e9   :  { %v2066_v25 = vrot.slane %v2065_v11, 2  ;;  %v2080_v29 = vrot.slane %v2079_v12, 2  ;;  %v1655_v28 = vadd.f32 %v1654_v10, %v9366_v21  ;;  %v1752_v32 = vadd.f32 %v1751_v27, %v9370_v22 }
 0x5ea   :  { %v2060_v26 = vmax.f32 %v2058_v5, %v2059_v15  ;;  %v2074_v30 = vmax.f32 %v2072_v6, %v2073_v43  ;;  %v2016_v31 = vmax.f32 %v1653_v23, 0.0  ;;  %v2018_v33 = vmax.f32 %v1750_v24, 0.0 }
 0x5eb   :  { %v2067_v34 = vmax.f32 %v2065_v11, %v2066_v25  ;;  %v2081_v35 = vmax.f32 %v2079_v12, %v2080_v29  ;;  %v2017_v36 = vmax.f32 %v1655_v28, 0.0  ;;  %v2019_v37 = vmax.f32 %v1752_v32, 0.0  ;;  %v1658_v38 = vpop.f32.mrb[24].mxu0  ;;  %v1755_v39 = vpop.f32.mrb[56].mxu1 }
 0x5ec   :  { %v2061_v40 = vrot.slane %v2060_v26, 1  ;;  %v2075_v41 = vrot.slane %v2074_v30, 1  ;;  %v2112_v42 = vmax.f32 %v2008_v7, %v2016_v31  ;;  %v2126_v45 = vmax.f32 %v2010_v9, %v2018_v33  ;;  %v1660_v46 = vpop.f32.mrb[25].mxu0  ;;  %v1757_v47 = vpop.f32.mrb[57].mxu1 }
 0x5ed   :  { %v2068_v48 = vrot.slane %v2067_v34, 1  ;;  %v2082_v49 = vrot.slane %v2081_v35, 1  ;;  %v2119_v50 = vmax.f32 %v2009_v13, %v2017_v36  ;;  %v2133_v51 = vmax.f32 %v2011_v14, %v2019_v37  ;;  %v1662_v53 = vpop.f32.mrb[26].mxu0  ;;  %v1759_v54 = vpop.f32.mrb[58].mxu1 }
 0x5ee   :  { %v2062_v55 = vmax.f32 %v2060_v26, %v2061_v40  ;;  %v2076_v56 = vmax.f32 %v2074_v30, %v2075_v41  ;;  %v2113_v57 = vrot.slane %v2112_v42, 4  ;;  %v2127_v58 = vrot.slane %v2126_v45, 4  ;;  %v1664_v59 = vpop.f32.mrb[27].mxu0  ;;  %v1761_v60 = vpop.f32.mrb[59].mxu1 }
 0x5ef   :  { %v2069_v61 = vmax.f32 %v2067_v34, %v2068_v48  ;;  %v2083_v62 = vmax.f32 %v2081_v35, %v2082_v49  ;;  %v2120_v63 = vrot.slane %v2119_v50, 4  ;;  %v2134_v0 = vrot.slane %v2133_v51, 4 }
 0x5f0   :  { %v2114_v1 = vmax.f32 %v2112_v42, %v2113_v57  ;;  %v2128_v2 = vmax.f32 %v2126_v45, %v2127_v58  ;;  %v1659_v3 = vadd.f32 %v1658_v38, %v9346_v19  ;;  %v1756_v4 = vadd.f32 %v1755_v39, %v9350_v20 }
 0x5f1   :  { %v2121_v5 = vmax.f32 %v2119_v50, %v2120_v63  ;;  %v2135_v6 = vmax.f32 %v2133_v51, %v2134_v0  ;;  %v1661_v7 = vadd.f32 %v1660_v46, %v9366_v21  ;;  %v1758_v9 = vadd.f32 %v1757_v47, %v9370_v22 }
 0x5f2   :  { %v2115_v10 = vrot.slane %v2114_v1, 2  ;;  %v2129_v27 = vrot.slane %v2128_v2, 2  ;;  %v2024_v11 = vmax.f32 %v1659_v3, 0.0  ;;  %v2026_v12 = vmax.f32 %v1756_v4, 0.0 }
 0x5f3   :  { %v2122_v13 = vrot.slane %v2121_v5, 2  ;;  %v2136_v14 = vrot.slane %v2135_v6, 2  ;;  %v2025_v15 = vmax.f32 %v1661_v7, 0.0  ;;  %v2027_v43 = vmax.f32 %v1758_v9, 0.0  ;;  %v1668_v23 = vpop.f32.mrb[28].mxu0  ;;  %v1765_v24 = vpop.f32.mrb[60].mxu1 }
 0x5f4   :  { %v2116_v25 = vmax.f32 %v2114_v1, %v2115_v10  ;;  %v2130_v29 = vmax.f32 %v2128_v2, %v2129_v27  ;;  %v1663_v28 = vadd.f32 %v1662_v53, %v9346_v19  ;;  %v1760_v32 = vadd.f32 %v1759_v54, %v9350_v20  ;;  %v1670_v26 = vpop.f32.mrb[29].mxu0  ;;  %v1767_v30 = vpop.f32.mrb[61].mxu1 }
 0x5f5   :  { %v2123_v31 = vmax.f32 %v2121_v5, %v2122_v13  ;;  %v2137_v33 = vmax.f32 %v2135_v6, %v2136_v14  ;;  %v1665_v34 = vadd.f32 %v1664_v59, %v9366_v21  ;;  %v1762_v35 = vadd.f32 %v1761_v60, %v9370_v22  ;;  %v1672_v36 = vpop.f32.mrb[30].mxu0  ;;  %v1769_v37 = vpop.f32.mrb[62].mxu1 }
 0x5f6   :  { %v2117_v38 = vrot.slane %v2116_v25, 1  ;;  %v2131_v39 = vrot.slane %v2130_v29, 1  ;;  %v2032_v40 = vmax.f32 %v1663_v28, 0.0  ;;  %v2034_v41 = vmax.f32 %v1760_v32, 0.0  ;;  %v1674_v42 = vpop.f32.mrb[31].mxu0  ;;  %v1771_v45 = vpop.f32.mrb[63].mxu1 }
 0x5f7   :  { %v2124_v46 = vrot.slane %v2123_v31, 1  ;;  %v2138_v47 = vrot.slane %v2137_v33, 1  ;;  %v2033_v48 = vmax.f32 %v1665_v34, 0.0  ;;  %v2035_v49 = vmax.f32 %v1762_v35, 0.0 }
 0x5f8   :  { %v2118_v50 = vmax.f32 %v2116_v25, %v2117_v38  ;;  %v2132_v51 = vmax.f32 %v2130_v29, %v2131_v39  ;;  %v2168_v53 = vmax.f32 %v2024_v11, %v2032_v40  ;;  %v2182_v54 = vmax.f32 %v2026_v12, %v2034_v41 }
 0x5f9   :  { %v2125_v57 = vmax.f32 %v2123_v31, %v2124_v46  ;;  %v2139_v58 = vmax.f32 %v2137_v33, %v2138_v47  ;;  %v2175_v59 = vmax.f32 %v2025_v15, %v2033_v48  ;;  %v2189_v60 = vmax.f32 %v2027_v43, %v2035_v49 }
 0x5fa   :  { %v9397_v63 = vsel %vm2296_vm3, %v2118_v50, %v2062_v55  ;;  %v9400_v0 = vsel %vm2296_vm3, %v2132_v51, %v2076_v56  ;;  %v2169_v5 = vrot.slane %v2168_v53, 4  ;;  %v2183_v6 = vrot.slane %v2182_v54, 4 }
 0x5fb   :  { %v9403_v1 = vsel %vm2296_vm3, %v2125_v57, %v2069_v61  ;;  %v9406_v2 = vsel %vm2296_vm3, %v2139_v58, %v2083_v62  ;;  %v1678_v3 = vpop.f32.mrb[32].mxu0  ;;  %v1775_v4 = vpop.f32.mrb[64].mxu1  ;;  %v2176_v10 = vrot.slane %v2175_v59, 4  ;;  %v2190_v27 = vrot.slane %v2189_v60, 4 }
 0x5fc   :  { %v1679_v7 = vpop.f32.mrb[33].mxu0  ;;  %v1776_v9 = vpop.f32.mrb[65].mxu1  ;;  %v1669_v12 = vadd.f32 %v1668_v23, %v9346_v19  ;;  %v1766_v56 = vadd.f32 %v1765_v24, %v9350_v20  ;;  %v1671_v14 = vadd.f32 %v1670_v26, %v9366_v21  ;;  %v1768_v62 = vadd.f32 %v1767_v30, %v9370_v22 }
 0x5fd   :  { %v1680_v11 = vpop.f32.mrb[34].mxu0  ;;  %v1777_v55 = vpop.f32.mrb[66].mxu1  ;;  %v2170_v15 = vmax.f32 %v2168_v53, %v2169_v5  ;;  %v2184_v43 = vmax.f32 %v2182_v54, %v2183_v6  ;;  %v1673_v25 = vadd.f32 %v1672_v36, %v9346_v19  ;;  %v1770_v29 = vadd.f32 %v1769_v37, %v9350_v20 }
 0x5fe   :  { %v1681_v13 = vpop.f32.mrb[35].mxu0  ;;  %v1778_v61 = vpop.f32.mrb[67].mxu1  ;;  %v2177_v28 = vmax.f32 %v2175_v59, %v2176_v10  ;;  %v2191_v32 = vmax.f32 %v2189_v60, %v2190_v27  ;;  %v1675_v31 = vadd.f32 %v1674_v42, %v9366_v21  ;;  %v1772_v23 = vadd.f32 %v1771_v45, %v9370_v22 }
 0x5ff   :  { %v2040_v33 = vmax.f32 %v1669_v12, 0.0  ;;  %v2042_v24 = vmax.f32 %v1766_v56, 0.0  ;;  %v2048_v34 = vmax.f32 %v1673_v25, 0.0  ;;  %v2050_v35 = vmax.f32 %v1770_v29, 0.0 }
 0x600   :  { %v2041_v38 = vmax.f32 %v1671_v14, 0.0  ;;  %v2043_v26 = vmax.f32 %v1768_v62, 0.0  ;;  %v2049_v39 = vmax.f32 %v1675_v31, 0.0  ;;  %v2051_v30 = vmax.f32 %v1772_v23, 0.0 }
 0x601   :  { %v2171_v46 = vrot.slane %v2170_v15, 2  ;;  %v2185_v19 = vrot.slane %v2184_v43, 2  ;;  %v2224_v36 = vmax.f32 %v2040_v33, %v2048_v34  ;;  %v2238_v20 = vmax.f32 %v2042_v24, %v2050_v35 }
 0x602   :  { %v2178_v48 = vrot.slane %v2177_v28, 2  ;;  %v2192_v21 = vrot.slane %v2191_v32, 2  ;;  %v2231_v42 = vmax.f32 %v2041_v38, %v2049_v39  ;;  %v2245_v22 = vmax.f32 %v2043_v26, %v2051_v30 }
 0x603   :  { %v1684_v40 = vpop.f32.mrb[36].mxu0  ;;  %v1781_v41 = vpop.f32.mrb[68].mxu1  ;;  %v2225_v50 = vrot.slane %v2224_v36, 4  ;;  %v2239_v51 = vrot.slane %v2238_v20, 4  ;;  %v2172_v59 = vmax.f32 %v2170_v15, %v2171_v46  ;;  %v2186_v60 = vmax.f32 %v2184_v43, %v2185_v19 }
 0x604   :  { %v1685_v37 = vpop.f32.mrb[37].mxu0  ;;  %v1782_v47 = vpop.f32.mrb[69].mxu1  ;;  %v2232_v57 = vrot.slane %v2231_v42, 4  ;;  %v2246_v58 = vrot.slane %v2245_v22, 4  ;;  %v2179_v5 = vmax.f32 %v2177_v28, %v2178_v48  ;;  %v2193_v6 = vmax.f32 %v2191_v32, %v2192_v21 }
 0x605   :  { %v1686_v45 = vpop.f32.mrb[38].mxu0  ;;  %v1783_v49 = vpop.f32.mrb[70].mxu1  ;;  %v2226_v3 = vmax.f32 %v2224_v36, %v2225_v50  ;;  %v2240_v4 = vmax.f32 %v2238_v20, %v2239_v51  ;;  %v2173_v13 = vrot.slane %v2172_v59, 1  ;;  %v2187_v61 = vrot.slane %v2186_v60, 1 }
 0x606   :  { %v1687_v53 = vpop.f32.mrb[39].mxu0  ;;  %v1784_v54 = vpop.f32.mrb[71].mxu1  ;;  %v2233_v7 = vmax.f32 %v2231_v42, %v2232_v57  ;;  %v2247_v9 = vmax.f32 %v2245_v22, %v2246_v58  ;;  %v2180_v15 = vrot.slane %v2179_v5, 1  ;;  %v2194_v43 = vrot.slane %v2193_v6, 1 }
 0x607   :  { %v2227_v10 = vrot.slane %v2226_v3, 2  ;;  %v2241_v27 = vrot.slane %v2240_v4, 2  ;;  %v2174_v39 = vmax.f32 %v2172_v59, %v2173_v13  ;;  %v2188_v30 = vmax.f32 %v2186_v60, %v2187_v61 }
 0x608   :  { %v2234_v11 = vrot.slane %v2233_v7, 2  ;;  %v2248_v55 = vrot.slane %v2247_v9, 2  ;;  %v2181_v46 = vmax.f32 %v2179_v5, %v2180_v15  ;;  %v2195_v19 = vmax.f32 %v2193_v6, %v2194_v43 }
 0x609   :  { %v2228_v14 = vmax.f32 %v2226_v3, %v2227_v10  ;;  %v2242_v62 = vmax.f32 %v2240_v4, %v2241_v27  ;;  %v9429_v50 = vsub.s32 4, %v9328_v44  ;;  %v9432_v51 = vsub.s32 6, %v9328_v44 }
 0x60a   :  { %v2235_v31 = vmax.f32 %v2233_v7, %v2234_v11  ;;  %v2249_v23 = vmax.f32 %v2247_v9, %v2248_v55  ;;  %v9435_v57 = vsub.s32 5, %v9328_v44  ;;  %v9438_v58 = vsub.s32 7, %v9328_v44 }
 0x60b   :  { %v1690_v12 = vpop.f32.mrb[40].mxu0  ;;  %v1787_v56 = vpop.f32.mrb[72].mxu1  ;;  %v2229_v33 = vrot.slane %v2228_v14, 1  ;;  %v2243_v24 = vrot.slane %v2242_v62, 1  ;;  %v9442_v3 = vrot.slane %v9336_v16, %v9429_v50  ;;  %v9446_v4 = vrot.slane %v9336_v16, %v9432_v51 }
 0x60c   :  { %v1691_v25 = vpop.f32.mrb[41].mxu0  ;;  %v1788_v29 = vpop.f32.mrb[73].mxu1  ;;  %v2236_v38 = vrot.slane %v2235_v31, 1  ;;  %v2250_v26 = vrot.slane %v2249_v23, 1  ;;  %v9450_v5 = vrot.slane %v9336_v16, %v9435_v57  ;;  %v9454_v6 = vrot.slane %v9336_v16, %v9438_v58 }
 0x60d   :  { %v1692_v28 = vpop.f32.mrb[42].mxu0  ;;  %v1789_v32 = vpop.f32.mrb[74].mxu1  ;;  %v2230_v40 = vmax.f32 %v2228_v14, %v2229_v33  ;;  %v2244_v41 = vmax.f32 %v2242_v62, %v2243_v24 }
 0x60e   :  { %v1693_v34 = vpop.f32.mrb[43].mxu0  ;;  %v1790_v35 = vpop.f32.mrb[75].mxu1  ;;  %v2237_v36 = vmax.f32 %v2235_v31, %v2236_v38  ;;  %v2251_v20 = vmax.f32 %v2249_v23, %v2250_v26 }
 0x60f   :  { %v9417_v37 = vsel %vm2296_vm3, %v2230_v40, %v2174_v39  ;;  %v9420_v47 = vsel %vm2296_vm3, %v2244_v41, %v2188_v30 }
 0x610   :  { %v9423_v48 = vsel %vm2296_vm3, %v2237_v36, %v2181_v46  ;;  %v9426_v21 = vsel %vm2296_vm3, %v2251_v20, %v2195_v19 }
 0x613   :  { %v1696_v42 = vpop.f32.mrb[44].mxu0  ;;  %v1793_v22 = vpop.f32.mrb[76].mxu1 }
 0x614   :  { %v1697_v45 = vpop.f32.mrb[45].mxu0  ;;  %v1794_v49 = vpop.f32.mrb[77].mxu1 }
 0x615   :  { %v1698_v53 = vpop.f32.mrb[46].mxu0  ;;  %v1795_v54 = vpop.f32.mrb[78].mxu1 }
 0x616   :  { %v1699_v59 = vpop.f32.mrb[47].mxu0  ;;  %v1796_v60 = vpop.f32.mrb[79].mxu1 }
 0x61b   :  { %v1832_v44 = vpop.f32.mrb[48].mxu0  ;;  %v1929_v7 = vpop.f32.mrb[80].mxu1 }
 0x61c   :  { %v1833_v9 = vadd.f32 %v1832_v44, %v9442_v3  ;;  %v1930_v10 = vadd.f32 %v1929_v7, %v9446_v4  ;;  %v1834_v27 = vpop.f32.mrb[49].mxu0  ;;  %v1931_v11 = vpop.f32.mrb[81].mxu1 }
 0x61d   :  { %v1835_v55 = vadd.f32 %v1834_v27, %v9450_v5  ;;  %v1932_v12 = vadd.f32 %v1931_v11, %v9454_v6  ;;  %v1836_v56 = vpop.f32.mrb[50].mxu0  ;;  %v1933_v13 = vpop.f32.mrb[82].mxu1 }
 0x61e   :  { %v1837_v61 = vadd.f32 %v1836_v56, %v9442_v3  ;;  %v1934_v14 = vadd.f32 %v1933_v13, %v9446_v4  ;;  %v1838_v16 = vpop.f32.mrb[51].mxu0  ;;  %v1935_v62 = vpop.f32.mrb[83].mxu1  ;;  %v1996_v15 = vmax.f32 %v1833_v9, 0.0  ;;  %v1998_v43 = vmax.f32 %v1930_v10, 0.0 }
 0x61f   :  { %v1839_v25 = vadd.f32 %v1838_v16, %v9450_v5  ;;  %v1936_v29 = vadd.f32 %v1935_v62, %v9454_v6  ;;  %v1997_v28 = vmax.f32 %v1835_v55, 0.0  ;;  %v1999_v32 = vmax.f32 %v1932_v12, 0.0 }
 0x620   :  { %v2004_v31 = vmax.f32 %v1837_v61, 0.0  ;;  %v2006_v23 = vmax.f32 %v1934_v14, 0.0 }
 0x621   :  { %v2005_v33 = vmax.f32 %v1839_v25, 0.0  ;;  %v2007_v24 = vmax.f32 %v1936_v29, 0.0 }
 0x622   :  { %v2084_v34 = vmax.f32 %v1996_v15, %v2004_v31  ;;  %v2098_v35 = vmax.f32 %v1998_v43, %v2006_v23 }
 0x623   :  { %v2091_v38 = vmax.f32 %v1997_v28, %v2005_v33  ;;  %v2105_v26 = vmax.f32 %v1999_v32, %v2007_v24  ;;  %v1842_v39 = vpop.f32.mrb[52].mxu0  ;;  %v1939_v30 = vpop.f32.mrb[84].mxu1 }
 0x624   :  { %v2085_v40 = vrot.slane %v2084_v34, 4  ;;  %v2099_v41 = vrot.slane %v2098_v35, 4  ;;  %v1843_v46 = vadd.f32 %v1842_v39, %v9442_v3  ;;  %v1940_v19 = vadd.f32 %v1939_v30, %v9446_v4  ;;  %v1844_v36 = vpop.f32.mrb[53].mxu0  ;;  %v1941_v20 = vpop.f32.mrb[85].mxu1 }
 0x625   :  { %v2092_v42 = vrot.slane %v2091_v38, 4  ;;  %v2106_v22 = vrot.slane %v2105_v26, 4  ;;  %v1845_v45 = vadd.f32 %v1844_v36, %v9450_v5  ;;  %v1942_v49 = vadd.f32 %v1941_v20, %v9454_v6  ;;  %v1846_v53 = vpop.f32.mrb[54].mxu0  ;;  %v1943_v54 = vpop.f32.mrb[86].mxu1 }
 0x626   :  { %v2086_v59 = vmax.f32 %v2084_v34, %v2085_v40  ;;  %v2100_v60 = vmax.f32 %v2098_v35, %v2099_v41  ;;  %v2012_v44 = vmax.f32 %v1843_v46, 0.0  ;;  %v2014_v7 = vmax.f32 %v1940_v19, 0.0  ;;  %v1848_v9 = vpop.f32.mrb[55].mxu0  ;;  %v1945_v10 = vpop.f32.mrb[87].mxu1 }
 0x627   :  { %v2093_v27 = vmax.f32 %v2091_v38, %v2092_v42  ;;  %v2107_v11 = vmax.f32 %v2105_v26, %v2106_v22  ;;  %v2013_v55 = vmax.f32 %v1845_v45, 0.0  ;;  %v2015_v12 = vmax.f32 %v1942_v49, 0.0 }
 0x628   :  { %v2087_v56 = vrot.slane %v2086_v59, 2  ;;  %v2101_v13 = vrot.slane %v2100_v60, 2  ;;  %v1847_v61 = vadd.f32 %v1846_v53, %v9442_v3  ;;  %v1944_v14 = vadd.f32 %v1943_v54, %v9446_v4 }
 0x629   :  { %v2094_v16 = vrot.slane %v2093_v27, 2  ;;  %v2108_v62 = vrot.slane %v2107_v11, 2  ;;  %v1849_v25 = vadd.f32 %v1848_v9, %v9450_v5  ;;  %v1946_v29 = vadd.f32 %v1945_v10, %v9454_v6 }
 0x62a   :  { %v2088_v15 = vmax.f32 %v2086_v59, %v2087_v56  ;;  %v2102_v43 = vmax.f32 %v2100_v60, %v2101_v13  ;;  %v2020_v31 = vmax.f32 %v1847_v61, 0.0  ;;  %v2022_v23 = vmax.f32 %v1944_v14, 0.0 }
 0x62b   :  { %v2095_v28 = vmax.f32 %v2093_v27, %v2094_v16  ;;  %v2109_v32 = vmax.f32 %v2107_v11, %v2108_v62  ;;  %v2021_v33 = vmax.f32 %v1849_v25, 0.0  ;;  %v2023_v24 = vmax.f32 %v1946_v29, 0.0  ;;  %v1852_v34 = vpop.f32.mrb[56].mxu0  ;;  %v1949_v35 = vpop.f32.mrb[88].mxu1 }
 0x62c   :  { %v2089_v38 = vrot.slane %v2088_v15, 1  ;;  %v2103_v26 = vrot.slane %v2102_v43, 1  ;;  %v2140_v39 = vmax.f32 %v2012_v44, %v2020_v31  ;;  %v2154_v30 = vmax.f32 %v2014_v7, %v2022_v23  ;;  %v1854_v40 = vpop.f32.mrb[57].mxu0  ;;  %v1951_v41 = vpop.f32.mrb[89].mxu1 }
 0x62d   :  { %v2096_v46 = vrot.slane %v2095_v28, 1  ;;  %v2110_v19 = vrot.slane %v2109_v32, 1  ;;  %v2147_v36 = vmax.f32 %v2013_v55, %v2021_v33  ;;  %v2161_v20 = vmax.f32 %v2015_v12, %v2023_v24  ;;  %v1856_v42 = vpop.f32.mrb[58].mxu0  ;;  %v1953_v22 = vpop.f32.mrb[90].mxu1 }
 0x62e   :  { %v2090_v45 = vmax.f32 %v2088_v15, %v2089_v38  ;;  %v2104_v49 = vmax.f32 %v2102_v43, %v2103_v26  ;;  %v2141_v53 = vrot.slane %v2140_v39, 4  ;;  %v2155_v54 = vrot.slane %v2154_v30, 4  ;;  %v1858_v59 = vpop.f32.mrb[59].mxu0  ;;  %v1955_v60 = vpop.f32.mrb[91].mxu1 }
 0x62f   :  { %v2097_v9 = vmax.f32 %v2095_v28, %v2096_v46  ;;  %v2111_v10 = vmax.f32 %v2109_v32, %v2110_v19  ;;  %v2148_v27 = vrot.slane %v2147_v36, 4  ;;  %v2162_v11 = vrot.slane %v2161_v20, 4 }
 0x630   :  { %v2142_v44 = vmax.f32 %v2140_v39, %v2141_v53  ;;  %v2156_v7 = vmax.f32 %v2154_v30, %v2155_v54  ;;  %v1853_v56 = vadd.f32 %v1852_v34, %v9442_v3  ;;  %v1950_v13 = vadd.f32 %v1949_v35, %v9446_v4 }
 0x631   :  { %v2149_v55 = vmax.f32 %v2147_v36, %v2148_v27  ;;  %v2163_v12 = vmax.f32 %v2161_v20, %v2162_v11  ;;  %v1855_v61 = vadd.f32 %v1854_v40, %v9450_v5  ;;  %v1952_v14 = vadd.f32 %v1951_v41, %v9454_v6 }
 0x632   :  { %v2143_v16 = vrot.slane %v2142_v44, 2  ;;  %v2157_v62 = vrot.slane %v2156_v7, 2  ;;  %v2028_v25 = vmax.f32 %v1853_v56, 0.0  ;;  %v2030_v29 = vmax.f32 %v1950_v13, 0.0 }
 0x633   :  { %v2150_v15 = vrot.slane %v2149_v55, 2  ;;  %v2164_v43 = vrot.slane %v2163_v12, 2  ;;  %v2029_v31 = vmax.f32 %v1855_v61, 0.0  ;;  %v2031_v23 = vmax.f32 %v1952_v14, 0.0  ;;  %v1862_v28 = vpop.f32.mrb[60].mxu0  ;;  %v1959_v32 = vpop.f32.mrb[92].mxu1 }
 0x634   :  { %v2144_v33 = vmax.f32 %v2142_v44, %v2143_v16  ;;  %v2158_v24 = vmax.f32 %v2156_v7, %v2157_v62  ;;  %v1857_v34 = vadd.f32 %v1856_v42, %v9442_v3  ;;  %v1954_v35 = vadd.f32 %v1953_v22, %v9446_v4  ;;  %v1864_v38 = vpop.f32.mrb[61].mxu0  ;;  %v1961_v26 = vpop.f32.mrb[93].mxu1 }
 0x635   :  { %v2151_v39 = vmax.f32 %v2149_v55, %v2150_v15  ;;  %v2165_v30 = vmax.f32 %v2163_v12, %v2164_v43  ;;  %v1859_v40 = vadd.f32 %v1858_v59, %v9450_v5  ;;  %v1956_v41 = vadd.f32 %v1955_v60, %v9454_v6  ;;  %v1866_v46 = vpop.f32.mrb[62].mxu0  ;;  %v1963_v19 = vpop.f32.mrb[94].mxu1 }
 0x636   :  { %v2145_v36 = vrot.slane %v2144_v33, 1  ;;  %v2159_v20 = vrot.slane %v2158_v24, 1  ;;  %v2036_v53 = vmax.f32 %v1857_v34, 0.0  ;;  %v2038_v54 = vmax.f32 %v1954_v35, 0.0  ;;  %v1868_v27 = vpop.f32.mrb[63].mxu0  ;;  %v1965_v11 = vpop.f32.mrb[95].mxu1 }
 0x637   :  { %v2152_v44 = vrot.slane %v2151_v39, 1  ;;  %v2166_v42 = vrot.slane %v2165_v30, 1  ;;  %v2037_v7 = vmax.f32 %v1859_v40, 0.0  ;;  %v2039_v22 = vmax.f32 %v1956_v41, 0.0 }
 0x638   :  { %v2146_v56 = vmax.f32 %v2144_v33, %v2145_v36  ;;  %v2160_v13 = vmax.f32 %v2158_v24, %v2159_v20  ;;  %v2196_v55 = vmax.f32 %v2028_v25, %v2036_v53  ;;  %v2210_v12 = vmax.f32 %v2030_v29, %v2038_v54 }
 0x639   :  { %v2153_v61 = vmax.f32 %v2151_v39, %v2152_v44  ;;  %v2167_v59 = vmax.f32 %v2165_v30, %v2166_v42  ;;  %v2203_v14 = vmax.f32 %v2029_v31, %v2037_v7  ;;  %v2217_v60 = vmax.f32 %v2031_v23, %v2039_v22 }
 0x63a   :  { %v9481_v16 = vsel %vm2296_vm3, %v2146_v56, %v2090_v45  ;;  %v9484_v62 = vsel %vm2296_vm3, %v2160_v13, %v2104_v49  ;;  %v2197_v25 = vrot.slane %v2196_v55, 4  ;;  %v2211_v29 = vrot.slane %v2210_v12, 4 }
 0x63b   :  { %v9487_v15 = vsel %vm2296_vm3, %v2153_v61, %v2097_v9  ;;  %v9490_v43 = vsel %vm2296_vm3, %v2167_v59, %v2111_v10  ;;  %v1872_v33 = vpop.f32.mrb[64].mxu0  ;;  %v1969_v24 = vpop.f32.mrb[96].mxu1  ;;  %v2204_v31 = vrot.slane %v2203_v14, 4  ;;  %v2218_v23 = vrot.slane %v2217_v60, 4 }
 0x63c   :  { %v1873_v34 = vpop.f32.mrb[65].mxu0  ;;  %v1970_v35 = vpop.f32.mrb[97].mxu1  ;;  %v1863_v30 = vadd.f32 %v1862_v28, %v9442_v3  ;;  %v1960_v49 = vadd.f32 %v1959_v32, %v9446_v4  ;;  %v1865_v41 = vadd.f32 %v1864_v38, %v9450_v5  ;;  %v1962_v10 = vadd.f32 %v1961_v26, %v9454_v6 }
 0x63d   :  { %v1874_v39 = vpop.f32.mrb[66].mxu0  ;;  %v1971_v45 = vpop.f32.mrb[98].mxu1  ;;  %v2198_v36 = vmax.f32 %v2196_v55, %v2197_v25  ;;  %v2212_v20 = vmax.f32 %v2210_v12, %v2211_v29  ;;  %v1867_v53 = vadd.f32 %v1866_v46, %v9442_v3  ;;  %v1964_v54 = vadd.f32 %v1963_v19, %v9446_v4 }
 0x63e   :  { %v1875_v40 = vpop.f32.mrb[67].mxu0  ;;  %v1972_v9 = vpop.f32.mrb[99].mxu1  ;;  %v2205_v44 = vmax.f32 %v2203_v14, %v2204_v31  ;;  %v2219_v42 = vmax.f32 %v2217_v60, %v2218_v23  ;;  %v1869_v7 = vadd.f32 %v1868_v27, %v9450_v5  ;;  %v1966_v28 = vadd.f32 %v1965_v11, %v9454_v6 }
 0x63f   :  { %v2044_v22 = vmax.f32 %v1863_v30, 0.0  ;;  %v2046_v32 = vmax.f32 %v1960_v49, 0.0  ;;  %v2052_v56 = vmax.f32 %v1867_v53, 0.0  ;;  %v2054_v13 = vmax.f32 %v1964_v54, 0.0 }
 0x640   :  { %v2045_v61 = vmax.f32 %v1865_v41, 0.0  ;;  %v2047_v38 = vmax.f32 %v1962_v10, 0.0  ;;  %v2053_v59 = vmax.f32 %v1869_v7, 0.0  ;;  %v2055_v26 = vmax.f32 %v1966_v28, 0.0 }
 0x641   :  { %v2199_v33 = vrot.slane %v2198_v36, 2  ;;  %v2213_v3 = vrot.slane %v2212_v20, 2  ;;  %v2252_v46 = vmax.f32 %v2044_v22, %v2052_v56  ;;  %v2266_v4 = vmax.f32 %v2046_v32, %v2054_v13 }
 0x642   :  { %v2206_v60 = vrot.slane %v2205_v44, 2  ;;  %v2220_v5 = vrot.slane %v2219_v42, 2  ;;  %v2259_v27 = vmax.f32 %v2045_v61, %v2053_v59  ;;  %v2273_v6 = vmax.f32 %v2047_v38, %v2055_v26 }
 0x643   :  { %v1878_v55 = vpop.f32.mrb[68].mxu0  ;;  %v1975_v12 = vpop.f32.mrb[100].mxu1  ;;  %v2253_v25 = vrot.slane %v2252_v46, 4  ;;  %v2267_v29 = vrot.slane %v2266_v4, 4  ;;  %v2200_v39 = vmax.f32 %v2198_v36, %v2199_v33  ;;  %v2214_v45 = vmax.f32 %v2212_v20, %v2213_v3 }
 0x644   :  { %v1879_v19 = vpop.f32.mrb[69].mxu0  ;;  %v1976_v14 = vpop.f32.mrb[101].mxu1  ;;  %v2260_v31 = vrot.slane %v2259_v27, 4  ;;  %v2274_v23 = vrot.slane %v2273_v6, 4  ;;  %v2207_v40 = vmax.f32 %v2205_v44, %v2206_v60  ;;  %v2221_v9 = vmax.f32 %v2219_v42, %v2220_v5 }
 0x645   :  { %v1880_v11 = vpop.f32.mrb[70].mxu0  ;;  %v1977_v24 = vpop.f32.mrb[102].mxu1  ;;  %v2254_v30 = vmax.f32 %v2252_v46, %v2253_v25  ;;  %v2268_v49 = vmax.f32 %v2266_v4, %v2267_v29  ;;  %v2201_v56 = vrot.slane %v2200_v39, 1  ;;  %v2215_v13 = vrot.slane %v2214_v45, 1 }
 0x646   :  { %v1881_v34 = vpop.f32.mrb[71].mxu0  ;;  %v1978_v35 = vpop.f32.mrb[103].mxu1  ;;  %v2261_v41 = vmax.f32 %v2259_v27, %v2260_v31  ;;  %v2275_v10 = vmax.f32 %v2273_v6, %v2274_v23  ;;  %v2208_v36 = vrot.slane %v2207_v40, 1  ;;  %v2222_v20 = vrot.slane %v2221_v9, 1 }
 0x647   :  { %v2255_v53 = vrot.slane %v2254_v30, 2  ;;  %v2269_v54 = vrot.slane %v2268_v49, 2  ;;  %v2202_v60 = vmax.f32 %v2200_v39, %v2201_v56  ;;  %v2216_v5 = vmax.f32 %v2214_v45, %v2215_v13 }
 0x648   :  { %v2262_v7 = vrot.slane %v2261_v41, 2  ;;  %v2276_v28 = vrot.slane %v2275_v10, 2  ;;  %v2209_v11 = vmax.f32 %v2207_v40, %v2208_v36  ;;  %v2223_v24 = vmax.f32 %v2221_v9, %v2222_v20 }
 0x649   :  { %v2256_v61 = vmax.f32 %v2254_v30, %v2255_v53  ;;  %v2270_v38 = vmax.f32 %v2268_v49, %v2269_v54 }
 0x64a   :  { %v2263_v55 = vmax.f32 %v2261_v41, %v2262_v7  ;;  %v2277_v12 = vmax.f32 %v2275_v10, %v2276_v28 }
 0x64b   :  { %v1884_v22 = vpop.f32.mrb[72].mxu0  ;;  %v1981_v32 = vpop.f32.mrb[104].mxu1  ;;  %v2257_v33 = vrot.slane %v2256_v61, 1  ;;  %v2271_v3 = vrot.slane %v2270_v38, 1 }
 0x64c   :  { %v1885_v59 = vpop.f32.mrb[73].mxu0  ;;  %v1982_v26 = vpop.f32.mrb[105].mxu1  ;;  %v2264_v19 = vrot.slane %v2263_v55, 1  ;;  %v2278_v14 = vrot.slane %v2277_v12, 1 }
 0x64d   :  { %v1886_v44 = vpop.f32.mrb[74].mxu0  ;;  %v1983_v42 = vpop.f32.mrb[106].mxu1  ;;  %v2258_v27 = vmax.f32 %v2256_v61, %v2257_v33  ;;  %v2272_v6 = vmax.f32 %v2270_v38, %v2271_v3 }
 0x64e   :  { %v1887_v46 = vpop.f32.mrb[75].mxu0  ;;  %v1984_v4 = vpop.f32.mrb[107].mxu1  ;;  %v2265_v25 = vmax.f32 %v2263_v55, %v2264_v19  ;;  %v2279_v29 = vmax.f32 %v2277_v12, %v2278_v14 }
 0x64f   :  { %v9501_v34 = vsel %vm2296_vm3, %v2258_v27, %v2202_v60  ;;  %v9504_v35 = vsel %vm2296_vm3, %v2272_v6, %v2216_v5 }
 0x650   :  { %v9507_v31 = vsel %vm2296_vm3, %v2265_v25, %v2209_v11  ;;  %v9510_v23 = vsel %vm2296_vm3, %v2279_v29, %v2223_v24 }
 0x653   :  { %v1890_v39 = vpop.f32.mrb[76].mxu0  ;;  %v1987_v45 = vpop.f32.mrb[108].mxu1 }
 0x654   :  { %v1891_v30 = vpop.f32.mrb[77].mxu0  ;;  %v1988_v49 = vpop.f32.mrb[109].mxu1 }
 0x655   :  { %v1892_v40 = vpop.f32.mrb[78].mxu0  ;;  %v1989_v9 = vpop.f32.mrb[110].mxu1 }
 0x656   :  { %v1893_v41 = vpop.f32.mrb[79].mxu0  ;;  %v1990_v10 = vpop.f32.mrb[111].mxu1 }
 0x657   :  { %8655 = dma.done.wait [#allocation8], 131072 }
 0x658   :  { %8656 = vsyncadd [#allocation8], 4294836224  ;;  %v9514_v53 = vpack.c.bf16 %v9403_v1, %v9403_v1  ;;  %v2366_v54 = vld [vmem:[#allocation2 + $0x8] sm:$0xff]  ;;  %v2368_v7 = vld [vmem:[#allocation2 + $0x18] sm:$0xff] }
 0x659   :  { %v2365_v28 = vld [vmem:[#allocation2] sm:$0xff]  ;;  %3431 = vmatprep.subr.bf16.mxu0 %v2366_v54  ;;  %3759 = vmatprep.subr.bf16.mxu1 %v2368_v7  ;;  %v2367_v22 = vld [vmem:[#allocation2 + $0x10] sm:$0xff]  ;;  %v2374_v32 = vld [vmem:[#allocation2 + $0x48] sm:$0xff] }
 0x65a   :  { %3463 = vmatprep.mubr.bf16.mxu0 %v9514_v53  ;;  %3791 = vmatprep.mubr.bf16.mxu1 %v9514_v53  ;;  %v2376_v56 = vld [vmem:[#allocation2 + $0x58] sm:$0xff]  ;;  %v2373_v13 = vld [vmem:[#allocation2 + $0x40] sm:$0xff]  ;;  %v2375_v61 = vld [vmem:[#allocation2 + $0x50] sm:$0xff] }
 0x65b   :  { %3432 = vmatpush1.bf16.msra.mxu0 %v2365_v28  ;;  %3760 = vmatpush1.bf16.msra.mxu1 %v2367_v22  ;;  %v2382_v1 = vld [vmem:[#allocation2 + $0x88] sm:$0xff]  ;;  %v2384_v38 = vld [vmem:[#allocation2 + $0x98] sm:$0xff]  ;;  %v2381_v59 = vld [vmem:[#allocation2 + $0x80] sm:$0xff] }
 0x65c   :  { %3433 = vmatprep.subr.bf16.mxu0 %v2374_v32  ;;  %3761 = vmatprep.subr.bf16.mxu1 %v2376_v56  ;;  %v2383_v26 = vld [vmem:[#allocation2 + $0x90] sm:$0xff]  ;;  %v2390_v36 = vld [vmem:[#allocation2 + $0xc8] sm:$0xff]  ;;  %v2392_v20 = vld [vmem:[#allocation2 + $0xd8] sm:$0xff] }
 0x65d   :  { %v2389_v55 = vld [vmem:[#allocation2 + $0xc0] sm:$0xff]  ;;  %v2391_v12 = vld [vmem:[#allocation2 + $0xd0] sm:$0xff]  ;;  %v2398_v44 = vld [vmem:[#allocation2 + $0x108] sm:$0xff] }
 0x65e   :  { %v2400_v42 = vld [vmem:[#allocation2 + $0x118] sm:$0xff]  ;;  %v2397_v33 = vld [vmem:[#allocation2 + $0x100] sm:$0xff]  ;;  %v2399_v3 = vld [vmem:[#allocation2 + $0x110] sm:$0xff] }
 0x65f   :  { %3434 = vmatpush1.bf16.msra.mxu0 %v2373_v13  ;;  %3762 = vmatpush1.bf16.msra.mxu1 %v2375_v61  ;;  %v2406_v46 = vld [vmem:[#allocation2 + $0x148] sm:$0xff]  ;;  %v2408_v4 = vld [vmem:[#allocation2 + $0x158] sm:$0xff]  ;;  %v2405_v19 = vld [vmem:[#allocation2 + $0x140] sm:$0xff] }
 0x660   :  { %3435 = vmatprep.subr.bf16.mxu0 %v2382_v1  ;;  %3763 = vmatprep.subr.bf16.mxu1 %v2384_v38  ;;  %v2407_v14 = vld [vmem:[#allocation2 + $0x150] sm:$0xff]  ;;  %v2414_v60 = vld [vmem:[#allocation2 + $0x188] sm:$0xff]  ;;  %v2416_v5 = vld [vmem:[#allocation2 + $0x198] sm:$0xff] }
 0x661   :  { %v2413_v27 = vld [vmem:[#allocation2 + $0x180] sm:$0xff]  ;;  %v2415_v6 = vld [vmem:[#allocation2 + $0x190] sm:$0xff]  ;;  %v2422_v11 = vld [vmem:[#allocation2 + $0x1c8] sm:$0xff] }
 0x662   :  { %v2424_v24 = vld [vmem:[#allocation2 + $0x1d8] sm:$0xff]  ;;  %v2421_v25 = vld [vmem:[#allocation2 + $0x1c0] sm:$0xff]  ;;  %v2423_v29 = vld [vmem:[#allocation2 + $0x1d0] sm:$0xff] }
 0x663   :  { %3436 = vmatpush1.bf16.msra.mxu0 %v2381_v59  ;;  %3764 = vmatpush1.bf16.msra.mxu1 %v2383_v26  ;;  %v2430_v39 = vld [vmem:[#allocation2 + $0x208] sm:$0xff]  ;;  %v2432_v45 = vld [vmem:[#allocation2 + $0x218] sm:$0xff]  ;;  %v2429_v30 = vld [vmem:[#allocation2 + $0x200] sm:$0xff] }
 0x664   :  { %3437 = vmatprep.subr.bf16.mxu0 %v2390_v36  ;;  %3765 = vmatprep.subr.bf16.mxu1 %v2392_v20  ;;  %v2431_v49 = vld [vmem:[#allocation2 + $0x210] sm:$0xff]  ;;  %v2438_v40 = vld [vmem:[#allocation2 + $0x248] sm:$0xff]  ;;  %v2440_v9 = vld [vmem:[#allocation2 + $0x258] sm:$0xff] }
 0x665   :  { %v2437_v41 = vld [vmem:[#allocation2 + $0x240] sm:$0xff]  ;;  %v2439_v10 = vld [vmem:[#allocation2 + $0x250] sm:$0xff]  ;;  %v2446_v54 = vld [vmem:[#allocation2 + $0x288] sm:$0xff] }
 0x666   :  { %v2448_v7 = vld [vmem:[#allocation2 + $0x298] sm:$0xff]  ;;  %v2445_v28 = vld [vmem:[#allocation2 + $0x280] sm:$0xff]  ;;  %v2447_v22 = vld [vmem:[#allocation2 + $0x290] sm:$0xff] }
 0x667   :  { %3438 = vmatpush1.bf16.msra.mxu0 %v2389_v55  ;;  %3766 = vmatpush1.bf16.msra.mxu1 %v2391_v12  ;;  %v2454_v32 = vld [vmem:[#allocation2 + $0x2c8] sm:$0xff]  ;;  %v2456_v56 = vld [vmem:[#allocation2 + $0x2d8] sm:$0xff]  ;;  %v2453_v13 = vld [vmem:[#allocation2 + $0x2c0] sm:$0xff] }
 0x668   :  { %3439 = vmatprep.subr.bf16.mxu0 %v2398_v44  ;;  %3767 = vmatprep.subr.bf16.mxu1 %v2400_v42  ;;  %v2455_v61 = vld [vmem:[#allocation2 + $0x2d0] sm:$0xff]  ;;  %v2462_v1 = vld [vmem:[#allocation2 + $0x308] sm:$0xff]  ;;  %v2464_v38 = vld [vmem:[#allocation2 + $0x318] sm:$0xff] }
 0x669   :  { %v2461_v59 = vld [vmem:[#allocation2 + $0x300] sm:$0xff]  ;;  %v2463_v26 = vld [vmem:[#allocation2 + $0x310] sm:$0xff]  ;;  %v2470_v36 = vld [vmem:[#allocation2 + $0x348] sm:$0xff] }
 0x66a   :  { %v2472_v20 = vld [vmem:[#allocation2 + $0x358] sm:$0xff]  ;;  %v2469_v55 = vld [vmem:[#allocation2 + $0x340] sm:$0xff]  ;;  %v2471_v12 = vld [vmem:[#allocation2 + $0x350] sm:$0xff] }
 0x66b   :  { %3440 = vmatpush1.bf16.msra.mxu0 %v2397_v33  ;;  %3768 = vmatpush1.bf16.msra.mxu1 %v2399_v3  ;;  %v2478_v44 = vld [vmem:[#allocation2 + $0x388] sm:$0xff]  ;;  %v2480_v42 = vld [vmem:[#allocation2 + $0x398] sm:$0xff]  ;;  %v2477_v33 = vld [vmem:[#allocation2 + $0x380] sm:$0xff] }
 0x66c   :  { %3441 = vmatprep.subr.bf16.mxu0 %v2406_v46  ;;  %3769 = vmatprep.subr.bf16.mxu1 %v2408_v4  ;;  %v2479_v3 = vld [vmem:[#allocation2 + $0x390] sm:$0xff]  ;;  %v2486_v46 = vld [vmem:[#allocation2 + $0x3c8] sm:$0xff]  ;;  %v2488_v4 = vld [vmem:[#allocation2 + $0x3d8] sm:$0xff] }
 0x66f   :  { %3442 = vmatpush1.bf16.msra.mxu0 %v2405_v19  ;;  %3770 = vmatpush1.bf16.msra.mxu1 %v2407_v14  ;;  %v2485_v19 = vld [vmem:[#allocation2 + $0x3c0] sm:$0xff]  ;;  %v2487_v14 = vld [vmem:[#allocation2 + $0x3d0] sm:$0xff] }
 0x670   :  { %3443 = vmatprep.subr.bf16.mxu0 %v2414_v60  ;;  %3771 = vmatprep.subr.bf16.mxu1 %v2416_v5  ;;  %v2494_v60 = vld [vmem:[#allocation2 + $0x408] sm:$0xff]  ;;  %v2496_v5 = vld [vmem:[#allocation2 + $0x418] sm:$0xff] }
 0x673   :  { %3444 = vmatpush1.bf16.msra.mxu0 %v2413_v27  ;;  %3772 = vmatpush1.bf16.msra.mxu1 %v2415_v6  ;;  %v9520_v27 = vpack.c.bf16 %v9397_v63, %v9397_v63  ;;  %v2493_v6 = vld [vmem:[#allocation2 + $0x400] sm:$0xff] }
 0x674   :  { %3445 = vmatprep.subr.bf16.mxu0 %v2422_v11  ;;  %3773 = vmatprep.subr.bf16.mxu1 %v2424_v24  ;;  %v2495_v11 = vld [vmem:[#allocation2 + $0x410] sm:$0xff]  ;;  %v2502_v24 = vld [vmem:[#allocation2 + $0x448] sm:$0xff]  ;;  %v2501_v63 = vld [vmem:[#allocation2 + $0x440] sm:$0xff] }
 0x677   :  { %3446 = vmatpush1.bf16.msra.mxu0 %v2421_v25  ;;  %3774 = vmatpush1.bf16.msra.mxu1 %v2423_v29  ;;  %v2504_v25 = vld [vmem:[#allocation2 + $0x458] sm:$0xff]  ;;  %v9524_v29 = vpack.c.bf16 %v9406_v2, %v9406_v2  ;;  %v2509_v2 = vld [vmem:[#allocation2 + $0x480] sm:$0xff] }
 0x678   :  { %3447 = vmatprep.subr.bf16.mxu0 %v2430_v39  ;;  %3775 = vmatprep.subr.bf16.mxu1 %v2432_v45  ;;  %v2503_v39 = vld [vmem:[#allocation2 + $0x450] sm:$0xff]  ;;  %v2510_v45 = vld [vmem:[#allocation2 + $0x488] sm:$0xff] }
 0x67b   :  { %3448 = vmatpush1.bf16.msra.mxu0 %v2429_v30  ;;  %3776 = vmatpush1.bf16.msra.mxu1 %v2431_v49  ;;  %v2512_v30 = vld [vmem:[#allocation2 + $0x498] sm:$0xff]  ;;  %v2511_v49 = vld [vmem:[#allocation2 + $0x490] sm:$0xff] }
 0x67c   :  { %3449 = vmatprep.subr.bf16.mxu0 %v2438_v40  ;;  %3777 = vmatprep.subr.bf16.mxu1 %v2440_v9  ;;  %v2518_v40 = vld [vmem:[#allocation2 + $0x4c8] sm:$0xff]  ;;  %v2520_v9 = vld [vmem:[#allocation2 + $0x4d8] sm:$0xff] }
 0x67f   :  { %3450 = vmatpush1.bf16.msra.mxu0 %v2437_v41  ;;  %3778 = vmatpush1.bf16.msra.mxu1 %v2439_v10  ;;  %v2517_v41 = vld [vmem:[#allocation2 + $0x4c0] sm:$0xff]  ;;  %v2519_v10 = vld [vmem:[#allocation2 + $0x4d0] sm:$0xff] }
 0x680   :  { %3451 = vmatprep.subr.bf16.mxu0 %v2446_v54  ;;  %3779 = vmatprep.subr.bf16.mxu1 %v2448_v7  ;;  %v2526_v54 = vld [vmem:[#allocation2 + $0x508] sm:$0xff]  ;;  %v2528_v7 = vld [vmem:[#allocation2 + $0x518] sm:$0xff] }
 0x683   :  { %3452 = vmatpush1.bf16.msra.mxu0 %v2445_v28  ;;  %3780 = vmatpush1.bf16.msra.mxu1 %v2447_v22  ;;  %v2525_v28 = vld [vmem:[#allocation2 + $0x500] sm:$0xff]  ;;  %v2527_v22 = vld [vmem:[#allocation2 + $0x510] sm:$0xff] }
 0x684   :  { %3453 = vmatprep.subr.bf16.mxu0 %v2454_v32  ;;  %3781 = vmatprep.subr.bf16.mxu1 %v2456_v56  ;;  %v2534_v32 = vld [vmem:[#allocation2 + $0x548] sm:$0xff]  ;;  %v2536_v56 = vld [vmem:[#allocation2 + $0x558] sm:$0xff] }
 0x687   :  { %3454 = vmatpush1.bf16.msra.mxu0 %v2453_v13  ;;  %3782 = vmatpush1.bf16.msra.mxu1 %v2455_v61  ;;  %v2533_v13 = vld [vmem:[#allocation2 + $0x540] sm:$0xff]  ;;  %v2535_v61 = vld [vmem:[#allocation2 + $0x550] sm:$0xff] }
 0x688   :  { %3455 = vmatprep.subr.bf16.mxu0 %v2462_v1  ;;  %3783 = vmatprep.subr.bf16.mxu1 %v2464_v38  ;;  %v2542_v1 = vld [vmem:[#allocation2 + $0x588] sm:$0xff]  ;;  %v2544_v38 = vld [vmem:[#allocation2 + $0x598] sm:$0xff] }
 0x68b   :  { %3456 = vmatpush1.bf16.msra.mxu0 %v2461_v59  ;;  %3784 = vmatpush1.bf16.msra.mxu1 %v2463_v26  ;;  %v2541_v59 = vld [vmem:[#allocation2 + $0x580] sm:$0xff]  ;;  %v2543_v26 = vld [vmem:[#allocation2 + $0x590] sm:$0xff] }
 0x68c   :  { %3457 = vmatprep.subr.bf16.mxu0 %v2470_v36  ;;  %3785 = vmatprep.subr.bf16.mxu1 %v2472_v20  ;;  %v2550_v36 = vld [vmem:[#allocation2 + $0x5c8] sm:$0xff]  ;;  %v2552_v20 = vld [vmem:[#allocation2 + $0x5d8] sm:$0xff] }
 0x68f   :  { %3458 = vmatpush1.bf16.msra.mxu0 %v2469_v55  ;;  %3786 = vmatpush1.bf16.msra.mxu1 %v2471_v12  ;;  %v2549_v55 = vld [vmem:[#allocation2 + $0x5c0] sm:$0xff]  ;;  %v2551_v12 = vld [vmem:[#allocation2 + $0x5d0] sm:$0xff] }
 0x690   :  { %3459 = vmatprep.subr.bf16.mxu0 %v2478_v44  ;;  %3787 = vmatprep.subr.bf16.mxu1 %v2480_v42  ;;  %v2558_v44 = vld [vmem:[#allocation2 + $0x608] sm:$0xff]  ;;  %v2560_v42 = vld [vmem:[#allocation2 + $0x618] sm:$0xff] }
 0x693   :  { %3460 = vmatpush1.bf16.msra.mxu0 %v2477_v33  ;;  %3788 = vmatpush1.bf16.msra.mxu1 %v2479_v3  ;;  %v2557_v33 = vld [vmem:[#allocation2 + $0x600] sm:$0xff]  ;;  %v2559_v3 = vld [vmem:[#allocation2 + $0x610] sm:$0xff] }
 0x694   :  { %3461 = vmatprep.subr.bf16.mxu0 %v2486_v46  ;;  %3789 = vmatprep.subr.bf16.mxu1 %v2488_v4  ;;  %v2566_v46 = vld [vmem:[#allocation2 + $0x648] sm:$0xff]  ;;  %v2568_v4 = vld [vmem:[#allocation2 + $0x658] sm:$0xff] }
 0x697   :  { %3462 = vmatpush1.bf16.msra.mxu0 %v2485_v19  ;;  %3790 = vmatpush1.bf16.msra.mxu1 %v2487_v14  ;;  %v2565_v19 = vld [vmem:[#allocation2 + $0x640] sm:$0xff]  ;;  %v2567_v14 = vld [vmem:[#allocation2 + $0x650] sm:$0xff] }
 0x698   :  { %3472 = vmatprep.subr.bf16.mxu0 %v2494_v60  ;;  %3800 = vmatprep.subr.bf16.mxu1 %v2496_v5  ;;  %v2574_v60 = vld [vmem:[#allocation2 + $0x688] sm:$0xff]  ;;  %v2576_v5 = vld [vmem:[#allocation2 + $0x698] sm:$0xff] }
 0x69a   :  { %3464 = vmatmul.mubr.bf16.vlgmr.msra.gmra.mrb[80].mxu0 %v9520_v27  ;;  %3792 = vmatmul.mubr.bf16.vlgmr.msra.gmra.mrb[112].mxu1 %v9520_v27 }
 0x69b   :  { %3473 = vmatpush1.bf16.msra.mxu0 %v2493_v6  ;;  %3801 = vmatpush1.bf16.msra.mxu1 %v2495_v11  ;;  %v2573_v6 = vld [vmem:[#allocation2 + $0x680] sm:$0xff]  ;;  %v2575_v11 = vld [vmem:[#allocation2 + $0x690] sm:$0xff] }
 0x69c   :  { %3474 = vmatprep.subr.bf16.mxu0 %v2502_v24  ;;  %3802 = vmatprep.subr.bf16.mxu1 %v2504_v25  ;;  %v2582_v24 = vld [vmem:[#allocation2 + $0x6c8] sm:$0xff]  ;;  %v2584_v25 = vld [vmem:[#allocation2 + $0x6d8] sm:$0xff] }
 0x69d   :  { %3504 = vmatprep.mubr.bf16.mxu0 %v9524_v29  ;;  %3832 = vmatprep.mubr.bf16.mxu1 %v9524_v29 }
 0x69f   :  { %3475 = vmatpush1.bf16.msra.mxu0 %v2501_v63  ;;  %3803 = vmatpush1.bf16.msra.mxu1 %v2503_v39  ;;  %v2581_v63 = vld [vmem:[#allocation2 + $0x6c0] sm:$0xff]  ;;  %v2583_v39 = vld [vmem:[#allocation2 + $0x6d0] sm:$0xff] }
 0x6a0   :  { %3476 = vmatprep.subr.bf16.mxu0 %v2510_v45  ;;  %3804 = vmatprep.subr.bf16.mxu1 %v2512_v30  ;;  %v2590_v45 = vld [vmem:[#allocation2 + $0x708] sm:$0xff]  ;;  %v2592_v30 = vld [vmem:[#allocation2 + $0x718] sm:$0xff] }
 0x6a3   :  { %3477 = vmatpush1.bf16.msra.mxu0 %v2509_v2  ;;  %3805 = vmatpush1.bf16.msra.mxu1 %v2511_v49  ;;  %v2589_v2 = vld [vmem:[#allocation2 + $0x700] sm:$0xff]  ;;  %v2591_v49 = vld [vmem:[#allocation2 + $0x710] sm:$0xff] }
 0x6a4   :  { %3478 = vmatprep.subr.bf16.mxu0 %v2518_v40  ;;  %3806 = vmatprep.subr.bf16.mxu1 %v2520_v9  ;;  %v2598_v40 = vld [vmem:[#allocation2 + $0x748] sm:$0xff]  ;;  %v2600_v9 = vld [vmem:[#allocation2 + $0x758] sm:$0xff] }
 0x6a7   :  { %3479 = vmatpush1.bf16.msra.mxu0 %v2517_v41  ;;  %3807 = vmatpush1.bf16.msra.mxu1 %v2519_v10  ;;  %v2597_v41 = vld [vmem:[#allocation2 + $0x740] sm:$0xff]  ;;  %v2599_v10 = vld [vmem:[#allocation2 + $0x750] sm:$0xff] }
 0x6a8   :  { %3480 = vmatprep.subr.bf16.mxu0 %v2526_v54  ;;  %3808 = vmatprep.subr.bf16.mxu1 %v2528_v7  ;;  %v2606_v54 = vld [vmem:[#allocation2 + $0x788] sm:$0xff]  ;;  %v2608_v7 = vld [vmem:[#allocation2 + $0x798] sm:$0xff] }
 0x6ab   :  { %3481 = vmatpush1.bf16.msra.mxu0 %v2525_v28  ;;  %3809 = vmatpush1.bf16.msra.mxu1 %v2527_v22  ;;  %v2605_v28 = vld [vmem:[#allocation2 + $0x780] sm:$0xff]  ;;  %v2607_v22 = vld [vmem:[#allocation2 + $0x790] sm:$0xff] }
 0x6ac   :  { %3482 = vmatprep.subr.bf16.mxu0 %v2534_v32  ;;  %3810 = vmatprep.subr.bf16.mxu1 %v2536_v56  ;;  %v2614_v32 = vld [vmem:[#allocation2 + $0x7c8] sm:$0xff]  ;;  %v2616_v56 = vld [vmem:[#allocation2 + $0x7d8] sm:$0xff] }
 0x6af   :  { %3483 = vmatpush1.bf16.msra.mxu0 %v2533_v13  ;;  %3811 = vmatpush1.bf16.msra.mxu1 %v2535_v61  ;;  %v2613_v13 = vld [vmem:[#allocation2 + $0x7c0] sm:$0xff]  ;;  %v2615_v61 = vld [vmem:[#allocation2 + $0x7d0] sm:$0xff] }
 0x6b0   :  { %3484 = vmatprep.subr.bf16.mxu0 %v2542_v1  ;;  %3812 = vmatprep.subr.bf16.mxu1 %v2544_v38  ;;  %v2622_v1 = vld [vmem:[#allocation2 + $0x808] sm:$0xff]  ;;  %v2624_v38 = vld [vmem:[#allocation2 + $0x818] sm:$0xff] }
 0x6b3   :  { %3485 = vmatpush1.bf16.msra.mxu0 %v2541_v59  ;;  %3813 = vmatpush1.bf16.msra.mxu1 %v2543_v26  ;;  %v9532_v59 = vpack.c.bf16 %v9400_v0, %v9400_v0  ;;  %v2621_v26 = vld [vmem:[#allocation2 + $0x800] sm:$0xff] }
 0x6b4   :  { %3486 = vmatprep.subr.bf16.mxu0 %v2550_v36  ;;  %3814 = vmatprep.subr.bf16.mxu1 %v2552_v20  ;;  %v2623_v36 = vld [vmem:[#allocation2 + $0x810] sm:$0xff]  ;;  %v2630_v20 = vld [vmem:[#allocation2 + $0x848] sm:$0xff]  ;;  %v2629_v0 = vld [vmem:[#allocation2 + $0x840] sm:$0xff] }
 0x6b7   :  { %3487 = vmatpush1.bf16.msra.mxu0 %v2549_v55  ;;  %3815 = vmatpush1.bf16.msra.mxu1 %v2551_v12  ;;  %v2632_v55 = vld [vmem:[#allocation2 + $0x858] sm:$0xff]  ;;  %v9536_v12 = vpack.c.bf16 %v9487_v15, %v9487_v15  ;;  %v2637_v15 = vld [vmem:[#allocation2 + $0x880] sm:$0xff] }
 0x6b8   :  { %3488 = vmatprep.subr.bf16.mxu0 %v2558_v44  ;;  %3816 = vmatprep.subr.bf16.mxu1 %v2560_v42  ;;  %v2631_v44 = vld [vmem:[#allocation2 + $0x850] sm:$0xff]  ;;  %v2638_v42 = vld [vmem:[#allocation2 + $0x888] sm:$0xff] }
 0x6bb   :  { %3489 = vmatpush1.bf16.msra.mxu0 %v2557_v33  ;;  %3817 = vmatpush1.bf16.msra.mxu1 %v2559_v3  ;;  %v2640_v33 = vld [vmem:[#allocation2 + $0x898] sm:$0xff]  ;;  %v2639_v3 = vld [vmem:[#allocation2 + $0x890] sm:$0xff] }
 0x6bc   :  { %3490 = vmatprep.subr.bf16.mxu0 %v2566_v46  ;;  %3818 = vmatprep.subr.bf16.mxu1 %v2568_v4  ;;  %v2646_v46 = vld [vmem:[#allocation2 + $0x8c8] sm:$0xff]  ;;  %v2648_v4 = vld [vmem:[#allocation2 + $0x8d8] sm:$0xff] }
 0x6bf   :  { %3491 = vmatpush1.bf16.msra.mxu0 %v2565_v19  ;;  %3819 = vmatpush1.bf16.msra.mxu1 %v2567_v14  ;;  %v2645_v19 = vld [vmem:[#allocation2 + $0x8c0] sm:$0xff]  ;;  %v2647_v14 = vld [vmem:[#allocation2 + $0x8d0] sm:$0xff] }
 0x6c0   :  { %3492 = vmatprep.subr.bf16.mxu0 %v2574_v60  ;;  %3820 = vmatprep.subr.bf16.mxu1 %v2576_v5  ;;  %v2654_v60 = vld [vmem:[#allocation2 + $0x908] sm:$0xff]  ;;  %v2656_v5 = vld [vmem:[#allocation2 + $0x918] sm:$0xff] }
 0x6c3   :  { %3493 = vmatpush1.bf16.msra.mxu0 %v2573_v6  ;;  %3821 = vmatpush1.bf16.msra.mxu1 %v2575_v11  ;;  %v2653_v6 = vld [vmem:[#allocation2 + $0x900] sm:$0xff]  ;;  %v2655_v11 = vld [vmem:[#allocation2 + $0x910] sm:$0xff] }
 0x6c4   :  { %3494 = vmatprep.subr.bf16.mxu0 %v2582_v24  ;;  %3822 = vmatprep.subr.bf16.mxu1 %v2584_v25  ;;  %v2662_v24 = vld [vmem:[#allocation2 + $0x948] sm:$0xff]  ;;  %v2664_v25 = vld [vmem:[#allocation2 + $0x958] sm:$0xff] }
 0x6c7   :  { %3495 = vmatpush1.bf16.msra.mxu0 %v2581_v63  ;;  %3823 = vmatpush1.bf16.msra.mxu1 %v2583_v39  ;;  %v2661_v63 = vld [vmem:[#allocation2 + $0x940] sm:$0xff]  ;;  %v2663_v39 = vld [vmem:[#allocation2 + $0x950] sm:$0xff] }
 0x6c8   :  { %3496 = vmatprep.subr.bf16.mxu0 %v2590_v45  ;;  %3824 = vmatprep.subr.bf16.mxu1 %v2592_v30  ;;  %v2670_v45 = vld [vmem:[#allocation2 + $0x988] sm:$0xff]  ;;  %v2672_v30 = vld [vmem:[#allocation2 + $0x998] sm:$0xff] }
 0x6cb   :  { %3497 = vmatpush1.bf16.msra.mxu0 %v2589_v2  ;;  %3825 = vmatpush1.bf16.msra.mxu1 %v2591_v49  ;;  %v2669_v2 = vld [vmem:[#allocation2 + $0x980] sm:$0xff]  ;;  %v2671_v49 = vld [vmem:[#allocation2 + $0x990] sm:$0xff] }
 0x6cc   :  { %3498 = vmatprep.subr.bf16.mxu0 %v2598_v40  ;;  %3826 = vmatprep.subr.bf16.mxu1 %v2600_v9  ;;  %v2678_v40 = vld [vmem:[#allocation2 + $0x9c8] sm:$0xff]  ;;  %v2680_v9 = vld [vmem:[#allocation2 + $0x9d8] sm:$0xff] }
 0x6cf   :  { %3499 = vmatpush1.bf16.msra.mxu0 %v2597_v41  ;;  %3827 = vmatpush1.bf16.msra.mxu1 %v2599_v10  ;;  %v2677_v41 = vld [vmem:[#allocation2 + $0x9c0] sm:$0xff]  ;;  %v2679_v10 = vld [vmem:[#allocation2 + $0x9d0] sm:$0xff] }
 0x6d0   :  { %3500 = vmatprep.subr.bf16.mxu0 %v2606_v54  ;;  %3828 = vmatprep.subr.bf16.mxu1 %v2608_v7  ;;  %v2686_v54 = vld [vmem:[#allocation2 + $0xa08] sm:$0xff]  ;;  %v2688_v7 = vld [vmem:[#allocation2 + $0xa18] sm:$0xff] }
 0x6d3   :  { %3501 = vmatpush1.bf16.msra.mxu0 %v2605_v28  ;;  %3829 = vmatpush1.bf16.msra.mxu1 %v2607_v22  ;;  %v2685_v28 = vld [vmem:[#allocation2 + $0xa00] sm:$0xff]  ;;  %v2687_v22 = vld [vmem:[#allocation2 + $0xa10] sm:$0xff] }
 0x6d4   :  { %3502 = vmatprep.subr.bf16.mxu0 %v2614_v32  ;;  %3830 = vmatprep.subr.bf16.mxu1 %v2616_v56  ;;  %v2694_v32 = vld [vmem:[#allocation2 + $0xa48] sm:$0xff]  ;;  %v2696_v56 = vld [vmem:[#allocation2 + $0xa58] sm:$0xff] }
 0x6d7   :  { %3503 = vmatpush1.bf16.msra.mxu0 %v2613_v13  ;;  %3831 = vmatpush1.bf16.msra.mxu1 %v2615_v61  ;;  %v2693_v13 = vld [vmem:[#allocation2 + $0xa40] sm:$0xff]  ;;  %v2695_v61 = vld [vmem:[#allocation2 + $0xa50] sm:$0xff] }
 0x6d8   :  { %3513 = vmatprep.subr.bf16.mxu0 %v2622_v1  ;;  %3841 = vmatprep.subr.bf16.mxu1 %v2624_v38  ;;  %v2702_v1 = vld [vmem:[#allocation2 + $0xa88] sm:$0xff]  ;;  %v2704_v38 = vld [vmem:[#allocation2 + $0xa98] sm:$0xff] }
 0x6da   :  { %3505 = vmatmul.mubr.bf16.vlgmr.msra.gmra.mrb[80].mxu0 %v9532_v59  ;;  %3833 = vmatmul.mubr.bf16.vlgmr.msra.gmra.mrb[112].mxu1 %v9532_v59 }
 0x6db   :  { %3514 = vmatpush1.bf16.msra.mxu0 %v2621_v26  ;;  %3842 = vmatpush1.bf16.msra.mxu1 %v2623_v36  ;;  %v2701_v26 = vld [vmem:[#allocation2 + $0xa80] sm:$0xff]  ;;  %v2703_v36 = vld [vmem:[#allocation2 + $0xa90] sm:$0xff] }
 0x6dc   :  { %3515 = vmatprep.subr.bf16.mxu0 %v2630_v20  ;;  %3843 = vmatprep.subr.bf16.mxu1 %v2632_v55  ;;  %v2710_v20 = vld [vmem:[#allocation2 + $0xac8] sm:$0xff]  ;;  %v2712_v55 = vld [vmem:[#allocation2 + $0xad8] sm:$0xff] }
 0x6dd   :  { %3545 = vmatprep.mubr.bf16.mxu0 %v9536_v12  ;;  %3873 = vmatprep.mubr.bf16.mxu1 %v9536_v12 }
 0x6df   :  { %3516 = vmatpush1.bf16.msra.mxu0 %v2629_v0  ;;  %3844 = vmatpush1.bf16.msra.mxu1 %v2631_v44  ;;  %v2709_v0 = vld [vmem:[#allocation2 + $0xac0] sm:$0xff]  ;;  %v2711_v44 = vld [vmem:[#allocation2 + $0xad0] sm:$0xff] }
 0x6e0   :  { %3517 = vmatprep.subr.bf16.mxu0 %v2638_v42  ;;  %3845 = vmatprep.subr.bf16.mxu1 %v2640_v33  ;;  %v2718_v42 = vld [vmem:[#allocation2 + $0xb08] sm:$0xff]  ;;  %v2720_v33 = vld [vmem:[#allocation2 + $0xb18] sm:$0xff] }
 0x6e3   :  { %3518 = vmatpush1.bf16.msra.mxu0 %v2637_v15  ;;  %3846 = vmatpush1.bf16.msra.mxu1 %v2639_v3  ;;  %v2717_v15 = vld [vmem:[#allocation2 + $0xb00] sm:$0xff]  ;;  %v2719_v3 = vld [vmem:[#allocation2 + $0xb10] sm:$0xff] }
 0x6e4   :  { %3519 = vmatprep.subr.bf16.mxu0 %v2646_v46  ;;  %3847 = vmatprep.subr.bf16.mxu1 %v2648_v4  ;;  %v2726_v46 = vld [vmem:[#allocation2 + $0xb48] sm:$0xff]  ;;  %v2728_v4 = vld [vmem:[#allocation2 + $0xb58] sm:$0xff] }
 0x6e7   :  { %3520 = vmatpush1.bf16.msra.mxu0 %v2645_v19  ;;  %3848 = vmatpush1.bf16.msra.mxu1 %v2647_v14  ;;  %v2725_v19 = vld [vmem:[#allocation2 + $0xb40] sm:$0xff]  ;;  %v2727_v14 = vld [vmem:[#allocation2 + $0xb50] sm:$0xff] }
 0x6e8   :  { %3521 = vmatprep.subr.bf16.mxu0 %v2654_v60  ;;  %3849 = vmatprep.subr.bf16.mxu1 %v2656_v5  ;;  %v2734_v60 = vld [vmem:[#allocation2 + $0xb88] sm:$0xff]  ;;  %v2736_v5 = vld [vmem:[#allocation2 + $0xb98] sm:$0xff] }
 0x6eb   :  { %3522 = vmatpush1.bf16.msra.mxu0 %v2653_v6  ;;  %3850 = vmatpush1.bf16.msra.mxu1 %v2655_v11  ;;  %v2733_v6 = vld [vmem:[#allocation2 + $0xb80] sm:$0xff]  ;;  %v2735_v11 = vld [vmem:[#allocation2 + $0xb90] sm:$0xff] }
 0x6ec   :  { %3523 = vmatprep.subr.bf16.mxu0 %v2662_v24  ;;  %3851 = vmatprep.subr.bf16.mxu1 %v2664_v25  ;;  %v2742_v24 = vld [vmem:[#allocation2 + $0xbc8] sm:$0xff]  ;;  %v2744_v25 = vld [vmem:[#allocation2 + $0xbd8] sm:$0xff] }
 0x6ef   :  { %3524 = vmatpush1.bf16.msra.mxu0 %v2661_v63  ;;  %3852 = vmatpush1.bf16.msra.mxu1 %v2663_v39  ;;  %v2741_v63 = vld [vmem:[#allocation2 + $0xbc0] sm:$0xff]  ;;  %v2743_v39 = vld [vmem:[#allocation2 + $0xbd0] sm:$0xff] }
 0x6f0   :  { %3525 = vmatprep.subr.bf16.mxu0 %v2670_v45  ;;  %3853 = vmatprep.subr.bf16.mxu1 %v2672_v30  ;;  %v2750_v45 = vld [vmem:[#allocation2 + $0xc08] sm:$0xff]  ;;  %v2752_v30 = vld [vmem:[#allocation2 + $0xc18] sm:$0xff] }
 0x6f3   :  { %3526 = vmatpush1.bf16.msra.mxu0 %v2669_v2  ;;  %3854 = vmatpush1.bf16.msra.mxu1 %v2671_v49  ;;  %v9544_v2 = vpack.c.bf16 %v9481_v16, %v9481_v16  ;;  %v2749_v49 = vld [vmem:[#allocation2 + $0xc00] sm:$0xff] }
 0x6f4   :  { %3527 = vmatprep.subr.bf16.mxu0 %v2678_v40  ;;  %3855 = vmatprep.subr.bf16.mxu1 %v2680_v9  ;;  %v2751_v40 = vld [vmem:[#allocation2 + $0xc10] sm:$0xff]  ;;  %v2758_v9 = vld [vmem:[#allocation2 + $0xc48] sm:$0xff]  ;;  %v2757_v16 = vld [vmem:[#allocation2 + $0xc40] sm:$0xff] }
 0x6f7   :  { %3528 = vmatpush1.bf16.msra.mxu0 %v2677_v41  ;;  %3856 = vmatpush1.bf16.msra.mxu1 %v2679_v10  ;;  %v2760_v41 = vld [vmem:[#allocation2 + $0xc58] sm:$0xff]  ;;  %v9548_v10 = vpack.c.bf16 %v9490_v43, %v9490_v43  ;;  %v2765_v43 = vld [vmem:[#allocation2 + $0xc80] sm:$0xff] }
 0x6f8   :  { %3529 = vmatprep.subr.bf16.mxu0 %v2686_v54  ;;  %3857 = vmatprep.subr.bf16.mxu1 %v2688_v7  ;;  %v2759_v54 = vld [vmem:[#allocation2 + $0xc50] sm:$0xff]  ;;  %v2766_v7 = vld [vmem:[#allocation2 + $0xc88] sm:$0xff] }
 0x6fb   :  { %3530 = vmatpush1.bf16.msra.mxu0 %v2685_v28  ;;  %3858 = vmatpush1.bf16.msra.mxu1 %v2687_v22  ;;  %v2768_v28 = vld [vmem:[#allocation2 + $0xc98] sm:$0xff]  ;;  %v2767_v22 = vld [vmem:[#allocation2 + $0xc90] sm:$0xff] }
 0x6fc   :  { %3531 = vmatprep.subr.bf16.mxu0 %v2694_v32  ;;  %3859 = vmatprep.subr.bf16.mxu1 %v2696_v56  ;;  %v2774_v32 = vld [vmem:[#allocation2 + $0xcc8] sm:$0xff]  ;;  %v2776_v56 = vld [vmem:[#allocation2 + $0xcd8] sm:$0xff] }
 0x6ff   :  { %3532 = vmatpush1.bf16.msra.mxu0 %v2693_v13  ;;  %3860 = vmatpush1.bf16.msra.mxu1 %v2695_v61  ;;  %v2773_v13 = vld [vmem:[#allocation2 + $0xcc0] sm:$0xff]  ;;  %v2775_v61 = vld [vmem:[#allocation2 + $0xcd0] sm:$0xff] }
 0x700   :  { %3533 = vmatprep.subr.bf16.mxu0 %v2702_v1  ;;  %3861 = vmatprep.subr.bf16.mxu1 %v2704_v38  ;;  %v2782_v1 = vld [vmem:[#allocation2 + $0xd08] sm:$0xff]  ;;  %v2784_v38 = vld [vmem:[#allocation2 + $0xd18] sm:$0xff] }
 0x703   :  { %3534 = vmatpush1.bf16.msra.mxu0 %v2701_v26  ;;  %3862 = vmatpush1.bf16.msra.mxu1 %v2703_v36  ;;  %v2781_v26 = vld [vmem:[#allocation2 + $0xd00] sm:$0xff]  ;;  %v2783_v36 = vld [vmem:[#allocation2 + $0xd10] sm:$0xff] }
 0x704   :  { %3535 = vmatprep.subr.bf16.mxu0 %v2710_v20  ;;  %3863 = vmatprep.subr.bf16.mxu1 %v2712_v55  ;;  %v2790_v20 = vld [vmem:[#allocation2 + $0xd48] sm:$0xff]  ;;  %v2792_v55 = vld [vmem:[#allocation2 + $0xd58] sm:$0xff] }
 0x707   :  { %3536 = vmatpush1.bf16.msra.mxu0 %v2709_v0  ;;  %3864 = vmatpush1.bf16.msra.mxu1 %v2711_v44  ;;  %v2789_v0 = vld [vmem:[#allocation2 + $0xd40] sm:$0xff]  ;;  %v2791_v44 = vld [vmem:[#allocation2 + $0xd50] sm:$0xff] }
 0x708   :  { %3537 = vmatprep.subr.bf16.mxu0 %v2718_v42  ;;  %3865 = vmatprep.subr.bf16.mxu1 %v2720_v33  ;;  %v2798_v42 = vld [vmem:[#allocation2 + $0xd88] sm:$0xff]  ;;  %v2800_v33 = vld [vmem:[#allocation2 + $0xd98] sm:$0xff] }
 0x70b   :  { %3538 = vmatpush1.bf16.msra.mxu0 %v2717_v15  ;;  %3866 = vmatpush1.bf16.msra.mxu1 %v2719_v3  ;;  %v2797_v15 = vld [vmem:[#allocation2 + $0xd80] sm:$0xff]  ;;  %v2799_v3 = vld [vmem:[#allocation2 + $0xd90] sm:$0xff] }
 0x70c   :  { %3539 = vmatprep.subr.bf16.mxu0 %v2726_v46  ;;  %3867 = vmatprep.subr.bf16.mxu1 %v2728_v4  ;;  %v2806_v46 = vld [vmem:[#allocation2 + $0xdc8] sm:$0xff]  ;;  %v2808_v4 = vld [vmem:[#allocation2 + $0xdd8] sm:$0xff] }
 0x70f   :  { %3540 = vmatpush1.bf16.msra.mxu0 %v2725_v19  ;;  %3868 = vmatpush1.bf16.msra.mxu1 %v2727_v14  ;;  %v2805_v19 = vld [vmem:[#allocation2 + $0xdc0] sm:$0xff]  ;;  %v2807_v14 = vld [vmem:[#allocation2 + $0xdd0] sm:$0xff] }
 0x710   :  { %3541 = vmatprep.subr.bf16.mxu0 %v2734_v60  ;;  %3869 = vmatprep.subr.bf16.mxu1 %v2736_v5  ;;  %v2814_v60 = vld [vmem:[#allocation2 + $0xe08] sm:$0xff]  ;;  %v2816_v5 = vld [vmem:[#allocation2 + $0xe18] sm:$0xff] }
 0x713   :  { %3542 = vmatpush1.bf16.msra.mxu0 %v2733_v6  ;;  %3870 = vmatpush1.bf16.msra.mxu1 %v2735_v11  ;;  %v2813_v6 = vld [vmem:[#allocation2 + $0xe00] sm:$0xff]  ;;  %v2815_v11 = vld [vmem:[#allocation2 + $0xe10] sm:$0xff] }
 0x714   :  { %3543 = vmatprep.subr.bf16.mxu0 %v2742_v24  ;;  %3871 = vmatprep.subr.bf16.mxu1 %v2744_v25  ;;  %v2822_v24 = vld [vmem:[#allocation2 + $0xe48] sm:$0xff]  ;;  %v2824_v25 = vld [vmem:[#allocation2 + $0xe58] sm:$0xff] }
 0x717   :  { %3544 = vmatpush1.bf16.msra.mxu0 %v2741_v63  ;;  %3872 = vmatpush1.bf16.msra.mxu1 %v2743_v39  ;;  %v2821_v63 = vld [vmem:[#allocation2 + $0xe40] sm:$0xff]  ;;  %v2823_v39 = vld [vmem:[#allocation2 + $0xe50] sm:$0xff] }
 0x718   :  { %3554 = vmatprep.subr.bf16.mxu0 %v2750_v45  ;;  %3882 = vmatprep.subr.bf16.mxu1 %v2752_v30  ;;  %v2830_v45 = vld [vmem:[#allocation2 + $0xe88] sm:$0xff]  ;;  %v2832_v30 = vld [vmem:[#allocation2 + $0xe98] sm:$0xff] }
 0x71a   :  { %3546 = vmatmul.mubr.bf16.vlgmr.msra.gmra.mrb[80].mxu0 %v9544_v2  ;;  %3874 = vmatmul.mubr.bf16.vlgmr.msra.gmra.mrb[112].mxu1 %v9544_v2 }
 0x71b   :  { %3555 = vmatpush1.bf16.msra.mxu0 %v2749_v49  ;;  %3883 = vmatpush1.bf16.msra.mxu1 %v2751_v40  ;;  %v2829_v49 = vld [vmem:[#allocation2 + $0xe80] sm:$0xff]  ;;  %v2831_v40 = vld [vmem:[#allocation2 + $0xe90] sm:$0xff] }
 0x71c   :  { %3556 = vmatprep.subr.bf16.mxu0 %v2758_v9  ;;  %3884 = vmatprep.subr.bf16.mxu1 %v2760_v41  ;;  %v2838_v9 = vld [vmem:[#allocation2 + $0xec8] sm:$0xff]  ;;  %v2840_v41 = vld [vmem:[#allocation2 + $0xed8] sm:$0xff] }
 0x71d   :  { %3586 = vmatprep.mubr.bf16.mxu0 %v9548_v10  ;;  %3914 = vmatprep.mubr.bf16.mxu1 %v9548_v10 }
 0x71f   :  { %3557 = vmatpush1.bf16.msra.mxu0 %v2757_v16  ;;  %3885 = vmatpush1.bf16.msra.mxu1 %v2759_v54  ;;  %v2837_v16 = vld [vmem:[#allocation2 + $0xec0] sm:$0xff]  ;;  %v2839_v54 = vld [vmem:[#allocation2 + $0xed0] sm:$0xff] }
 0x720   :  { %3558 = vmatprep.subr.bf16.mxu0 %v2766_v7  ;;  %3886 = vmatprep.subr.bf16.mxu1 %v2768_v28  ;;  %v2846_v7 = vld [vmem:[#allocation2 + $0xf08] sm:$0xff]  ;;  %v2848_v28 = vld [vmem:[#allocation2 + $0xf18] sm:$0xff] }
 0x723   :  { %3559 = vmatpush1.bf16.msra.mxu0 %v2765_v43  ;;  %3887 = vmatpush1.bf16.msra.mxu1 %v2767_v22  ;;  %v2845_v43 = vld [vmem:[#allocation2 + $0xf00] sm:$0xff]  ;;  %v2847_v22 = vld [vmem:[#allocation2 + $0xf10] sm:$0xff] }
 0x724   :  { %3560 = vmatprep.subr.bf16.mxu0 %v2774_v32  ;;  %3888 = vmatprep.subr.bf16.mxu1 %v2776_v56  ;;  %v2854_v32 = vld [vmem:[#allocation2 + $0xf48] sm:$0xff]  ;;  %v2856_v56 = vld [vmem:[#allocation2 + $0xf58] sm:$0xff] }
 0x727   :  { %3561 = vmatpush1.bf16.msra.mxu0 %v2773_v13  ;;  %3889 = vmatpush1.bf16.msra.mxu1 %v2775_v61  ;;  %v2853_v13 = vld [vmem:[#allocation2 + $0xf40] sm:$0xff]  ;;  %v2855_v61 = vld [vmem:[#allocation2 + $0xf50] sm:$0xff] }
 0x728   :  { %3562 = vmatprep.subr.bf16.mxu0 %v2782_v1  ;;  %3890 = vmatprep.subr.bf16.mxu1 %v2784_v38  ;;  %v2862_v1 = vld [vmem:[#allocation2 + $0xf88] sm:$0xff]  ;;  %v2864_v38 = vld [vmem:[#allocation2 + $0xf98] sm:$0xff] }
 0x72b   :  { %3563 = vmatpush1.bf16.msra.mxu0 %v2781_v26  ;;  %3891 = vmatpush1.bf16.msra.mxu1 %v2783_v36  ;;  %v2861_v26 = vld [vmem:[#allocation2 + $0xf80] sm:$0xff]  ;;  %v2863_v36 = vld [vmem:[#allocation2 + $0xf90] sm:$0xff] }
 0x72c   :  { %3564 = vmatprep.subr.bf16.mxu0 %v2790_v20  ;;  %3892 = vmatprep.subr.bf16.mxu1 %v2792_v55  ;;  %v2870_v20 = vld [vmem:[#allocation2 + $0xfc8] sm:$0xff]  ;;  %v2872_v55 = vld [vmem:[#allocation2 + $0xfd8] sm:$0xff] }
 0x72f   :  { %3565 = vmatpush1.bf16.msra.mxu0 %v2789_v0  ;;  %3893 = vmatpush1.bf16.msra.mxu1 %v2791_v44  ;;  %v2869_v0 = vld [vmem:[#allocation2 + $0xfc0] sm:$0xff]  ;;  %v2871_v44 = vld [vmem:[#allocation2 + $0xfd0] sm:$0xff] }
 0x730   :  { %3566 = vmatprep.subr.bf16.mxu0 %v2798_v42  ;;  %3894 = vmatprep.subr.bf16.mxu1 %v2800_v33  ;;  %v2878_v42 = vld [vmem:[#allocation2 + $0x1008] sm:$0xff]  ;;  %v2880_v33 = vld [vmem:[#allocation2 + $0x1018] sm:$0xff] }
 0x733   :  { %3567 = vmatpush1.bf16.msra.mxu0 %v2797_v15  ;;  %3895 = vmatpush1.bf16.msra.mxu1 %v2799_v3  ;;  %v9556_v15 = vpack.c.bf16 %v9484_v62, %v9484_v62  ;;  %v2877_v3 = vld [vmem:[#allocation2 + $0x1000] sm:$0xff] }
 0x734   :  { %3568 = vmatprep.subr.bf16.mxu0 %v2806_v46  ;;  %3896 = vmatprep.subr.bf16.mxu1 %v2808_v4  ;;  %v2879_v46 = vld [vmem:[#allocation2 + $0x1010] sm:$0xff]  ;;  %v2886_v4 = vld [vmem:[#allocation2 + $0x1048] sm:$0xff]  ;;  %v2885_v62 = vld [vmem:[#allocation2 + $0x1040] sm:$0xff] }
 0x737   :  { %3569 = vmatpush1.bf16.msra.mxu0 %v2805_v19  ;;  %3897 = vmatpush1.bf16.msra.mxu1 %v2807_v14  ;;  %v2888_v19 = vld [vmem:[#allocation2 + $0x1058] sm:$0xff]  ;;  %v9560_v14 = vpack.c.bf16 %v9423_v48, %v9423_v48  ;;  %v2893_v48 = vld [vmem:[#allocation2 + $0x1080] sm:$0xff] }
 0x738   :  { %3570 = vmatprep.subr.bf16.mxu0 %v2814_v60  ;;  %3898 = vmatprep.subr.bf16.mxu1 %v2816_v5  ;;  %v2887_v60 = vld [vmem:[#allocation2 + $0x1050] sm:$0xff]  ;;  %v2894_v5 = vld [vmem:[#allocation2 + $0x1088] sm:$0xff] }
 0x73b   :  { %3571 = vmatpush1.bf16.msra.mxu0 %v2813_v6  ;;  %3899 = vmatpush1.bf16.msra.mxu1 %v2815_v11  ;;  %v2896_v6 = vld [vmem:[#allocation2 + $0x1098] sm:$0xff]  ;;  %v2895_v11 = vld [vmem:[#allocation2 + $0x1090] sm:$0xff] }
 0x73c   :  { %3572 = vmatprep.subr.bf16.mxu0 %v2822_v24  ;;  %3900 = vmatprep.subr.bf16.mxu1 %v2824_v25  ;;  %v2902_v24 = vld [vmem:[#allocation2 + $0x10c8] sm:$0xff]  ;;  %v2904_v25 = vld [vmem:[#allocation2 + $0x10d8] sm:$0xff] }
 0x73f   :  { %3573 = vmatpush1.bf16.msra.mxu0 %v2821_v63  ;;  %3901 = vmatpush1.bf16.msra.mxu1 %v2823_v39  ;;  %v2901_v63 = vld [vmem:[#allocation2 + $0x10c0] sm:$0xff]  ;;  %v2903_v39 = vld [vmem:[#allocation2 + $0x10d0] sm:$0xff] }
 0x740   :  { %3574 = vmatprep.subr.bf16.mxu0 %v2830_v45  ;;  %3902 = vmatprep.subr.bf16.mxu1 %v2832_v30  ;;  %v2910_v45 = vld [vmem:[#allocation2 + $0x1108] sm:$0xff]  ;;  %v2912_v30 = vld [vmem:[#allocation2 + $0x1118] sm:$0xff] }
 0x743   :  { %3575 = vmatpush1.bf16.msra.mxu0 %v2829_v49  ;;  %3903 = vmatpush1.bf16.msra.mxu1 %v2831_v40  ;;  %v2909_v49 = vld [vmem:[#allocation2 + $0x1100] sm:$0xff]  ;;  %v2911_v40 = vld [vmem:[#allocation2 + $0x1110] sm:$0xff] }
 0x744   :  { %3576 = vmatprep.subr.bf16.mxu0 %v2838_v9  ;;  %3904 = vmatprep.subr.bf16.mxu1 %v2840_v41  ;;  %v2918_v9 = vld [vmem:[#allocation2 + $0x1148] sm:$0xff]  ;;  %v2920_v41 = vld [vmem:[#allocation2 + $0x1158] sm:$0xff] }
 0x747   :  { %3577 = vmatpush1.bf16.msra.mxu0 %v2837_v16  ;;  %3905 = vmatpush1.bf16.msra.mxu1 %v2839_v54  ;;  %v2917_v16 = vld [vmem:[#allocation2 + $0x1140] sm:$0xff]  ;;  %v2919_v54 = vld [vmem:[#allocation2 + $0x1150] sm:$0xff] }
 0x748   :  { %3578 = vmatprep.subr.bf16.mxu0 %v2846_v7  ;;  %3906 = vmatprep.subr.bf16.mxu1 %v2848_v28  ;;  %v2926_v7 = vld [vmem:[#allocation2 + $0x1188] sm:$0xff]  ;;  %v2928_v28 = vld [vmem:[#allocation2 + $0x1198] sm:$0xff] }
 0x74b   :  { %3579 = vmatpush1.bf16.msra.mxu0 %v2845_v43  ;;  %3907 = vmatpush1.bf16.msra.mxu1 %v2847_v22  ;;  %v2925_v43 = vld [vmem:[#allocation2 + $0x1180] sm:$0xff]  ;;  %v2927_v22 = vld [vmem:[#allocation2 + $0x1190] sm:$0xff] }
 0x74c   :  { %3580 = vmatprep.subr.bf16.mxu0 %v2854_v32  ;;  %3908 = vmatprep.subr.bf16.mxu1 %v2856_v56  ;;  %v2934_v32 = vld [vmem:[#allocation2 + $0x11c8] sm:$0xff]  ;;  %v2936_v56 = vld [vmem:[#allocation2 + $0x11d8] sm:$0xff] }
 0x74f   :  { %3581 = vmatpush1.bf16.msra.mxu0 %v2853_v13  ;;  %3909 = vmatpush1.bf16.msra.mxu1 %v2855_v61  ;;  %v2933_v13 = vld [vmem:[#allocation2 + $0x11c0] sm:$0xff]  ;;  %v2935_v61 = vld [vmem:[#allocation2 + $0x11d0] sm:$0xff] }
 0x750   :  { %3582 = vmatprep.subr.bf16.mxu0 %v2862_v1  ;;  %3910 = vmatprep.subr.bf16.mxu1 %v2864_v38  ;;  %v2942_v1 = vld [vmem:[#allocation2 + $0x1208] sm:$0xff]  ;;  %v2944_v38 = vld [vmem:[#allocation2 + $0x1218] sm:$0xff] }
 0x753   :  { %3583 = vmatpush1.bf16.msra.mxu0 %v2861_v26  ;;  %3911 = vmatpush1.bf16.msra.mxu1 %v2863_v36  ;;  %v2941_v26 = vld [vmem:[#allocation2 + $0x1200] sm:$0xff]  ;;  %v2943_v36 = vld [vmem:[#allocation2 + $0x1210] sm:$0xff] }
 0x754   :  { %3584 = vmatprep.subr.bf16.mxu0 %v2870_v20  ;;  %3912 = vmatprep.subr.bf16.mxu1 %v2872_v55  ;;  %v2950_v20 = vld [vmem:[#allocation2 + $0x1248] sm:$0xff]  ;;  %v2952_v55 = vld [vmem:[#allocation2 + $0x1258] sm:$0xff] }
 0x757   :  { %3585 = vmatpush1.bf16.msra.mxu0 %v2869_v0  ;;  %3913 = vmatpush1.bf16.msra.mxu1 %v2871_v44  ;;  %v2949_v0 = vld [vmem:[#allocation2 + $0x1240] sm:$0xff]  ;;  %v2951_v44 = vld [vmem:[#allocation2 + $0x1250] sm:$0xff] }
 0x758   :  { %3595 = vmatprep.subr.bf16.mxu0 %v2878_v42  ;;  %3923 = vmatprep.subr.bf16.mxu1 %v2880_v33  ;;  %v2958_v42 = vld [vmem:[#allocation2 + $0x1288] sm:$0xff]  ;;  %v2960_v33 = vld [vmem:[#allocation2 + $0x1298] sm:$0xff] }
 0x75a   :  { %3587 = vmatmul.mubr.bf16.vlgmr.msra.gmra.mrb[80].mxu0 %v9556_v15  ;;  %3915 = vmatmul.mubr.bf16.vlgmr.msra.gmra.mrb[112].mxu1 %v9556_v15 }
 0x75b   :  { %3596 = vmatpush1.bf16.msra.mxu0 %v2877_v3  ;;  %3924 = vmatpush1.bf16.msra.mxu1 %v2879_v46  ;;  %v2957_v3 = vld [vmem:[#allocation2 + $0x1280] sm:$0xff]  ;;  %v2959_v46 = vld [vmem:[#allocation2 + $0x1290] sm:$0xff] }
 0x75c   :  { %3597 = vmatprep.subr.bf16.mxu0 %v2886_v4  ;;  %3925 = vmatprep.subr.bf16.mxu1 %v2888_v19  ;;  %v2966_v4 = vld [vmem:[#allocation2 + $0x12c8] sm:$0xff]  ;;  %v2968_v19 = vld [vmem:[#allocation2 + $0x12d8] sm:$0xff] }
 0x75d   :  { %3627 = vmatprep.mubr.bf16.mxu0 %v9560_v14  ;;  %3955 = vmatprep.mubr.bf16.mxu1 %v9560_v14 }
 0x75f   :  { %3598 = vmatpush1.bf16.msra.mxu0 %v2885_v62  ;;  %3926 = vmatpush1.bf16.msra.mxu1 %v2887_v60  ;;  %v2965_v62 = vld [vmem:[#allocation2 + $0x12c0] sm:$0xff]  ;;  %v2967_v60 = vld [vmem:[#allocation2 + $0x12d0] sm:$0xff] }
 0x760   :  { %3599 = vmatprep.subr.bf16.mxu0 %v2894_v5  ;;  %3927 = vmatprep.subr.bf16.mxu1 %v2896_v6  ;;  %v2974_v5 = vld [vmem:[#allocation2 + $0x1308] sm:$0xff]  ;;  %v2976_v6 = vld [vmem:[#allocation2 + $0x1318] sm:$0xff] }
 0x763   :  { %3600 = vmatpush1.bf16.msra.mxu0 %v2893_v48  ;;  %3928 = vmatpush1.bf16.msra.mxu1 %v2895_v11  ;;  %v2973_v48 = vld [vmem:[#allocation2 + $0x1300] sm:$0xff]  ;;  %v2975_v11 = vld [vmem:[#allocation2 + $0x1310] sm:$0xff] }
 0x764   :  { %3601 = vmatprep.subr.bf16.mxu0 %v2902_v24  ;;  %3929 = vmatprep.subr.bf16.mxu1 %v2904_v25  ;;  %v2982_v24 = vld [vmem:[#allocation2 + $0x1348] sm:$0xff]  ;;  %v2984_v25 = vld [vmem:[#allocation2 + $0x1358] sm:$0xff] }
 0x767   :  { %3602 = vmatpush1.bf16.msra.mxu0 %v2901_v63  ;;  %3930 = vmatpush1.bf16.msra.mxu1 %v2903_v39  ;;  %v2981_v63 = vld [vmem:[#allocation2 + $0x1340] sm:$0xff]  ;;  %v2983_v39 = vld [vmem:[#allocation2 + $0x1350] sm:$0xff] }
 0x768   :  { %3603 = vmatprep.subr.bf16.mxu0 %v2910_v45  ;;  %3931 = vmatprep.subr.bf16.mxu1 %v2912_v30  ;;  %v2990_v45 = vld [vmem:[#allocation2 + $0x1388] sm:$0xff]  ;;  %v2992_v30 = vld [vmem:[#allocation2 + $0x1398] sm:$0xff] }
 0x76b   :  { %3604 = vmatpush1.bf16.msra.mxu0 %v2909_v49  ;;  %3932 = vmatpush1.bf16.msra.mxu1 %v2911_v40  ;;  %v2989_v49 = vld [vmem:[#allocation2 + $0x1380] sm:$0xff]  ;;  %v2991_v40 = vld [vmem:[#allocation2 + $0x1390] sm:$0xff] }
 0x76c   :  { %3605 = vmatprep.subr.bf16.mxu0 %v2918_v9  ;;  %3933 = vmatprep.subr.bf16.mxu1 %v2920_v41  ;;  %v2998_v9 = vld [vmem:[#allocation2 + $0x13c8] sm:$0xff]  ;;  %v3000_v41 = vld [vmem:[#allocation2 + $0x13d8] sm:$0xff] }
 0x76f   :  { %3606 = vmatpush1.bf16.msra.mxu0 %v2917_v16  ;;  %3934 = vmatpush1.bf16.msra.mxu1 %v2919_v54  ;;  %v2997_v16 = vld [vmem:[#allocation2 + $0x13c0] sm:$0xff]  ;;  %v2999_v54 = vld [vmem:[#allocation2 + $0x13d0] sm:$0xff] }
 0x770   :  { %3607 = vmatprep.subr.bf16.mxu0 %v2926_v7  ;;  %3935 = vmatprep.subr.bf16.mxu1 %v2928_v28  ;;  %v3006_v7 = vld [vmem:[#allocation2 + $0x1408] sm:$0xff]  ;;  %v3008_v28 = vld [vmem:[#allocation2 + $0x1418] sm:$0xff] }
 0x773   :  { %3608 = vmatpush1.bf16.msra.mxu0 %v2925_v43  ;;  %3936 = vmatpush1.bf16.msra.mxu1 %v2927_v22  ;;  %v9568_v43 = vpack.c.bf16 %v9417_v37, %v9417_v37  ;;  %v3005_v22 = vld [vmem:[#allocation2 + $0x1400] sm:$0xff] }
 0x774   :  { %3609 = vmatprep.subr.bf16.mxu0 %v2934_v32  ;;  %3937 = vmatprep.subr.bf16.mxu1 %v2936_v56  ;;  %v3007_v32 = vld [vmem:[#allocation2 + $0x1410] sm:$0xff]  ;;  %v3014_v56 = vld [vmem:[#allocation2 + $0x1448] sm:$0xff]  ;;  %v3013_v37 = vld [vmem:[#allocation2 + $0x1440] sm:$0xff] }
 0x777   :  { %3610 = vmatpush1.bf16.msra.mxu0 %v2933_v13  ;;  %3938 = vmatpush1.bf16.msra.mxu1 %v2935_v61  ;;  %v3016_v13 = vld [vmem:[#allocation2 + $0x1458] sm:$0xff]  ;;  %v9572_v61 = vpack.c.bf16 %v9426_v21, %v9426_v21  ;;  %v3021_v21 = vld [vmem:[#allocation2 + $0x1480] sm:$0xff] }
 0x778   :  { %3611 = vmatprep.subr.bf16.mxu0 %v2942_v1  ;;  %3939 = vmatprep.subr.bf16.mxu1 %v2944_v38  ;;  %v3015_v1 = vld [vmem:[#allocation2 + $0x1450] sm:$0xff]  ;;  %v3022_v38 = vld [vmem:[#allocation2 + $0x1488] sm:$0xff] }
 0x77b   :  { %3612 = vmatpush1.bf16.msra.mxu0 %v2941_v26  ;;  %3940 = vmatpush1.bf16.msra.mxu1 %v2943_v36  ;;  %v3024_v26 = vld [vmem:[#allocation2 + $0x1498] sm:$0xff]  ;;  %v3023_v36 = vld [vmem:[#allocation2 + $0x1490] sm:$0xff] }
 0x77c   :  { %3613 = vmatprep.subr.bf16.mxu0 %v2950_v20  ;;  %3941 = vmatprep.subr.bf16.mxu1 %v2952_v55  ;;  %v3030_v20 = vld [vmem:[#allocation2 + $0x14c8] sm:$0xff]  ;;  %v3032_v55 = vld [vmem:[#allocation2 + $0x14d8] sm:$0xff] }
 0x77f   :  { %3614 = vmatpush1.bf16.msra.mxu0 %v2949_v0  ;;  %3942 = vmatpush1.bf16.msra.mxu1 %v2951_v44  ;;  %v3029_v0 = vld [vmem:[#allocation2 + $0x14c0] sm:$0xff]  ;;  %v3031_v44 = vld [vmem:[#allocation2 + $0x14d0] sm:$0xff] }
 0x780   :  { %3615 = vmatprep.subr.bf16.mxu0 %v2958_v42  ;;  %3943 = vmatprep.subr.bf16.mxu1 %v2960_v33  ;;  %v3038_v42 = vld [vmem:[#allocation2 + $0x1508] sm:$0xff]  ;;  %v3040_v33 = vld [vmem:[#allocation2 + $0x1518] sm:$0xff] }
 0x783   :  { %3616 = vmatpush1.bf16.msra.mxu0 %v2957_v3  ;;  %3944 = vmatpush1.bf16.msra.mxu1 %v2959_v46  ;;  %v3037_v3 = vld [vmem:[#allocation2 + $0x1500] sm:$0xff]  ;;  %v3039_v46 = vld [vmem:[#allocation2 + $0x1510] sm:$0xff] }
 0x784   :  { %3617 = vmatprep.subr.bf16.mxu0 %v2966_v4  ;;  %3945 = vmatprep.subr.bf16.mxu1 %v2968_v19  ;;  %v3046_v4 = vld [vmem:[#allocation2 + $0x1548] sm:$0xff]  ;;  %v3048_v19 = vld [vmem:[#allocation2 + $0x1558] sm:$0xff] }
 0x787   :  { %3618 = vmatpush1.bf16.msra.mxu0 %v2965_v62  ;;  %3946 = vmatpush1.bf16.msra.mxu1 %v2967_v60  ;;  %v3045_v62 = vld [vmem:[#allocation2 + $0x1540] sm:$0xff]  ;;  %v3047_v60 = vld [vmem:[#allocation2 + $0x1550] sm:$0xff] }
 0x788   :  { %3619 = vmatprep.subr.bf16.mxu0 %v2974_v5  ;;  %3947 = vmatprep.subr.bf16.mxu1 %v2976_v6  ;;  %v3054_v5 = vld [vmem:[#allocation2 + $0x1588] sm:$0xff]  ;;  %v3056_v6 = vld [vmem:[#allocation2 + $0x1598] sm:$0xff] }
 0x78b   :  { %3620 = vmatpush1.bf16.msra.mxu0 %v2973_v48  ;;  %3948 = vmatpush1.bf16.msra.mxu1 %v2975_v11  ;;  %v3053_v48 = vld [vmem:[#allocation2 + $0x1580] sm:$0xff]  ;;  %v3055_v11 = vld [vmem:[#allocation2 + $0x1590] sm:$0xff] }
 0x78c   :  { %3621 = vmatprep.subr.bf16.mxu0 %v2982_v24  ;;  %3949 = vmatprep.subr.bf16.mxu1 %v2984_v25  ;;  %v3062_v24 = vld [vmem:[#allocation2 + $0x15c8] sm:$0xff]  ;;  %v3064_v25 = vld [vmem:[#allocation2 + $0x15d8] sm:$0xff] }
 0x78f   :  { %3622 = vmatpush1.bf16.msra.mxu0 %v2981_v63  ;;  %3950 = vmatpush1.bf16.msra.mxu1 %v2983_v39  ;;  %v3061_v63 = vld [vmem:[#allocation2 + $0x15c0] sm:$0xff]  ;;  %v3063_v39 = vld [vmem:[#allocation2 + $0x15d0] sm:$0xff] }
 0x790   :  { %3623 = vmatprep.subr.bf16.mxu0 %v2990_v45  ;;  %3951 = vmatprep.subr.bf16.mxu1 %v2992_v30  ;;  %v3070_v45 = vld [vmem:[#allocation2 + $0x1608] sm:$0xff]  ;;  %v3072_v30 = vld [vmem:[#allocation2 + $0x1618] sm:$0xff] }
 0x793   :  { %3624 = vmatpush1.bf16.msra.mxu0 %v2989_v49  ;;  %3952 = vmatpush1.bf16.msra.mxu1 %v2991_v40  ;;  %v3069_v49 = vld [vmem:[#allocation2 + $0x1600] sm:$0xff]  ;;  %v3071_v40 = vld [vmem:[#allocation2 + $0x1610] sm:$0xff] }
 0x794   :  { %3625 = vmatprep.subr.bf16.mxu0 %v2998_v9  ;;  %3953 = vmatprep.subr.bf16.mxu1 %v3000_v41  ;;  %v3078_v9 = vld [vmem:[#allocation2 + $0x1648] sm:$0xff]  ;;  %v3080_v41 = vld [vmem:[#allocation2 + $0x1658] sm:$0xff] }
 0x797   :  { %3626 = vmatpush1.bf16.msra.mxu0 %v2997_v16  ;;  %3954 = vmatpush1.bf16.msra.mxu1 %v2999_v54  ;;  %v3077_v16 = vld [vmem:[#allocation2 + $0x1640] sm:$0xff]  ;;  %v3079_v54 = vld [vmem:[#allocation2 + $0x1650] sm:$0xff] }
 0x798   :  { %3636 = vmatprep.subr.bf16.mxu0 %v3006_v7  ;;  %3964 = vmatprep.subr.bf16.mxu1 %v3008_v28  ;;  %v3086_v7 = vld [vmem:[#allocation2 + $0x1688] sm:$0xff]  ;;  %v3088_v28 = vld [vmem:[#allocation2 + $0x1698] sm:$0xff] }
 0x79a   :  { %3628 = vmatmul.mubr.bf16.vlgmr.msra.gmra.mrb[80].mxu0 %v9568_v43  ;;  %3956 = vmatmul.mubr.bf16.vlgmr.msra.gmra.mrb[112].mxu1 %v9568_v43 }
 0x79b   :  { %3637 = vmatpush1.bf16.msra.mxu0 %v3005_v22  ;;  %3965 = vmatpush1.bf16.msra.mxu1 %v3007_v32  ;;  %v3085_v22 = vld [vmem:[#allocation2 + $0x1680] sm:$0xff]  ;;  %v3087_v32 = vld [vmem:[#allocation2 + $0x1690] sm:$0xff] }
 0x79c   :  { %3638 = vmatprep.subr.bf16.mxu0 %v3014_v56  ;;  %3966 = vmatprep.subr.bf16.mxu1 %v3016_v13  ;;  %v3094_v56 = vld [vmem:[#allocation2 + $0x16c8] sm:$0xff]  ;;  %v3096_v13 = vld [vmem:[#allocation2 + $0x16d8] sm:$0xff] }
 0x79d   :  { %3668 = vmatprep.mubr.bf16.mxu0 %v9572_v61  ;;  %3996 = vmatprep.mubr.bf16.mxu1 %v9572_v61 }
 0x79f   :  { %3639 = vmatpush1.bf16.msra.mxu0 %v3013_v37  ;;  %3967 = vmatpush1.bf16.msra.mxu1 %v3015_v1  ;;  %v3093_v37 = vld [vmem:[#allocation2 + $0x16c0] sm:$0xff]  ;;  %v3095_v1 = vld [vmem:[#allocation2 + $0x16d0] sm:$0xff] }
 0x7a0   :  { %3640 = vmatprep.subr.bf16.mxu0 %v3022_v38  ;;  %3968 = vmatprep.subr.bf16.mxu1 %v3024_v26  ;;  %v3102_v38 = vld [vmem:[#allocation2 + $0x1708] sm:$0xff]  ;;  %v3104_v26 = vld [vmem:[#allocation2 + $0x1718] sm:$0xff] }
 0x7a3   :  { %3641 = vmatpush1.bf16.msra.mxu0 %v3021_v21  ;;  %3969 = vmatpush1.bf16.msra.mxu1 %v3023_v36  ;;  %v3101_v21 = vld [vmem:[#allocation2 + $0x1700] sm:$0xff]  ;;  %v3103_v36 = vld [vmem:[#allocation2 + $0x1710] sm:$0xff] }
 0x7a4   :  { %3642 = vmatprep.subr.bf16.mxu0 %v3030_v20  ;;  %3970 = vmatprep.subr.bf16.mxu1 %v3032_v55  ;;  %v3110_v20 = vld [vmem:[#allocation2 + $0x1748] sm:$0xff]  ;;  %v3112_v55 = vld [vmem:[#allocation2 + $0x1758] sm:$0xff] }
 0x7a7   :  { %3643 = vmatpush1.bf16.msra.mxu0 %v3029_v0  ;;  %3971 = vmatpush1.bf16.msra.mxu1 %v3031_v44  ;;  %v3109_v0 = vld [vmem:[#allocation2 + $0x1740] sm:$0xff]  ;;  %v3111_v44 = vld [vmem:[#allocation2 + $0x1750] sm:$0xff] }
 0x7a8   :  { %3644 = vmatprep.subr.bf16.mxu0 %v3038_v42  ;;  %3972 = vmatprep.subr.bf16.mxu1 %v3040_v33  ;;  %v3118_v42 = vld [vmem:[#allocation2 + $0x1788] sm:$0xff]  ;;  %v3120_v33 = vld [vmem:[#allocation2 + $0x1798] sm:$0xff] }
 0x7ab   :  { %3645 = vmatpush1.bf16.msra.mxu0 %v3037_v3  ;;  %3973 = vmatpush1.bf16.msra.mxu1 %v3039_v46  ;;  %v3117_v3 = vld [vmem:[#allocation2 + $0x1780] sm:$0xff]  ;;  %v3119_v46 = vld [vmem:[#allocation2 + $0x1790] sm:$0xff] }
 0x7ac   :  { %3646 = vmatprep.subr.bf16.mxu0 %v3046_v4  ;;  %3974 = vmatprep.subr.bf16.mxu1 %v3048_v19  ;;  %v3126_v4 = vld [vmem:[#allocation2 + $0x17c8] sm:$0xff]  ;;  %v3128_v19 = vld [vmem:[#allocation2 + $0x17d8] sm:$0xff] }
 0x7af   :  { %3647 = vmatpush1.bf16.msra.mxu0 %v3045_v62  ;;  %3975 = vmatpush1.bf16.msra.mxu1 %v3047_v60  ;;  %v3125_v62 = vld [vmem:[#allocation2 + $0x17c0] sm:$0xff]  ;;  %v3127_v60 = vld [vmem:[#allocation2 + $0x17d0] sm:$0xff] }
 0x7b0   :  { %3648 = vmatprep.subr.bf16.mxu0 %v3054_v5  ;;  %3976 = vmatprep.subr.bf16.mxu1 %v3056_v6  ;;  %v3134_v5 = vld [vmem:[#allocation2 + $0x1808] sm:$0xff]  ;;  %v3136_v6 = vld [vmem:[#allocation2 + $0x1818] sm:$0xff] }
 0x7b3   :  { %3649 = vmatpush1.bf16.msra.mxu0 %v3053_v48  ;;  %3977 = vmatpush1.bf16.msra.mxu1 %v3055_v11  ;;  %v9580_v48 = vpack.c.bf16 %v9420_v47, %v9420_v47  ;;  %v3133_v11 = vld [vmem:[#allocation2 + $0x1800] sm:$0xff] }
 0x7b4   :  { %3650 = vmatprep.subr.bf16.mxu0 %v3062_v24  ;;  %3978 = vmatprep.subr.bf16.mxu1 %v3064_v25  ;;  %v3135_v24 = vld [vmem:[#allocation2 + $0x1810] sm:$0xff]  ;;  %v3142_v25 = vld [vmem:[#allocation2 + $0x1848] sm:$0xff]  ;;  %v3141_v47 = vld [vmem:[#allocation2 + $0x1840] sm:$0xff] }
 0x7b7   :  { %3651 = vmatpush1.bf16.msra.mxu0 %v3061_v63  ;;  %3979 = vmatpush1.bf16.msra.mxu1 %v3063_v39  ;;  %v3144_v63 = vld [vmem:[#allocation2 + $0x1858] sm:$0xff]  ;;  %v9584_v39 = vpack.c.bf16 %v9507_v31, %v9507_v31  ;;  %v3149_v31 = vld [vmem:[#allocation2 + $0x1880] sm:$0xff] }
 0x7b8   :  { %3652 = vmatprep.subr.bf16.mxu0 %v3070_v45  ;;  %3980 = vmatprep.subr.bf16.mxu1 %v3072_v30  ;;  %v3143_v45 = vld [vmem:[#allocation2 + $0x1850] sm:$0xff]  ;;  %v3150_v30 = vld [vmem:[#allocation2 + $0x1888] sm:$0xff] }
 0x7bb   :  { %3653 = vmatpush1.bf16.msra.mxu0 %v3069_v49  ;;  %3981 = vmatpush1.bf16.msra.mxu1 %v3071_v40  ;;  %v3152_v49 = vld [vmem:[#allocation2 + $0x1898] sm:$0xff]  ;;  %v3151_v40 = vld [vmem:[#allocation2 + $0x1890] sm:$0xff] }
 0x7bc   :  { %3654 = vmatprep.subr.bf16.mxu0 %v3078_v9  ;;  %3982 = vmatprep.subr.bf16.mxu1 %v3080_v41  ;;  %v3158_v9 = vld [vmem:[#allocation2 + $0x18c8] sm:$0xff]  ;;  %v3160_v41 = vld [vmem:[#allocation2 + $0x18d8] sm:$0xff] }
 0x7bf   :  { %3655 = vmatpush1.bf16.msra.mxu0 %v3077_v16  ;;  %3983 = vmatpush1.bf16.msra.mxu1 %v3079_v54  ;;  %v3157_v16 = vld [vmem:[#allocation2 + $0x18c0] sm:$0xff]  ;;  %v3159_v54 = vld [vmem:[#allocation2 + $0x18d0] sm:$0xff] }
 0x7c0   :  { %3656 = vmatprep.subr.bf16.mxu0 %v3086_v7  ;;  %3984 = vmatprep.subr.bf16.mxu1 %v3088_v28  ;;  %v3166_v7 = vld [vmem:[#allocation2 + $0x1908] sm:$0xff]  ;;  %v3168_v28 = vld [vmem:[#allocation2 + $0x1918] sm:$0xff] }
 0x7c3   :  { %3657 = vmatpush1.bf16.msra.mxu0 %v3085_v22  ;;  %3985 = vmatpush1.bf16.msra.mxu1 %v3087_v32  ;;  %v3165_v22 = vld [vmem:[#allocation2 + $0x1900] sm:$0xff]  ;;  %v3167_v32 = vld [vmem:[#allocation2 + $0x1910] sm:$0xff] }
 0x7c4   :  { %3658 = vmatprep.subr.bf16.mxu0 %v3094_v56  ;;  %3986 = vmatprep.subr.bf16.mxu1 %v3096_v13  ;;  %v3174_v56 = vld [vmem:[#allocation2 + $0x1948] sm:$0xff]  ;;  %v3176_v13 = vld [vmem:[#allocation2 + $0x1958] sm:$0xff] }
 0x7c7   :  { %3659 = vmatpush1.bf16.msra.mxu0 %v3093_v37  ;;  %3987 = vmatpush1.bf16.msra.mxu1 %v3095_v1  ;;  %v3173_v37 = vld [vmem:[#allocation2 + $0x1940] sm:$0xff]  ;;  %v3175_v1 = vld [vmem:[#allocation2 + $0x1950] sm:$0xff] }
 0x7c8   :  { %3660 = vmatprep.subr.bf16.mxu0 %v3102_v38  ;;  %3988 = vmatprep.subr.bf16.mxu1 %v3104_v26  ;;  %v3182_v38 = vld [vmem:[#allocation2 + $0x1988] sm:$0xff]  ;;  %v3184_v26 = vld [vmem:[#allocation2 + $0x1998] sm:$0xff] }
 0x7cb   :  { %3661 = vmatpush1.bf16.msra.mxu0 %v3101_v21  ;;  %3989 = vmatpush1.bf16.msra.mxu1 %v3103_v36  ;;  %v3181_v21 = vld [vmem:[#allocation2 + $0x1980] sm:$0xff]  ;;  %v3183_v36 = vld [vmem:[#allocation2 + $0x1990] sm:$0xff] }
 0x7cc   :  { %3662 = vmatprep.subr.bf16.mxu0 %v3110_v20  ;;  %3990 = vmatprep.subr.bf16.mxu1 %v3112_v55  ;;  %v3190_v20 = vld [vmem:[#allocation2 + $0x19c8] sm:$0xff]  ;;  %v3192_v55 = vld [vmem:[#allocation2 + $0x19d8] sm:$0xff] }
 0x7cf   :  { %3663 = vmatpush1.bf16.msra.mxu0 %v3109_v0  ;;  %3991 = vmatpush1.bf16.msra.mxu1 %v3111_v44  ;;  %v3189_v0 = vld [vmem:[#allocation2 + $0x19c0] sm:$0xff]  ;;  %v3191_v44 = vld [vmem:[#allocation2 + $0x19d0] sm:$0xff] }
 0x7d0   :  { %3664 = vmatprep.subr.bf16.mxu0 %v3118_v42  ;;  %3992 = vmatprep.subr.bf16.mxu1 %v3120_v33  ;;  %v3198_v42 = vld [vmem:[#allocation2 + $0x1a08] sm:$0xff]  ;;  %v3200_v33 = vld [vmem:[#allocation2 + $0x1a18] sm:$0xff] }
 0x7d3   :  { %3665 = vmatpush1.bf16.msra.mxu0 %v3117_v3  ;;  %3993 = vmatpush1.bf16.msra.mxu1 %v3119_v46  ;;  %v3197_v3 = vld [vmem:[#allocation2 + $0x1a00] sm:$0xff]  ;;  %v3199_v46 = vld [vmem:[#allocation2 + $0x1a10] sm:$0xff] }
 0x7d4   :  { %3666 = vmatprep.subr.bf16.mxu0 %v3126_v4  ;;  %3994 = vmatprep.subr.bf16.mxu1 %v3128_v19  ;;  %v3206_v4 = vld [vmem:[#allocation2 + $0x1a48] sm:$0xff]  ;;  %v3208_v19 = vld [vmem:[#allocation2 + $0x1a58] sm:$0xff] }
 0x7d7   :  { %3667 = vmatpush1.bf16.msra.mxu0 %v3125_v62  ;;  %3995 = vmatpush1.bf16.msra.mxu1 %v3127_v60  ;;  %v3205_v62 = vld [vmem:[#allocation2 + $0x1a40] sm:$0xff]  ;;  %v3207_v60 = vld [vmem:[#allocation2 + $0x1a50] sm:$0xff] }
 0x7d8   :  { %3677 = vmatprep.subr.bf16.mxu0 %v3134_v5  ;;  %4005 = vmatprep.subr.bf16.mxu1 %v3136_v6  ;;  %v3214_v5 = vld [vmem:[#allocation2 + $0x1a88] sm:$0xff]  ;;  %v3216_v6 = vld [vmem:[#allocation2 + $0x1a98] sm:$0xff] }
 0x7da   :  { %3669 = vmatmul.mubr.bf16.vlgmr.msra.gmra.mrb[80].mxu0 %v9580_v48  ;;  %3997 = vmatmul.mubr.bf16.vlgmr.msra.gmra.mrb[112].mxu1 %v9580_v48 }
 0x7db   :  { %3678 = vmatpush1.bf16.msra.mxu0 %v3133_v11  ;;  %4006 = vmatpush1.bf16.msra.mxu1 %v3135_v24  ;;  %v3213_v11 = vld [vmem:[#allocation2 + $0x1a80] sm:$0xff]  ;;  %v3215_v24 = vld [vmem:[#allocation2 + $0x1a90] sm:$0xff] }
 0x7dc   :  { %3679 = vmatprep.subr.bf16.mxu0 %v3142_v25  ;;  %4007 = vmatprep.subr.bf16.mxu1 %v3144_v63  ;;  %v3222_v25 = vld [vmem:[#allocation2 + $0x1ac8] sm:$0xff]  ;;  %v3224_v63 = vld [vmem:[#allocation2 + $0x1ad8] sm:$0xff] }
 0x7dd   :  { %3709 = vmatprep.mubr.bf16.mxu0 %v9584_v39  ;;  %4037 = vmatprep.mubr.bf16.mxu1 %v9584_v39 }
 0x7df   :  { %3680 = vmatpush1.bf16.msra.mxu0 %v3141_v47  ;;  %4008 = vmatpush1.bf16.msra.mxu1 %v3143_v45  ;;  %v3221_v47 = vld [vmem:[#allocation2 + $0x1ac0] sm:$0xff]  ;;  %v3223_v45 = vld [vmem:[#allocation2 + $0x1ad0] sm:$0xff] }
 0x7e0   :  { %3681 = vmatprep.subr.bf16.mxu0 %v3150_v30  ;;  %4009 = vmatprep.subr.bf16.mxu1 %v3152_v49  ;;  %v3230_v30 = vld [vmem:[#allocation2 + $0x1b08] sm:$0xff]  ;;  %v3232_v49 = vld [vmem:[#allocation2 + $0x1b18] sm:$0xff] }
 0x7e3   :  { %3682 = vmatpush1.bf16.msra.mxu0 %v3149_v31  ;;  %4010 = vmatpush1.bf16.msra.mxu1 %v3151_v40  ;;  %v3229_v31 = vld [vmem:[#allocation2 + $0x1b00] sm:$0xff]  ;;  %v3231_v40 = vld [vmem:[#allocation2 + $0x1b10] sm:$0xff] }
 0x7e4   :  { %3683 = vmatprep.subr.bf16.mxu0 %v3158_v9  ;;  %4011 = vmatprep.subr.bf16.mxu1 %v3160_v41  ;;  %v3238_v9 = vld [vmem:[#allocation2 + $0x1b48] sm:$0xff]  ;;  %v3240_v41 = vld [vmem:[#allocation2 + $0x1b58] sm:$0xff] }
 0x7e7   :  { %3684 = vmatpush1.bf16.msra.mxu0 %v3157_v16  ;;  %4012 = vmatpush1.bf16.msra.mxu1 %v3159_v54  ;;  %v3237_v16 = vld [vmem:[#allocation2 + $0x1b40] sm:$0xff]  ;;  %v3239_v54 = vld [vmem:[#allocation2 + $0x1b50] sm:$0xff] }
 0x7e8   :  { %3685 = vmatprep.subr.bf16.mxu0 %v3166_v7  ;;  %4013 = vmatprep.subr.bf16.mxu1 %v3168_v28  ;;  %v3246_v7 = vld [vmem:[#allocation2 + $0x1b88] sm:$0xff]  ;;  %v3248_v28 = vld [vmem:[#allocation2 + $0x1b98] sm:$0xff] }
 0x7eb   :  { %3686 = vmatpush1.bf16.msra.mxu0 %v3165_v22  ;;  %4014 = vmatpush1.bf16.msra.mxu1 %v3167_v32  ;;  %v3245_v22 = vld [vmem:[#allocation2 + $0x1b80] sm:$0xff]  ;;  %v3247_v32 = vld [vmem:[#allocation2 + $0x1b90] sm:$0xff] }
 0x7ec   :  { %3687 = vmatprep.subr.bf16.mxu0 %v3174_v56  ;;  %4015 = vmatprep.subr.bf16.mxu1 %v3176_v13  ;;  %v3254_v56 = vld [vmem:[#allocation2 + $0x1bc8] sm:$0xff]  ;;  %v3256_v13 = vld [vmem:[#allocation2 + $0x1bd8] sm:$0xff] }
 0x7ef   :  { %3688 = vmatpush1.bf16.msra.mxu0 %v3173_v37  ;;  %4016 = vmatpush1.bf16.msra.mxu1 %v3175_v1  ;;  %v3253_v37 = vld [vmem:[#allocation2 + $0x1bc0] sm:$0xff]  ;;  %v3255_v1 = vld [vmem:[#allocation2 + $0x1bd0] sm:$0xff] }
 0x7f0   :  { %3689 = vmatprep.subr.bf16.mxu0 %v3182_v38  ;;  %4017 = vmatprep.subr.bf16.mxu1 %v3184_v26  ;;  %v3262_v38 = vld [vmem:[#allocation2 + $0x1c08] sm:$0xff]  ;;  %v3264_v26 = vld [vmem:[#allocation2 + $0x1c18] sm:$0xff] }
 0x7f3   :  { %3690 = vmatpush1.bf16.msra.mxu0 %v3181_v21  ;;  %4018 = vmatpush1.bf16.msra.mxu1 %v3183_v36  ;;  %v9592_v21 = vpack.c.bf16 %v9501_v34, %v9501_v34  ;;  %v3261_v36 = vld [vmem:[#allocation2 + $0x1c00] sm:$0xff] }
 0x7f4   :  { %3691 = vmatprep.subr.bf16.mxu0 %v3190_v20  ;;  %4019 = vmatprep.subr.bf16.mxu1 %v3192_v55  ;;  %v3263_v20 = vld [vmem:[#allocation2 + $0x1c10] sm:$0xff]  ;;  %v3270_v55 = vld [vmem:[#allocation2 + $0x1c48] sm:$0xff]  ;;  %v3269_v34 = vld [vmem:[#allocation2 + $0x1c40] sm:$0xff] }
 0x7f7   :  { %3692 = vmatpush1.bf16.msra.mxu0 %v3189_v0  ;;  %4020 = vmatpush1.bf16.msra.mxu1 %v3191_v44  ;;  %v3272_v0 = vld [vmem:[#allocation2 + $0x1c58] sm:$0xff]  ;;  %v9596_v44 = vpack.c.bf16 %v9510_v23, %v9510_v23  ;;  %v3277_v23 = vld [vmem:[#allocation2 + $0x1c80] sm:$0xff] }
 0x7f8   :  { %3693 = vmatprep.subr.bf16.mxu0 %v3198_v42  ;;  %4021 = vmatprep.subr.bf16.mxu1 %v3200_v33  ;;  %v3271_v42 = vld [vmem:[#allocation2 + $0x1c50] sm:$0xff]  ;;  %v3278_v33 = vld [vmem:[#allocation2 + $0x1c88] sm:$0xff] }
 0x7fb   :  { %3694 = vmatpush1.bf16.msra.mxu0 %v3197_v3  ;;  %4022 = vmatpush1.bf16.msra.mxu1 %v3199_v46  ;;  %v3280_v3 = vld [vmem:[#allocation2 + $0x1c98] sm:$0xff]  ;;  %v3279_v46 = vld [vmem:[#allocation2 + $0x1c90] sm:$0xff] }
 0x7fc   :  { %3695 = vmatprep.subr.bf16.mxu0 %v3206_v4  ;;  %4023 = vmatprep.subr.bf16.mxu1 %v3208_v19  ;;  %v3286_v4 = vld [vmem:[#allocation2 + $0x1cc8] sm:$0xff]  ;;  %v3288_v19 = vld [vmem:[#allocation2 + $0x1cd8] sm:$0xff] }
 0x7ff   :  { %3696 = vmatpush1.bf16.msra.mxu0 %v3205_v62  ;;  %4024 = vmatpush1.bf16.msra.mxu1 %v3207_v60  ;;  %v3285_v62 = vld [vmem:[#allocation2 + $0x1cc0] sm:$0xff]  ;;  %v3287_v60 = vld [vmem:[#allocation2 + $0x1cd0] sm:$0xff] }
 0x800   :  { %3697 = vmatprep.subr.bf16.mxu0 %v3214_v5  ;;  %4025 = vmatprep.subr.bf16.mxu1 %v3216_v6  ;;  %v3294_v5 = vld [vmem:[#allocation2 + $0x1d08] sm:$0xff]  ;;  %v3296_v6 = vld [vmem:[#allocation2 + $0x1d18] sm:$0xff] }
 0x803   :  { %3698 = vmatpush1.bf16.msra.mxu0 %v3213_v11  ;;  %4026 = vmatpush1.bf16.msra.mxu1 %v3215_v24  ;;  %v3293_v11 = vld [vmem:[#allocation2 + $0x1d00] sm:$0xff]  ;;  %v3295_v24 = vld [vmem:[#allocation2 + $0x1d10] sm:$0xff] }
 0x804   :  { %3699 = vmatprep.subr.bf16.mxu0 %v3222_v25  ;;  %4027 = vmatprep.subr.bf16.mxu1 %v3224_v63  ;;  %v3302_v25 = vld [vmem:[#allocation2 + $0x1d48] sm:$0xff]  ;;  %v3304_v63 = vld [vmem:[#allocation2 + $0x1d58] sm:$0xff] }
 0x807   :  { %3700 = vmatpush1.bf16.msra.mxu0 %v3221_v47  ;;  %4028 = vmatpush1.bf16.msra.mxu1 %v3223_v45  ;;  %v3301_v47 = vld [vmem:[#allocation2 + $0x1d40] sm:$0xff]  ;;  %v3303_v45 = vld [vmem:[#allocation2 + $0x1d50] sm:$0xff] }
 0x808   :  { %3701 = vmatprep.subr.bf16.mxu0 %v3230_v30  ;;  %4029 = vmatprep.subr.bf16.mxu1 %v3232_v49  ;;  %v3310_v30 = vld [vmem:[#allocation2 + $0x1d88] sm:$0xff]  ;;  %v3312_v49 = vld [vmem:[#allocation2 + $0x1d98] sm:$0xff] }
 0x80b   :  { %3702 = vmatpush1.bf16.msra.mxu0 %v3229_v31  ;;  %4030 = vmatpush1.bf16.msra.mxu1 %v3231_v40  ;;  %v3309_v31 = vld [vmem:[#allocation2 + $0x1d80] sm:$0xff]  ;;  %v3311_v40 = vld [vmem:[#allocation2 + $0x1d90] sm:$0xff] }
 0x80c   :  { %3703 = vmatprep.subr.bf16.mxu0 %v3238_v9  ;;  %4031 = vmatprep.subr.bf16.mxu1 %v3240_v41  ;;  %v3318_v9 = vld [vmem:[#allocation2 + $0x1dc8] sm:$0xff]  ;;  %v3320_v41 = vld [vmem:[#allocation2 + $0x1dd8] sm:$0xff] }
 0x80f   :  { %3704 = vmatpush1.bf16.msra.mxu0 %v3237_v16  ;;  %4032 = vmatpush1.bf16.msra.mxu1 %v3239_v54  ;;  %v3317_v16 = vld [vmem:[#allocation2 + $0x1dc0] sm:$0xff]  ;;  %v3319_v54 = vld [vmem:[#allocation2 + $0x1dd0] sm:$0xff] }
 0x810   :  { %3705 = vmatprep.subr.bf16.mxu0 %v3246_v7  ;;  %4033 = vmatprep.subr.bf16.mxu1 %v3248_v28  ;;  %v3326_v7 = vld [vmem:[#allocation2 + $0x1e08] sm:$0xff]  ;;  %v3328_v28 = vld [vmem:[#allocation2 + $0x1e18] sm:$0xff] }
 0x813   :  { %3706 = vmatpush1.bf16.msra.mxu0 %v3245_v22  ;;  %4034 = vmatpush1.bf16.msra.mxu1 %v3247_v32  ;;  %v3325_v22 = vld [vmem:[#allocation2 + $0x1e00] sm:$0xff]  ;;  %v3327_v32 = vld [vmem:[#allocation2 + $0x1e10] sm:$0xff] }
 0x814   :  { %3707 = vmatprep.subr.bf16.mxu0 %v3254_v56  ;;  %4035 = vmatprep.subr.bf16.mxu1 %v3256_v13  ;;  %v3334_v56 = vld [vmem:[#allocation2 + $0x1e48] sm:$0xff]  ;;  %v3336_v13 = vld [vmem:[#allocation2 + $0x1e58] sm:$0xff] }
 0x817   :  { %3708 = vmatpush1.bf16.msra.mxu0 %v3253_v37  ;;  %4036 = vmatpush1.bf16.msra.mxu1 %v3255_v1  ;;  %v3333_v37 = vld [vmem:[#allocation2 + $0x1e40] sm:$0xff]  ;;  %v3335_v1 = vld [vmem:[#allocation2 + $0x1e50] sm:$0xff] }
 0x818   :  { %3718 = vmatprep.subr.bf16.mxu0 %v3262_v38  ;;  %4046 = vmatprep.subr.bf16.mxu1 %v3264_v26  ;;  %v3342_v38 = vld [vmem:[#allocation2 + $0x1e88] sm:$0xff]  ;;  %v3344_v26 = vld [vmem:[#allocation2 + $0x1e98] sm:$0xff] }
 0x81a   :  { %3710 = vmatmul.mubr.bf16.vlgmr.msra.gmra.mrb[80].mxu0 %v9592_v21  ;;  %4038 = vmatmul.mubr.bf16.vlgmr.msra.gmra.mrb[112].mxu1 %v9592_v21 }
 0x81b   :  { %3719 = vmatpush1.bf16.msra.mxu0 %v3261_v36  ;;  %4047 = vmatpush1.bf16.msra.mxu1 %v3263_v20  ;;  %v3341_v36 = vld [vmem:[#allocation2 + $0x1e80] sm:$0xff]  ;;  %v3343_v20 = vld [vmem:[#allocation2 + $0x1e90] sm:$0xff] }
 0x81c   :  { %3720 = vmatprep.subr.bf16.mxu0 %v3270_v55  ;;  %4048 = vmatprep.subr.bf16.mxu1 %v3272_v0  ;;  %v3350_v55 = vld [vmem:[#allocation2 + $0x1ec8] sm:$0xff]  ;;  %v3352_v0 = vld [vmem:[#allocation2 + $0x1ed8] sm:$0xff] }
 0x81d   :  { %3750 = vmatprep.mubr.bf16.mxu0 %v9596_v44  ;;  %4078 = vmatprep.mubr.bf16.mxu1 %v9596_v44 }
 0x81f   :  { %3721 = vmatpush1.bf16.msra.mxu0 %v3269_v34  ;;  %4049 = vmatpush1.bf16.msra.mxu1 %v3271_v42  ;;  %v3349_v34 = vld [vmem:[#allocation2 + $0x1ec0] sm:$0xff]  ;;  %v3351_v42 = vld [vmem:[#allocation2 + $0x1ed0] sm:$0xff] }
 0x820   :  { %3722 = vmatprep.subr.bf16.mxu0 %v3278_v33  ;;  %4050 = vmatprep.subr.bf16.mxu1 %v3280_v3  ;;  %v3358_v33 = vld [vmem:[#allocation2 + $0x1f08] sm:$0xff]  ;;  %v3360_v3 = vld [vmem:[#allocation2 + $0x1f18] sm:$0xff] }
 0x823   :  { %3723 = vmatpush1.bf16.msra.mxu0 %v3277_v23  ;;  %4051 = vmatpush1.bf16.msra.mxu1 %v3279_v46  ;;  %v3357_v23 = vld [vmem:[#allocation2 + $0x1f00] sm:$0xff]  ;;  %v3359_v46 = vld [vmem:[#allocation2 + $0x1f10] sm:$0xff] }
 0x824   :  { %3724 = vmatprep.subr.bf16.mxu0 %v3286_v4  ;;  %4052 = vmatprep.subr.bf16.mxu1 %v3288_v19  ;;  %v3366_v4 = vld [vmem:[#allocation2 + $0x1f48] sm:$0xff]  ;;  %v3368_v19 = vld [vmem:[#allocation2 + $0x1f58] sm:$0xff] }
 0x827   :  { %3725 = vmatpush1.bf16.msra.mxu0 %v3285_v62  ;;  %4053 = vmatpush1.bf16.msra.mxu1 %v3287_v60  ;;  %v3365_v62 = vld [vmem:[#allocation2 + $0x1f40] sm:$0xff]  ;;  %v3367_v60 = vld [vmem:[#allocation2 + $0x1f50] sm:$0xff] }
 0x828   :  { %3726 = vmatprep.subr.bf16.mxu0 %v3294_v5  ;;  %4054 = vmatprep.subr.bf16.mxu1 %v3296_v6  ;;  %v3374_v5 = vld [vmem:[#allocation2 + $0x1f88] sm:$0xff]  ;;  %v3376_v6 = vld [vmem:[#allocation2 + $0x1f98] sm:$0xff] }
 0x82b   :  { %3727 = vmatpush1.bf16.msra.mxu0 %v3293_v11  ;;  %4055 = vmatpush1.bf16.msra.mxu1 %v3295_v24  ;;  %v3373_v11 = vld [vmem:[#allocation2 + $0x1f80] sm:$0xff]  ;;  %v3375_v24 = vld [vmem:[#allocation2 + $0x1f90] sm:$0xff] }
 0x82c   :  { %3728 = vmatprep.subr.bf16.mxu0 %v3302_v25  ;;  %4056 = vmatprep.subr.bf16.mxu1 %v3304_v63  ;;  %v3382_v25 = vld [vmem:[#allocation2 + $0x1fc8] sm:$0xff]  ;;  %v3384_v63 = vld [vmem:[#allocation2 + $0x1fd8] sm:$0xff] }
 0x82f   :  { %3729 = vmatpush1.bf16.msra.mxu0 %v3301_v47  ;;  %4057 = vmatpush1.bf16.msra.mxu1 %v3303_v45  ;;  %v3381_v47 = vld [vmem:[#allocation2 + $0x1fc0] sm:$0xff]  ;;  %v3383_v45 = vld [vmem:[#allocation2 + $0x1fd0] sm:$0xff] }
 0x830   :  { %3730 = vmatprep.subr.bf16.mxu0 %v3310_v30  ;;  %4058 = vmatprep.subr.bf16.mxu1 %v3312_v49  ;;  %v2370_v30 = vld [vmem:[#allocation2 + $0x28] sm:$0xff]  ;;  %v2372_v49 = vld [vmem:[#allocation2 + $0x38] sm:$0xff] }
 0x833   :  { %3731 = vmatpush1.bf16.msra.mxu0 %v3309_v31  ;;  %4059 = vmatpush1.bf16.msra.mxu1 %v3311_v40  ;;  %v9604_v31 = vpack.c.bf16 %v9504_v35, %v9504_v35  ;;  %v2369_v40 = vld [vmem:[#allocation2 + $0x20] sm:$0xff]  ;;  %v2386_v35 = vld [vmem:[#allocation2 + $0xa8] sm:$0xff] }
 0x834   :  { %3732 = vmatprep.subr.bf16.mxu0 %v3318_v9  ;;  %4060 = vmatprep.subr.bf16.mxu1 %v3320_v41  ;;  %v2371_v9 = vld [vmem:[#allocation2 + $0x30] sm:$0xff]  ;;  %v2378_v41 = vld [vmem:[#allocation2 + $0x68] sm:$0xff] }
 0x837   :  { %3733 = vmatpush1.bf16.msra.mxu0 %v3317_v16  ;;  %4061 = vmatpush1.bf16.msra.mxu1 %v3319_v54  ;;  %v2380_v16 = vld [vmem:[#allocation2 + $0x78] sm:$0xff]  ;;  %v2377_v54 = vld [vmem:[#allocation2 + $0x60] sm:$0xff] }
 0x838   :  { %3734 = vmatprep.subr.bf16.mxu0 %v3326_v7  ;;  %4062 = vmatprep.subr.bf16.mxu1 %v3328_v28  ;;  %v2379_v7 = vld [vmem:[#allocation2 + $0x70] sm:$0xff]  ;;  %v2388_v28 = vld [vmem:[#allocation2 + $0xb8] sm:$0xff] }
 0x83b   :  { %3735 = vmatpush1.bf16.msra.mxu0 %v3325_v22  ;;  %4063 = vmatpush1.bf16.msra.mxu1 %v3327_v32  ;;  %v2385_v22 = vld [vmem:[#allocation2 + $0xa0] sm:$0xff]  ;;  %v2387_v32 = vld [vmem:[#allocation2 + $0xb0] sm:$0xff] }
 0x83c   :  { %3736 = vmatprep.subr.bf16.mxu0 %v3334_v56  ;;  %4064 = vmatprep.subr.bf16.mxu1 %v3336_v13  ;;  %v2394_v56 = vld [vmem:[#allocation2 + $0xe8] sm:$0xff]  ;;  %v2396_v13 = vld [vmem:[#allocation2 + $0xf8] sm:$0xff] }
 0x83f   :  { %3737 = vmatpush1.bf16.msra.mxu0 %v3333_v37  ;;  %4065 = vmatpush1.bf16.msra.mxu1 %v3335_v1  ;;  %v2393_v37 = vld [vmem:[#allocation2 + $0xe0] sm:$0xff]  ;;  %v2395_v1 = vld [vmem:[#allocation2 + $0xf0] sm:$0xff] }
 0x840   :  { %3738 = vmatprep.subr.bf16.mxu0 %v3342_v38  ;;  %4066 = vmatprep.subr.bf16.mxu1 %v3344_v26  ;;  %v2402_v38 = vld [vmem:[#allocation2 + $0x128] sm:$0xff]  ;;  %v2404_v26 = vld [vmem:[#allocation2 + $0x138] sm:$0xff] }
 0x843   :  { %3739 = vmatpush1.bf16.msra.mxu0 %v3341_v36  ;;  %4067 = vmatpush1.bf16.msra.mxu1 %v3343_v20  ;;  %v2403_v36 = vld [vmem:[#allocation2 + $0x130] sm:$0xff]  ;;  %v2410_v20 = vld [vmem:[#allocation2 + $0x168] sm:$0xff] }
 0x844   :  { %3740 = vmatprep.subr.bf16.mxu0 %v3350_v55  ;;  %4068 = vmatprep.subr.bf16.mxu1 %v3352_v0  ;;  %v2412_v55 = vld [vmem:[#allocation2 + $0x178] sm:$0xff]  ;;  %v2409_v0 = vld [vmem:[#allocation2 + $0x160] sm:$0xff] }
 0x847   :  { %3741 = vmatpush1.bf16.msra.mxu0 %v3349_v34  ;;  %4069 = vmatpush1.bf16.msra.mxu1 %v3351_v42  ;;  %v2411_v34 = vld [vmem:[#allocation2 + $0x170] sm:$0xff]  ;;  %v2418_v42 = vld [vmem:[#allocation2 + $0x1a8] sm:$0xff] }
 0x848   :  { %3742 = vmatprep.subr.bf16.mxu0 %v3358_v33  ;;  %4070 = vmatprep.subr.bf16.mxu1 %v3360_v3  ;;  %v2420_v33 = vld [vmem:[#allocation2 + $0x1b8] sm:$0xff]  ;;  %v2417_v3 = vld [vmem:[#allocation2 + $0x1a0] sm:$0xff] }
 0x84b   :  { %3743 = vmatpush1.bf16.msra.mxu0 %v3357_v23  ;;  %4071 = vmatpush1.bf16.msra.mxu1 %v3359_v46  ;;  %v2419_v23 = vld [vmem:[#allocation2 + $0x1b0] sm:$0xff]  ;;  %v2426_v46 = vld [vmem:[#allocation2 + $0x1e8] sm:$0xff] }
 0x84c   :  { %3744 = vmatprep.subr.bf16.mxu0 %v3366_v4  ;;  %4072 = vmatprep.subr.bf16.mxu1 %v3368_v19  ;;  %v2428_v4 = vld [vmem:[#allocation2 + $0x1f8] sm:$0xff]  ;;  %v2425_v19 = vld [vmem:[#allocation2 + $0x1e0] sm:$0xff] }
 0x84f   :  { %3745 = vmatpush1.bf16.msra.mxu0 %v3365_v62  ;;  %4073 = vmatpush1.bf16.msra.mxu1 %v3367_v60  ;;  %v2427_v62 = vld [vmem:[#allocation2 + $0x1f0] sm:$0xff]  ;;  %v2434_v60 = vld [vmem:[#allocation2 + $0x228] sm:$0xff] }
 0x850   :  { %3746 = vmatprep.subr.bf16.mxu0 %v3374_v5  ;;  %4074 = vmatprep.subr.bf16.mxu1 %v3376_v6  ;;  %v2436_v5 = vld [vmem:[#allocation2 + $0x238] sm:$0xff]  ;;  %v2433_v6 = vld [vmem:[#allocation2 + $0x220] sm:$0xff] }
 0x853   :  { %3747 = vmatpush1.bf16.msra.mxu0 %v3373_v11  ;;  %4075 = vmatpush1.bf16.msra.mxu1 %v3375_v24  ;;  %v2435_v11 = vld [vmem:[#allocation2 + $0x230] sm:$0xff]  ;;  %v2442_v24 = vld [vmem:[#allocation2 + $0x268] sm:$0xff] }
 0x854   :  { %3748 = vmatprep.subr.bf16.mxu0 %v3382_v25  ;;  %4076 = vmatprep.subr.bf16.mxu1 %v3384_v63  ;;  %v2444_v25 = vld [vmem:[#allocation2 + $0x278] sm:$0xff]  ;;  %v2441_v63 = vld [vmem:[#allocation2 + $0x260] sm:$0xff] }
 0x857   :  { %3749 = vmatpush1.bf16.msra.mxu0 %v3381_v47  ;;  %4077 = vmatpush1.bf16.msra.mxu1 %v3383_v45  ;;  %v2443_v47 = vld [vmem:[#allocation2 + $0x270] sm:$0xff]  ;;  %v2450_v45 = vld [vmem:[#allocation2 + $0x2a8] sm:$0xff] }
 0x858   :  { %4087 = vmatprep.subr.bf16.mxu0 %v2370_v30  ;;  %4415 = vmatprep.subr.bf16.mxu1 %v2372_v49  ;;  %v2452_v30 = vld [vmem:[#allocation2 + $0x2b8] sm:$0xff]  ;;  %v2449_v49 = vld [vmem:[#allocation2 + $0x2a0] sm:$0xff] }
 0x85a   :  { %3751 = vmatmul.mubr.bf16.vlgmr.msra.gmra.mrb[80].mxu0 %v9604_v31  ;;  %4079 = vmatmul.mubr.bf16.vlgmr.msra.gmra.mrb[112].mxu1 %v9604_v31 }
 0x85b   :  { %4088 = vmatpush1.bf16.msra.mxu0 %v2369_v40  ;;  %4416 = vmatpush1.bf16.msra.mxu1 %v2371_v9  ;;  %v2451_v40 = vld [vmem:[#allocation2 + $0x2b0] sm:$0xff]  ;;  %v2458_v9 = vld [vmem:[#allocation2 + $0x2e8] sm:$0xff] }
 0x85c   :  { %4089 = vmatprep.subr.bf16.mxu0 %v2378_v41  ;;  %4417 = vmatprep.subr.bf16.mxu1 %v2380_v16  ;;  %v2460_v41 = vld [vmem:[#allocation2 + $0x2f8] sm:$0xff]  ;;  %v2457_v16 = vld [vmem:[#allocation2 + $0x2e0] sm:$0xff] }
 0x85d   :  { %4119 = vmatprep.mubr.bf16.mxu0 %v9514_v53  ;;  %4447 = vmatprep.mubr.bf16.mxu1 %v9514_v53  ;;  %v2401_v53 = vld [vmem:[#allocation2 + $0x120] sm:$0xff] }
 0x85f   :  { %4090 = vmatpush1.bf16.msra.mxu0 %v2377_v54  ;;  %4418 = vmatpush1.bf16.msra.mxu1 %v2379_v7  ;;  %v2459_v54 = vld [vmem:[#allocation2 + $0x2f0] sm:$0xff]  ;;  %v2466_v7 = vld [vmem:[#allocation2 + $0x328] sm:$0xff] }
 0x860   :  { %4091 = vmatprep.subr.bf16.mxu0 %v2386_v35  ;;  %4419 = vmatprep.subr.bf16.mxu1 %v2388_v28  ;;  %v2468_v35 = vld [vmem:[#allocation2 + $0x338] sm:$0xff]  ;;  %v2465_v28 = vld [vmem:[#allocation2 + $0x320] sm:$0xff] }
 0x863   :  { %4092 = vmatpush1.bf16.msra.mxu0 %v2385_v22  ;;  %4420 = vmatpush1.bf16.msra.mxu1 %v2387_v32  ;;  %v2467_v22 = vld [vmem:[#allocation2 + $0x330] sm:$0xff]  ;;  %v2474_v32 = vld [vmem:[#allocation2 + $0x368] sm:$0xff] }
 0x864   :  { %4093 = vmatprep.subr.bf16.mxu0 %v2394_v56  ;;  %4421 = vmatprep.subr.bf16.mxu1 %v2396_v13  ;;  %v2476_v56 = vld [vmem:[#allocation2 + $0x378] sm:$0xff]  ;;  %v2473_v13 = vld [vmem:[#allocation2 + $0x360] sm:$0xff] }
 0x867   :  { %4094 = vmatpush1.bf16.msra.mxu0 %v2393_v37  ;;  %4422 = vmatpush1.bf16.msra.mxu1 %v2395_v1  ;;  %v2475_v37 = vld [vmem:[#allocation2 + $0x370] sm:$0xff]  ;;  %v2482_v1 = vld [vmem:[#allocation2 + $0x3a8] sm:$0xff] }
 0x868   :  { %4095 = vmatprep.subr.bf16.mxu0 %v2402_v38  ;;  %4423 = vmatprep.subr.bf16.mxu1 %v2404_v26  ;;  %v2484_v38 = vld [vmem:[#allocation2 + $0x3b8] sm:$0xff]  ;;  %v2481_v26 = vld [vmem:[#allocation2 + $0x3a0] sm:$0xff] }
 0x86b   :  { %4096 = vmatpush1.bf16.msra.mxu0 %v2401_v53  ;;  %4424 = vmatpush1.bf16.msra.mxu1 %v2403_v36  ;;  %v2483_v53 = vld [vmem:[#allocation2 + $0x3b0] sm:$0xff]  ;;  %v2490_v36 = vld [vmem:[#allocation2 + $0x3e8] sm:$0xff] }
 0x86c   :  { %4097 = vmatprep.subr.bf16.mxu0 %v2410_v20  ;;  %4425 = vmatprep.subr.bf16.mxu1 %v2412_v55  ;;  %v2492_v20 = vld [vmem:[#allocation2 + $0x3f8] sm:$0xff]  ;;  %v2489_v55 = vld [vmem:[#allocation2 + $0x3e0] sm:$0xff] }
 0x86f   :  { %4098 = vmatpush1.bf16.msra.mxu0 %v2409_v0  ;;  %4426 = vmatpush1.bf16.msra.mxu1 %v2411_v34  ;;  %v2491_v0 = vld [vmem:[#allocation2 + $0x3f0] sm:$0xff]  ;;  %v2498_v34 = vld [vmem:[#allocation2 + $0x428] sm:$0xff] }
 0x870   :  { %4099 = vmatprep.subr.bf16.mxu0 %v2418_v42  ;;  %4427 = vmatprep.subr.bf16.mxu1 %v2420_v33  ;;  %v2500_v42 = vld [vmem:[#allocation2 + $0x438] sm:$0xff]  ;;  %v2497_v33 = vld [vmem:[#allocation2 + $0x420] sm:$0xff] }
 0x873   :  { %4100 = vmatpush1.bf16.msra.mxu0 %v2417_v3  ;;  %4428 = vmatpush1.bf16.msra.mxu1 %v2419_v23  ;;  %v2499_v3 = vld [vmem:[#allocation2 + $0x430] sm:$0xff]  ;;  %v2506_v23 = vld [vmem:[#allocation2 + $0x468] sm:$0xff] }
 0x874   :  { %4101 = vmatprep.subr.bf16.mxu0 %v2426_v46  ;;  %4429 = vmatprep.subr.bf16.mxu1 %v2428_v4  ;;  %v2508_v46 = vld [vmem:[#allocation2 + $0x478] sm:$0xff]  ;;  %v2505_v4 = vld [vmem:[#allocation2 + $0x460] sm:$0xff] }
 0x877   :  { %4102 = vmatpush1.bf16.msra.mxu0 %v2425_v19  ;;  %4430 = vmatpush1.bf16.msra.mxu1 %v2427_v62  ;;  %v2507_v19 = vld [vmem:[#allocation2 + $0x470] sm:$0xff]  ;;  %v2514_v62 = vld [vmem:[#allocation2 + $0x4a8] sm:$0xff] }
 0x878   :  { %4103 = vmatprep.subr.bf16.mxu0 %v2434_v60  ;;  %4431 = vmatprep.subr.bf16.mxu1 %v2436_v5  ;;  %v2516_v60 = vld [vmem:[#allocation2 + $0x4b8] sm:$0xff]  ;;  %v2513_v5 = vld [vmem:[#allocation2 + $0x4a0] sm:$0xff] }
 0x87b   :  { %4104 = vmatpush1.bf16.msra.mxu0 %v2433_v6  ;;  %4432 = vmatpush1.bf16.msra.mxu1 %v2435_v11  ;;  %v2515_v6 = vld [vmem:[#allocation2 + $0x4b0] sm:$0xff]  ;;  %v2522_v11 = vld [vmem:[#allocation2 + $0x4e8] sm:$0xff] }
 0x87c   :  { %4105 = vmatprep.subr.bf16.mxu0 %v2442_v24  ;;  %4433 = vmatprep.subr.bf16.mxu1 %v2444_v25  ;;  %v2521_v24 = vld [vmem:[#allocation2 + $0x4e0] sm:$0xff]  ;;  %v2523_v25 = vld [vmem:[#allocation2 + $0x4f0] sm:$0xff] }
 0x87f   :  { %4106 = vmatpush1.bf16.msra.mxu0 %v2441_v63  ;;  %4434 = vmatpush1.bf16.msra.mxu1 %v2443_v47  ;;  %v2530_v63 = vld [vmem:[#allocation2 + $0x528] sm:$0xff]  ;;  %v2532_v47 = vld [vmem:[#allocation2 + $0x538] sm:$0xff] }
 0x880   :  { %4107 = vmatprep.subr.bf16.mxu0 %v2450_v45  ;;  %4435 = vmatprep.subr.bf16.mxu1 %v2452_v30  ;;  %v2531_v45 = vld [vmem:[#allocation2 + $0x530] sm:$0xff]  ;;  %v2538_v30 = vld [vmem:[#allocation2 + $0x568] sm:$0xff] }
 0x883   :  { %4108 = vmatpush1.bf16.msra.mxu0 %v2449_v49  ;;  %4436 = vmatpush1.bf16.msra.mxu1 %v2451_v40  ;;  %v2540_v49 = vld [vmem:[#allocation2 + $0x578] sm:$0xff]  ;;  %v2537_v40 = vld [vmem:[#allocation2 + $0x560] sm:$0xff] }
 0x884   :  { %4109 = vmatprep.subr.bf16.mxu0 %v2458_v9  ;;  %4437 = vmatprep.subr.bf16.mxu1 %v2460_v41  ;;  %v2539_v9 = vld [vmem:[#allocation2 + $0x570] sm:$0xff]  ;;  %v2546_v41 = vld [vmem:[#allocation2 + $0x5a8] sm:$0xff] }
 0x887   :  { %4110 = vmatpush1.bf16.msra.mxu0 %v2457_v16  ;;  %4438 = vmatpush1.bf16.msra.mxu1 %v2459_v54  ;;  %v2548_v16 = vld [vmem:[#allocation2 + $0x5b8] sm:$0xff]  ;;  %v2545_v54 = vld [vmem:[#allocation2 + $0x5a0] sm:$0xff] }
 0x888   :  { %4111 = vmatprep.subr.bf16.mxu0 %v2466_v7  ;;  %4439 = vmatprep.subr.bf16.mxu1 %v2468_v35  ;;  %v2547_v7 = vld [vmem:[#allocation2 + $0x5b0] sm:$0xff]  ;;  %v2554_v35 = vld [vmem:[#allocation2 + $0x5e8] sm:$0xff] }
 0x88b   :  { %4112 = vmatpush1.bf16.msra.mxu0 %v2465_v28  ;;  %4440 = vmatpush1.bf16.msra.mxu1 %v2467_v22  ;;  %v2556_v28 = vld [vmem:[#allocation2 + $0x5f8] sm:$0xff]  ;;  %v2553_v22 = vld [vmem:[#allocation2 + $0x5e0] sm:$0xff] }
 0x88c   :  { %4113 = vmatprep.subr.bf16.mxu0 %v2474_v32  ;;  %4441 = vmatprep.subr.bf16.mxu1 %v2476_v56  ;;  %v2555_v32 = vld [vmem:[#allocation2 + $0x5f0] sm:$0xff]  ;;  %v2562_v56 = vld [vmem:[#allocation2 + $0x628] sm:$0xff] }
 0x88f   :  { %4114 = vmatpush1.bf16.msra.mxu0 %v2473_v13  ;;  %4442 = vmatpush1.bf16.msra.mxu1 %v2475_v37  ;;  %v2564_v13 = vld [vmem:[#allocation2 + $0x638] sm:$0xff]  ;;  %v2561_v37 = vld [vmem:[#allocation2 + $0x620] sm:$0xff] }
 0x890   :  { %4115 = vmatprep.subr.bf16.mxu0 %v2482_v1  ;;  %4443 = vmatprep.subr.bf16.mxu1 %v2484_v38  ;;  %v2563_v1 = vld [vmem:[#allocation2 + $0x630] sm:$0xff]  ;;  %v2570_v38 = vld [vmem:[#allocation2 + $0x668] sm:$0xff] }
 0x893   :  { %4116 = vmatpush1.bf16.msra.mxu0 %v2481_v26  ;;  %4444 = vmatpush1.bf16.msra.mxu1 %v2483_v53  ;;  %v2572_v26 = vld [vmem:[#allocation2 + $0x678] sm:$0xff]  ;;  %v2569_v53 = vld [vmem:[#allocation2 + $0x660] sm:$0xff] }
 0x894   :  { %4117 = vmatprep.subr.bf16.mxu0 %v2490_v36  ;;  %4445 = vmatprep.subr.bf16.mxu1 %v2492_v20  ;;  %v2571_v36 = vld [vmem:[#allocation2 + $0x670] sm:$0xff]  ;;  %v2578_v20 = vld [vmem:[#allocation2 + $0x6a8] sm:$0xff] }
 0x897   :  { %4118 = vmatpush1.bf16.msra.mxu0 %v2489_v55  ;;  %4446 = vmatpush1.bf16.msra.mxu1 %v2491_v0  ;;  %v2580_v55 = vld [vmem:[#allocation2 + $0x6b8] sm:$0xff]  ;;  %v2577_v0 = vld [vmem:[#allocation2 + $0x6a0] sm:$0xff] }
 0x898   :  { %4128 = vmatprep.subr.bf16.mxu0 %v2498_v34  ;;  %4456 = vmatprep.subr.bf16.mxu1 %v2500_v42  ;;  %v2579_v34 = vld [vmem:[#allocation2 + $0x6b0] sm:$0xff]  ;;  %v2586_v42 = vld [vmem:[#allocation2 + $0x6e8] sm:$0xff] }
 0x89a   :  { %4120 = vmatmul.mubr.bf16.vlgmr.msra.gmra.mrb[84].mxu0 %v9520_v27  ;;  %4448 = vmatmul.mubr.bf16.vlgmr.msra.gmra.mrb[116].mxu1 %v9520_v27  ;;  %v2524_v27 = vld [vmem:[#allocation2 + $0x4f8] sm:$0xff] }
 0x89b   :  { %4129 = vmatpush1.bf16.msra.mxu0 %v2497_v33  ;;  %4457 = vmatpush1.bf16.msra.mxu1 %v2499_v3  ;;  %v2588_v33 = vld [vmem:[#allocation2 + $0x6f8] sm:$0xff]  ;;  %v2585_v3 = vld [vmem:[#allocation2 + $0x6e0] sm:$0xff] }
 0x89c   :  { %4130 = vmatprep.subr.bf16.mxu0 %v2506_v23  ;;  %4458 = vmatprep.subr.bf16.mxu1 %v2508_v46  ;;  %v2587_v23 = vld [vmem:[#allocation2 + $0x6f0] sm:$0xff]  ;;  %v2594_v46 = vld [vmem:[#allocation2 + $0x728] sm:$0xff] }
 0x89d   :  { %4160 = vmatprep.mubr.bf16.mxu0 %v9524_v29  ;;  %4488 = vmatprep.mubr.bf16.mxu1 %v9524_v29  ;;  %v2529_v29 = vld [vmem:[#allocation2 + $0x520] sm:$0xff] }
 0x89f   :  { %4131 = vmatpush1.bf16.msra.mxu0 %v2505_v4  ;;  %4459 = vmatpush1.bf16.msra.mxu1 %v2507_v19  ;;  %v2596_v4 = vld [vmem:[#allocation2 + $0x738] sm:$0xff]  ;;  %v2593_v19 = vld [vmem:[#allocation2 + $0x720] sm:$0xff] }
 0x8a0   :  { %4132 = vmatprep.subr.bf16.mxu0 %v2514_v62  ;;  %4460 = vmatprep.subr.bf16.mxu1 %v2516_v60  ;;  %v2595_v62 = vld [vmem:[#allocation2 + $0x730] sm:$0xff]  ;;  %v2602_v60 = vld [vmem:[#allocation2 + $0x768] sm:$0xff] }
 0x8a3   :  { %4133 = vmatpush1.bf16.msra.mxu0 %v2513_v5  ;;  %4461 = vmatpush1.bf16.msra.mxu1 %v2515_v6  ;;  %v2604_v5 = vld [vmem:[#allocation2 + $0x778] sm:$0xff]  ;;  %v2601_v6 = vld [vmem:[#allocation2 + $0x760] sm:$0xff] }
 0x8a4   :  { %4134 = vmatprep.subr.bf16.mxu0 %v2522_v11  ;;  %4462 = vmatprep.subr.bf16.mxu1 %v2524_v27  ;;  %v2603_v11 = vld [vmem:[#allocation2 + $0x770] sm:$0xff]  ;;  %v2610_v27 = vld [vmem:[#allocation2 + $0x7a8] sm:$0xff] }
 0x8a7   :  { %4135 = vmatpush1.bf16.msra.mxu0 %v2521_v24  ;;  %4463 = vmatpush1.bf16.msra.mxu1 %v2523_v25  ;;  %v2612_v24 = vld [vmem:[#allocation2 + $0x7b8] sm:$0xff]  ;;  %v2609_v25 = vld [vmem:[#allocation2 + $0x7a0] sm:$0xff] }
 0x8a8   :  { %4136 = vmatprep.subr.bf16.mxu0 %v2530_v63  ;;  %4464 = vmatprep.subr.bf16.mxu1 %v2532_v47  ;;  %v2611_v63 = vld [vmem:[#allocation2 + $0x7b0] sm:$0xff]  ;;  %v2618_v47 = vld [vmem:[#allocation2 + $0x7e8] sm:$0xff] }
 0x8ab   :  { %4137 = vmatpush1.bf16.msra.mxu0 %v2529_v29  ;;  %4465 = vmatpush1.bf16.msra.mxu1 %v2531_v45  ;;  %v2620_v29 = vld [vmem:[#allocation2 + $0x7f8] sm:$0xff]  ;;  %v2617_v45 = vld [vmem:[#allocation2 + $0x7e0] sm:$0xff] }
 0x8ac   :  { %4138 = vmatprep.subr.bf16.mxu0 %v2538_v30  ;;  %4466 = vmatprep.subr.bf16.mxu1 %v2540_v49  ;;  %v2619_v30 = vld [vmem:[#allocation2 + $0x7f0] sm:$0xff]  ;;  %v2626_v49 = vld [vmem:[#allocation2 + $0x828] sm:$0xff] }
 0x8af   :  { %4139 = vmatpush1.bf16.msra.mxu0 %v2537_v40  ;;  %4467 = vmatpush1.bf16.msra.mxu1 %v2539_v9  ;;  %v2628_v40 = vld [vmem:[#allocation2 + $0x838] sm:$0xff]  ;;  %v2625_v9 = vld [vmem:[#allocation2 + $0x820] sm:$0xff] }
 0x8b0   :  { %4140 = vmatprep.subr.bf16.mxu0 %v2546_v41  ;;  %4468 = vmatprep.subr.bf16.mxu1 %v2548_v16  ;;  %v2627_v41 = vld [vmem:[#allocation2 + $0x830] sm:$0xff]  ;;  %v2634_v16 = vld [vmem:[#allocation2 + $0x868] sm:$0xff] }
 0x8b3   :  { %4141 = vmatpush1.bf16.msra.mxu0 %v2545_v54  ;;  %4469 = vmatpush1.bf16.msra.mxu1 %v2547_v7  ;;  %v2636_v54 = vld [vmem:[#allocation2 + $0x878] sm:$0xff]  ;;  %v2633_v7 = vld [vmem:[#allocation2 + $0x860] sm:$0xff] }
 0x8b4   :  { %4142 = vmatprep.subr.bf16.mxu0 %v2554_v35  ;;  %4470 = vmatprep.subr.bf16.mxu1 %v2556_v28  ;;  %v2635_v35 = vld [vmem:[#allocation2 + $0x870] sm:$0xff]  ;;  %v2642_v28 = vld [vmem:[#allocation2 + $0x8a8] sm:$0xff] }
 0x8b7   :  { %4143 = vmatpush1.bf16.msra.mxu0 %v2553_v22  ;;  %4471 = vmatpush1.bf16.msra.mxu1 %v2555_v32  ;;  %v2644_v22 = vld [vmem:[#allocation2 + $0x8b8] sm:$0xff]  ;;  %v2641_v32 = vld [vmem:[#allocation2 + $0x8a0] sm:$0xff] }
 0x8b8   :  { %4144 = vmatprep.subr.bf16.mxu0 %v2562_v56  ;;  %4472 = vmatprep.subr.bf16.mxu1 %v2564_v13  ;;  %v2643_v56 = vld [vmem:[#allocation2 + $0x8b0] sm:$0xff]  ;;  %v2650_v13 = vld [vmem:[#allocation2 + $0x8e8] sm:$0xff] }
 0x8bb   :  { %4145 = vmatpush1.bf16.msra.mxu0 %v2561_v37  ;;  %4473 = vmatpush1.bf16.msra.mxu1 %v2563_v1  ;;  %v2649_v37 = vld [vmem:[#allocation2 + $0x8e0] sm:$0xff]  ;;  %v2651_v1 = vld [vmem:[#allocation2 + $0x8f0] sm:$0xff] }
 0x8bc   :  { %4146 = vmatprep.subr.bf16.mxu0 %v2570_v38  ;;  %4474 = vmatprep.subr.bf16.mxu1 %v2572_v26  ;;  %v2658_v38 = vld [vmem:[#allocation2 + $0x928] sm:$0xff]  ;;  %v2660_v26 = vld [vmem:[#allocation2 + $0x938] sm:$0xff] }
 0x8bf   :  { %4147 = vmatpush1.bf16.msra.mxu0 %v2569_v53  ;;  %4475 = vmatpush1.bf16.msra.mxu1 %v2571_v36  ;;  %v2659_v53 = vld [vmem:[#allocation2 + $0x930] sm:$0xff]  ;;  %v2666_v36 = vld [vmem:[#allocation2 + $0x968] sm:$0xff] }
 0x8c0   :  { %4148 = vmatprep.subr.bf16.mxu0 %v2578_v20  ;;  %4476 = vmatprep.subr.bf16.mxu1 %v2580_v55  ;;  %v2668_v20 = vld [vmem:[#allocation2 + $0x978] sm:$0xff]  ;;  %v2665_v55 = vld [vmem:[#allocation2 + $0x960] sm:$0xff] }
 0x8c3   :  { %4149 = vmatpush1.bf16.msra.mxu0 %v2577_v0  ;;  %4477 = vmatpush1.bf16.msra.mxu1 %v2579_v34  ;;  %v2667_v0 = vld [vmem:[#allocation2 + $0x970] sm:$0xff]  ;;  %v2674_v34 = vld [vmem:[#allocation2 + $0x9a8] sm:$0xff] }
 0x8c4   :  { %4150 = vmatprep.subr.bf16.mxu0 %v2586_v42  ;;  %4478 = vmatprep.subr.bf16.mxu1 %v2588_v33  ;;  %v2676_v42 = vld [vmem:[#allocation2 + $0x9b8] sm:$0xff]  ;;  %v2673_v33 = vld [vmem:[#allocation2 + $0x9a0] sm:$0xff] }
 0x8c7   :  { %4151 = vmatpush1.bf16.msra.mxu0 %v2585_v3  ;;  %4479 = vmatpush1.bf16.msra.mxu1 %v2587_v23  ;;  %v2675_v3 = vld [vmem:[#allocation2 + $0x9b0] sm:$0xff]  ;;  %v2682_v23 = vld [vmem:[#allocation2 + $0x9e8] sm:$0xff] }
 0x8c8   :  { %4152 = vmatprep.subr.bf16.mxu0 %v2594_v46  ;;  %4480 = vmatprep.subr.bf16.mxu1 %v2596_v4  ;;  %v2684_v46 = vld [vmem:[#allocation2 + $0x9f8] sm:$0xff]  ;;  %v2681_v4 = vld [vmem:[#allocation2 + $0x9e0] sm:$0xff] }
 0x8cb   :  { %4153 = vmatpush1.bf16.msra.mxu0 %v2593_v19  ;;  %4481 = vmatpush1.bf16.msra.mxu1 %v2595_v62  ;;  %v2683_v19 = vld [vmem:[#allocation2 + $0x9f0] sm:$0xff]  ;;  %v2690_v62 = vld [vmem:[#allocation2 + $0xa28] sm:$0xff] }
 0x8cc   :  { %4154 = vmatprep.subr.bf16.mxu0 %v2602_v60  ;;  %4482 = vmatprep.subr.bf16.mxu1 %v2604_v5  ;;  %v2692_v60 = vld [vmem:[#allocation2 + $0xa38] sm:$0xff]  ;;  %v2689_v5 = vld [vmem:[#allocation2 + $0xa20] sm:$0xff] }
 0x8cf   :  { %4155 = vmatpush1.bf16.msra.mxu0 %v2601_v6  ;;  %4483 = vmatpush1.bf16.msra.mxu1 %v2603_v11  ;;  %v2691_v6 = vld [vmem:[#allocation2 + $0xa30] sm:$0xff]  ;;  %v2698_v11 = vld [vmem:[#allocation2 + $0xa68] sm:$0xff] }
 0x8d0   :  { %4156 = vmatprep.subr.bf16.mxu0 %v2610_v27  ;;  %4484 = vmatprep.subr.bf16.mxu1 %v2612_v24  ;;  %v2700_v27 = vld [vmem:[#allocation2 + $0xa78] sm:$0xff]  ;;  %v2697_v24 = vld [vmem:[#allocation2 + $0xa60] sm:$0xff] }
 0x8d3   :  { %4157 = vmatpush1.bf16.msra.mxu0 %v2609_v25  ;;  %4485 = vmatpush1.bf16.msra.mxu1 %v2611_v63  ;;  %v2699_v25 = vld [vmem:[#allocation2 + $0xa70] sm:$0xff]  ;;  %v2706_v63 = vld [vmem:[#allocation2 + $0xaa8] sm:$0xff] }
 0x8d4   :  { %4158 = vmatprep.subr.bf16.mxu0 %v2618_v47  ;;  %4486 = vmatprep.subr.bf16.mxu1 %v2620_v29  ;;  %v2708_v47 = vld [vmem:[#allocation2 + $0xab8] sm:$0xff]  ;;  %v2705_v29 = vld [vmem:[#allocation2 + $0xaa0] sm:$0xff] }
 0x8d7   :  { %4159 = vmatpush1.bf16.msra.mxu0 %v2617_v45  ;;  %4487 = vmatpush1.bf16.msra.mxu1 %v2619_v30  ;;  %v2707_v45 = vld [vmem:[#allocation2 + $0xab0] sm:$0xff]  ;;  %v2714_v30 = vld [vmem:[#allocation2 + $0xae8] sm:$0xff] }
 0x8d8   :  { %4169 = vmatprep.subr.bf16.mxu0 %v2626_v49  ;;  %4497 = vmatprep.subr.bf16.mxu1 %v2628_v40  ;;  %v2716_v49 = vld [vmem:[#allocation2 + $0xaf8] sm:$0xff]  ;;  %v2713_v40 = vld [vmem:[#allocation2 + $0xae0] sm:$0xff] }
 0x8da   :  { %4161 = vmatmul.mubr.bf16.vlgmr.msra.gmra.mrb[84].mxu0 %v9532_v59  ;;  %4489 = vmatmul.mubr.bf16.vlgmr.msra.gmra.mrb[116].mxu1 %v9532_v59  ;;  %v2652_v59 = vld [vmem:[#allocation2 + $0x8f8] sm:$0xff] }
 0x8db   :  { %4170 = vmatpush1.bf16.msra.mxu0 %v2625_v9  ;;  %4498 = vmatpush1.bf16.msra.mxu1 %v2627_v41  ;;  %v2715_v9 = vld [vmem:[#allocation2 + $0xaf0] sm:$0xff]  ;;  %v2722_v41 = vld [vmem:[#allocation2 + $0xb28] sm:$0xff] }
 0x8dc   :  { %4171 = vmatprep.subr.bf16.mxu0 %v2634_v16  ;;  %4499 = vmatprep.subr.bf16.mxu1 %v2636_v54  ;;  %v2724_v16 = vld [vmem:[#allocation2 + $0xb38] sm:$0xff]  ;;  %v2721_v54 = vld [vmem:[#allocation2 + $0xb20] sm:$0xff] }
 0x8dd   :  { %4201 = vmatprep.mubr.bf16.mxu0 %v9536_v12  ;;  %4529 = vmatprep.mubr.bf16.mxu1 %v9536_v12  ;;  %v2657_v12 = vld [vmem:[#allocation2 + $0x920] sm:$0xff] }
 0x8df   :  { %4172 = vmatpush1.bf16.msra.mxu0 %v2633_v7  ;;  %4500 = vmatpush1.bf16.msra.mxu1 %v2635_v35  ;;  %v2723_v7 = vld [vmem:[#allocation2 + $0xb30] sm:$0xff]  ;;  %v2730_v35 = vld [vmem:[#allocation2 + $0xb68] sm:$0xff] }
 0x8e0   :  { %4173 = vmatprep.subr.bf16.mxu0 %v2642_v28  ;;  %4501 = vmatprep.subr.bf16.mxu1 %v2644_v22  ;;  %v2732_v28 = vld [vmem:[#allocation2 + $0xb78] sm:$0xff]  ;;  %v2729_v22 = vld [vmem:[#allocation2 + $0xb60] sm:$0xff] }
 0x8e3   :  { %4174 = vmatpush1.bf16.msra.mxu0 %v2641_v32  ;;  %4502 = vmatpush1.bf16.msra.mxu1 %v2643_v56  ;;  %v2731_v32 = vld [vmem:[#allocation2 + $0xb70] sm:$0xff]  ;;  %v2738_v56 = vld [vmem:[#allocation2 + $0xba8] sm:$0xff] }
 0x8e4   :  { %4175 = vmatprep.subr.bf16.mxu0 %v2650_v13  ;;  %4503 = vmatprep.subr.bf16.mxu1 %v2652_v59  ;;  %v2740_v13 = vld [vmem:[#allocation2 + $0xbb8] sm:$0xff]  ;;  %v2737_v59 = vld [vmem:[#allocation2 + $0xba0] sm:$0xff] }
 0x8e7   :  { %4176 = vmatpush1.bf16.msra.mxu0 %v2649_v37  ;;  %4504 = vmatpush1.bf16.msra.mxu1 %v2651_v1  ;;  %v2739_v37 = vld [vmem:[#allocation2 + $0xbb0] sm:$0xff]  ;;  %v2746_v1 = vld [vmem:[#allocation2 + $0xbe8] sm:$0xff] }
 0x8e8   :  { %4177 = vmatprep.subr.bf16.mxu0 %v2658_v38  ;;  %4505 = vmatprep.subr.bf16.mxu1 %v2660_v26  ;;  %v2748_v38 = vld [vmem:[#allocation2 + $0xbf8] sm:$0xff]  ;;  %v2745_v26 = vld [vmem:[#allocation2 + $0xbe0] sm:$0xff] }
 0x8eb   :  { %4178 = vmatpush1.bf16.msra.mxu0 %v2657_v12  ;;  %4506 = vmatpush1.bf16.msra.mxu1 %v2659_v53  ;;  %v2747_v12 = vld [vmem:[#allocation2 + $0xbf0] sm:$0xff]  ;;  %v2754_v53 = vld [vmem:[#allocation2 + $0xc28] sm:$0xff] }
 0x8ec   :  { %4179 = vmatprep.subr.bf16.mxu0 %v2666_v36  ;;  %4507 = vmatprep.subr.bf16.mxu1 %v2668_v20  ;;  %v2756_v36 = vld [vmem:[#allocation2 + $0xc38] sm:$0xff]  ;;  %v2753_v20 = vld [vmem:[#allocation2 + $0xc20] sm:$0xff] }
 0x8ef   :  { %4180 = vmatpush1.bf16.msra.mxu0 %v2665_v55  ;;  %4508 = vmatpush1.bf16.msra.mxu1 %v2667_v0  ;;  %v2755_v55 = vld [vmem:[#allocation2 + $0xc30] sm:$0xff]  ;;  %v2762_v0 = vld [vmem:[#allocation2 + $0xc68] sm:$0xff] }
 0x8f0   :  { %4181 = vmatprep.subr.bf16.mxu0 %v2674_v34  ;;  %4509 = vmatprep.subr.bf16.mxu1 %v2676_v42  ;;  %v2764_v34 = vld [vmem:[#allocation2 + $0xc78] sm:$0xff]  ;;  %v2761_v42 = vld [vmem:[#allocation2 + $0xc60] sm:$0xff] }
 0x8f3   :  { %4182 = vmatpush1.bf16.msra.mxu0 %v2673_v33  ;;  %4510 = vmatpush1.bf16.msra.mxu1 %v2675_v3  ;;  %v2763_v33 = vld [vmem:[#allocation2 + $0xc70] sm:$0xff]  ;;  %v2770_v3 = vld [vmem:[#allocation2 + $0xca8] sm:$0xff] }
 0x8f4   :  { %4183 = vmatprep.subr.bf16.mxu0 %v2682_v23  ;;  %4511 = vmatprep.subr.bf16.mxu1 %v2684_v46  ;;  %v2772_v23 = vld [vmem:[#allocation2 + $0xcb8] sm:$0xff]  ;;  %v2769_v46 = vld [vmem:[#allocation2 + $0xca0] sm:$0xff] }
 0x8f7   :  { %4184 = vmatpush1.bf16.msra.mxu0 %v2681_v4  ;;  %4512 = vmatpush1.bf16.msra.mxu1 %v2683_v19  ;;  %v2771_v4 = vld [vmem:[#allocation2 + $0xcb0] sm:$0xff]  ;;  %v2778_v19 = vld [vmem:[#allocation2 + $0xce8] sm:$0xff] }
 0x8f8   :  { %4185 = vmatprep.subr.bf16.mxu0 %v2690_v62  ;;  %4513 = vmatprep.subr.bf16.mxu1 %v2692_v60  ;;  %v2777_v62 = vld [vmem:[#allocation2 + $0xce0] sm:$0xff]  ;;  %v2779_v60 = vld [vmem:[#allocation2 + $0xcf0] sm:$0xff] }
 0x8fb   :  { %4186 = vmatpush1.bf16.msra.mxu0 %v2689_v5  ;;  %4514 = vmatpush1.bf16.msra.mxu1 %v2691_v6  ;;  %v2786_v5 = vld [vmem:[#allocation2 + $0xd28] sm:$0xff]  ;;  %v2788_v6 = vld [vmem:[#allocation2 + $0xd38] sm:$0xff] }
 0x8fc   :  { %4187 = vmatprep.subr.bf16.mxu0 %v2698_v11  ;;  %4515 = vmatprep.subr.bf16.mxu1 %v2700_v27  ;;  %v3389_v11 = vld [vmem:[#allocation25] sm:$0xff] }
 0x8fd   :  { %v2787_v27 = vld [vmem:[#allocation2 + $0xd30] sm:$0xff] }
 0x8ff   :  { %4188 = vmatpush1.bf16.msra.mxu0 %v2697_v24  ;;  %4516 = vmatpush1.bf16.msra.mxu1 %v2699_v25  ;;  %v2794_v24 = vld [vmem:[#allocation2 + $0xd68] sm:$0xff]  ;;  %v2796_v25 = vld [vmem:[#allocation2 + $0xd78] sm:$0xff] }
 0x900   :  { %4189 = vmatprep.subr.bf16.mxu0 %v2706_v63  ;;  %4517 = vmatprep.subr.bf16.mxu1 %v2708_v47  ;;  %v3394_v63 = vrot.slane %v3389_v11, %v9331_v8  ;;  %v3402_v47 = vrot.slane %v3389_v11, %v9334_v52 }
 0x903   :  { %4190 = vmatpush1.bf16.msra.mxu0 %v2705_v29  ;;  %4518 = vmatpush1.bf16.msra.mxu1 %v2707_v45  ;;  %v3398_v29 = vrot.slane %v3389_v11, %v9339_v18  ;;  %v3406_v45 = vrot.slane %v3389_v11, %v9342_v17  ;;  %v2842_v11 = vld [vmem:[#allocation2 + $0xee8] sm:$0xff] }
 0x904   :  { %4191 = vmatprep.subr.bf16.mxu0 %v2714_v30  ;;  %4519 = vmatprep.subr.bf16.mxu1 %v2716_v49  ;;  %v2793_v30 = vld [vmem:[#allocation2 + $0xd60] sm:$0xff]  ;;  %v2795_v49 = vld [vmem:[#allocation2 + $0xd70] sm:$0xff] }
 0x907   :  { %4192 = vmatpush1.bf16.msra.mxu0 %v2713_v40  ;;  %4520 = vmatpush1.bf16.msra.mxu1 %v2715_v9 }
 0x908   :  { %4193 = vmatprep.subr.bf16.mxu0 %v2722_v41  ;;  %4521 = vmatprep.subr.bf16.mxu1 %v2724_v16  ;;  %v2802_v41 = vld [vmem:[#allocation2 + $0xda8] sm:$0xff]  ;;  %v2804_v16 = vld [vmem:[#allocation2 + $0xdb8] sm:$0xff] }
 0x90b   :  { %4194 = vmatpush1.bf16.msra.mxu0 %v2721_v54  ;;  %4522 = vmatpush1.bf16.msra.mxu1 %v2723_v7 }
 0x90c   :  { %4195 = vmatprep.subr.bf16.mxu0 %v2730_v35  ;;  %4523 = vmatprep.subr.bf16.mxu1 %v2732_v28 }
 0x90f   :  { %4196 = vmatpush1.bf16.msra.mxu0 %v2729_v22  ;;  %4524 = vmatpush1.bf16.msra.mxu1 %v2731_v32 }
 0x910   :  { %4197 = vmatprep.subr.bf16.mxu0 %v2738_v56  ;;  %4525 = vmatprep.subr.bf16.mxu1 %v2740_v13 }
 0x913   :  { %4198 = vmatpush1.bf16.msra.mxu0 %v2737_v59  ;;  %4526 = vmatpush1.bf16.msra.mxu1 %v2739_v37 }
 0x914   :  { %4199 = vmatprep.subr.bf16.mxu0 %v2746_v1  ;;  %4527 = vmatprep.subr.bf16.mxu1 %v2748_v38 }
 0x917   :  { %4200 = vmatpush1.bf16.msra.mxu0 %v2745_v26  ;;  %4528 = vmatpush1.bf16.msra.mxu1 %v2747_v12  ;;  %v2801_v26 = vld [vmem:[#allocation2 + $0xda0] sm:$0xff]  ;;  %v2803_v12 = vld [vmem:[#allocation2 + $0xdb0] sm:$0xff] }
 0x918   :  { %4210 = vmatprep.subr.bf16.mxu0 %v2754_v53  ;;  %4538 = vmatprep.subr.bf16.mxu1 %v2756_v36 }
 0x91a   :  { %4202 = vmatmul.mubr.bf16.vlgmr.msra.gmra.mrb[84].mxu0 %v9544_v2  ;;  %4530 = vmatmul.mubr.bf16.vlgmr.msra.gmra.mrb[116].mxu1 %v9544_v2  ;;  %v2780_v2 = vld [vmem:[#allocation2 + $0xcf8] sm:$0xff] }
 0x91b   :  { %4211 = vmatpush1.bf16.msra.mxu0 %v2753_v20  ;;  %4539 = vmatpush1.bf16.msra.mxu1 %v2755_v55  ;;  %v2810_v20 = vld [vmem:[#allocation2 + $0xde8] sm:$0xff]  ;;  %v2812_v55 = vld [vmem:[#allocation2 + $0xdf8] sm:$0xff] }
 0x91c   :  { %4212 = vmatprep.subr.bf16.mxu0 %v2762_v0  ;;  %4540 = vmatprep.subr.bf16.mxu1 %v2764_v34  ;;  %v2809_v0 = vld [vmem:[#allocation2 + $0xde0] sm:$0xff]  ;;  %v2811_v34 = vld [vmem:[#allocation2 + $0xdf0] sm:$0xff] }
 0x91d   :  { %4242 = vmatprep.mubr.bf16.mxu0 %v9548_v10  ;;  %4570 = vmatprep.mubr.bf16.mxu1 %v9548_v10  ;;  %v2785_v10 = vld [vmem:[#allocation2 + $0xd20] sm:$0xff] }
 0x91f   :  { %4213 = vmatpush1.bf16.msra.mxu0 %v2761_v42  ;;  %4541 = vmatpush1.bf16.msra.mxu1 %v2763_v33  ;;  %v2818_v42 = vld [vmem:[#allocation2 + $0xe28] sm:$0xff]  ;;  %v2820_v33 = vld [vmem:[#allocation2 + $0xe38] sm:$0xff] }
 0x920   :  { %4214 = vmatprep.subr.bf16.mxu0 %v2770_v3  ;;  %4542 = vmatprep.subr.bf16.mxu1 %v2772_v23  ;;  %v2817_v3 = vld [vmem:[#allocation2 + $0xe20] sm:$0xff]  ;;  %v2819_v23 = vld [vmem:[#allocation2 + $0xe30] sm:$0xff] }
 0x923   :  { %4215 = vmatpush1.bf16.msra.mxu0 %v2769_v46  ;;  %4543 = vmatpush1.bf16.msra.mxu1 %v2771_v4  ;;  %v2826_v46 = vld [vmem:[#allocation2 + $0xe68] sm:$0xff]  ;;  %v2828_v4 = vld [vmem:[#allocation2 + $0xe78] sm:$0xff] }
 0x924   :  { %4216 = vmatprep.subr.bf16.mxu0 %v2778_v19  ;;  %4544 = vmatprep.subr.bf16.mxu1 %v2780_v2  ;;  %v2825_v19 = vld [vmem:[#allocation2 + $0xe60] sm:$0xff]  ;;  %v2827_v2 = vld [vmem:[#allocation2 + $0xe70] sm:$0xff] }
 0x927   :  { %4217 = vmatpush1.bf16.msra.mxu0 %v2777_v62  ;;  %4545 = vmatpush1.bf16.msra.mxu1 %v2779_v60  ;;  %v2834_v62 = vld [vmem:[#allocation2 + $0xea8] sm:$0xff]  ;;  %v2836_v60 = vld [vmem:[#allocation2 + $0xeb8] sm:$0xff] }
 0x928   :  { %4218 = vmatprep.subr.bf16.mxu0 %v2786_v5  ;;  %4546 = vmatprep.subr.bf16.mxu1 %v2788_v6  ;;  %v2833_v5 = vld [vmem:[#allocation2 + $0xea0] sm:$0xff]  ;;  %v2835_v6 = vld [vmem:[#allocation2 + $0xeb0] sm:$0xff] }
 0x92b   :  { %4219 = vmatpush1.bf16.msra.mxu0 %v2785_v10  ;;  %4547 = vmatpush1.bf16.msra.mxu1 %v2787_v27  ;;  %v2844_v10 = vld [vmem:[#allocation2 + $0xef8] sm:$0xff]  ;;  %v2841_v27 = vld [vmem:[#allocation2 + $0xee0] sm:$0xff] }
 0x92c   :  { %4220 = vmatprep.subr.bf16.mxu0 %v2794_v24  ;;  %4548 = vmatprep.subr.bf16.mxu1 %v2796_v25  ;;  %v2843_v24 = vld [vmem:[#allocation2 + $0xef0] sm:$0xff]  ;;  %v2850_v25 = vld [vmem:[#allocation2 + $0xf28] sm:$0xff] }
 0x92d   :  { %v3752_v40 = vpop.f32.mrb[80].mxu0  ;;  %v4080_v9 = vpop.f32.mrb[112].mxu1 }
 0x92e   :  { %v9626_v54 = vadd.f32 %v3752_v40, %v3394_v63  ;;  %v9628_v7 = vadd.f32 %v4080_v9, %v3402_v47  ;;  %v3754_v35 = vpop.f32.mrb[81].mxu0  ;;  %v4082_v28 = vpop.f32.mrb[113].mxu1  ;;  %v2852_v63 = vld [vmem:[#allocation2 + $0xf38] sm:$0xff]  ;;  %v2849_v47 = vld [vmem:[#allocation2 + $0xf20] sm:$0xff]  ;;  %v2859_v40 = vld [vmem:[#allocation2 + $0xf70] sm:$0xff] }
 0x92f   :  { %v9630_v22 = vadd.f32 %v3754_v35, %v3398_v29  ;;  %v9632_v32 = vadd.f32 %v4082_v28, %v3406_v45  ;;  %v3756_v56 = vpop.f32.mrb[82].mxu0  ;;  %v4084_v13 = vpop.f32.mrb[114].mxu1  ;;  %4221 = vmatpush1.bf16.msra.mxu0 %v2793_v30  ;;  %4549 = vmatpush1.bf16.msra.mxu1 %v2795_v49  ;;  %v2851_v29 = vld [vmem:[#allocation2 + $0xf30] sm:$0xff]  ;;  %v2858_v45 = vld [vmem:[#allocation2 + $0xf68] sm:$0xff]  ;;  %v2860_v30 = vld [vmem:[#allocation2 + $0xf78] sm:$0xff] }
 0x930   :  { %v4743_v59 = vmax.f32 %v9626_v54, 0.0  ;;  %v4745_v37 = vmax.f32 %v9628_v7, 0.0  ;;  %v3757_v1 = vpop.f32.mrb[83].mxu0  ;;  %v4085_v38 = vpop.f32.mrb[115].mxu1  ;;  %4222 = vmatprep.subr.bf16.mxu0 %v2802_v41  ;;  %4550 = vmatprep.subr.bf16.mxu1 %v2804_v16  ;;  %v2857_v49 = vld [vmem:[#allocation2 + $0xf60] sm:$0xff]  ;;  %v2866_v9 = vld [vmem:[#allocation2 + $0xfa8] sm:$0xff] }
 0x931   :  { %v4744_v53 = vmax.f32 %v9630_v22, 0.0  ;;  %v4746_v36 = vmax.f32 %v9632_v32, 0.0  ;;  %v2868_v41 = vld [vmem:[#allocation2 + $0xfb8] sm:$0xff]  ;;  %v2865_v16 = vld [vmem:[#allocation2 + $0xfa0] sm:$0xff]  ;;  %v2867_v35 = vld [vmem:[#allocation2 + $0xfb0] sm:$0xff] }
 0x932   :  { %v2874_v28 = vld [vmem:[#allocation2 + $0xfe8] sm:$0xff]  ;;  %v2876_v56 = vld [vmem:[#allocation2 + $0xff8] sm:$0xff]  ;;  %v2873_v13 = vld [vmem:[#allocation2 + $0xfe0] sm:$0xff] }
 0x933   :  { %4223 = vmatpush1.bf16.msra.mxu0 %v2801_v26  ;;  %4551 = vmatpush1.bf16.msra.mxu1 %v2803_v12  ;;  %v2875_v1 = vld [vmem:[#allocation2 + $0xff0] sm:$0xff]  ;;  %v2882_v38 = vld [vmem:[#allocation2 + $0x1028] sm:$0xff]  ;;  %v2884_v26 = vld [vmem:[#allocation2 + $0x1038] sm:$0xff] }
 0x934   :  { %4224 = vmatprep.subr.bf16.mxu0 %v2810_v20  ;;  %4552 = vmatprep.subr.bf16.mxu1 %v2812_v55  ;;  %v2881_v12 = vld [vmem:[#allocation2 + $0x1020] sm:$0xff]  ;;  %v2883_v20 = vld [vmem:[#allocation2 + $0x1030] sm:$0xff]  ;;  %v2890_v55 = vld [vmem:[#allocation2 + $0x1068] sm:$0xff] }
 0x937   :  { %4225 = vmatpush1.bf16.msra.mxu0 %v2809_v0  ;;  %4553 = vmatpush1.bf16.msra.mxu1 %v2811_v34  ;;  %v2892_v0 = vld [vmem:[#allocation2 + $0x1078] sm:$0xff]  ;;  %v2889_v34 = vld [vmem:[#allocation2 + $0x1060] sm:$0xff] }
 0x938   :  { %4226 = vmatprep.subr.bf16.mxu0 %v2818_v42  ;;  %4554 = vmatprep.subr.bf16.mxu1 %v2820_v33  ;;  %v2891_v42 = vld [vmem:[#allocation2 + $0x1070] sm:$0xff]  ;;  %v2898_v33 = vld [vmem:[#allocation2 + $0x10a8] sm:$0xff] }
 0x93b   :  { %4227 = vmatpush1.bf16.msra.mxu0 %v2817_v3  ;;  %4555 = vmatpush1.bf16.msra.mxu1 %v2819_v23  ;;  %v2900_v3 = vld [vmem:[#allocation2 + $0x10b8] sm:$0xff]  ;;  %v2897_v23 = vld [vmem:[#allocation2 + $0x10a0] sm:$0xff] }
 0x93c   :  { %4228 = vmatprep.subr.bf16.mxu0 %v2826_v46  ;;  %4556 = vmatprep.subr.bf16.mxu1 %v2828_v4  ;;  %v2899_v46 = vld [vmem:[#allocation2 + $0x10b0] sm:$0xff]  ;;  %v2906_v4 = vld [vmem:[#allocation2 + $0x10e8] sm:$0xff] }
 0x93f   :  { %4229 = vmatpush1.bf16.msra.mxu0 %v2825_v19  ;;  %4557 = vmatpush1.bf16.msra.mxu1 %v2827_v2  ;;  %v2905_v19 = vld [vmem:[#allocation2 + $0x10e0] sm:$0xff]  ;;  %v2907_v2 = vld [vmem:[#allocation2 + $0x10f0] sm:$0xff] }
 0x940   :  { %4230 = vmatprep.subr.bf16.mxu0 %v2834_v62  ;;  %4558 = vmatprep.subr.bf16.mxu1 %v2836_v60  ;;  %v2914_v62 = vld [vmem:[#allocation2 + $0x1128] sm:$0xff]  ;;  %v2916_v60 = vld [vmem:[#allocation2 + $0x1138] sm:$0xff] }
 0x943   :  { %4231 = vmatpush1.bf16.msra.mxu0 %v2833_v5  ;;  %4559 = vmatpush1.bf16.msra.mxu1 %v2835_v6  ;;  %v2915_v5 = vld [vmem:[#allocation2 + $0x1130] sm:$0xff]  ;;  %v2922_v6 = vld [vmem:[#allocation2 + $0x1168] sm:$0xff] }
 0x944   :  { %4232 = vmatprep.subr.bf16.mxu0 %v2842_v11  ;;  %4560 = vmatprep.subr.bf16.mxu1 %v2844_v10  ;;  %v2924_v11 = vld [vmem:[#allocation2 + $0x1178] sm:$0xff]  ;;  %v2921_v10 = vld [vmem:[#allocation2 + $0x1160] sm:$0xff] }
 0x947   :  { %4233 = vmatpush1.bf16.msra.mxu0 %v2841_v27  ;;  %4561 = vmatpush1.bf16.msra.mxu1 %v2843_v24  ;;  %v2923_v27 = vld [vmem:[#allocation2 + $0x1170] sm:$0xff]  ;;  %v2930_v24 = vld [vmem:[#allocation2 + $0x11a8] sm:$0xff] }
 0x948   :  { %4234 = vmatprep.subr.bf16.mxu0 %v2850_v25  ;;  %4562 = vmatprep.subr.bf16.mxu1 %v2852_v63  ;;  %v2932_v25 = vld [vmem:[#allocation2 + $0x11b8] sm:$0xff]  ;;  %v2929_v63 = vld [vmem:[#allocation2 + $0x11a0] sm:$0xff] }
 0x94b   :  { %4235 = vmatpush1.bf16.msra.mxu0 %v2849_v47  ;;  %4563 = vmatpush1.bf16.msra.mxu1 %v2851_v29  ;;  %v2931_v47 = vld [vmem:[#allocation2 + $0x11b0] sm:$0xff]  ;;  %v2938_v29 = vld [vmem:[#allocation2 + $0x11e8] sm:$0xff] }
 0x94c   :  { %4236 = vmatprep.subr.bf16.mxu0 %v2858_v45  ;;  %4564 = vmatprep.subr.bf16.mxu1 %v2860_v30  ;;  %v2940_v45 = vld [vmem:[#allocation2 + $0x11f8] sm:$0xff]  ;;  %v2937_v30 = vld [vmem:[#allocation2 + $0x11e0] sm:$0xff] }
 0x94f   :  { %4237 = vmatpush1.bf16.msra.mxu0 %v2857_v49  ;;  %4565 = vmatpush1.bf16.msra.mxu1 %v2859_v40  ;;  %v2939_v49 = vld [vmem:[#allocation2 + $0x11f0] sm:$0xff]  ;;  %v2946_v40 = vld [vmem:[#allocation2 + $0x1228] sm:$0xff] }
 0x950   :  { %4238 = vmatprep.subr.bf16.mxu0 %v2866_v9  ;;  %4566 = vmatprep.subr.bf16.mxu1 %v2868_v41  ;;  %v2948_v9 = vld [vmem:[#allocation2 + $0x1238] sm:$0xff]  ;;  %v2945_v41 = vld [vmem:[#allocation2 + $0x1220] sm:$0xff] }
 0x953   :  { %4239 = vmatpush1.bf16.msra.mxu0 %v2865_v16  ;;  %4567 = vmatpush1.bf16.msra.mxu1 %v2867_v35  ;;  %v2947_v16 = vld [vmem:[#allocation2 + $0x1230] sm:$0xff]  ;;  %v2954_v35 = vld [vmem:[#allocation2 + $0x1268] sm:$0xff] }
 0x954   :  { %4240 = vmatprep.subr.bf16.mxu0 %v2874_v28  ;;  %4568 = vmatprep.subr.bf16.mxu1 %v2876_v56  ;;  %v2956_v28 = vld [vmem:[#allocation2 + $0x1278] sm:$0xff]  ;;  %v2953_v56 = vld [vmem:[#allocation2 + $0x1260] sm:$0xff] }
 0x957   :  { %4241 = vmatpush1.bf16.msra.mxu0 %v2873_v13  ;;  %4569 = vmatpush1.bf16.msra.mxu1 %v2875_v1  ;;  %v2955_v13 = vld [vmem:[#allocation2 + $0x1270] sm:$0xff]  ;;  %v2962_v1 = vld [vmem:[#allocation2 + $0x12a8] sm:$0xff] }
 0x958   :  { %4251 = vmatprep.subr.bf16.mxu0 %v2882_v38  ;;  %4579 = vmatprep.subr.bf16.mxu1 %v2884_v26  ;;  %v2964_v38 = vld [vmem:[#allocation2 + $0x12b8] sm:$0xff]  ;;  %v2961_v26 = vld [vmem:[#allocation2 + $0x12a0] sm:$0xff] }
 0x95a   :  { %4243 = vmatmul.mubr.bf16.vlgmr.msra.gmra.mrb[84].mxu0 %v9556_v15  ;;  %4571 = vmatmul.mubr.bf16.vlgmr.msra.gmra.mrb[116].mxu1 %v9556_v15  ;;  %v2908_v15 = vld [vmem:[#allocation2 + $0x10f8] sm:$0xff] }
 0x95b   :  { %4252 = vmatpush1.bf16.msra.mxu0 %v2881_v12  ;;  %4580 = vmatpush1.bf16.msra.mxu1 %v2883_v20  ;;  %v2963_v12 = vld [vmem:[#allocation2 + $0x12b0] sm:$0xff]  ;;  %v2970_v20 = vld [vmem:[#allocation2 + $0x12e8] sm:$0xff] }
 0x95c   :  { %4253 = vmatprep.subr.bf16.mxu0 %v2890_v55  ;;  %4581 = vmatprep.subr.bf16.mxu1 %v2892_v0  ;;  %v2972_v55 = vld [vmem:[#allocation2 + $0x12f8] sm:$0xff]  ;;  %v2969_v0 = vld [vmem:[#allocation2 + $0x12e0] sm:$0xff] }
 0x95d   :  { %4283 = vmatprep.mubr.bf16.mxu0 %v9560_v14  ;;  %4611 = vmatprep.mubr.bf16.mxu1 %v9560_v14  ;;  %v2913_v14 = vld [vmem:[#allocation2 + $0x1120] sm:$0xff] }
 0x95f   :  { %4254 = vmatpush1.bf16.msra.mxu0 %v2889_v34  ;;  %4582 = vmatpush1.bf16.msra.mxu1 %v2891_v42  ;;  %v2971_v34 = vld [vmem:[#allocation2 + $0x12f0] sm:$0xff]  ;;  %v2978_v42 = vld [vmem:[#allocation2 + $0x1328] sm:$0xff] }
 0x960   :  { %4255 = vmatprep.subr.bf16.mxu0 %v2898_v33  ;;  %4583 = vmatprep.subr.bf16.mxu1 %v2900_v3  ;;  %v2980_v33 = vld [vmem:[#allocation2 + $0x1338] sm:$0xff]  ;;  %v2977_v3 = vld [vmem:[#allocation2 + $0x1320] sm:$0xff] }
 0x963   :  { %4256 = vmatpush1.bf16.msra.mxu0 %v2897_v23  ;;  %4584 = vmatpush1.bf16.msra.mxu1 %v2899_v46  ;;  %v2979_v23 = vld [vmem:[#allocation2 + $0x1330] sm:$0xff]  ;;  %v2986_v46 = vld [vmem:[#allocation2 + $0x1368] sm:$0xff] }
 0x964   :  { %4257 = vmatprep.subr.bf16.mxu0 %v2906_v4  ;;  %4585 = vmatprep.subr.bf16.mxu1 %v2908_v15  ;;  %v2988_v4 = vld [vmem:[#allocation2 + $0x1378] sm:$0xff]  ;;  %v2985_v15 = vld [vmem:[#allocation2 + $0x1360] sm:$0xff] }
 0x967   :  { %4258 = vmatpush1.bf16.msra.mxu0 %v2905_v19  ;;  %4586 = vmatpush1.bf16.msra.mxu1 %v2907_v2  ;;  %v2987_v19 = vld [vmem:[#allocation2 + $0x1370] sm:$0xff]  ;;  %v2994_v2 = vld [vmem:[#allocation2 + $0x13a8] sm:$0xff] }
 0x968   :  { %4259 = vmatprep.subr.bf16.mxu0 %v2914_v62  ;;  %4587 = vmatprep.subr.bf16.mxu1 %v2916_v60  ;;  %v2996_v62 = vld [vmem:[#allocation2 + $0x13b8] sm:$0xff]  ;;  %v2993_v60 = vld [vmem:[#allocation2 + $0x13a0] sm:$0xff] }
 0x96b   :  { %4260 = vmatpush1.bf16.msra.mxu0 %v2913_v14  ;;  %4588 = vmatpush1.bf16.msra.mxu1 %v2915_v5  ;;  %v2995_v14 = vld [vmem:[#allocation2 + $0x13b0] sm:$0xff]  ;;  %v3002_v5 = vld [vmem:[#allocation2 + $0x13e8] sm:$0xff] }
 0x96c   :  { %4261 = vmatprep.subr.bf16.mxu0 %v2922_v6  ;;  %4589 = vmatprep.subr.bf16.mxu1 %v2924_v11  ;;  %v3004_v6 = vld [vmem:[#allocation2 + $0x13f8] sm:$0xff]  ;;  %v3001_v11 = vld [vmem:[#allocation2 + $0x13e0] sm:$0xff] }
 0x96f   :  { %4262 = vmatpush1.bf16.msra.mxu0 %v2921_v10  ;;  %4590 = vmatpush1.bf16.msra.mxu1 %v2923_v27  ;;  %v3003_v10 = vld [vmem:[#allocation2 + $0x13f0] sm:$0xff]  ;;  %v3010_v27 = vld [vmem:[#allocation2 + $0x1428] sm:$0xff] }
 0x970   :  { %4263 = vmatprep.subr.bf16.mxu0 %v2930_v24  ;;  %4591 = vmatprep.subr.bf16.mxu1 %v2932_v25  ;;  %v3012_v24 = vld [vmem:[#allocation2 + $0x1438] sm:$0xff]  ;;  %v3009_v25 = vld [vmem:[#allocation2 + $0x1420] sm:$0xff] }
 0x973   :  { %4264 = vmatpush1.bf16.msra.mxu0 %v2929_v63  ;;  %4592 = vmatpush1.bf16.msra.mxu1 %v2931_v47  ;;  %v3011_v63 = vld [vmem:[#allocation2 + $0x1430] sm:$0xff]  ;;  %v3018_v47 = vld [vmem:[#allocation2 + $0x1468] sm:$0xff] }
 0x974   :  { %4265 = vmatprep.subr.bf16.mxu0 %v2938_v29  ;;  %4593 = vmatprep.subr.bf16.mxu1 %v2940_v45  ;;  %v3020_v29 = vld [vmem:[#allocation2 + $0x1478] sm:$0xff]  ;;  %v3017_v45 = vld [vmem:[#allocation2 + $0x1460] sm:$0xff] }
 0x977   :  { %4266 = vmatpush1.bf16.msra.mxu0 %v2937_v30  ;;  %4594 = vmatpush1.bf16.msra.mxu1 %v2939_v49  ;;  %v3019_v30 = vld [vmem:[#allocation2 + $0x1470] sm:$0xff]  ;;  %v3026_v49 = vld [vmem:[#allocation2 + $0x14a8] sm:$0xff] }
 0x978   :  { %4267 = vmatprep.subr.bf16.mxu0 %v2946_v40  ;;  %4595 = vmatprep.subr.bf16.mxu1 %v2948_v9  ;;  %v3028_v40 = vld [vmem:[#allocation2 + $0x14b8] sm:$0xff]  ;;  %v3025_v9 = vld [vmem:[#allocation2 + $0x14a0] sm:$0xff] }
 0x97b   :  { %4268 = vmatpush1.bf16.msra.mxu0 %v2945_v41  ;;  %4596 = vmatpush1.bf16.msra.mxu1 %v2947_v16  ;;  %v3027_v41 = vld [vmem:[#allocation2 + $0x14b0] sm:$0xff]  ;;  %v3034_v16 = vld [vmem:[#allocation2 + $0x14e8] sm:$0xff] }
 0x97c   :  { %4269 = vmatprep.subr.bf16.mxu0 %v2954_v35  ;;  %4597 = vmatprep.subr.bf16.mxu1 %v2956_v28  ;;  %v3033_v35 = vld [vmem:[#allocation2 + $0x14e0] sm:$0xff]  ;;  %v3035_v28 = vld [vmem:[#allocation2 + $0x14f0] sm:$0xff] }
 0x97f   :  { %4270 = vmatpush1.bf16.msra.mxu0 %v2953_v56  ;;  %4598 = vmatpush1.bf16.msra.mxu1 %v2955_v13  ;;  %v3042_v56 = vld [vmem:[#allocation2 + $0x1528] sm:$0xff]  ;;  %v3044_v13 = vld [vmem:[#allocation2 + $0x1538] sm:$0xff] }
 0x980   :  { %4271 = vmatprep.subr.bf16.mxu0 %v2962_v1  ;;  %4599 = vmatprep.subr.bf16.mxu1 %v2964_v38  ;;  %v3043_v1 = vld [vmem:[#allocation2 + $0x1530] sm:$0xff]  ;;  %v3050_v38 = vld [vmem:[#allocation2 + $0x1568] sm:$0xff] }
 0x983   :  { %4272 = vmatpush1.bf16.msra.mxu0 %v2961_v26  ;;  %4600 = vmatpush1.bf16.msra.mxu1 %v2963_v12  ;;  %v3052_v26 = vld [vmem:[#allocation2 + $0x1578] sm:$0xff]  ;;  %v3049_v12 = vld [vmem:[#allocation2 + $0x1560] sm:$0xff] }
 0x984   :  { %4273 = vmatprep.subr.bf16.mxu0 %v2970_v20  ;;  %4601 = vmatprep.subr.bf16.mxu1 %v2972_v55  ;;  %v3051_v20 = vld [vmem:[#allocation2 + $0x1570] sm:$0xff]  ;;  %v3058_v55 = vld [vmem:[#allocation2 + $0x15a8] sm:$0xff] }
 0x987   :  { %4274 = vmatpush1.bf16.msra.mxu0 %v2969_v0  ;;  %4602 = vmatpush1.bf16.msra.mxu1 %v2971_v34  ;;  %v3060_v0 = vld [vmem:[#allocation2 + $0x15b8] sm:$0xff]  ;;  %v3057_v34 = vld [vmem:[#allocation2 + $0x15a0] sm:$0xff] }
 0x988   :  { %4275 = vmatprep.subr.bf16.mxu0 %v2978_v42  ;;  %4603 = vmatprep.subr.bf16.mxu1 %v2980_v33  ;;  %v3059_v42 = vld [vmem:[#allocation2 + $0x15b0] sm:$0xff]  ;;  %v3066_v33 = vld [vmem:[#allocation2 + $0x15e8] sm:$0xff] }
 0x98b   :  { %4276 = vmatpush1.bf16.msra.mxu0 %v2977_v3  ;;  %4604 = vmatpush1.bf16.msra.mxu1 %v2979_v23  ;;  %v3068_v3 = vld [vmem:[#allocation2 + $0x15f8] sm:$0xff]  ;;  %v3065_v23 = vld [vmem:[#allocation2 + $0x15e0] sm:$0xff] }
 0x98c   :  { %4277 = vmatprep.subr.bf16.mxu0 %v2986_v46  ;;  %4605 = vmatprep.subr.bf16.mxu1 %v2988_v4  ;;  %v3067_v46 = vld [vmem:[#allocation2 + $0x15f0] sm:$0xff]  ;;  %v3074_v4 = vld [vmem:[#allocation2 + $0x1628] sm:$0xff] }
 0x98f   :  { %4278 = vmatpush1.bf16.msra.mxu0 %v2985_v15  ;;  %4606 = vmatpush1.bf16.msra.mxu1 %v2987_v19  ;;  %v3076_v15 = vld [vmem:[#allocation2 + $0x1638] sm:$0xff]  ;;  %v3073_v19 = vld [vmem:[#allocation2 + $0x1620] sm:$0xff] }
 0x990   :  { %4279 = vmatprep.subr.bf16.mxu0 %v2994_v2  ;;  %4607 = vmatprep.subr.bf16.mxu1 %v2996_v62  ;;  %v3075_v2 = vld [vmem:[#allocation2 + $0x1630] sm:$0xff]  ;;  %v3082_v62 = vld [vmem:[#allocation2 + $0x1668] sm:$0xff] }
 0x993   :  { %4280 = vmatpush1.bf16.msra.mxu0 %v2993_v60  ;;  %4608 = vmatpush1.bf16.msra.mxu1 %v2995_v14  ;;  %v3084_v60 = vld [vmem:[#allocation2 + $0x1678] sm:$0xff]  ;;  %v3081_v14 = vld [vmem:[#allocation2 + $0x1660] sm:$0xff] }
 0x994   :  { %4281 = vmatprep.subr.bf16.mxu0 %v3002_v5  ;;  %4609 = vmatprep.subr.bf16.mxu1 %v3004_v6  ;;  %v3083_v5 = vld [vmem:[#allocation2 + $0x1670] sm:$0xff]  ;;  %v3090_v6 = vld [vmem:[#allocation2 + $0x16a8] sm:$0xff] }
 0x997   :  { %4282 = vmatpush1.bf16.msra.mxu0 %v3001_v11  ;;  %4610 = vmatpush1.bf16.msra.mxu1 %v3003_v10  ;;  %v3092_v11 = vld [vmem:[#allocation2 + $0x16b8] sm:$0xff]  ;;  %v3089_v10 = vld [vmem:[#allocation2 + $0x16a0] sm:$0xff] }
 0x998   :  { %4292 = vmatprep.subr.bf16.mxu0 %v3010_v27  ;;  %4620 = vmatprep.subr.bf16.mxu1 %v3012_v24  ;;  %v3091_v27 = vld [vmem:[#allocation2 + $0x16b0] sm:$0xff]  ;;  %v3098_v24 = vld [vmem:[#allocation2 + $0x16e8] sm:$0xff] }
 0x99a   :  { %4284 = vmatmul.mubr.bf16.vlgmr.msra.gmra.mrb[84].mxu0 %v9568_v43  ;;  %4612 = vmatmul.mubr.bf16.vlgmr.msra.gmra.mrb[116].mxu1 %v9568_v43  ;;  %v3036_v43 = vld [vmem:[#allocation2 + $0x14f8] sm:$0xff] }
 0x99b   :  { %4293 = vmatpush1.bf16.msra.mxu0 %v3009_v25  ;;  %4621 = vmatpush1.bf16.msra.mxu1 %v3011_v63  ;;  %v3100_v25 = vld [vmem:[#allocation2 + $0x16f8] sm:$0xff]  ;;  %v3097_v63 = vld [vmem:[#allocation2 + $0x16e0] sm:$0xff] }
 0x99c   :  { %4294 = vmatprep.subr.bf16.mxu0 %v3018_v47  ;;  %4622 = vmatprep.subr.bf16.mxu1 %v3020_v29  ;;  %v3099_v47 = vld [vmem:[#allocation2 + $0x16f0] sm:$0xff]  ;;  %v3106_v29 = vld [vmem:[#allocation2 + $0x1728] sm:$0xff] }
 0x99d   :  { %4324 = vmatprep.mubr.bf16.mxu0 %v9572_v61  ;;  %4652 = vmatprep.mubr.bf16.mxu1 %v9572_v61  ;;  %v3041_v61 = vld [vmem:[#allocation2 + $0x1520] sm:$0xff] }
 0x99f   :  { %4295 = vmatpush1.bf16.msra.mxu0 %v3017_v45  ;;  %4623 = vmatpush1.bf16.msra.mxu1 %v3019_v30  ;;  %v3108_v45 = vld [vmem:[#allocation2 + $0x1738] sm:$0xff]  ;;  %v3105_v30 = vld [vmem:[#allocation2 + $0x1720] sm:$0xff] }
 0x9a0   :  { %4296 = vmatprep.subr.bf16.mxu0 %v3026_v49  ;;  %4624 = vmatprep.subr.bf16.mxu1 %v3028_v40  ;;  %v3107_v49 = vld [vmem:[#allocation2 + $0x1730] sm:$0xff]  ;;  %v3114_v40 = vld [vmem:[#allocation2 + $0x1768] sm:$0xff] }
 0x9a3   :  { %4297 = vmatpush1.bf16.msra.mxu0 %v3025_v9  ;;  %4625 = vmatpush1.bf16.msra.mxu1 %v3027_v41  ;;  %v3116_v9 = vld [vmem:[#allocation2 + $0x1778] sm:$0xff]  ;;  %v3113_v41 = vld [vmem:[#allocation2 + $0x1760] sm:$0xff] }
 0x9a4   :  { %4298 = vmatprep.subr.bf16.mxu0 %v3034_v16  ;;  %4626 = vmatprep.subr.bf16.mxu1 %v3036_v43  ;;  %v3115_v16 = vld [vmem:[#allocation2 + $0x1770] sm:$0xff]  ;;  %v3122_v43 = vld [vmem:[#allocation2 + $0x17a8] sm:$0xff] }
 0x9a7   :  { %4299 = vmatpush1.bf16.msra.mxu0 %v3033_v35  ;;  %4627 = vmatpush1.bf16.msra.mxu1 %v3035_v28  ;;  %v3124_v35 = vld [vmem:[#allocation2 + $0x17b8] sm:$0xff]  ;;  %v3121_v28 = vld [vmem:[#allocation2 + $0x17a0] sm:$0xff] }
 0x9a8   :  { %4300 = vmatprep.subr.bf16.mxu0 %v3042_v56  ;;  %4628 = vmatprep.subr.bf16.mxu1 %v3044_v13  ;;  %v3123_v56 = vld [vmem:[#allocation2 + $0x17b0] sm:$0xff]  ;;  %v3130_v13 = vld [vmem:[#allocation2 + $0x17e8] sm:$0xff] }
 0x9ab   :  { %4301 = vmatpush1.bf16.msra.mxu0 %v3041_v61  ;;  %4629 = vmatpush1.bf16.msra.mxu1 %v3043_v1  ;;  %v3132_v61 = vld [vmem:[#allocation2 + $0x17f8] sm:$0xff]  ;;  %v3129_v1 = vld [vmem:[#allocation2 + $0x17e0] sm:$0xff] }
 0x9ac   :  { %4302 = vmatprep.subr.bf16.mxu0 %v3050_v38  ;;  %4630 = vmatprep.subr.bf16.mxu1 %v3052_v26  ;;  %v3131_v38 = vld [vmem:[#allocation2 + $0x17f0] sm:$0xff]  ;;  %v3138_v26 = vld [vmem:[#allocation2 + $0x1828] sm:$0xff] }
 0x9af   :  { %4303 = vmatpush1.bf16.msra.mxu0 %v3049_v12  ;;  %4631 = vmatpush1.bf16.msra.mxu1 %v3051_v20  ;;  %v3140_v12 = vld [vmem:[#allocation2 + $0x1838] sm:$0xff]  ;;  %v3137_v20 = vld [vmem:[#allocation2 + $0x1820] sm:$0xff] }
 0x9b0   :  { %4304 = vmatprep.subr.bf16.mxu0 %v3058_v55  ;;  %4632 = vmatprep.subr.bf16.mxu1 %v3060_v0  ;;  %v3139_v55 = vld [vmem:[#allocation2 + $0x1830] sm:$0xff]  ;;  %v3146_v0 = vld [vmem:[#allocation2 + $0x1868] sm:$0xff] }
 0x9b3   :  { %4305 = vmatpush1.bf16.msra.mxu0 %v3057_v34  ;;  %4633 = vmatpush1.bf16.msra.mxu1 %v3059_v42  ;;  %v3148_v34 = vld [vmem:[#allocation2 + $0x1878] sm:$0xff]  ;;  %v3145_v42 = vld [vmem:[#allocation2 + $0x1860] sm:$0xff] }
 0x9b4   :  { %4306 = vmatprep.subr.bf16.mxu0 %v3066_v33  ;;  %4634 = vmatprep.subr.bf16.mxu1 %v3068_v3  ;;  %v3147_v33 = vld [vmem:[#allocation2 + $0x1870] sm:$0xff]  ;;  %v3154_v3 = vld [vmem:[#allocation2 + $0x18a8] sm:$0xff] }
 0x9b7   :  { %4307 = vmatpush1.bf16.msra.mxu0 %v3065_v23  ;;  %4635 = vmatpush1.bf16.msra.mxu1 %v3067_v46  ;;  %v3156_v23 = vld [vmem:[#allocation2 + $0x18b8] sm:$0xff]  ;;  %v3153_v46 = vld [vmem:[#allocation2 + $0x18a0] sm:$0xff] }
 0x9b8   :  { %4308 = vmatprep.subr.bf16.mxu0 %v3074_v4  ;;  %4636 = vmatprep.subr.bf16.mxu1 %v3076_v15  ;;  %v3155_v4 = vld [vmem:[#allocation2 + $0x18b0] sm:$0xff]  ;;  %v3162_v15 = vld [vmem:[#allocation2 + $0x18e8] sm:$0xff] }
 0x9bb   :  { %4309 = vmatpush1.bf16.msra.mxu0 %v3073_v19  ;;  %4637 = vmatpush1.bf16.msra.mxu1 %v3075_v2  ;;  %v3161_v19 = vld [vmem:[#allocation2 + $0x18e0] sm:$0xff]  ;;  %v3163_v2 = vld [vmem:[#allocation2 + $0x18f0] sm:$0xff] }
 0x9bc   :  { %4310 = vmatprep.subr.bf16.mxu0 %v3082_v62  ;;  %4638 = vmatprep.subr.bf16.mxu1 %v3084_v60  ;;  %v3170_v62 = vld [vmem:[#allocation2 + $0x1928] sm:$0xff]  ;;  %v3172_v60 = vld [vmem:[#allocation2 + $0x1938] sm:$0xff] }
 0x9bf   :  { %4311 = vmatpush1.bf16.msra.mxu0 %v3081_v14  ;;  %4639 = vmatpush1.bf16.msra.mxu1 %v3083_v5  ;;  %v3171_v14 = vld [vmem:[#allocation2 + $0x1930] sm:$0xff]  ;;  %v3178_v5 = vld [vmem:[#allocation2 + $0x1968] sm:$0xff] }
 0x9c0   :  { %4312 = vmatprep.subr.bf16.mxu0 %v3090_v6  ;;  %4640 = vmatprep.subr.bf16.mxu1 %v3092_v11  ;;  %v3180_v6 = vld [vmem:[#allocation2 + $0x1978] sm:$0xff]  ;;  %v3177_v11 = vld [vmem:[#allocation2 + $0x1960] sm:$0xff] }
 0x9c3   :  { %4313 = vmatpush1.bf16.msra.mxu0 %v3089_v10  ;;  %4641 = vmatpush1.bf16.msra.mxu1 %v3091_v27  ;;  %v3179_v10 = vld [vmem:[#allocation2 + $0x1970] sm:$0xff]  ;;  %v3186_v27 = vld [vmem:[#allocation2 + $0x19a8] sm:$0xff] }
 0x9c4   :  { %4314 = vmatprep.subr.bf16.mxu0 %v3098_v24  ;;  %4642 = vmatprep.subr.bf16.mxu1 %v3100_v25  ;;  %v3188_v24 = vld [vmem:[#allocation2 + $0x19b8] sm:$0xff]  ;;  %v3185_v25 = vld [vmem:[#allocation2 + $0x19a0] sm:$0xff] }
 0x9c7   :  { %4315 = vmatpush1.bf16.msra.mxu0 %v3097_v63  ;;  %4643 = vmatpush1.bf16.msra.mxu1 %v3099_v47  ;;  %v3187_v63 = vld [vmem:[#allocation2 + $0x19b0] sm:$0xff]  ;;  %v3194_v47 = vld [vmem:[#allocation2 + $0x19e8] sm:$0xff] }
 0x9c8   :  { %4316 = vmatprep.subr.bf16.mxu0 %v3106_v29  ;;  %4644 = vmatprep.subr.bf16.mxu1 %v3108_v45  ;;  %v3196_v29 = vld [vmem:[#allocation2 + $0x19f8] sm:$0xff]  ;;  %v3193_v45 = vld [vmem:[#allocation2 + $0x19e0] sm:$0xff] }
 0x9cb   :  { %4317 = vmatpush1.bf16.msra.mxu0 %v3105_v30  ;;  %4645 = vmatpush1.bf16.msra.mxu1 %v3107_v49  ;;  %v3195_v30 = vld [vmem:[#allocation2 + $0x19f0] sm:$0xff]  ;;  %v3202_v49 = vld [vmem:[#allocation2 + $0x1a28] sm:$0xff] }
 0x9cc   :  { %4318 = vmatprep.subr.bf16.mxu0 %v3114_v40  ;;  %4646 = vmatprep.subr.bf16.mxu1 %v3116_v9  ;;  %v3204_v40 = vld [vmem:[#allocation2 + $0x1a38] sm:$0xff]  ;;  %v3201_v9 = vld [vmem:[#allocation2 + $0x1a20] sm:$0xff] }
 0x9cf   :  { %4319 = vmatpush1.bf16.msra.mxu0 %v3113_v41  ;;  %4647 = vmatpush1.bf16.msra.mxu1 %v3115_v16  ;;  %v3203_v41 = vld [vmem:[#allocation2 + $0x1a30] sm:$0xff]  ;;  %v3210_v16 = vld [vmem:[#allocation2 + $0x1a68] sm:$0xff] }
 0x9d0   :  { %4320 = vmatprep.subr.bf16.mxu0 %v3122_v43  ;;  %4648 = vmatprep.subr.bf16.mxu1 %v3124_v35  ;;  %v3212_v43 = vld [vmem:[#allocation2 + $0x1a78] sm:$0xff]  ;;  %v3209_v35 = vld [vmem:[#allocation2 + $0x1a60] sm:$0xff] }
 0x9d3   :  { %4321 = vmatpush1.bf16.msra.mxu0 %v3121_v28  ;;  %4649 = vmatpush1.bf16.msra.mxu1 %v3123_v56  ;;  %v3211_v28 = vld [vmem:[#allocation2 + $0x1a70] sm:$0xff]  ;;  %v3218_v56 = vld [vmem:[#allocation2 + $0x1aa8] sm:$0xff] }
 0x9d4   :  { %4322 = vmatprep.subr.bf16.mxu0 %v3130_v13  ;;  %4650 = vmatprep.subr.bf16.mxu1 %v3132_v61  ;;  %v3220_v13 = vld [vmem:[#allocation2 + $0x1ab8] sm:$0xff]  ;;  %v3217_v61 = vld [vmem:[#allocation2 + $0x1aa0] sm:$0xff] }
 0x9d7   :  { %4323 = vmatpush1.bf16.msra.mxu0 %v3129_v1  ;;  %4651 = vmatpush1.bf16.msra.mxu1 %v3131_v38  ;;  %v3219_v1 = vld [vmem:[#allocation2 + $0x1ab0] sm:$0xff]  ;;  %v3226_v38 = vld [vmem:[#allocation2 + $0x1ae8] sm:$0xff] }
 0x9d8   :  { %4333 = vmatprep.subr.bf16.mxu0 %v3138_v26  ;;  %4661 = vmatprep.subr.bf16.mxu1 %v3140_v12  ;;  %v3228_v26 = vld [vmem:[#allocation2 + $0x1af8] sm:$0xff]  ;;  %v3225_v12 = vld [vmem:[#allocation2 + $0x1ae0] sm:$0xff] }
 0x9da   :  { %4325 = vmatmul.mubr.bf16.vlgmr.msra.gmra.mrb[84].mxu0 %v9580_v48  ;;  %4653 = vmatmul.mubr.bf16.vlgmr.msra.gmra.mrb[116].mxu1 %v9580_v48  ;;  %v3164_v48 = vld [vmem:[#allocation2 + $0x18f8] sm:$0xff] }
 0x9db   :  { %4334 = vmatpush1.bf16.msra.mxu0 %v3137_v20  ;;  %4662 = vmatpush1.bf16.msra.mxu1 %v3139_v55  ;;  %v3227_v20 = vld [vmem:[#allocation2 + $0x1af0] sm:$0xff]  ;;  %v3234_v55 = vld [vmem:[#allocation2 + $0x1b28] sm:$0xff] }
 0x9dc   :  { %4335 = vmatprep.subr.bf16.mxu0 %v3146_v0  ;;  %4663 = vmatprep.subr.bf16.mxu1 %v3148_v34  ;;  %v3236_v0 = vld [vmem:[#allocation2 + $0x1b38] sm:$0xff]  ;;  %v3233_v34 = vld [vmem:[#allocation2 + $0x1b20] sm:$0xff] }
 0x9dd   :  { %4365 = vmatprep.mubr.bf16.mxu0 %v9584_v39  ;;  %4693 = vmatprep.mubr.bf16.mxu1 %v9584_v39  ;;  %v3169_v39 = vld [vmem:[#allocation2 + $0x1920] sm:$0xff] }
 0x9df   :  { %4336 = vmatpush1.bf16.msra.mxu0 %v3145_v42  ;;  %4664 = vmatpush1.bf16.msra.mxu1 %v3147_v33  ;;  %v3235_v42 = vld [vmem:[#allocation2 + $0x1b30] sm:$0xff]  ;;  %v3242_v33 = vld [vmem:[#allocation2 + $0x1b68] sm:$0xff] }
 0x9e0   :  { %4337 = vmatprep.subr.bf16.mxu0 %v3154_v3  ;;  %4665 = vmatprep.subr.bf16.mxu1 %v3156_v23  ;;  %v3244_v3 = vld [vmem:[#allocation2 + $0x1b78] sm:$0xff]  ;;  %v3241_v23 = vld [vmem:[#allocation2 + $0x1b60] sm:$0xff] }
 0x9e3   :  { %4338 = vmatpush1.bf16.msra.mxu0 %v3153_v46  ;;  %4666 = vmatpush1.bf16.msra.mxu1 %v3155_v4  ;;  %v3243_v46 = vld [vmem:[#allocation2 + $0x1b70] sm:$0xff]  ;;  %v3250_v4 = vld [vmem:[#allocation2 + $0x1ba8] sm:$0xff] }
 0x9e4   :  { %4339 = vmatprep.subr.bf16.mxu0 %v3162_v15  ;;  %4667 = vmatprep.subr.bf16.mxu1 %v3164_v48  ;;  %v3252_v15 = vld [vmem:[#allocation2 + $0x1bb8] sm:$0xff]  ;;  %v3249_v48 = vld [vmem:[#allocation2 + $0x1ba0] sm:$0xff] }
 0x9e7   :  { %4340 = vmatpush1.bf16.msra.mxu0 %v3161_v19  ;;  %4668 = vmatpush1.bf16.msra.mxu1 %v3163_v2  ;;  %v3251_v19 = vld [vmem:[#allocation2 + $0x1bb0] sm:$0xff]  ;;  %v3258_v2 = vld [vmem:[#allocation2 + $0x1be8] sm:$0xff] }
 0x9e8   :  { %4341 = vmatprep.subr.bf16.mxu0 %v3170_v62  ;;  %4669 = vmatprep.subr.bf16.mxu1 %v3172_v60  ;;  %v3260_v62 = vld [vmem:[#allocation2 + $0x1bf8] sm:$0xff]  ;;  %v3257_v60 = vld [vmem:[#allocation2 + $0x1be0] sm:$0xff] }
 0x9eb   :  { %4342 = vmatpush1.bf16.msra.mxu0 %v3169_v39  ;;  %4670 = vmatpush1.bf16.msra.mxu1 %v3171_v14  ;;  %v3259_v39 = vld [vmem:[#allocation2 + $0x1bf0] sm:$0xff]  ;;  %v3266_v14 = vld [vmem:[#allocation2 + $0x1c28] sm:$0xff] }
 0x9ec   :  { %4343 = vmatprep.subr.bf16.mxu0 %v3178_v5  ;;  %4671 = vmatprep.subr.bf16.mxu1 %v3180_v6  ;;  %v3268_v5 = vld [vmem:[#allocation2 + $0x1c38] sm:$0xff]  ;;  %v3265_v6 = vld [vmem:[#allocation2 + $0x1c20] sm:$0xff] }
 0x9ef   :  { %4344 = vmatpush1.bf16.msra.mxu0 %v3177_v11  ;;  %4672 = vmatpush1.bf16.msra.mxu1 %v3179_v10  ;;  %v3267_v11 = vld [vmem:[#allocation2 + $0x1c30] sm:$0xff]  ;;  %v3274_v10 = vld [vmem:[#allocation2 + $0x1c68] sm:$0xff] }
 0x9f0   :  { %4345 = vmatprep.subr.bf16.mxu0 %v3186_v27  ;;  %4673 = vmatprep.subr.bf16.mxu1 %v3188_v24  ;;  %v3276_v27 = vld [vmem:[#allocation2 + $0x1c78] sm:$0xff]  ;;  %v3273_v24 = vld [vmem:[#allocation2 + $0x1c60] sm:$0xff] }
 0x9f3   :  { %4346 = vmatpush1.bf16.msra.mxu0 %v3185_v25  ;;  %4674 = vmatpush1.bf16.msra.mxu1 %v3187_v63  ;;  %v3275_v25 = vld [vmem:[#allocation2 + $0x1c70] sm:$0xff]  ;;  %v3282_v63 = vld [vmem:[#allocation2 + $0x1ca8] sm:$0xff] }
 0x9f4   :  { %4347 = vmatprep.subr.bf16.mxu0 %v3194_v47  ;;  %4675 = vmatprep.subr.bf16.mxu1 %v3196_v29  ;;  %v3284_v47 = vld [vmem:[#allocation2 + $0x1cb8] sm:$0xff]  ;;  %v3281_v29 = vld [vmem:[#allocation2 + $0x1ca0] sm:$0xff] }
 0x9f7   :  { %4348 = vmatpush1.bf16.msra.mxu0 %v3193_v45  ;;  %4676 = vmatpush1.bf16.msra.mxu1 %v3195_v30  ;;  %v3283_v45 = vld [vmem:[#allocation2 + $0x1cb0] sm:$0xff]  ;;  %v3290_v30 = vld [vmem:[#allocation2 + $0x1ce8] sm:$0xff] }
 0x9f8   :  { %4349 = vmatprep.subr.bf16.mxu0 %v3202_v49  ;;  %4677 = vmatprep.subr.bf16.mxu1 %v3204_v40  ;;  %v3289_v49 = vld [vmem:[#allocation2 + $0x1ce0] sm:$0xff]  ;;  %v3291_v40 = vld [vmem:[#allocation2 + $0x1cf0] sm:$0xff] }
 0x9fb   :  { %4350 = vmatpush1.bf16.msra.mxu0 %v3201_v9  ;;  %4678 = vmatpush1.bf16.msra.mxu1 %v3203_v41  ;;  %v3298_v9 = vld [vmem:[#allocation2 + $0x1d28] sm:$0xff]  ;;  %v3300_v41 = vld [vmem:[#allocation2 + $0x1d38] sm:$0xff] }
 0x9fc   :  { %4351 = vmatprep.subr.bf16.mxu0 %v3210_v16  ;;  %4679 = vmatprep.subr.bf16.mxu1 %v3212_v43  ;;  %v3299_v16 = vld [vmem:[#allocation2 + $0x1d30] sm:$0xff]  ;;  %v3306_v43 = vld [vmem:[#allocation2 + $0x1d68] sm:$0xff] }
 0x9ff   :  { %4352 = vmatpush1.bf16.msra.mxu0 %v3209_v35  ;;  %4680 = vmatpush1.bf16.msra.mxu1 %v3211_v28  ;;  %v3308_v35 = vld [vmem:[#allocation2 + $0x1d78] sm:$0xff]  ;;  %v3305_v28 = vld [vmem:[#allocation2 + $0x1d60] sm:$0xff] }
 0xa00   :  { %4353 = vmatprep.subr.bf16.mxu0 %v3218_v56  ;;  %4681 = vmatprep.subr.bf16.mxu1 %v3220_v13  ;;  %v3307_v56 = vld [vmem:[#allocation2 + $0x1d70] sm:$0xff]  ;;  %v3314_v13 = vld [vmem:[#allocation2 + $0x1da8] sm:$0xff] }
 0xa03   :  { %4354 = vmatpush1.bf16.msra.mxu0 %v3217_v61  ;;  %4682 = vmatpush1.bf16.msra.mxu1 %v3219_v1  ;;  %v3316_v61 = vld [vmem:[#allocation2 + $0x1db8] sm:$0xff]  ;;  %v3313_v1 = vld [vmem:[#allocation2 + $0x1da0] sm:$0xff] }
 0xa04   :  { %4355 = vmatprep.subr.bf16.mxu0 %v3226_v38  ;;  %4683 = vmatprep.subr.bf16.mxu1 %v3228_v26  ;;  %v3315_v38 = vld [vmem:[#allocation2 + $0x1db0] sm:$0xff]  ;;  %v3322_v26 = vld [vmem:[#allocation2 + $0x1de8] sm:$0xff] }
 0xa07   :  { %4356 = vmatpush1.bf16.msra.mxu0 %v3225_v12  ;;  %4684 = vmatpush1.bf16.msra.mxu1 %v3227_v20  ;;  %v3324_v12 = vld [vmem:[#allocation2 + $0x1df8] sm:$0xff]  ;;  %v3321_v20 = vld [vmem:[#allocation2 + $0x1de0] sm:$0xff] }
 0xa08   :  { %4357 = vmatprep.subr.bf16.mxu0 %v3234_v55  ;;  %4685 = vmatprep.subr.bf16.mxu1 %v3236_v0  ;;  %v3323_v55 = vld [vmem:[#allocation2 + $0x1df0] sm:$0xff]  ;;  %v3330_v0 = vld [vmem:[#allocation2 + $0x1e28] sm:$0xff] }
 0xa0b   :  { %4358 = vmatpush1.bf16.msra.mxu0 %v3233_v34  ;;  %4686 = vmatpush1.bf16.msra.mxu1 %v3235_v42  ;;  %v3332_v34 = vld [vmem:[#allocation2 + $0x1e38] sm:$0xff]  ;;  %v3329_v42 = vld [vmem:[#allocation2 + $0x1e20] sm:$0xff] }
 0xa0c   :  { %4359 = vmatprep.subr.bf16.mxu0 %v3242_v33  ;;  %4687 = vmatprep.subr.bf16.mxu1 %v3244_v3  ;;  %v3331_v33 = vld [vmem:[#allocation2 + $0x1e30] sm:$0xff]  ;;  %v3338_v3 = vld [vmem:[#allocation2 + $0x1e68] sm:$0xff] }
 0xa0f   :  { %4360 = vmatpush1.bf16.msra.mxu0 %v3241_v23  ;;  %4688 = vmatpush1.bf16.msra.mxu1 %v3243_v46  ;;  %v3340_v23 = vld [vmem:[#allocation2 + $0x1e78] sm:$0xff]  ;;  %v3337_v46 = vld [vmem:[#allocation2 + $0x1e60] sm:$0xff] }
 0xa10   :  { %4361 = vmatprep.subr.bf16.mxu0 %v3250_v4  ;;  %4689 = vmatprep.subr.bf16.mxu1 %v3252_v15  ;;  %v3339_v4 = vld [vmem:[#allocation2 + $0x1e70] sm:$0xff]  ;;  %v3346_v15 = vld [vmem:[#allocation2 + $0x1ea8] sm:$0xff] }
 0xa13   :  { %4362 = vmatpush1.bf16.msra.mxu0 %v3249_v48  ;;  %4690 = vmatpush1.bf16.msra.mxu1 %v3251_v19  ;;  %v3348_v48 = vld [vmem:[#allocation2 + $0x1eb8] sm:$0xff]  ;;  %v3345_v19 = vld [vmem:[#allocation2 + $0x1ea0] sm:$0xff] }
 0xa14   :  { %4363 = vmatprep.subr.bf16.mxu0 %v3258_v2  ;;  %4691 = vmatprep.subr.bf16.mxu1 %v3260_v62  ;;  %v3347_v2 = vld [vmem:[#allocation2 + $0x1eb0] sm:$0xff]  ;;  %v3354_v62 = vld [vmem:[#allocation2 + $0x1ee8] sm:$0xff] }
 0xa17   :  { %4364 = vmatpush1.bf16.msra.mxu0 %v3257_v60  ;;  %4692 = vmatpush1.bf16.msra.mxu1 %v3259_v39  ;;  %v3356_v60 = vld [vmem:[#allocation2 + $0x1ef8] sm:$0xff]  ;;  %v3353_v39 = vld [vmem:[#allocation2 + $0x1ee0] sm:$0xff] }
 0xa18   :  { %4374 = vmatprep.subr.bf16.mxu0 %v3266_v14  ;;  %4702 = vmatprep.subr.bf16.mxu1 %v3268_v5  ;;  %v3355_v14 = vld [vmem:[#allocation2 + $0x1ef0] sm:$0xff]  ;;  %v3362_v5 = vld [vmem:[#allocation2 + $0x1f28] sm:$0xff] }
 0xa1a   :  { %4366 = vmatmul.mubr.bf16.vlgmr.msra.gmra.mrb[84].mxu0 %v9592_v21  ;;  %4694 = vmatmul.mubr.bf16.vlgmr.msra.gmra.mrb[116].mxu1 %v9592_v21  ;;  %v3292_v21 = vld [vmem:[#allocation2 + $0x1cf8] sm:$0xff] }
 0xa1b   :  { %4375 = vmatpush1.bf16.msra.mxu0 %v3265_v6  ;;  %4703 = vmatpush1.bf16.msra.mxu1 %v3267_v11  ;;  %v3364_v6 = vld [vmem:[#allocation2 + $0x1f38] sm:$0xff]  ;;  %v3361_v11 = vld [vmem:[#allocation2 + $0x1f20] sm:$0xff] }
 0xa1c   :  { %4376 = vmatprep.subr.bf16.mxu0 %v3274_v10  ;;  %4704 = vmatprep.subr.bf16.mxu1 %v3276_v27  ;;  %v3363_v10 = vld [vmem:[#allocation2 + $0x1f30] sm:$0xff]  ;;  %v3370_v27 = vld [vmem:[#allocation2 + $0x1f68] sm:$0xff] }
 0xa1d   :  { %4406 = vmatprep.mubr.bf16.mxu0 %v9596_v44  ;;  %4734 = vmatprep.mubr.bf16.mxu1 %v9596_v44  ;;  %v3297_v44 = vld [vmem:[#allocation2 + $0x1d20] sm:$0xff] }
 0xa1f   :  { %4377 = vmatpush1.bf16.msra.mxu0 %v3273_v24  ;;  %4705 = vmatpush1.bf16.msra.mxu1 %v3275_v25  ;;  %v3372_v24 = vld [vmem:[#allocation2 + $0x1f78] sm:$0xff]  ;;  %v3369_v25 = vld [vmem:[#allocation2 + $0x1f60] sm:$0xff] }
 0xa20   :  { %4378 = vmatprep.subr.bf16.mxu0 %v3282_v63  ;;  %4706 = vmatprep.subr.bf16.mxu1 %v3284_v47  ;;  %v3371_v63 = vld [vmem:[#allocation2 + $0x1f70] sm:$0xff]  ;;  %v3378_v47 = vld [vmem:[#allocation2 + $0x1fa8] sm:$0xff] }
 0xa23   :  { %4379 = vmatpush1.bf16.msra.mxu0 %v3281_v29  ;;  %4707 = vmatpush1.bf16.msra.mxu1 %v3283_v45  ;;  %v3380_v29 = vld [vmem:[#allocation2 + $0x1fb8] sm:$0xff]  ;;  %v3377_v45 = vld [vmem:[#allocation2 + $0x1fa0] sm:$0xff] }
 0xa24   :  { %4380 = vmatprep.subr.bf16.mxu0 %v3290_v30  ;;  %4708 = vmatprep.subr.bf16.mxu1 %v3292_v21  ;;  %v3379_v30 = vld [vmem:[#allocation2 + $0x1fb0] sm:$0xff]  ;;  %v3386_v21 = vld [vmem:[#allocation2 + $0x1fe8] sm:$0xff] }
 0xa27   :  { %4381 = vmatpush1.bf16.msra.mxu0 %v3289_v49  ;;  %4709 = vmatpush1.bf16.msra.mxu1 %v3291_v40  ;;  %v3388_v49 = vld [vmem:[#allocation2 + $0x1ff8] sm:$0xff]  ;;  %v3385_v40 = vld [vmem:[#allocation2 + $0x1fe0] sm:$0xff] }
 0xa28   :  { %4382 = vmatprep.subr.bf16.mxu0 %v3298_v9  ;;  %4710 = vmatprep.subr.bf16.mxu1 %v3300_v41  ;;  %v3387_v9 = vld [vmem:[#allocation2 + $0x1ff0] sm:$0xff] }
 0xa29   :  { %v8262_v41 = vld [vmem:[#allocation25] sm:$0xff] }
 0xa2b   :  { %4383 = vmatpush1.bf16.msra.mxu0 %v3297_v44  ;;  %4711 = vmatpush1.bf16.msra.mxu1 %v3299_v16  ;;  %v3410_v44 = vrot.slane %v8262_v41, %v9429_v50  ;;  %v3418_v16 = vrot.slane %v8262_v41, %v9432_v51 }
 0xa2c   :  { %4384 = vmatprep.subr.bf16.mxu0 %v3306_v43  ;;  %4712 = vmatprep.subr.bf16.mxu1 %v3308_v35  ;;  %v3414_v43 = vrot.slane %v8262_v41, %v9435_v57  ;;  %v3422_v35 = vrot.slane %v8262_v41, %v9438_v58 }
 0xa2f   :  { %4385 = vmatpush1.bf16.msra.mxu0 %v3305_v28  ;;  %4713 = vmatpush1.bf16.msra.mxu1 %v3307_v56 }
 0xa30   :  { %4386 = vmatprep.subr.bf16.mxu0 %v3314_v13  ;;  %4714 = vmatprep.subr.bf16.mxu1 %v3316_v61 }
 0xa33   :  { %4387 = vmatpush1.bf16.msra.mxu0 %v3313_v1  ;;  %4715 = vmatpush1.bf16.msra.mxu1 %v3315_v38 }
 0xa34   :  { %4388 = vmatprep.subr.bf16.mxu0 %v3322_v26  ;;  %4716 = vmatprep.subr.bf16.mxu1 %v3324_v12 }
 0xa37   :  { %4389 = vmatpush1.bf16.msra.mxu0 %v3321_v20  ;;  %4717 = vmatpush1.bf16.msra.mxu1 %v3323_v55 }
 0xa38   :  { %4390 = vmatprep.subr.bf16.mxu0 %v3330_v0  ;;  %4718 = vmatprep.subr.bf16.mxu1 %v3332_v34 }
 0xa3b   :  { %4391 = vmatpush1.bf16.msra.mxu0 %v3329_v42  ;;  %4719 = vmatpush1.bf16.msra.mxu1 %v3331_v33 }
 0xa3c   :  { %4392 = vmatprep.subr.bf16.mxu0 %v3338_v3  ;;  %4720 = vmatprep.subr.bf16.mxu1 %v3340_v23 }
 0xa3f   :  { %4393 = vmatpush1.bf16.msra.mxu0 %v3337_v46  ;;  %4721 = vmatpush1.bf16.msra.mxu1 %v3339_v4 }
 0xa40   :  { %4394 = vmatprep.subr.bf16.mxu0 %v3346_v15  ;;  %4722 = vmatprep.subr.bf16.mxu1 %v3348_v48 }
 0xa43   :  { %4395 = vmatpush1.bf16.msra.mxu0 %v3345_v19  ;;  %4723 = vmatpush1.bf16.msra.mxu1 %v3347_v2 }
 0xa44   :  { %4396 = vmatprep.subr.bf16.mxu0 %v3354_v62  ;;  %4724 = vmatprep.subr.bf16.mxu1 %v3356_v60 }
 0xa47   :  { %4397 = vmatpush1.bf16.msra.mxu0 %v3353_v39  ;;  %4725 = vmatpush1.bf16.msra.mxu1 %v3355_v14 }
 0xa48   :  { %4398 = vmatprep.subr.bf16.mxu0 %v3362_v5  ;;  %4726 = vmatprep.subr.bf16.mxu1 %v3364_v6 }
 0xa4b   :  { %4399 = vmatpush1.bf16.msra.mxu0 %v3361_v11  ;;  %4727 = vmatpush1.bf16.msra.mxu1 %v3363_v10 }
 0xa4c   :  { %4400 = vmatprep.subr.bf16.mxu0 %v3370_v27  ;;  %4728 = vmatprep.subr.bf16.mxu1 %v3372_v24 }
 0xa4f   :  { %4401 = vmatpush1.bf16.msra.mxu0 %v3369_v25  ;;  %4729 = vmatpush1.bf16.msra.mxu1 %v3371_v63 }
 0xa50   :  { %4402 = vmatprep.subr.bf16.mxu0 %v3378_v47  ;;  %4730 = vmatprep.subr.bf16.mxu1 %v3380_v29 }
 0xa53   :  { %4403 = vmatpush1.bf16.msra.mxu0 %v3377_v45  ;;  %4731 = vmatpush1.bf16.msra.mxu1 %v3379_v30 }
 0xa54   :  { %4404 = vmatprep.subr.bf16.mxu0 %v3386_v21  ;;  %4732 = vmatprep.subr.bf16.mxu1 %v3388_v49 }
 0xa57   :  { %4405 = vmatpush1.bf16.msra.mxu0 %v3385_v40  ;;  %4733 = vmatpush1.bf16.msra.mxu1 %v3387_v9 }
 0xa5a   :  { %4407 = vmatmul.mubr.bf16.vlgmr.msra.gmra.mrb[84].mxu0 %v9604_v31  ;;  %4735 = vmatmul.mubr.bf16.vlgmr.msra.gmra.mrb[116].mxu1 %v9604_v31 }
 0xb2d   :  { %v4408_v28 = vpop.f32.mrb[84].mxu0  ;;  %v4736_v56 = vpop.f32.mrb[116].mxu1 }
 0xb2e   :  { %v9660_v13 = vadd.f32 %v4408_v28, %v3410_v44  ;;  %v9662_v61 = vadd.f32 %v4736_v56, %v3418_v16  ;;  %v4410_v1 = vpop.f32.mrb[85].mxu0  ;;  %v4738_v38 = vpop.f32.mrb[117].mxu1 }
 0xb2f   :  { %v9664_v26 = vadd.f32 %v4410_v1, %v3414_v43  ;;  %v9666_v31 = vadd.f32 %v4738_v38, %v3422_v35  ;;  %v4412_v12 = vpop.f32.mrb[86].mxu0  ;;  %v4740_v20 = vpop.f32.mrb[118].mxu1 }
 0xb30   :  { %v4747_v55 = vmax.f32 %v9660_v13, 0.0  ;;  %v4749_v0 = vmax.f32 %v9662_v61, 0.0  ;;  %v4413_v34 = vpop.f32.mrb[87].mxu0  ;;  %v4741_v42 = vpop.f32.mrb[119].mxu1 }
 0xb31   :  { %v4748_v33 = vmax.f32 %v9664_v26, 0.0  ;;  %v4750_v3 = vmax.f32 %v9666_v31, 0.0 }
 0xb32   :  { %8657 = dma.done.wait [#allocation8 + $0x1], 81920 }
 0xb33   :  { %8658 = vsyncadd [#allocation8 + $0x1], 4294885376  ;;  %v9675_v23 = vpack.c.bf16 %v4744_v53, %v4744_v53  ;;  %v4764_v46 = vld [vmem:[#allocation3 + $0x8] sm:$0xff]  ;;  %v4763_v4 = vld [vmem:[#allocation3] sm:$0xff] }
 0xb34   :  { %v4774_v15 = vld [vmem:[#allocation3 + $0x58] sm:$0xff]  ;;  %5457 = vmatprep.subr.bf16.mxu0 %v4764_v46  ;;  %v4773_v48 = vld [vmem:[#allocation3 + $0x50] sm:$0xff]  ;;  %v4784_v19 = vld [vmem:[#allocation3 + $0xa8] sm:$0xff] }
 0xb35   :  { %5489 = vmatprep.mubr.bf16.mxu0 %v9675_v23  ;;  %5653 = vmatprep.mubr.bf16.mxu1 %v9675_v23  ;;  %v4783_v2 = vld [vmem:[#allocation3 + $0xa0] sm:$0xff]  ;;  %v4794_v62 = vld [vmem:[#allocation3 + $0xf8] sm:$0xff]  ;;  %v4793_v53 = vld [vmem:[#allocation3 + $0xf0] sm:$0xff] }
 0xb36   :  { %5458 = vmatpush1.bf16.msra.mxu0 %v4763_v4  ;;  %v4766_v22 = vld [vmem:[#allocation3 + $0x18] sm:$0xff]  ;;  %v4765_v60 = vld [vmem:[#allocation3 + $0x10] sm:$0xff]  ;;  %v4804_v39 = vld [vmem:[#allocation3 + $0x148] sm:$0xff] }
 0xb37   :  { %5459 = vmatprep.subr.bf16.mxu0 %v4774_v15  ;;  %5621 = vmatprep.subr.bf16.mxu1 %v4766_v22  ;;  %v4776_v14 = vld [vmem:[#allocation3 + $0x68] sm:$0xff]  ;;  %v4775_v5 = vld [vmem:[#allocation3 + $0x60] sm:$0xff]  ;;  %v4786_v6 = vld [vmem:[#allocation3 + $0xb8] sm:$0xff] }
 0xb38   :  { %5622 = vmatpush1.bf16.msra.mxu1 %v4765_v60  ;;  %v4803_v11 = vld [vmem:[#allocation3 + $0x140] sm:$0xff]  ;;  %v4814_v10 = vld [vmem:[#allocation3 + $0x198] sm:$0xff]  ;;  %v4785_v27 = vld [vmem:[#allocation3 + $0xb0] sm:$0xff] }
 0xb39   :  { %5623 = vmatprep.subr.bf16.mxu1 %v4776_v14  ;;  %v4796_v24 = vld [vmem:[#allocation3 + $0x108] sm:$0xff]  ;;  %v4813_v25 = vld [vmem:[#allocation3 + $0x190] sm:$0xff]  ;;  %v4795_v47 = vld [vmem:[#allocation3 + $0x100] sm:$0xff] }
 0xb3a   :  { %5460 = vmatpush1.bf16.msra.mxu0 %v4773_v48  ;;  %v4824_v63 = vld [vmem:[#allocation3 + $0x1e8] sm:$0xff]  ;;  %v4806_v29 = vld [vmem:[#allocation3 + $0x158] sm:$0xff]  ;;  %v4823_v45 = vld [vmem:[#allocation3 + $0x1e0] sm:$0xff] }
 0xb3b   :  { %5461 = vmatprep.subr.bf16.mxu0 %v4784_v19  ;;  %v4834_v30 = vld [vmem:[#allocation3 + $0x238] sm:$0xff]  ;;  %v4805_v21 = vld [vmem:[#allocation3 + $0x150] sm:$0xff]  ;;  %v4816_v49 = vld [vmem:[#allocation3 + $0x1a8] sm:$0xff] }
 0xb3c   :  { %5624 = vmatpush1.bf16.msra.mxu1 %v4775_v5  ;;  %v4833_v40 = vld [vmem:[#allocation3 + $0x230] sm:$0xff]  ;;  %v4844_v9 = vld [vmem:[#allocation3 + $0x288] sm:$0xff]  ;;  %v4815_v41 = vld [vmem:[#allocation3 + $0x1a0] sm:$0xff] }
 0xb3d   :  { %5625 = vmatprep.subr.bf16.mxu1 %v4786_v6  ;;  %v4826_v44 = vld [vmem:[#allocation3 + $0x1f8] sm:$0xff]  ;;  %v4843_v16 = vld [vmem:[#allocation3 + $0x280] sm:$0xff]  ;;  %v4825_v35 = vld [vmem:[#allocation3 + $0x1f0] sm:$0xff] }
 0xb3e   :  { %5462 = vmatpush1.bf16.msra.mxu0 %v4783_v2  ;;  %v4854_v43 = vld [vmem:[#allocation3 + $0x2d8] sm:$0xff]  ;;  %v4836_v28 = vld [vmem:[#allocation3 + $0x248] sm:$0xff]  ;;  %v4853_v56 = vld [vmem:[#allocation3 + $0x2d0] sm:$0xff] }
 0xb3f   :  { %5463 = vmatprep.subr.bf16.mxu0 %v4794_v62  ;;  %v4864_v1 = vld [vmem:[#allocation3 + $0x328] sm:$0xff]  ;;  %v4835_v38 = vld [vmem:[#allocation3 + $0x240] sm:$0xff]  ;;  %v4846_v12 = vld [vmem:[#allocation3 + $0x298] sm:$0xff] }
 0xb40   :  { %5626 = vmatpush1.bf16.msra.mxu1 %v4785_v27  ;;  %v4863_v20 = vld [vmem:[#allocation3 + $0x320] sm:$0xff]  ;;  %v4874_v34 = vld [vmem:[#allocation3 + $0x378] sm:$0xff]  ;;  %v4845_v42 = vld [vmem:[#allocation3 + $0x290] sm:$0xff] }
 0xb41   :  { %5627 = vmatprep.subr.bf16.mxu1 %v4796_v24  ;;  %v4856_v46 = vld [vmem:[#allocation3 + $0x2e8] sm:$0xff]  ;;  %v4873_v4 = vld [vmem:[#allocation3 + $0x370] sm:$0xff]  ;;  %v4855_v48 = vld [vmem:[#allocation3 + $0x2e0] sm:$0xff] }
 0xb42   :  { %5464 = vmatpush1.bf16.msra.mxu0 %v4793_v53  ;;  %v4884_v15 = vld [vmem:[#allocation3 + $0x3c8] sm:$0xff]  ;;  %v4866_v19 = vld [vmem:[#allocation3 + $0x338] sm:$0xff]  ;;  %v4883_v2 = vld [vmem:[#allocation3 + $0x3c0] sm:$0xff] }
 0xb43   :  { %5465 = vmatprep.subr.bf16.mxu0 %v4804_v39  ;;  %v4894_v62 = vld [vmem:[#allocation3 + $0x418] sm:$0xff]  ;;  %v4865_v22 = vld [vmem:[#allocation3 + $0x330] sm:$0xff]  ;;  %v4876_v53 = vld [vmem:[#allocation3 + $0x388] sm:$0xff] }
 0xb44   :  { %5628 = vmatpush1.bf16.msra.mxu1 %v4795_v47  ;;  %v4893_v60 = vld [vmem:[#allocation3 + $0x410] sm:$0xff]  ;;  %v4904_v39 = vld [vmem:[#allocation3 + $0x468] sm:$0xff]  ;;  %v4875_v14 = vld [vmem:[#allocation3 + $0x380] sm:$0xff] }
 0xb45   :  { %5629 = vmatprep.subr.bf16.mxu1 %v4806_v29  ;;  %v4886_v5 = vld [vmem:[#allocation3 + $0x3d8] sm:$0xff]  ;;  %v4903_v6 = vld [vmem:[#allocation3 + $0x460] sm:$0xff]  ;;  %v4896_v27 = vld [vmem:[#allocation3 + $0x428] sm:$0xff] }
 0xb46   :  { %5466 = vmatpush1.bf16.msra.mxu0 %v4803_v11  ;;  %v4914_v11 = vld [vmem:[#allocation3 + $0x4b8] sm:$0xff]  ;;  %v4913_v24 = vld [vmem:[#allocation3 + $0x4b0] sm:$0xff]  ;;  %v4895_v47 = vld [vmem:[#allocation3 + $0x420] sm:$0xff] }
 0xb47   :  { %5467 = vmatprep.subr.bf16.mxu0 %v4814_v10  ;;  %v4885_v10 = vld [vmem:[#allocation3 + $0x3d0] sm:$0xff]  ;;  %v4906_v29 = vld [vmem:[#allocation3 + $0x478] sm:$0xff]  ;;  %v4915_v32 = vld [vmem:[#allocation3 + $0x4c0] sm:$0xff] }
 0xb48   :  { %5630 = vmatpush1.bf16.msra.mxu1 %v4805_v21  ;;  %v4934_v21 = vld [vmem:[#allocation3 + $0x558] sm:$0xff]  ;;  %v4905_v54 = vld [vmem:[#allocation3 + $0x470] sm:$0xff]  ;;  %v5075_v26 = vld [vmem:[#allocation3 + $0x9c0] sm:$0xff] }
 0xb49   :  { %5631 = vmatprep.subr.bf16.mxu1 %v4816_v49  ;;  %v4933_v49 = vld [vmem:[#allocation3 + $0x550] sm:$0xff]  ;;  %v5235_v31 = vld [vmem:[#allocation3 + $0xec0] sm:$0xff] }
 0xb4a   :  { %5468 = vmatpush1.bf16.msra.mxu0 %v4813_v25  ;;  %v4924_v25 = vld [vmem:[#allocation3 + $0x508] sm:$0xff]  ;;  %v5065_v7 = vld [vmem:[#allocation3 + $0x970] sm:$0xff] }
 0xb4b   :  { %5469 = vmatprep.subr.bf16.mxu0 %v4824_v63  ;;  %v9682_v63 = vpack.c.bf16 %v4743_v59, %v4743_v59  ;;  %v4916_v59 = vld [vmem:[#allocation3 + $0x4c8] sm:$0xff]  ;;  %v5225_v13 = vld [vmem:[#allocation3 + $0xe70] sm:$0xff] }
 0xb4c   :  { %5632 = vmatpush1.bf16.msra.mxu1 %v4815_v41  ;;  %v4954_v41 = vld [vmem:[#allocation3 + $0x5f8] sm:$0xff]  ;;  %v4777_v61 = vld [vmem:[#allocation3 + $0x70] sm:$0xff] }
 0xb4d   :  { %5633 = vmatprep.subr.bf16.mxu1 %v4826_v44  ;;  %v4925_v44 = vld [vmem:[#allocation3 + $0x510] sm:$0xff] }
 0xb4e   :  { %5470 = vmatpush1.bf16.msra.mxu0 %v4823_v45  ;;  %v9687_v45 = vpack.c.bf16 %v4746_v36, %v4746_v36  ;;  %v4926_v36 = vld [vmem:[#allocation3 + $0x518] sm:$0xff] }
 0xb4f   :  { %5471 = vmatprep.subr.bf16.mxu0 %v4834_v30  ;;  %v4923_v30 = vld [vmem:[#allocation3 + $0x500] sm:$0xff] }
 0xb50   :  { %5634 = vmatpush1.bf16.msra.mxu1 %v4825_v35  ;;  %v4964_v35 = vld [vmem:[#allocation3 + $0x648] sm:$0xff] }
 0xb51   :  { %5635 = vmatprep.subr.bf16.mxu1 %v4836_v28  ;;  %v4935_v28 = vld [vmem:[#allocation3 + $0x560] sm:$0xff] }
 0xb52   :  { %5472 = vmatpush1.bf16.msra.mxu0 %v4833_v40  ;;  %v4944_v40 = vld [vmem:[#allocation3 + $0x5a8] sm:$0xff] }
 0xb53   :  { %5473 = vmatprep.subr.bf16.mxu0 %v4844_v9  ;;  %v4943_v9 = vld [vmem:[#allocation3 + $0x5a0] sm:$0xff] }
 0xb54   :  { %5636 = vmatpush1.bf16.msra.mxu1 %v4835_v38  ;;  %v4974_v38 = vld [vmem:[#allocation3 + $0x698] sm:$0xff] }
 0xb55   :  { %5637 = vmatprep.subr.bf16.mxu1 %v4846_v12  ;;  %v4945_v12 = vld [vmem:[#allocation3 + $0x5b0] sm:$0xff] }
 0xb56   :  { %5474 = vmatpush1.bf16.msra.mxu0 %v4843_v16  ;;  %v4936_v16 = vld [vmem:[#allocation3 + $0x568] sm:$0xff] }
 0xb57   :  { %5475 = vmatprep.subr.bf16.mxu0 %v4854_v43  ;;  %v4953_v43 = vld [vmem:[#allocation3 + $0x5f0] sm:$0xff] }
 0xb58   :  { %5638 = vmatpush1.bf16.msra.mxu1 %v4845_v42  ;;  %v4984_v42 = vld [vmem:[#allocation3 + $0x6e8] sm:$0xff] }
 0xb59   :  { %5639 = vmatprep.subr.bf16.mxu1 %v4856_v46  ;;  %v4955_v46 = vld [vmem:[#allocation3 + $0x600] sm:$0xff] }
 0xb5a   :  { %5476 = vmatpush1.bf16.msra.mxu0 %v4853_v56  ;;  %v4946_v56 = vld [vmem:[#allocation3 + $0x5b8] sm:$0xff] }
 0xb5b   :  { %5477 = vmatprep.subr.bf16.mxu0 %v4864_v1  ;;  %v4963_v1 = vld [vmem:[#allocation3 + $0x640] sm:$0xff] }
 0xb5c   :  { %5640 = vmatpush1.bf16.msra.mxu1 %v4855_v48  ;;  %v4994_v48 = vld [vmem:[#allocation3 + $0x738] sm:$0xff] }
 0xb5d   :  { %5641 = vmatprep.subr.bf16.mxu1 %v4866_v19  ;;  %v4965_v19 = vld [vmem:[#allocation3 + $0x650] sm:$0xff] }
 0xb5e   :  { %5478 = vmatpush1.bf16.msra.mxu0 %v4863_v20  ;;  %v4956_v20 = vld [vmem:[#allocation3 + $0x608] sm:$0xff] }
 0xb5f   :  { %5479 = vmatprep.subr.bf16.mxu0 %v4874_v34  ;;  %v4973_v34 = vld [vmem:[#allocation3 + $0x690] sm:$0xff] }
 0xb60   :  { %5642 = vmatpush1.bf16.msra.mxu1 %v4865_v22  ;;  %v5004_v22 = vld [vmem:[#allocation3 + $0x788] sm:$0xff] }
 0xb61   :  { %5643 = vmatprep.subr.bf16.mxu1 %v4876_v53  ;;  %v4975_v53 = vld [vmem:[#allocation3 + $0x6a0] sm:$0xff] }
 0xb62   :  { %5480 = vmatpush1.bf16.msra.mxu0 %v4873_v4  ;;  %v4966_v4 = vld [vmem:[#allocation3 + $0x658] sm:$0xff] }
 0xb63   :  { %5481 = vmatprep.subr.bf16.mxu0 %v4884_v15  ;;  %v4983_v15 = vld [vmem:[#allocation3 + $0x6e0] sm:$0xff] }
 0xb64   :  { %5644 = vmatpush1.bf16.msra.mxu1 %v4875_v14  ;;  %v5014_v14 = vld [vmem:[#allocation3 + $0x7d8] sm:$0xff] }
 0xb65   :  { %5645 = vmatprep.subr.bf16.mxu1 %v4886_v5  ;;  %v4985_v5 = vld [vmem:[#allocation3 + $0x6f0] sm:$0xff] }
 0xb66   :  { %5482 = vmatpush1.bf16.msra.mxu0 %v4883_v2  ;;  %v4976_v2 = vld [vmem:[#allocation3 + $0x6a8] sm:$0xff] }
 0xb67   :  { %5483 = vmatprep.subr.bf16.mxu0 %v4894_v62  ;;  %v4993_v62 = vld [vmem:[#allocation3 + $0x730] sm:$0xff] }
 0xb68   :  { %5646 = vmatpush1.bf16.msra.mxu1 %v4885_v10  ;;  %v5024_v10 = vld [vmem:[#allocation3 + $0x828] sm:$0xff] }
 0xb69   :  { %5647 = vmatprep.subr.bf16.mxu1 %v4896_v27  ;;  %v4995_v27 = vld [vmem:[#allocation3 + $0x740] sm:$0xff] }
 0xb6a   :  { %5484 = vmatpush1.bf16.msra.mxu0 %v4893_v60  ;;  %v4986_v60 = vld [vmem:[#allocation3 + $0x6f8] sm:$0xff] }
 0xb6b   :  { %5485 = vmatprep.subr.bf16.mxu0 %v4904_v39  ;;  %v5003_v39 = vld [vmem:[#allocation3 + $0x780] sm:$0xff] }
 0xb6c   :  { %5648 = vmatpush1.bf16.msra.mxu1 %v4895_v47  ;;  %v5034_v47 = vld [vmem:[#allocation3 + $0x878] sm:$0xff] }
 0xb6d   :  { %5649 = vmatprep.subr.bf16.mxu1 %v4906_v29  ;;  %v5005_v29 = vld [vmem:[#allocation3 + $0x790] sm:$0xff] }
 0xb6e   :  { %5486 = vmatpush1.bf16.msra.mxu0 %v4903_v6  ;;  %v4996_v6 = vld [vmem:[#allocation3 + $0x748] sm:$0xff] }
 0xb6f   :  { %5487 = vmatprep.subr.bf16.mxu0 %v4914_v11  ;;  %v5013_v11 = vld [vmem:[#allocation3 + $0x7d0] sm:$0xff] }
 0xb70   :  { %5650 = vmatpush1.bf16.msra.mxu1 %v4905_v54  ;;  %v5044_v54 = vld [vmem:[#allocation3 + $0x8c8] sm:$0xff] }
 0xb71   :  { %5651 = vmatprep.subr.bf16.mxu1 %v4916_v59  ;;  %v5015_v59 = vld [vmem:[#allocation3 + $0x7e0] sm:$0xff] }
 0xb72   :  { %5488 = vmatpush1.bf16.msra.mxu0 %v4913_v24  ;;  %v5006_v24 = vld [vmem:[#allocation3 + $0x798] sm:$0xff] }
 0xb73   :  { %5498 = vmatprep.subr.bf16.mxu0 %v4924_v25  ;;  %v5023_v25 = vld [vmem:[#allocation3 + $0x820] sm:$0xff] }
 0xb74   :  { %5652 = vmatpush1.bf16.msra.mxu1 %v4915_v32  ;;  %v5054_v32 = vld [vmem:[#allocation3 + $0x918] sm:$0xff] }
 0xb75   :  { %5490 = vmatmul.mubr.bf16.vlgmr.msra.gmra.mrb[88].mxu0 %v9682_v63  ;;  %5662 = vmatprep.subr.bf16.mxu1 %v4926_v36  ;;  %v5025_v36 = vld [vmem:[#allocation3 + $0x830] sm:$0xff] }
 0xb76   :  { %5499 = vmatpush1.bf16.msra.mxu0 %v4923_v30  ;;  %5530 = vmatprep.mubr.bf16.mxu0 %v9687_v45  ;;  %v5016_v30 = vld [vmem:[#allocation3 + $0x7e8] sm:$0xff] }
 0xb77   :  { %5500 = vmatprep.subr.bf16.mxu0 %v4934_v21  ;;  %5654 = vmatmul.mubr.bf16.vlgmr.msra.gmra.mrb[120].mxu1 %v9682_v63  ;;  %v5033_v21 = vld [vmem:[#allocation3 + $0x870] sm:$0xff] }
 0xb78   :  { %5663 = vmatpush1.bf16.msra.mxu1 %v4925_v44  ;;  %5694 = vmatprep.mubr.bf16.mxu1 %v9687_v45  ;;  %v5064_v44 = vld [vmem:[#allocation3 + $0x968] sm:$0xff] }
 0xb79   :  { %5664 = vmatprep.subr.bf16.mxu1 %v4936_v16  ;;  %v5035_v16 = vld [vmem:[#allocation3 + $0x880] sm:$0xff] }
 0xb7a   :  { %5501 = vmatpush1.bf16.msra.mxu0 %v4933_v49  ;;  %v5026_v49 = vld [vmem:[#allocation3 + $0x838] sm:$0xff] }
 0xb7b   :  { %5502 = vmatprep.subr.bf16.mxu0 %v4944_v40  ;;  %v5043_v40 = vld [vmem:[#allocation3 + $0x8c0] sm:$0xff] }
 0xb7c   :  { %5665 = vmatpush1.bf16.msra.mxu1 %v4935_v28  ;;  %v5074_v28 = vld [vmem:[#allocation3 + $0x9b8] sm:$0xff] }
 0xb7d   :  { %5666 = vmatprep.subr.bf16.mxu1 %v4946_v56  ;;  %v5045_v56 = vld [vmem:[#allocation3 + $0x8d0] sm:$0xff] }
 0xb7e   :  { %5503 = vmatpush1.bf16.msra.mxu0 %v4943_v9  ;;  %v5036_v9 = vld [vmem:[#allocation3 + $0x888] sm:$0xff] }
 0xb7f   :  { %5504 = vmatprep.subr.bf16.mxu0 %v4954_v41  ;;  %v5053_v41 = vld [vmem:[#allocation3 + $0x910] sm:$0xff] }
 0xb80   :  { %5667 = vmatpush1.bf16.msra.mxu1 %v4945_v12  ;;  %v5084_v12 = vld [vmem:[#allocation3 + $0xa08] sm:$0xff] }
 0xb81   :  { %5668 = vmatprep.subr.bf16.mxu1 %v4956_v20  ;;  %v9696_v20 = vpack.c.bf16 %v4745_v37, %v4745_v37  ;;  %v5076_v37 = vld [vmem:[#allocation3 + $0x9c8] sm:$0xff] }
 0xb82   :  { %5505 = vmatpush1.bf16.msra.mxu0 %v4953_v43  ;;  %v5046_v43 = vld [vmem:[#allocation3 + $0x8d8] sm:$0xff] }
 0xb83   :  { %5506 = vmatprep.subr.bf16.mxu0 %v4964_v35  ;;  %v5063_v35 = vld [vmem:[#allocation3 + $0x960] sm:$0xff] }
 0xb84   :  { %5669 = vmatpush1.bf16.msra.mxu1 %v4955_v46  ;;  %v9701_v46 = vpack.c.bf16 %v4748_v33, %v4748_v33  ;;  %v5086_v33 = vld [vmem:[#allocation3 + $0xa18] sm:$0xff] }
 0xb85   :  { %5670 = vmatprep.subr.bf16.mxu1 %v4966_v4  ;;  %v5083_v4 = vld [vmem:[#allocation3 + $0xa00] sm:$0xff] }
 0xb86   :  { %5507 = vmatpush1.bf16.msra.mxu0 %v4963_v1  ;;  %v5056_v1 = vld [vmem:[#allocation3 + $0x928] sm:$0xff] }
 0xb87   :  { %5508 = vmatprep.subr.bf16.mxu0 %v4974_v38  ;;  %v5073_v38 = vld [vmem:[#allocation3 + $0x9b0] sm:$0xff] }
 0xb88   :  { %5671 = vmatpush1.bf16.msra.mxu1 %v4965_v19  ;;  %v5104_v19 = vld [vmem:[#allocation3 + $0xaa8] sm:$0xff] }
 0xb89   :  { %5672 = vmatprep.subr.bf16.mxu1 %v4976_v2  ;;  %v5103_v2 = vld [vmem:[#allocation3 + $0xaa0] sm:$0xff] }
 0xb8a   :  { %5509 = vmatpush1.bf16.msra.mxu0 %v4973_v34  ;;  %v5055_v34 = vld [vmem:[#allocation3 + $0x920] sm:$0xff] }
 0xb8b   :  { %5510 = vmatprep.subr.bf16.mxu0 %v4984_v42  ;;  %v5066_v42 = vld [vmem:[#allocation3 + $0x978] sm:$0xff] }
 0xb8c   :  { %5673 = vmatpush1.bf16.msra.mxu1 %v4975_v53  ;;  %v5096_v53 = vld [vmem:[#allocation3 + $0xa68] sm:$0xff] }
 0xb8d   :  { %5674 = vmatprep.subr.bf16.mxu1 %v4986_v60  ;;  %v5113_v60 = vld [vmem:[#allocation3 + $0xaf0] sm:$0xff] }
 0xb8e   :  { %5511 = vmatpush1.bf16.msra.mxu0 %v4983_v15  ;;  %v5094_v15 = vld [vmem:[#allocation3 + $0xa58] sm:$0xff] }
 0xb8f   :  { %5512 = vmatprep.subr.bf16.mxu0 %v4994_v48  ;;  %v5093_v48 = vld [vmem:[#allocation3 + $0xa50] sm:$0xff] }
 0xb90   :  { %5675 = vmatpush1.bf16.msra.mxu1 %v4985_v5  ;;  %v5106_v5 = vld [vmem:[#allocation3 + $0xab8] sm:$0xff] }
 0xb91   :  { %5676 = vmatprep.subr.bf16.mxu1 %v4996_v6  ;;  %v5123_v6 = vld [vmem:[#allocation3 + $0xb40] sm:$0xff] }
 0xb92   :  { %5513 = vmatpush1.bf16.msra.mxu0 %v4993_v62  ;;  %v5114_v62 = vld [vmem:[#allocation3 + $0xaf8] sm:$0xff] }
 0xb93   :  { %5514 = vmatprep.subr.bf16.mxu0 %v5004_v22  ;;  %v5085_v22 = vld [vmem:[#allocation3 + $0xa10] sm:$0xff] }
 0xb94   :  { %5677 = vmatpush1.bf16.msra.mxu1 %v4995_v27  ;;  %v5116_v27 = vld [vmem:[#allocation3 + $0xb08] sm:$0xff] }
 0xb95   :  { %5678 = vmatprep.subr.bf16.mxu1 %v5006_v24  ;;  %v5133_v24 = vld [vmem:[#allocation3 + $0xb90] sm:$0xff] }
 0xb96   :  { %5515 = vmatpush1.bf16.msra.mxu0 %v5003_v39  ;;  %v5124_v39 = vld [vmem:[#allocation3 + $0xb48] sm:$0xff] }
 0xb97   :  { %5516 = vmatprep.subr.bf16.mxu0 %v5014_v14  ;;  %v5095_v14 = vld [vmem:[#allocation3 + $0xa60] sm:$0xff] }
 0xb98   :  { %5679 = vmatpush1.bf16.msra.mxu1 %v5005_v29  ;;  %v5126_v29 = vld [vmem:[#allocation3 + $0xb58] sm:$0xff] }
 0xb99   :  { %5680 = vmatprep.subr.bf16.mxu1 %v5016_v30  ;;  %v5143_v30 = vld [vmem:[#allocation3 + $0xbe0] sm:$0xff] }
 0xb9a   :  { %5517 = vmatpush1.bf16.msra.mxu0 %v5013_v11  ;;  %v5134_v11 = vld [vmem:[#allocation3 + $0xb98] sm:$0xff] }
 0xb9b   :  { %5518 = vmatprep.subr.bf16.mxu0 %v5024_v10  ;;  %v5105_v10 = vld [vmem:[#allocation3 + $0xab0] sm:$0xff] }
 0xb9c   :  { %5681 = vmatpush1.bf16.msra.mxu1 %v5015_v59  ;;  %v5136_v59 = vld [vmem:[#allocation3 + $0xba8] sm:$0xff] }
 0xb9d   :  { %5682 = vmatprep.subr.bf16.mxu1 %v5026_v49  ;;  %v5153_v49 = vld [vmem:[#allocation3 + $0xc30] sm:$0xff] }
 0xb9e   :  { %5519 = vmatpush1.bf16.msra.mxu0 %v5023_v25  ;;  %v5144_v25 = vld [vmem:[#allocation3 + $0xbe8] sm:$0xff] }
 0xb9f   :  { %5520 = vmatprep.subr.bf16.mxu0 %v5034_v47  ;;  %v5115_v47 = vld [vmem:[#allocation3 + $0xb00] sm:$0xff] }
 0xba0   :  { %5683 = vmatpush1.bf16.msra.mxu1 %v5025_v36  ;;  %v5146_v36 = vld [vmem:[#allocation3 + $0xbf8] sm:$0xff] }
 0xba1   :  { %5684 = vmatprep.subr.bf16.mxu1 %v5036_v9  ;;  %v5163_v9 = vld [vmem:[#allocation3 + $0xc80] sm:$0xff] }
 0xba2   :  { %5521 = vmatpush1.bf16.msra.mxu0 %v5033_v21  ;;  %v5154_v21 = vld [vmem:[#allocation3 + $0xc38] sm:$0xff] }
 0xba3   :  { %5522 = vmatprep.subr.bf16.mxu0 %v5044_v54  ;;  %v5125_v54 = vld [vmem:[#allocation3 + $0xb50] sm:$0xff] }
 0xba4   :  { %5685 = vmatpush1.bf16.msra.mxu1 %v5035_v16  ;;  %v5156_v16 = vld [vmem:[#allocation3 + $0xc48] sm:$0xff] }
 0xba5   :  { %5686 = vmatprep.subr.bf16.mxu1 %v5046_v43  ;;  %v5173_v43 = vld [vmem:[#allocation3 + $0xcd0] sm:$0xff] }
 0xba6   :  { %5523 = vmatpush1.bf16.msra.mxu0 %v5043_v40  ;;  %v5164_v40 = vld [vmem:[#allocation3 + $0xc88] sm:$0xff] }
 0xba7   :  { %5524 = vmatprep.subr.bf16.mxu0 %v5054_v32  ;;  %v5135_v32 = vld [vmem:[#allocation3 + $0xba0] sm:$0xff] }
 0xba8   :  { %5687 = vmatpush1.bf16.msra.mxu1 %v5045_v56  ;;  %v5166_v56 = vld [vmem:[#allocation3 + $0xc98] sm:$0xff] }
 0xba9   :  { %5688 = vmatprep.subr.bf16.mxu1 %v5056_v1  ;;  %v5183_v1 = vld [vmem:[#allocation3 + $0xd20] sm:$0xff] }
 0xbaa   :  { %5525 = vmatpush1.bf16.msra.mxu0 %v5053_v41  ;;  %v5174_v41 = vld [vmem:[#allocation3 + $0xcd8] sm:$0xff] }
 0xbab   :  { %5526 = vmatprep.subr.bf16.mxu0 %v5064_v44  ;;  %v5145_v44 = vld [vmem:[#allocation3 + $0xbf0] sm:$0xff] }
 0xbac   :  { %5689 = vmatpush1.bf16.msra.mxu1 %v5055_v34  ;;  %v5176_v34 = vld [vmem:[#allocation3 + $0xce8] sm:$0xff] }
 0xbad   :  { %5690 = vmatprep.subr.bf16.mxu1 %v5066_v42  ;;  %v5193_v42 = vld [vmem:[#allocation3 + $0xd70] sm:$0xff] }
 0xbae   :  { %5527 = vmatpush1.bf16.msra.mxu0 %v5063_v35  ;;  %v5184_v35 = vld [vmem:[#allocation3 + $0xd28] sm:$0xff] }
 0xbaf   :  { %5528 = vmatprep.subr.bf16.mxu0 %v5074_v28  ;;  %v5155_v28 = vld [vmem:[#allocation3 + $0xc40] sm:$0xff] }
 0xbb0   :  { %5691 = vmatpush1.bf16.msra.mxu1 %v5065_v7  ;;  %v5186_v7 = vld [vmem:[#allocation3 + $0xd38] sm:$0xff] }
 0xbb1   :  { %5692 = vmatprep.subr.bf16.mxu1 %v5076_v37  ;;  %v5203_v37 = vld [vmem:[#allocation3 + $0xdc0] sm:$0xff] }
 0xbb2   :  { %5529 = vmatpush1.bf16.msra.mxu0 %v5073_v38  ;;  %v5194_v38 = vld [vmem:[#allocation3 + $0xd78] sm:$0xff] }
 0xbb3   :  { %5539 = vmatprep.subr.bf16.mxu0 %v5084_v12  ;;  %v5165_v12 = vld [vmem:[#allocation3 + $0xc90] sm:$0xff] }
 0xbb4   :  { %5693 = vmatpush1.bf16.msra.mxu1 %v5075_v26  ;;  %v5196_v26 = vld [vmem:[#allocation3 + $0xd88] sm:$0xff] }
 0xbb5   :  { %5531 = vmatmul.mubr.bf16.vlgmr.msra.gmra.mrb[88].mxu0 %v9696_v20  ;;  %5703 = vmatprep.subr.bf16.mxu1 %v5086_v33  ;;  %v5213_v33 = vld [vmem:[#allocation3 + $0xe10] sm:$0xff] }
 0xbb6   :  { %5540 = vmatpush1.bf16.msra.mxu0 %v5083_v4  ;;  %5571 = vmatprep.mubr.bf16.mxu0 %v9701_v46  ;;  %v5204_v4 = vld [vmem:[#allocation3 + $0xdc8] sm:$0xff] }
 0xbb7   :  { %5541 = vmatprep.subr.bf16.mxu0 %v5094_v15  ;;  %5695 = vmatmul.mubr.bf16.vlgmr.msra.gmra.mrb[120].mxu1 %v9696_v20  ;;  %v5175_v15 = vld [vmem:[#allocation3 + $0xce0] sm:$0xff] }
 0xbb8   :  { %5704 = vmatpush1.bf16.msra.mxu1 %v5085_v22  ;;  %5735 = vmatprep.mubr.bf16.mxu1 %v9701_v46  ;;  %v5206_v22 = vld [vmem:[#allocation3 + $0xdd8] sm:$0xff] }
 0xbb9   :  { %5705 = vmatprep.subr.bf16.mxu1 %v5096_v53  ;;  %v5223_v53 = vld [vmem:[#allocation3 + $0xe60] sm:$0xff] }
 0xbba   :  { %5542 = vmatpush1.bf16.msra.mxu0 %v5093_v48  ;;  %v5214_v48 = vld [vmem:[#allocation3 + $0xe18] sm:$0xff] }
 0xbbb   :  { %5543 = vmatprep.subr.bf16.mxu0 %v5104_v19  ;;  %v5185_v19 = vld [vmem:[#allocation3 + $0xd30] sm:$0xff] }
 0xbbc   :  { %5706 = vmatpush1.bf16.msra.mxu1 %v5095_v14  ;;  %v5216_v14 = vld [vmem:[#allocation3 + $0xe28] sm:$0xff] }
 0xbbd   :  { %5707 = vmatprep.subr.bf16.mxu1 %v5106_v5  ;;  %v5233_v5 = vld [vmem:[#allocation3 + $0xeb0] sm:$0xff] }
 0xbbe   :  { %5544 = vmatpush1.bf16.msra.mxu0 %v5103_v2  ;;  %v5224_v2 = vld [vmem:[#allocation3 + $0xe68] sm:$0xff] }
 0xbbf   :  { %5545 = vmatprep.subr.bf16.mxu0 %v5114_v62  ;;  %v5195_v62 = vld [vmem:[#allocation3 + $0xd80] sm:$0xff] }
 0xbc0   :  { %5708 = vmatpush1.bf16.msra.mxu1 %v5105_v10  ;;  %v5215_v10 = vld [vmem:[#allocation3 + $0xe20] sm:$0xff] }
 0xbc1   :  { %5709 = vmatprep.subr.bf16.mxu1 %v5116_v27  ;;  %v5226_v27 = vld [vmem:[#allocation3 + $0xe78] sm:$0xff] }
 0xbc2   :  { %5546 = vmatpush1.bf16.msra.mxu0 %v5113_v60  ;;  %v5234_v60 = vld [vmem:[#allocation3 + $0xeb8] sm:$0xff] }
 0xbc3   :  { %5547 = vmatprep.subr.bf16.mxu0 %v5124_v39  ;;  %v5205_v39 = vld [vmem:[#allocation3 + $0xdd0] sm:$0xff] }
 0xbc4   :  { %5710 = vmatpush1.bf16.msra.mxu1 %v5115_v47  ;;  %v5254_v47 = vld [vmem:[#allocation3 + $0xf58] sm:$0xff] }
 0xbc5   :  { %5711 = vmatprep.subr.bf16.mxu1 %v5126_v29  ;;  %v5253_v29 = vld [vmem:[#allocation3 + $0xf50] sm:$0xff] }
 0xbc6   :  { %5548 = vmatpush1.bf16.msra.mxu0 %v5123_v6  ;;  %v5244_v6 = vld [vmem:[#allocation3 + $0xf08] sm:$0xff] }
 0xbc7   :  { %5549 = vmatprep.subr.bf16.mxu0 %v5134_v11  ;;  %v9710_v11 = vpack.c.bf16 %v4747_v55, %v4747_v55  ;;  %v5236_v55 = vld [vmem:[#allocation3 + $0xec8] sm:$0xff] }
 0xbc8   :  { %5712 = vmatpush1.bf16.msra.mxu1 %v5125_v54  ;;  %v5274_v54 = vld [vmem:[#allocation3 + $0xff8] sm:$0xff] }
 0xbc9   :  { %5713 = vmatprep.subr.bf16.mxu1 %v5136_v59  ;;  %v5245_v59 = vld [vmem:[#allocation3 + $0xf10] sm:$0xff] }
 0xbca   :  { %5550 = vmatpush1.bf16.msra.mxu0 %v5133_v24  ;;  %v9715_v24 = vpack.c.bf16 %v4750_v3, %v4750_v3  ;;  %v5246_v3 = vld [vmem:[#allocation3 + $0xf18] sm:$0xff] }
 0xbcb   :  { %5551 = vmatprep.subr.bf16.mxu0 %v5144_v25  ;;  %v5243_v25 = vld [vmem:[#allocation3 + $0xf00] sm:$0xff] }
 0xbcc   :  { %5714 = vmatpush1.bf16.msra.mxu1 %v5135_v32  ;;  %v5284_v32 = vld [vmem:[#allocation3 + $0x1048] sm:$0xff] }
 0xbcd   :  { %5715 = vmatprep.subr.bf16.mxu1 %v5146_v36  ;;  %v5255_v36 = vld [vmem:[#allocation3 + $0xf60] sm:$0xff] }
 0xbce   :  { %5552 = vmatpush1.bf16.msra.mxu0 %v5143_v30  ;;  %v5264_v30 = vld [vmem:[#allocation3 + $0xfa8] sm:$0xff] }
 0xbcf   :  { %5553 = vmatprep.subr.bf16.mxu0 %v5154_v21  ;;  %v5263_v21 = vld [vmem:[#allocation3 + $0xfa0] sm:$0xff] }
 0xbd0   :  { %5716 = vmatpush1.bf16.msra.mxu1 %v5145_v44  ;;  %v5294_v44 = vld [vmem:[#allocation3 + $0x1098] sm:$0xff] }
 0xbd1   :  { %5717 = vmatprep.subr.bf16.mxu1 %v5156_v16  ;;  %v5265_v16 = vld [vmem:[#allocation3 + $0xfb0] sm:$0xff] }
 0xbd2   :  { %5554 = vmatpush1.bf16.msra.mxu0 %v5153_v49  ;;  %v5256_v49 = vld [vmem:[#allocation3 + $0xf68] sm:$0xff] }
 0xbd3   :  { %5555 = vmatprep.subr.bf16.mxu0 %v5164_v40  ;;  %v5273_v40 = vld [vmem:[#allocation3 + $0xff0] sm:$0xff] }
 0xbd4   :  { %5718 = vmatpush1.bf16.msra.mxu1 %v5155_v28  ;;  %v5304_v28 = vld [vmem:[#allocation3 + $0x10e8] sm:$0xff] }
 0xbd5   :  { %5719 = vmatprep.subr.bf16.mxu1 %v5166_v56  ;;  %v5275_v56 = vld [vmem:[#allocation3 + $0x1000] sm:$0xff] }
 0xbd6   :  { %5556 = vmatpush1.bf16.msra.mxu0 %v5163_v9  ;;  %v5266_v9 = vld [vmem:[#allocation3 + $0xfb8] sm:$0xff] }
 0xbd7   :  { %5557 = vmatprep.subr.bf16.mxu0 %v5174_v41  ;;  %v5283_v41 = vld [vmem:[#allocation3 + $0x1040] sm:$0xff] }
 0xbd8   :  { %5720 = vmatpush1.bf16.msra.mxu1 %v5165_v12  ;;  %v5314_v12 = vld [vmem:[#allocation3 + $0x1138] sm:$0xff] }
 0xbd9   :  { %5721 = vmatprep.subr.bf16.mxu1 %v5176_v34  ;;  %v5285_v34 = vld [vmem:[#allocation3 + $0x1050] sm:$0xff] }
 0xbda   :  { %5558 = vmatpush1.bf16.msra.mxu0 %v5173_v43  ;;  %v5276_v43 = vld [vmem:[#allocation3 + $0x1008] sm:$0xff] }
 0xbdb   :  { %5559 = vmatprep.subr.bf16.mxu0 %v5184_v35  ;;  %v5293_v35 = vld [vmem:[#allocation3 + $0x1090] sm:$0xff] }
 0xbdc   :  { %5722 = vmatpush1.bf16.msra.mxu1 %v5175_v15  ;;  %v5324_v15 = vld [vmem:[#allocation3 + $0x1188] sm:$0xff] }
 0xbdd   :  { %5723 = vmatprep.subr.bf16.mxu1 %v5186_v7  ;;  %v5295_v7 = vld [vmem:[#allocation3 + $0x10a0] sm:$0xff] }
 0xbde   :  { %5560 = vmatpush1.bf16.msra.mxu0 %v5183_v1  ;;  %v5286_v1 = vld [vmem:[#allocation3 + $0x1058] sm:$0xff] }
 0xbdf   :  { %5561 = vmatprep.subr.bf16.mxu0 %v5194_v38  ;;  %v5303_v38 = vld [vmem:[#allocation3 + $0x10e0] sm:$0xff] }
 0xbe0   :  { %5724 = vmatpush1.bf16.msra.mxu1 %v5185_v19  ;;  %v5334_v19 = vld [vmem:[#allocation3 + $0x11d8] sm:$0xff] }
 0xbe1   :  { %5725 = vmatprep.subr.bf16.mxu1 %v5196_v26  ;;  %v5305_v26 = vld [vmem:[#allocation3 + $0x10f0] sm:$0xff] }
 0xbe2   :  { %5562 = vmatpush1.bf16.msra.mxu0 %v5193_v42  ;;  %v5296_v42 = vld [vmem:[#allocation3 + $0x10a8] sm:$0xff] }
 0xbe3   :  { %5563 = vmatprep.subr.bf16.mxu0 %v5204_v4  ;;  %v5313_v4 = vld [vmem:[#allocation3 + $0x1130] sm:$0xff] }
 0xbe4   :  { %5726 = vmatpush1.bf16.msra.mxu1 %v5195_v62  ;;  %v5344_v62 = vld [vmem:[#allocation3 + $0x1228] sm:$0xff] }
 0xbe5   :  { %5727 = vmatprep.subr.bf16.mxu1 %v5206_v22  ;;  %v5315_v22 = vld [vmem:[#allocation3 + $0x1140] sm:$0xff] }
 0xbe6   :  { %5564 = vmatpush1.bf16.msra.mxu0 %v5203_v37  ;;  %v5306_v37 = vld [vmem:[#allocation3 + $0x10f8] sm:$0xff] }
 0xbe7   :  { %5565 = vmatprep.subr.bf16.mxu0 %v5214_v48  ;;  %v5323_v48 = vld [vmem:[#allocation3 + $0x1180] sm:$0xff] }
 0xbe8   :  { %5728 = vmatpush1.bf16.msra.mxu1 %v5205_v39  ;;  %v5354_v39 = vld [vmem:[#allocation3 + $0x1278] sm:$0xff] }
 0xbe9   :  { %5729 = vmatprep.subr.bf16.mxu1 %v5216_v14  ;;  %v5325_v14 = vld [vmem:[#allocation3 + $0x1190] sm:$0xff] }
 0xbea   :  { %5566 = vmatpush1.bf16.msra.mxu0 %v5213_v33  ;;  %v5316_v33 = vld [vmem:[#allocation3 + $0x1148] sm:$0xff] }
 0xbeb   :  { %5567 = vmatprep.subr.bf16.mxu0 %v5224_v2  ;;  %v5333_v2 = vld [vmem:[#allocation3 + $0x11d0] sm:$0xff] }
 0xbec   :  { %5730 = vmatpush1.bf16.msra.mxu1 %v5215_v10  ;;  %v5364_v10 = vld [vmem:[#allocation3 + $0x12c8] sm:$0xff] }
 0xbed   :  { %5731 = vmatprep.subr.bf16.mxu1 %v5226_v27  ;;  %v5335_v27 = vld [vmem:[#allocation3 + $0x11e0] sm:$0xff] }
 0xbee   :  { %5568 = vmatpush1.bf16.msra.mxu0 %v5223_v53  ;;  %v5326_v53 = vld [vmem:[#allocation3 + $0x1198] sm:$0xff] }
 0xbef   :  { %5569 = vmatprep.subr.bf16.mxu0 %v5234_v60  ;;  %v5343_v60 = vld [vmem:[#allocation3 + $0x1220] sm:$0xff] }
 0xbf0   :  { %5732 = vmatpush1.bf16.msra.mxu1 %v5225_v13  ;;  %v5374_v13 = vld [vmem:[#allocation3 + $0x1318] sm:$0xff] }
 0xbf1   :  { %5733 = vmatprep.subr.bf16.mxu1 %v5236_v55  ;;  %v5345_v55 = vld [vmem:[#allocation3 + $0x1230] sm:$0xff] }
 0xbf2   :  { %5570 = vmatpush1.bf16.msra.mxu0 %v5233_v5  ;;  %v5336_v5 = vld [vmem:[#allocation3 + $0x11e8] sm:$0xff] }
 0xbf3   :  { %5580 = vmatprep.subr.bf16.mxu0 %v5244_v6  ;;  %v5353_v6 = vld [vmem:[#allocation3 + $0x1270] sm:$0xff] }
 0xbf4   :  { %5734 = vmatpush1.bf16.msra.mxu1 %v5235_v31  ;;  %v5384_v31 = vld [vmem:[#allocation3 + $0x1368] sm:$0xff] }
 0xbf5   :  { %5572 = vmatmul.mubr.bf16.vlgmr.msra.gmra.mrb[88].mxu0 %v9710_v11  ;;  %5744 = vmatprep.subr.bf16.mxu1 %v5246_v3  ;;  %v5355_v3 = vld [vmem:[#allocation3 + $0x1280] sm:$0xff] }
 0xbf6   :  { %5581 = vmatpush1.bf16.msra.mxu0 %v5243_v25  ;;  %5612 = vmatprep.mubr.bf16.mxu0 %v9715_v24  ;;  %v5346_v25 = vld [vmem:[#allocation3 + $0x1238] sm:$0xff] }
 0xbf7   :  { %5582 = vmatprep.subr.bf16.mxu0 %v5254_v47  ;;  %5736 = vmatmul.mubr.bf16.vlgmr.msra.gmra.mrb[120].mxu1 %v9710_v11  ;;  %v5363_v47 = vld [vmem:[#allocation3 + $0x12c0] sm:$0xff] }
 0xbf8   :  { %5745 = vmatpush1.bf16.msra.mxu1 %v5245_v59  ;;  %5776 = vmatprep.mubr.bf16.mxu1 %v9715_v24  ;;  %v5394_v59 = vld [vmem:[#allocation3 + $0x13b8] sm:$0xff] }
 0xbf9   :  { %5746 = vmatprep.subr.bf16.mxu1 %v5256_v49  ;;  %v5365_v49 = vld [vmem:[#allocation3 + $0x12d0] sm:$0xff] }
 0xbfa   :  { %5583 = vmatpush1.bf16.msra.mxu0 %v5253_v29  ;;  %v5356_v29 = vld [vmem:[#allocation3 + $0x1288] sm:$0xff] }
 0xbfb   :  { %5584 = vmatprep.subr.bf16.mxu0 %v5264_v30  ;;  %v5373_v30 = vld [vmem:[#allocation3 + $0x1310] sm:$0xff] }
 0xbfc   :  { %5747 = vmatpush1.bf16.msra.mxu1 %v5255_v36  ;;  %v4768_v36 = vld [vmem:[#allocation3 + $0x28] sm:$0xff] }
 0xbfd   :  { %5748 = vmatprep.subr.bf16.mxu1 %v5266_v9  ;;  %v9724_v9 = vpack.c.bf16 %v4749_v0, %v4749_v0  ;;  %v4788_v0 = vld [vmem:[#allocation3 + $0xc8] sm:$0xff] }
 0xbfe   :  { %5585 = vmatpush1.bf16.msra.mxu0 %v5263_v21  ;;  %v5366_v21 = vld [vmem:[#allocation3 + $0x12d8] sm:$0xff] }
 0xbff   :  { %5586 = vmatprep.subr.bf16.mxu0 %v5274_v54  ;;  %v5383_v54 = vld [vmem:[#allocation3 + $0x1360] sm:$0xff] }
 0xc00   :  { %5749 = vmatpush1.bf16.msra.mxu1 %v5265_v16  ;;  %v4767_v16 = vld [vmem:[#allocation3 + $0x20] sm:$0xff] }
 0xc01   :  { %5750 = vmatprep.subr.bf16.mxu1 %v5276_v43  ;;  %v4778_v43 = vld [vmem:[#allocation3 + $0x78] sm:$0xff] }
 0xc02   :  { %5587 = vmatpush1.bf16.msra.mxu0 %v5273_v40  ;;  %v5376_v40 = vld [vmem:[#allocation3 + $0x1328] sm:$0xff] }
 0xc03   :  { %5588 = vmatprep.subr.bf16.mxu0 %v5284_v32  ;;  %v5393_v32 = vld [vmem:[#allocation3 + $0x13b0] sm:$0xff] }
 0xc04   :  { %5751 = vmatpush1.bf16.msra.mxu1 %v5275_v56  ;;  %v5395_v56 = vld [vmem:[#allocation3 + $0x13c0] sm:$0xff] }
 0xc05   :  { %5752 = vmatprep.subr.bf16.mxu1 %v5286_v1  ;;  %v4770_v1 = vld [vmem:[#allocation3 + $0x38] sm:$0xff] }
 0xc06   :  { %5589 = vmatpush1.bf16.msra.mxu0 %v5283_v41  ;;  %v5375_v41 = vld [vmem:[#allocation3 + $0x1320] sm:$0xff] }
 0xc07   :  { %5590 = vmatprep.subr.bf16.mxu0 %v5294_v44  ;;  %v5386_v44 = vld [vmem:[#allocation3 + $0x1378] sm:$0xff] }
 0xc08   :  { %5753 = vmatpush1.bf16.msra.mxu1 %v5285_v34  ;;  %v4769_v34 = vld [vmem:[#allocation3 + $0x30] sm:$0xff] }
 0xc09   :  { %5754 = vmatprep.subr.bf16.mxu1 %v5296_v42  ;;  %v4780_v42 = vld [vmem:[#allocation3 + $0x88] sm:$0xff] }
 0xc0a   :  { %5591 = vmatpush1.bf16.msra.mxu0 %v5293_v35  ;;  %v5385_v35 = vld [vmem:[#allocation3 + $0x1370] sm:$0xff] }
 0xc0b   :  { %5592 = vmatprep.subr.bf16.mxu0 %v5304_v28  ;;  %v5396_v28 = vld [vmem:[#allocation3 + $0x13c8] sm:$0xff] }
 0xc0c   :  { %5755 = vmatpush1.bf16.msra.mxu1 %v5295_v7  ;;  %v4779_v7 = vld [vmem:[#allocation3 + $0x80] sm:$0xff] }
 0xc0d   :  { %5756 = vmatprep.subr.bf16.mxu1 %v5306_v37  ;;  %v4790_v37 = vld [vmem:[#allocation3 + $0xd8] sm:$0xff] }
 0xc0e   :  { %5593 = vmatpush1.bf16.msra.mxu0 %v5303_v38  ;;  %v4787_v38 = vld [vmem:[#allocation3 + $0xc0] sm:$0xff] }
 0xc0f   :  { %5594 = vmatprep.subr.bf16.mxu0 %v5314_v12  ;;  %v4798_v12 = vld [vmem:[#allocation3 + $0x118] sm:$0xff] }
 0xc10   :  { %5757 = vmatpush1.bf16.msra.mxu1 %v5305_v26  ;;  %v4789_v26 = vld [vmem:[#allocation3 + $0xd0] sm:$0xff] }
 0xc11   :  { %5758 = vmatprep.subr.bf16.mxu1 %v5316_v33  ;;  %v4800_v33 = vld [vmem:[#allocation3 + $0x128] sm:$0xff] }
 0xc12   :  { %5595 = vmatpush1.bf16.msra.mxu0 %v5313_v4  ;;  %v4797_v4 = vld [vmem:[#allocation3 + $0x110] sm:$0xff] }
 0xc13   :  { %5596 = vmatprep.subr.bf16.mxu0 %v5324_v15  ;;  %v4808_v15 = vld [vmem:[#allocation3 + $0x168] sm:$0xff] }
 0xc14   :  { %5759 = vmatpush1.bf16.msra.mxu1 %v5315_v22  ;;  %v4799_v22 = vld [vmem:[#allocation3 + $0x120] sm:$0xff] }
 0xc15   :  { %5760 = vmatprep.subr.bf16.mxu1 %v5326_v53  ;;  %v4810_v53 = vld [vmem:[#allocation3 + $0x178] sm:$0xff] }
 0xc16   :  { %5597 = vmatpush1.bf16.msra.mxu0 %v5323_v48  ;;  %v4807_v48 = vld [vmem:[#allocation3 + $0x160] sm:$0xff] }
 0xc17   :  { %5598 = vmatprep.subr.bf16.mxu0 %v5334_v19  ;;  %v4818_v19 = vld [vmem:[#allocation3 + $0x1b8] sm:$0xff] }
 0xc18   :  { %5761 = vmatpush1.bf16.msra.mxu1 %v5325_v14  ;;  %v4809_v14 = vld [vmem:[#allocation3 + $0x170] sm:$0xff] }
 0xc19   :  { %5762 = vmatprep.subr.bf16.mxu1 %v5336_v5  ;;  %v4820_v5 = vld [vmem:[#allocation3 + $0x1c8] sm:$0xff] }
 0xc1a   :  { %5599 = vmatpush1.bf16.msra.mxu0 %v5333_v2  ;;  %v4817_v2 = vld [vmem:[#allocation3 + $0x1b0] sm:$0xff] }
 0xc1b   :  { %5600 = vmatprep.subr.bf16.mxu0 %v5344_v62  ;;  %v4828_v62 = vld [vmem:[#allocation3 + $0x208] sm:$0xff] }
 0xc1c   :  { %5763 = vmatpush1.bf16.msra.mxu1 %v5335_v27  ;;  %v4819_v27 = vld [vmem:[#allocation3 + $0x1c0] sm:$0xff] }
 0xc1d   :  { %5764 = vmatprep.subr.bf16.mxu1 %v5346_v25  ;;  %v4830_v25 = vld [vmem:[#allocation3 + $0x218] sm:$0xff] }
 0xc1e   :  { %5601 = vmatpush1.bf16.msra.mxu0 %v5343_v60  ;;  %v4827_v60 = vld [vmem:[#allocation3 + $0x200] sm:$0xff] }
 0xc1f   :  { %5602 = vmatprep.subr.bf16.mxu0 %v5354_v39  ;;  %v4838_v39 = vld [vmem:[#allocation3 + $0x258] sm:$0xff] }
 0xc20   :  { %5765 = vmatpush1.bf16.msra.mxu1 %v5345_v55  ;;  %v4829_v55 = vld [vmem:[#allocation3 + $0x210] sm:$0xff] }
 0xc21   :  { %5766 = vmatprep.subr.bf16.mxu1 %v5356_v29  ;;  %v4840_v29 = vld [vmem:[#allocation3 + $0x268] sm:$0xff] }
 0xc22   :  { %5603 = vmatpush1.bf16.msra.mxu0 %v5353_v6  ;;  %v4837_v6 = vld [vmem:[#allocation3 + $0x250] sm:$0xff] }
 0xc23   :  { %5604 = vmatprep.subr.bf16.mxu0 %v5364_v10  ;;  %v4848_v10 = vld [vmem:[#allocation3 + $0x2a8] sm:$0xff] }
 0xc24   :  { %5767 = vmatpush1.bf16.msra.mxu1 %v5355_v3  ;;  %v4839_v3 = vld [vmem:[#allocation3 + $0x260] sm:$0xff] }
 0xc25   :  { %5768 = vmatprep.subr.bf16.mxu1 %v5366_v21  ;;  %v4850_v21 = vld [vmem:[#allocation3 + $0x2b8] sm:$0xff] }
 0xc26   :  { %5605 = vmatpush1.bf16.msra.mxu0 %v5363_v47  ;;  %v4847_v47 = vld [vmem:[#allocation3 + $0x2a0] sm:$0xff] }
 0xc27   :  { %5606 = vmatprep.subr.bf16.mxu0 %v5374_v13  ;;  %v4858_v13 = vld [vmem:[#allocation3 + $0x2f8] sm:$0xff] }
 0xc28   :  { %5769 = vmatpush1.bf16.msra.mxu1 %v5365_v49  ;;  %v4849_v49 = vld [vmem:[#allocation3 + $0x2b0] sm:$0xff] }
 0xc29   :  { %5770 = vmatprep.subr.bf16.mxu1 %v5376_v40  ;;  %v4860_v40 = vld [vmem:[#allocation3 + $0x308] sm:$0xff] }
 0xc2a   :  { %5607 = vmatpush1.bf16.msra.mxu0 %v5373_v30  ;;  %v4857_v30 = vld [vmem:[#allocation3 + $0x2f0] sm:$0xff] }
 0xc2b   :  { %5608 = vmatprep.subr.bf16.mxu0 %v5384_v31  ;;  %v4868_v31 = vld [vmem:[#allocation3 + $0x348] sm:$0xff] }
 0xc2c   :  { %5771 = vmatpush1.bf16.msra.mxu1 %v5375_v41  ;;  %v4859_v41 = vld [vmem:[#allocation3 + $0x300] sm:$0xff] }
 0xc2d   :  { %5772 = vmatprep.subr.bf16.mxu1 %v5386_v44  ;;  %v4870_v44 = vld [vmem:[#allocation3 + $0x358] sm:$0xff] }
 0xc2e   :  { %5609 = vmatpush1.bf16.msra.mxu0 %v5383_v54  ;;  %v4867_v54 = vld [vmem:[#allocation3 + $0x340] sm:$0xff] }
 0xc2f   :  { %5610 = vmatprep.subr.bf16.mxu0 %v5394_v59  ;;  %v4878_v59 = vld [vmem:[#allocation3 + $0x398] sm:$0xff] }
 0xc30   :  { %5773 = vmatpush1.bf16.msra.mxu1 %v5385_v35  ;;  %v4869_v35 = vld [vmem:[#allocation3 + $0x350] sm:$0xff] }
 0xc31   :  { %5774 = vmatprep.subr.bf16.mxu1 %v5396_v28  ;;  %v4880_v28 = vld [vmem:[#allocation3 + $0x3a8] sm:$0xff] }
 0xc32   :  { %5611 = vmatpush1.bf16.msra.mxu0 %v5393_v32  ;;  %v4877_v32 = vld [vmem:[#allocation3 + $0x390] sm:$0xff] }
 0xc33   :  { %5785 = vmatprep.subr.bf16.mxu0 %v4768_v36  ;;  %v4888_v36 = vld [vmem:[#allocation3 + $0x3e8] sm:$0xff] }
 0xc34   :  { %5775 = vmatpush1.bf16.msra.mxu1 %v5395_v56  ;;  %v4879_v56 = vld [vmem:[#allocation3 + $0x3a0] sm:$0xff] }
 0xc35   :  { %5613 = vmatmul.mubr.bf16.vlgmr.msra.gmra.mrb[88].mxu0 %v9724_v9  ;;  %5949 = vmatprep.subr.bf16.mxu1 %v4770_v1  ;;  %v4890_v1 = vld [vmem:[#allocation3 + $0x3f8] sm:$0xff] }
 0xc36   :  { %5786 = vmatpush1.bf16.msra.mxu0 %v4767_v16  ;;  %5817 = vmatprep.mubr.bf16.mxu0 %v9675_v23  ;;  %v4887_v16 = vld [vmem:[#allocation3 + $0x3e0] sm:$0xff] }
 0xc37   :  { %5787 = vmatprep.subr.bf16.mxu0 %v4778_v43  ;;  %5777 = vmatmul.mubr.bf16.vlgmr.msra.gmra.mrb[120].mxu1 %v9724_v9  ;;  %v4898_v43 = vld [vmem:[#allocation3 + $0x438] sm:$0xff] }
 0xc38   :  { %5950 = vmatpush1.bf16.msra.mxu1 %v4769_v34  ;;  %5981 = vmatprep.mubr.bf16.mxu1 %v9675_v23  ;;  %v4889_v34 = vld [vmem:[#allocation3 + $0x3f0] sm:$0xff] }
 0xc39   :  { %5951 = vmatprep.subr.bf16.mxu1 %v4780_v42  ;;  %v4900_v42 = vld [vmem:[#allocation3 + $0x448] sm:$0xff] }
 0xc3a   :  { %5788 = vmatpush1.bf16.msra.mxu0 %v4777_v61  ;;  %v4897_v61 = vld [vmem:[#allocation3 + $0x430] sm:$0xff] }
 0xc3b   :  { %5789 = vmatprep.subr.bf16.mxu0 %v4788_v0  ;;  %v4908_v0 = vld [vmem:[#allocation3 + $0x488] sm:$0xff] }
 0xc3c   :  { %5952 = vmatpush1.bf16.msra.mxu1 %v4779_v7  ;;  %v4899_v7 = vld [vmem:[#allocation3 + $0x440] sm:$0xff] }
 0xc3d   :  { %5953 = vmatprep.subr.bf16.mxu1 %v4790_v37  ;;  %v4910_v37 = vld [vmem:[#allocation3 + $0x498] sm:$0xff] }
 0xc3e   :  { %5790 = vmatpush1.bf16.msra.mxu0 %v4787_v38  ;;  %v4907_v38 = vld [vmem:[#allocation3 + $0x480] sm:$0xff] }
 0xc3f   :  { %5791 = vmatprep.subr.bf16.mxu0 %v4798_v12  ;;  %v4918_v12 = vld [vmem:[#allocation3 + $0x4d8] sm:$0xff] }
 0xc40   :  { %5954 = vmatpush1.bf16.msra.mxu1 %v4789_v26  ;;  %v4909_v26 = vld [vmem:[#allocation3 + $0x490] sm:$0xff] }
 0xc41   :  { %5955 = vmatprep.subr.bf16.mxu1 %v4800_v33  ;;  %v4920_v33 = vld [vmem:[#allocation3 + $0x4e8] sm:$0xff] }
 0xc42   :  { %5792 = vmatpush1.bf16.msra.mxu0 %v4797_v4  ;;  %v4917_v4 = vld [vmem:[#allocation3 + $0x4d0] sm:$0xff] }
 0xc43   :  { %5793 = vmatprep.subr.bf16.mxu0 %v4808_v15  ;;  %v4928_v15 = vld [vmem:[#allocation3 + $0x528] sm:$0xff] }
 0xc44   :  { %5956 = vmatpush1.bf16.msra.mxu1 %v4799_v22  ;;  %v4919_v22 = vld [vmem:[#allocation3 + $0x4e0] sm:$0xff] }
 0xc45   :  { %5957 = vmatprep.subr.bf16.mxu1 %v4810_v53  ;;  %v4930_v53 = vld [vmem:[#allocation3 + $0x538] sm:$0xff] }
 0xc46   :  { %5794 = vmatpush1.bf16.msra.mxu0 %v4807_v48  ;;  %v4927_v48 = vld [vmem:[#allocation3 + $0x520] sm:$0xff] }
 0xc47   :  { %5795 = vmatprep.subr.bf16.mxu0 %v4818_v19  ;;  %v4938_v19 = vld [vmem:[#allocation3 + $0x578] sm:$0xff] }
 0xc48   :  { %5958 = vmatpush1.bf16.msra.mxu1 %v4809_v14  ;;  %v4929_v14 = vld [vmem:[#allocation3 + $0x530] sm:$0xff] }
 0xc49   :  { %5959 = vmatprep.subr.bf16.mxu1 %v4820_v5  ;;  %v4940_v5 = vld [vmem:[#allocation3 + $0x588] sm:$0xff] }
 0xc4a   :  { %5796 = vmatpush1.bf16.msra.mxu0 %v4817_v2  ;;  %v4937_v2 = vld [vmem:[#allocation3 + $0x570] sm:$0xff] }
 0xc4b   :  { %5797 = vmatprep.subr.bf16.mxu0 %v4828_v62  ;;  %v4948_v62 = vld [vmem:[#allocation3 + $0x5c8] sm:$0xff] }
 0xc4c   :  { %5960 = vmatpush1.bf16.msra.mxu1 %v4819_v27  ;;  %v4939_v27 = vld [vmem:[#allocation3 + $0x580] sm:$0xff] }
 0xc4d   :  { %5961 = vmatprep.subr.bf16.mxu1 %v4830_v25  ;;  %v4950_v25 = vld [vmem:[#allocation3 + $0x5d8] sm:$0xff] }
 0xc4e   :  { %5798 = vmatpush1.bf16.msra.mxu0 %v4827_v60  ;;  %v4947_v60 = vld [vmem:[#allocation3 + $0x5c0] sm:$0xff] }
 0xc4f   :  { %5799 = vmatprep.subr.bf16.mxu0 %v4838_v39  ;;  %v4958_v39 = vld [vmem:[#allocation3 + $0x618] sm:$0xff] }
 0xc50   :  { %5962 = vmatpush1.bf16.msra.mxu1 %v4829_v55  ;;  %v4949_v55 = vld [vmem:[#allocation3 + $0x5d0] sm:$0xff] }
 0xc51   :  { %5963 = vmatprep.subr.bf16.mxu1 %v4840_v29  ;;  %v4960_v29 = vld [vmem:[#allocation3 + $0x628] sm:$0xff] }
 0xc52   :  { %5800 = vmatpush1.bf16.msra.mxu0 %v4837_v6  ;;  %v4957_v6 = vld [vmem:[#allocation3 + $0x610] sm:$0xff] }
 0xc53   :  { %5801 = vmatprep.subr.bf16.mxu0 %v4848_v10  ;;  %v4968_v10 = vld [vmem:[#allocation3 + $0x668] sm:$0xff] }
 0xc54   :  { %5964 = vmatpush1.bf16.msra.mxu1 %v4839_v3  ;;  %v4959_v3 = vld [vmem:[#allocation3 + $0x620] sm:$0xff] }
 0xc55   :  { %5965 = vmatprep.subr.bf16.mxu1 %v4850_v21  ;;  %v4970_v21 = vld [vmem:[#allocation3 + $0x678] sm:$0xff] }
 0xc56   :  { %5802 = vmatpush1.bf16.msra.mxu0 %v4847_v47  ;;  %v4967_v47 = vld [vmem:[#allocation3 + $0x660] sm:$0xff] }
 0xc57   :  { %5803 = vmatprep.subr.bf16.mxu0 %v4858_v13  ;;  %v4978_v13 = vld [vmem:[#allocation3 + $0x6b8] sm:$0xff] }
 0xc58   :  { %5966 = vmatpush1.bf16.msra.mxu1 %v4849_v49  ;;  %v4969_v49 = vld [vmem:[#allocation3 + $0x670] sm:$0xff] }
 0xc59   :  { %5967 = vmatprep.subr.bf16.mxu1 %v4860_v40  ;;  %v4980_v40 = vld [vmem:[#allocation3 + $0x6c8] sm:$0xff] }
 0xc5a   :  { %5804 = vmatpush1.bf16.msra.mxu0 %v4857_v30  ;;  %v4977_v30 = vld [vmem:[#allocation3 + $0x6b0] sm:$0xff] }
 0xc5b   :  { %5805 = vmatprep.subr.bf16.mxu0 %v4868_v31  ;;  %v4988_v31 = vld [vmem:[#allocation3 + $0x708] sm:$0xff] }
 0xc5c   :  { %5968 = vmatpush1.bf16.msra.mxu1 %v4859_v41  ;;  %v4979_v41 = vld [vmem:[#allocation3 + $0x6c0] sm:$0xff] }
 0xc5d   :  { %5969 = vmatprep.subr.bf16.mxu1 %v4870_v44  ;;  %v4990_v44 = vld [vmem:[#allocation3 + $0x718] sm:$0xff] }
 0xc5e   :  { %5806 = vmatpush1.bf16.msra.mxu0 %v4867_v54  ;;  %v4987_v54 = vld [vmem:[#allocation3 + $0x700] sm:$0xff] }
 0xc5f   :  { %5807 = vmatprep.subr.bf16.mxu0 %v4878_v59  ;;  %v4998_v59 = vld [vmem:[#allocation3 + $0x758] sm:$0xff] }
 0xc60   :  { %5970 = vmatpush1.bf16.msra.mxu1 %v4869_v35  ;;  %v4989_v35 = vld [vmem:[#allocation3 + $0x710] sm:$0xff] }
 0xc61   :  { %5971 = vmatprep.subr.bf16.mxu1 %v4880_v28  ;;  %v5000_v28 = vld [vmem:[#allocation3 + $0x768] sm:$0xff] }
 0xc62   :  { %5808 = vmatpush1.bf16.msra.mxu0 %v4877_v32  ;;  %v4997_v32 = vld [vmem:[#allocation3 + $0x750] sm:$0xff] }
 0xc63   :  { %5809 = vmatprep.subr.bf16.mxu0 %v4888_v36  ;;  %v5008_v36 = vld [vmem:[#allocation3 + $0x7a8] sm:$0xff] }
 0xc64   :  { %5972 = vmatpush1.bf16.msra.mxu1 %v4879_v56  ;;  %v4999_v56 = vld [vmem:[#allocation3 + $0x760] sm:$0xff] }
 0xc65   :  { %5973 = vmatprep.subr.bf16.mxu1 %v4890_v1  ;;  %v5010_v1 = vld [vmem:[#allocation3 + $0x7b8] sm:$0xff] }
 0xc66   :  { %5810 = vmatpush1.bf16.msra.mxu0 %v4887_v16  ;;  %v5007_v16 = vld [vmem:[#allocation3 + $0x7a0] sm:$0xff] }
 0xc67   :  { %5811 = vmatprep.subr.bf16.mxu0 %v4898_v43  ;;  %v5018_v43 = vld [vmem:[#allocation3 + $0x7f8] sm:$0xff] }
 0xc68   :  { %5974 = vmatpush1.bf16.msra.mxu1 %v4889_v34  ;;  %v5009_v34 = vld [vmem:[#allocation3 + $0x7b0] sm:$0xff] }
 0xc69   :  { %5975 = vmatprep.subr.bf16.mxu1 %v4900_v42  ;;  %v5020_v42 = vld [vmem:[#allocation3 + $0x808] sm:$0xff] }
 0xc6a   :  { %5812 = vmatpush1.bf16.msra.mxu0 %v4897_v61  ;;  %v5017_v61 = vld [vmem:[#allocation3 + $0x7f0] sm:$0xff] }
 0xc6b   :  { %5813 = vmatprep.subr.bf16.mxu0 %v4908_v0  ;;  %v5028_v0 = vld [vmem:[#allocation3 + $0x848] sm:$0xff] }
 0xc6c   :  { %5976 = vmatpush1.bf16.msra.mxu1 %v4899_v7  ;;  %v5019_v7 = vld [vmem:[#allocation3 + $0x800] sm:$0xff] }
 0xc6d   :  { %5977 = vmatprep.subr.bf16.mxu1 %v4910_v37  ;;  %v5030_v37 = vld [vmem:[#allocation3 + $0x858] sm:$0xff] }
 0xc6e   :  { %5814 = vmatpush1.bf16.msra.mxu0 %v4907_v38  ;;  %v5027_v38 = vld [vmem:[#allocation3 + $0x840] sm:$0xff] }
 0xc6f   :  { %5815 = vmatprep.subr.bf16.mxu0 %v4918_v12  ;;  %v5038_v12 = vld [vmem:[#allocation3 + $0x898] sm:$0xff] }
 0xc70   :  { %5978 = vmatpush1.bf16.msra.mxu1 %v4909_v26  ;;  %v5029_v26 = vld [vmem:[#allocation3 + $0x850] sm:$0xff] }
 0xc71   :  { %5979 = vmatprep.subr.bf16.mxu1 %v4920_v33  ;;  %v5040_v33 = vld [vmem:[#allocation3 + $0x8a8] sm:$0xff] }
 0xc72   :  { %5816 = vmatpush1.bf16.msra.mxu0 %v4917_v4  ;;  %v5037_v4 = vld [vmem:[#allocation3 + $0x890] sm:$0xff] }
 0xc73   :  { %5826 = vmatprep.subr.bf16.mxu0 %v4928_v15  ;;  %v5048_v15 = vld [vmem:[#allocation3 + $0x8e8] sm:$0xff] }
 0xc74   :  { %5980 = vmatpush1.bf16.msra.mxu1 %v4919_v22  ;;  %v5039_v22 = vld [vmem:[#allocation3 + $0x8a0] sm:$0xff] }
 0xc75   :  { %5818 = vmatmul.mubr.bf16.vlgmr.msra.gmra.mrb[92].mxu0 %v9682_v63  ;;  %5990 = vmatprep.subr.bf16.mxu1 %v4930_v53  ;;  %v5050_v53 = vld [vmem:[#allocation3 + $0x8f8] sm:$0xff] }
 0xc76   :  { %5827 = vmatpush1.bf16.msra.mxu0 %v4927_v48  ;;  %5858 = vmatprep.mubr.bf16.mxu0 %v9687_v45  ;;  %v5047_v48 = vld [vmem:[#allocation3 + $0x8e0] sm:$0xff] }
 0xc77   :  { %5828 = vmatprep.subr.bf16.mxu0 %v4938_v19  ;;  %5982 = vmatmul.mubr.bf16.vlgmr.msra.gmra.mrb[124].mxu1 %v9682_v63  ;;  %v5058_v19 = vld [vmem:[#allocation3 + $0x938] sm:$0xff] }
 0xc78   :  { %5991 = vmatpush1.bf16.msra.mxu1 %v4929_v14  ;;  %6022 = vmatprep.mubr.bf16.mxu1 %v9687_v45  ;;  %v5049_v14 = vld [vmem:[#allocation3 + $0x8f0] sm:$0xff] }
 0xc79   :  { %5992 = vmatprep.subr.bf16.mxu1 %v4940_v5  ;;  %v5060_v5 = vld [vmem:[#allocation3 + $0x948] sm:$0xff] }
 0xc7a   :  { %5829 = vmatpush1.bf16.msra.mxu0 %v4937_v2  ;;  %v5057_v2 = vld [vmem:[#allocation3 + $0x930] sm:$0xff] }
 0xc7b   :  { %5830 = vmatprep.subr.bf16.mxu0 %v4948_v62  ;;  %v5068_v62 = vld [vmem:[#allocation3 + $0x988] sm:$0xff] }
 0xc7c   :  { %5993 = vmatpush1.bf16.msra.mxu1 %v4939_v27  ;;  %v5059_v27 = vld [vmem:[#allocation3 + $0x940] sm:$0xff] }
 0xc7d   :  { %5994 = vmatprep.subr.bf16.mxu1 %v4950_v25  ;;  %v5070_v25 = vld [vmem:[#allocation3 + $0x998] sm:$0xff] }
 0xc7e   :  { %5831 = vmatpush1.bf16.msra.mxu0 %v4947_v60  ;;  %v5067_v60 = vld [vmem:[#allocation3 + $0x980] sm:$0xff] }
 0xc7f   :  { %5832 = vmatprep.subr.bf16.mxu0 %v4958_v39  ;;  %v5078_v39 = vld [vmem:[#allocation3 + $0x9d8] sm:$0xff] }
 0xc80   :  { %5995 = vmatpush1.bf16.msra.mxu1 %v4949_v55  ;;  %v5069_v55 = vld [vmem:[#allocation3 + $0x990] sm:$0xff] }
 0xc81   :  { %5996 = vmatprep.subr.bf16.mxu1 %v4960_v29  ;;  %v5080_v29 = vld [vmem:[#allocation3 + $0x9e8] sm:$0xff] }
 0xc82   :  { %5833 = vmatpush1.bf16.msra.mxu0 %v4957_v6  ;;  %v5077_v6 = vld [vmem:[#allocation3 + $0x9d0] sm:$0xff] }
 0xc83   :  { %5834 = vmatprep.subr.bf16.mxu0 %v4968_v10  ;;  %v5088_v10 = vld [vmem:[#allocation3 + $0xa28] sm:$0xff] }
 0xc84   :  { %5997 = vmatpush1.bf16.msra.mxu1 %v4959_v3  ;;  %v5079_v3 = vld [vmem:[#allocation3 + $0x9e0] sm:$0xff] }
 0xc85   :  { %5998 = vmatprep.subr.bf16.mxu1 %v4970_v21  ;;  %v5090_v21 = vld [vmem:[#allocation3 + $0xa38] sm:$0xff] }
 0xc86   :  { %5835 = vmatpush1.bf16.msra.mxu0 %v4967_v47  ;;  %v5087_v47 = vld [vmem:[#allocation3 + $0xa20] sm:$0xff] }
 0xc87   :  { %5836 = vmatprep.subr.bf16.mxu0 %v4978_v13  ;;  %v5098_v13 = vld [vmem:[#allocation3 + $0xa78] sm:$0xff] }
 0xc88   :  { %5999 = vmatpush1.bf16.msra.mxu1 %v4969_v49  ;;  %v5089_v49 = vld [vmem:[#allocation3 + $0xa30] sm:$0xff] }
 0xc89   :  { %6000 = vmatprep.subr.bf16.mxu1 %v4980_v40  ;;  %v5100_v40 = vld [vmem:[#allocation3 + $0xa88] sm:$0xff] }
 0xc8a   :  { %5837 = vmatpush1.bf16.msra.mxu0 %v4977_v30  ;;  %v5097_v30 = vld [vmem:[#allocation3 + $0xa70] sm:$0xff] }
 0xc8b   :  { %5838 = vmatprep.subr.bf16.mxu0 %v4988_v31  ;;  %v5108_v31 = vld [vmem:[#allocation3 + $0xac8] sm:$0xff] }
 0xc8c   :  { %6001 = vmatpush1.bf16.msra.mxu1 %v4979_v41  ;;  %v5099_v41 = vld [vmem:[#allocation3 + $0xa80] sm:$0xff] }
 0xc8d   :  { %6002 = vmatprep.subr.bf16.mxu1 %v4990_v44  ;;  %v5110_v44 = vld [vmem:[#allocation3 + $0xad8] sm:$0xff] }
 0xc8e   :  { %5839 = vmatpush1.bf16.msra.mxu0 %v4987_v54  ;;  %v5107_v54 = vld [vmem:[#allocation3 + $0xac0] sm:$0xff] }
 0xc8f   :  { %5840 = vmatprep.subr.bf16.mxu0 %v4998_v59  ;;  %v5118_v59 = vld [vmem:[#allocation3 + $0xb18] sm:$0xff] }
 0xc90   :  { %6003 = vmatpush1.bf16.msra.mxu1 %v4989_v35  ;;  %v5109_v35 = vld [vmem:[#allocation3 + $0xad0] sm:$0xff] }
 0xc91   :  { %6004 = vmatprep.subr.bf16.mxu1 %v5000_v28  ;;  %v5120_v28 = vld [vmem:[#allocation3 + $0xb28] sm:$0xff] }
 0xc92   :  { %5841 = vmatpush1.bf16.msra.mxu0 %v4997_v32  ;;  %v5117_v32 = vld [vmem:[#allocation3 + $0xb10] sm:$0xff] }
 0xc93   :  { %5842 = vmatprep.subr.bf16.mxu0 %v5008_v36  ;;  %v5128_v36 = vld [vmem:[#allocation3 + $0xb68] sm:$0xff] }
 0xc94   :  { %6005 = vmatpush1.bf16.msra.mxu1 %v4999_v56  ;;  %v5119_v56 = vld [vmem:[#allocation3 + $0xb20] sm:$0xff] }
 0xc95   :  { %6006 = vmatprep.subr.bf16.mxu1 %v5010_v1  ;;  %v5130_v1 = vld [vmem:[#allocation3 + $0xb78] sm:$0xff] }
 0xc96   :  { %5843 = vmatpush1.bf16.msra.mxu0 %v5007_v16  ;;  %v5127_v16 = vld [vmem:[#allocation3 + $0xb60] sm:$0xff] }
 0xc97   :  { %5844 = vmatprep.subr.bf16.mxu0 %v5018_v43  ;;  %v5138_v43 = vld [vmem:[#allocation3 + $0xbb8] sm:$0xff] }
 0xc98   :  { %6007 = vmatpush1.bf16.msra.mxu1 %v5009_v34  ;;  %v5129_v34 = vld [vmem:[#allocation3 + $0xb70] sm:$0xff] }
 0xc99   :  { %6008 = vmatprep.subr.bf16.mxu1 %v5020_v42  ;;  %v5140_v42 = vld [vmem:[#allocation3 + $0xbc8] sm:$0xff] }
 0xc9a   :  { %5845 = vmatpush1.bf16.msra.mxu0 %v5017_v61  ;;  %v5137_v61 = vld [vmem:[#allocation3 + $0xbb0] sm:$0xff] }
 0xc9b   :  { %5846 = vmatprep.subr.bf16.mxu0 %v5028_v0  ;;  %v5148_v0 = vld [vmem:[#allocation3 + $0xc08] sm:$0xff] }
 0xc9c   :  { %6009 = vmatpush1.bf16.msra.mxu1 %v5019_v7  ;;  %v5139_v7 = vld [vmem:[#allocation3 + $0xbc0] sm:$0xff] }
 0xc9d   :  { %6010 = vmatprep.subr.bf16.mxu1 %v5030_v37  ;;  %v5150_v37 = vld [vmem:[#allocation3 + $0xc18] sm:$0xff] }
 0xc9e   :  { %5847 = vmatpush1.bf16.msra.mxu0 %v5027_v38  ;;  %v5147_v38 = vld [vmem:[#allocation3 + $0xc00] sm:$0xff] }
 0xc9f   :  { %5848 = vmatprep.subr.bf16.mxu0 %v5038_v12  ;;  %v5158_v12 = vld [vmem:[#allocation3 + $0xc58] sm:$0xff] }
 0xca0   :  { %6011 = vmatpush1.bf16.msra.mxu1 %v5029_v26  ;;  %v5149_v26 = vld [vmem:[#allocation3 + $0xc10] sm:$0xff] }
 0xca1   :  { %6012 = vmatprep.subr.bf16.mxu1 %v5040_v33  ;;  %v5160_v33 = vld [vmem:[#allocation3 + $0xc68] sm:$0xff] }
 0xca2   :  { %5849 = vmatpush1.bf16.msra.mxu0 %v5037_v4  ;;  %v5157_v4 = vld [vmem:[#allocation3 + $0xc50] sm:$0xff] }
 0xca3   :  { %5850 = vmatprep.subr.bf16.mxu0 %v5048_v15  ;;  %v5168_v15 = vld [vmem:[#allocation3 + $0xca8] sm:$0xff] }
 0xca4   :  { %6013 = vmatpush1.bf16.msra.mxu1 %v5039_v22  ;;  %v5159_v22 = vld [vmem:[#allocation3 + $0xc60] sm:$0xff] }
 0xca5   :  { %6014 = vmatprep.subr.bf16.mxu1 %v5050_v53  ;;  %v5170_v53 = vld [vmem:[#allocation3 + $0xcb8] sm:$0xff] }
 0xca6   :  { %5851 = vmatpush1.bf16.msra.mxu0 %v5047_v48  ;;  %v5167_v48 = vld [vmem:[#allocation3 + $0xca0] sm:$0xff] }
 0xca7   :  { %5852 = vmatprep.subr.bf16.mxu0 %v5058_v19  ;;  %v5178_v19 = vld [vmem:[#allocation3 + $0xcf8] sm:$0xff] }
 0xca8   :  { %6015 = vmatpush1.bf16.msra.mxu1 %v5049_v14  ;;  %v5169_v14 = vld [vmem:[#allocation3 + $0xcb0] sm:$0xff] }
 0xca9   :  { %6016 = vmatprep.subr.bf16.mxu1 %v5060_v5  ;;  %v5180_v5 = vld [vmem:[#allocation3 + $0xd08] sm:$0xff] }
 0xcaa   :  { %5853 = vmatpush1.bf16.msra.mxu0 %v5057_v2  ;;  %v5177_v2 = vld [vmem:[#allocation3 + $0xcf0] sm:$0xff] }
 0xcab   :  { %5854 = vmatprep.subr.bf16.mxu0 %v5068_v62  ;;  %v5188_v62 = vld [vmem:[#allocation3 + $0xd48] sm:$0xff] }
 0xcac   :  { %6017 = vmatpush1.bf16.msra.mxu1 %v5059_v27  ;;  %v5179_v27 = vld [vmem:[#allocation3 + $0xd00] sm:$0xff] }
 0xcad   :  { %6018 = vmatprep.subr.bf16.mxu1 %v5070_v25  ;;  %v5190_v25 = vld [vmem:[#allocation3 + $0xd58] sm:$0xff] }
 0xcae   :  { %5855 = vmatpush1.bf16.msra.mxu0 %v5067_v60  ;;  %v5187_v60 = vld [vmem:[#allocation3 + $0xd40] sm:$0xff] }
 0xcaf   :  { %5856 = vmatprep.subr.bf16.mxu0 %v5078_v39  ;;  %v5198_v39 = vld [vmem:[#allocation3 + $0xd98] sm:$0xff] }
 0xcb0   :  { %6019 = vmatpush1.bf16.msra.mxu1 %v5069_v55  ;;  %v5189_v55 = vld [vmem:[#allocation3 + $0xd50] sm:$0xff] }
 0xcb1   :  { %6020 = vmatprep.subr.bf16.mxu1 %v5080_v29  ;;  %v5200_v29 = vld [vmem:[#allocation3 + $0xda8] sm:$0xff] }
 0xcb2   :  { %5857 = vmatpush1.bf16.msra.mxu0 %v5077_v6  ;;  %v5197_v6 = vld [vmem:[#allocation3 + $0xd90] sm:$0xff] }
 0xcb3   :  { %5867 = vmatprep.subr.bf16.mxu0 %v5088_v10  ;;  %v5208_v10 = vld [vmem:[#allocation3 + $0xde8] sm:$0xff] }
 0xcb4   :  { %6021 = vmatpush1.bf16.msra.mxu1 %v5079_v3  ;;  %v5199_v3 = vld [vmem:[#allocation3 + $0xda0] sm:$0xff] }
 0xcb5   :  { %5859 = vmatmul.mubr.bf16.vlgmr.msra.gmra.mrb[92].mxu0 %v9696_v20  ;;  %6031 = vmatprep.subr.bf16.mxu1 %v5090_v21  ;;  %v5210_v21 = vld [vmem:[#allocation3 + $0xdf8] sm:$0xff] }
 0xcb6   :  { %5868 = vmatpush1.bf16.msra.mxu0 %v5087_v47  ;;  %5899 = vmatprep.mubr.bf16.mxu0 %v9701_v46  ;;  %v5207_v47 = vld [vmem:[#allocation3 + $0xde0] sm:$0xff] }
 0xcb7   :  { %5869 = vmatprep.subr.bf16.mxu0 %v5098_v13  ;;  %6023 = vmatmul.mubr.bf16.vlgmr.msra.gmra.mrb[124].mxu1 %v9696_v20  ;;  %v5218_v13 = vld [vmem:[#allocation3 + $0xe38] sm:$0xff] }
 0xcb8   :  { %6032 = vmatpush1.bf16.msra.mxu1 %v5089_v49  ;;  %6063 = vmatprep.mubr.bf16.mxu1 %v9701_v46  ;;  %v5209_v49 = vld [vmem:[#allocation3 + $0xdf0] sm:$0xff] }
 0xcb9   :  { %6033 = vmatprep.subr.bf16.mxu1 %v5100_v40  ;;  %v5220_v40 = vld [vmem:[#allocation3 + $0xe48] sm:$0xff] }
 0xcba   :  { %5870 = vmatpush1.bf16.msra.mxu0 %v5097_v30  ;;  %v5217_v30 = vld [vmem:[#allocation3 + $0xe30] sm:$0xff] }
 0xcbb   :  { %5871 = vmatprep.subr.bf16.mxu0 %v5108_v31  ;;  %v5228_v31 = vld [vmem:[#allocation3 + $0xe88] sm:$0xff] }
 0xcbc   :  { %6034 = vmatpush1.bf16.msra.mxu1 %v5099_v41  ;;  %v5219_v41 = vld [vmem:[#allocation3 + $0xe40] sm:$0xff] }
 0xcbd   :  { %6035 = vmatprep.subr.bf16.mxu1 %v5110_v44  ;;  %v5230_v44 = vld [vmem:[#allocation3 + $0xe98] sm:$0xff] }
 0xcbe   :  { %5872 = vmatpush1.bf16.msra.mxu0 %v5107_v54  ;;  %v5227_v54 = vld [vmem:[#allocation3 + $0xe80] sm:$0xff] }
 0xcbf   :  { %5873 = vmatprep.subr.bf16.mxu0 %v5118_v59  ;;  %v5238_v59 = vld [vmem:[#allocation3 + $0xed8] sm:$0xff] }
 0xcc0   :  { %6036 = vmatpush1.bf16.msra.mxu1 %v5109_v35  ;;  %v5229_v35 = vld [vmem:[#allocation3 + $0xe90] sm:$0xff] }
 0xcc1   :  { %6037 = vmatprep.subr.bf16.mxu1 %v5120_v28  ;;  %v5240_v28 = vld [vmem:[#allocation3 + $0xee8] sm:$0xff] }
 0xcc2   :  { %5874 = vmatpush1.bf16.msra.mxu0 %v5117_v32  ;;  %v5237_v32 = vld [vmem:[#allocation3 + $0xed0] sm:$0xff] }
 0xcc3   :  { %5875 = vmatprep.subr.bf16.mxu0 %v5128_v36  ;;  %v5248_v36 = vld [vmem:[#allocation3 + $0xf28] sm:$0xff] }
 0xcc4   :  { %6038 = vmatpush1.bf16.msra.mxu1 %v5119_v56  ;;  %v5239_v56 = vld [vmem:[#allocation3 + $0xee0] sm:$0xff] }
 0xcc5   :  { %6039 = vmatprep.subr.bf16.mxu1 %v5130_v1  ;;  %v5250_v1 = vld [vmem:[#allocation3 + $0xf38] sm:$0xff] }
 0xcc6   :  { %5876 = vmatpush1.bf16.msra.mxu0 %v5127_v16  ;;  %v5247_v16 = vld [vmem:[#allocation3 + $0xf20] sm:$0xff] }
 0xcc7   :  { %5877 = vmatprep.subr.bf16.mxu0 %v5138_v43  ;;  %v5258_v43 = vld [vmem:[#allocation3 + $0xf78] sm:$0xff] }
 0xcc8   :  { %6040 = vmatpush1.bf16.msra.mxu1 %v5129_v34  ;;  %v5249_v34 = vld [vmem:[#allocation3 + $0xf30] sm:$0xff] }
 0xcc9   :  { %6041 = vmatprep.subr.bf16.mxu1 %v5140_v42  ;;  %v5260_v42 = vld [vmem:[#allocation3 + $0xf88] sm:$0xff] }
 0xcca   :  { %5878 = vmatpush1.bf16.msra.mxu0 %v5137_v61  ;;  %v5257_v61 = vld [vmem:[#allocation3 + $0xf70] sm:$0xff] }
 0xccb   :  { %5879 = vmatprep.subr.bf16.mxu0 %v5148_v0  ;;  %v5268_v0 = vld [vmem:[#allocation3 + $0xfc8] sm:$0xff] }
 0xccc   :  { %6042 = vmatpush1.bf16.msra.mxu1 %v5139_v7  ;;  %v5259_v7 = vld [vmem:[#allocation3 + $0xf80] sm:$0xff] }
 0xccd   :  { %6043 = vmatprep.subr.bf16.mxu1 %v5150_v37  ;;  %v9742_v37 = vld [vmem:[#allocation26] sm:$0xff] }
 0xcce   :  { %5880 = vmatpush1.bf16.msra.mxu0 %v5147_v38  ;;  %v5267_v38 = vld [vmem:[#allocation3 + $0xfc0] sm:$0xff] }
 0xccf   :  { %5881 = vmatprep.subr.bf16.mxu0 %v5158_v12  ;;  %v5278_v12 = vld [vmem:[#allocation3 + $0x1018] sm:$0xff] }
 0xcd0   :  { %6044 = vmatpush1.bf16.msra.mxu1 %v5149_v26  ;;  %v5298_v26 = vld [vmem:[#allocation3 + $0x10b8] sm:$0xff] }
 0xcd1   :  { %6045 = vmatprep.subr.bf16.mxu1 %v5160_v33  ;;  %v5410_v33 = vrot.slane %v9742_v37, %v9331_v8 }
 0xcd2   :  { %5882 = vmatpush1.bf16.msra.mxu0 %v5157_v4  ;;  %v5277_v4 = vld [vmem:[#allocation3 + $0x1010] sm:$0xff] }
 0xcd3   :  { %5883 = vmatprep.subr.bf16.mxu0 %v5168_v15  ;;  %v5288_v15 = vld [vmem:[#allocation3 + $0x1068] sm:$0xff] }
 0xcd4   :  { %6046 = vmatpush1.bf16.msra.mxu1 %v5159_v22  ;;  %v5280_v22 = vld [vmem:[#allocation3 + $0x1028] sm:$0xff] }
 0xcd5   :  { %6047 = vmatprep.subr.bf16.mxu1 %v5170_v53  ;;  %v5297_v53 = vld [vmem:[#allocation3 + $0x10b0] sm:$0xff] }
 0xcd6   :  { %5884 = vmatpush1.bf16.msra.mxu0 %v5167_v48  ;;  %v5270_v48 = vld [vmem:[#allocation3 + $0xfd8] sm:$0xff] }
 0xcd7   :  { %5885 = vmatprep.subr.bf16.mxu0 %v5178_v19  ;;  %v5287_v19 = vld [vmem:[#allocation3 + $0x1060] sm:$0xff] }
 0xcd8   :  { %6048 = vmatpush1.bf16.msra.mxu1 %v5169_v14 }
 0xcd9   :  { %6049 = vmatprep.subr.bf16.mxu1 %v5180_v5 }
 0xcda   :  { %5886 = vmatpush1.bf16.msra.mxu0 %v5177_v2  ;;  %v5269_v2 = vld [vmem:[#allocation3 + $0xfd0] sm:$0xff] }
 0xcdb   :  { %5887 = vmatprep.subr.bf16.mxu0 %v5188_v62  ;;  %v5414_v62 = vrot.slane %v9742_v37, %v9339_v18 }
 0xcdc   :  { %6050 = vmatpush1.bf16.msra.mxu1 %v5179_v27 }
 0xcdd   :  { %6051 = vmatprep.subr.bf16.mxu1 %v5190_v25  ;;  %v5290_v25 = vld [vmem:[#allocation3 + $0x1078] sm:$0xff] }
 0xcde   :  { %5888 = vmatpush1.bf16.msra.mxu0 %v5187_v60 }
 0xcdf   :  { %5889 = vmatprep.subr.bf16.mxu0 %v5198_v39  ;;  %v5308_v39 = vld [vmem:[#allocation3 + $0x1108] sm:$0xff] }
 0xce0   :  { %6052 = vmatpush1.bf16.msra.mxu1 %v5189_v55  ;;  %v5307_v55 = vld [vmem:[#allocation3 + $0x1100] sm:$0xff] }
 0xce1   :  { %6053 = vmatprep.subr.bf16.mxu1 %v5200_v29 }
 0xce2   :  { %5890 = vmatpush1.bf16.msra.mxu0 %v5197_v6  ;;  %v5279_v6 = vld [vmem:[#allocation3 + $0x1020] sm:$0xff] }
 0xce3   :  { %5891 = vmatprep.subr.bf16.mxu0 %v5208_v10 }
 0xce4   :  { %6054 = vmatpush1.bf16.msra.mxu1 %v5199_v3  ;;  %v5300_v3 = vld [vmem:[#allocation3 + $0x10c8] sm:$0xff] }
 0xce5   :  { %6055 = vmatprep.subr.bf16.mxu1 %v5210_v21  ;;  %v5317_v21 = vld [vmem:[#allocation3 + $0x1150] sm:$0xff] }
 0xce6   :  { %5892 = vmatpush1.bf16.msra.mxu0 %v5207_v47 }
 0xce7   :  { %5893 = vmatprep.subr.bf16.mxu0 %v5218_v13 }
 0xce8   :  { %6056 = vmatpush1.bf16.msra.mxu1 %v5209_v49  ;;  %v5422_v49 = vrot.slane %v9742_v37, %v9342_v17 }
 0xce9   :  { %6057 = vmatprep.subr.bf16.mxu1 %v5220_v40  ;;  %v5299_v40 = vld [vmem:[#allocation3 + $0x10c0] sm:$0xff] }
 0xcea   :  { %5894 = vmatpush1.bf16.msra.mxu0 %v5217_v30  ;;  %v5318_v30 = vld [vmem:[#allocation3 + $0x1158] sm:$0xff] }
 0xceb   :  { %5895 = vmatprep.subr.bf16.mxu0 %v5228_v31  ;;  %v5289_v31 = vld [vmem:[#allocation3 + $0x1070] sm:$0xff] }
 0xcec   :  { %6058 = vmatpush1.bf16.msra.mxu1 %v5219_v41  ;;  %v5327_v41 = vld [vmem:[#allocation3 + $0x11a0] sm:$0xff] }
 0xced   :  { %6059 = vmatprep.subr.bf16.mxu1 %v5230_v44 }
 0xcee   :  { %5896 = vmatpush1.bf16.msra.mxu0 %v5227_v54  ;;  %v5418_v54 = vrot.slane %v9742_v37, %v9334_v52 }
 0xcef   :  { %5897 = vmatprep.subr.bf16.mxu0 %v5238_v59  ;;  %v5328_v59 = vld [vmem:[#allocation3 + $0x11a8] sm:$0xff] }
 0xcf0   :  { %6060 = vmatpush1.bf16.msra.mxu1 %v5229_v35 }
 0xcf1   :  { %6061 = vmatprep.subr.bf16.mxu1 %v5240_v28 }
 0xcf2   :  { %5898 = vmatpush1.bf16.msra.mxu0 %v5237_v32 }
 0xcf3   :  { %5908 = vmatprep.subr.bf16.mxu0 %v5248_v36  ;;  %v5310_v36 = vld [vmem:[#allocation3 + $0x1118] sm:$0xff] }
 0xcf4   :  { %6062 = vmatpush1.bf16.msra.mxu1 %v5239_v56  ;;  %v5309_v56 = vld [vmem:[#allocation3 + $0x1110] sm:$0xff] }
 0xcf5   :  { %5900 = vmatmul.mubr.bf16.vlgmr.msra.gmra.mrb[92].mxu0 %v9710_v11  ;;  %6072 = vmatprep.subr.bf16.mxu1 %v5250_v1 }
 0xcf6   :  { %5909 = vmatpush1.bf16.msra.mxu0 %v5247_v16  ;;  %5940 = vmatprep.mubr.bf16.mxu0 %v9715_v24 }
 0xcf7   :  { %5910 = vmatprep.subr.bf16.mxu0 %v5258_v43  ;;  %6064 = vmatmul.mubr.bf16.vlgmr.msra.gmra.mrb[124].mxu1 %v9710_v11  ;;  %v5338_v43 = vld [vmem:[#allocation3 + $0x11f8] sm:$0xff] }
 0xcf8   :  { %6073 = vmatpush1.bf16.msra.mxu1 %v5249_v34  ;;  %6104 = vmatprep.mubr.bf16.mxu1 %v9715_v24  ;;  %v5348_v34 = vld [vmem:[#allocation3 + $0x1248] sm:$0xff] }
 0xcf9   :  { %6074 = vmatprep.subr.bf16.mxu1 %v5260_v42  ;;  %v5319_v42 = vld [vmem:[#allocation3 + $0x1160] sm:$0xff] }
 0xcfa   :  { %5911 = vmatpush1.bf16.msra.mxu0 %v5257_v61 }
 0xcfb   :  { %5912 = vmatprep.subr.bf16.mxu0 %v5268_v0 }
 0xcfc   :  { %6075 = vmatpush1.bf16.msra.mxu1 %v5259_v7  ;;  %v5358_v7 = vld [vmem:[#allocation3 + $0x1298] sm:$0xff] }
 0xcfd   :  { %6076 = vmatprep.subr.bf16.mxu1 %v5270_v48  ;;  %v5329_v48 = vld [vmem:[#allocation3 + $0x11b0] sm:$0xff] }
 0xcfe   :  { %5913 = vmatpush1.bf16.msra.mxu0 %v5267_v38  ;;  %v5320_v38 = vld [vmem:[#allocation3 + $0x1168] sm:$0xff] }
 0xcff   :  { %5914 = vmatprep.subr.bf16.mxu0 %v5278_v12  ;;  %v5337_v12 = vld [vmem:[#allocation3 + $0x11f0] sm:$0xff] }
 0xd00   :  { %6077 = vmatpush1.bf16.msra.mxu1 %v5269_v2  ;;  %v5339_v2 = vld [vmem:[#allocation3 + $0x1200] sm:$0xff] }
 0xd01   :  { %6078 = vmatprep.subr.bf16.mxu1 %v5280_v22  ;;  %v5367_v22 = vld [vmem:[#allocation3 + $0x12e0] sm:$0xff] }
 0xd02   :  { %5915 = vmatpush1.bf16.msra.mxu0 %v5277_v4  ;;  %v5330_v4 = vld [vmem:[#allocation3 + $0x11b8] sm:$0xff] }
 0xd03   :  { %5916 = vmatprep.subr.bf16.mxu0 %v5288_v15  ;;  %v5347_v15 = vld [vmem:[#allocation3 + $0x1240] sm:$0xff] }
 0xd04   :  { %6079 = vmatpush1.bf16.msra.mxu1 %v5279_v6  ;;  %v5388_v6 = vld [vmem:[#allocation3 + $0x1388] sm:$0xff] }
 0xd05   :  { %6080 = vmatprep.subr.bf16.mxu1 %v5290_v25  ;;  %v5370_v25 = vld [vmem:[#allocation3 + $0x12f8] sm:$0xff] }
 0xd06   :  { %5917 = vmatpush1.bf16.msra.mxu0 %v5287_v19  ;;  %v5340_v19 = vld [vmem:[#allocation3 + $0x1208] sm:$0xff] }
 0xd07   :  { %5918 = vmatprep.subr.bf16.mxu0 %v5298_v26  ;;  %v5357_v26 = vld [vmem:[#allocation3 + $0x1290] sm:$0xff] }
 0xd08   :  { %v5614_v60 = vpop.f32.mrb[88].mxu0  ;;  %6081 = vmatpush1.bf16.msra.mxu1 %v5289_v31  ;;  %v5380_v31 = vld [vmem:[#allocation3 + $0x1348] sm:$0xff] }
 0xd09   :  { %v9748_v14 = vadd.f32 %v5614_v60, %v5410_v33  ;;  %v5616_v5 = vpop.f32.mrb[89].mxu0  ;;  %6082 = vmatprep.subr.bf16.mxu1 %v5300_v3  ;;  %v5368_v33 = vld [vmem:[#allocation3 + $0x12e8] sm:$0xff]  ;;  %v5349_v60 = vld [vmem:[#allocation3 + $0x1250] sm:$0xff] }
 0xd0a   :  { %v9750_v10 = vadd.f32 %v5616_v5, %v5414_v62  ;;  %v5618_v27 = vpop.f32.mrb[90].mxu0  ;;  %5919 = vmatpush1.bf16.msra.mxu0 %v5297_v53  ;;  %v5778_v32 = vpop.f32.mrb[120].mxu1  ;;  %v5350_v62 = vld [vmem:[#allocation3 + $0x1258] sm:$0xff]  ;;  %v5377_v5 = vld [vmem:[#allocation3 + $0x1330] sm:$0xff] }
 0xd0b   :  { %v6277_v47 = vmax.f32 %v9748_v14, 0.0  ;;  %v5619_v13 = vpop.f32.mrb[91].mxu0  ;;  %5920 = vmatprep.subr.bf16.mxu0 %v5308_v39  ;;  %v9758_v44 = vadd.f32 %v5778_v32, %v5418_v54  ;;  %v5780_v16 = vpop.f32.mrb[121].mxu1  ;;  %v5378_v53 = vld [vmem:[#allocation3 + $0x1338] sm:$0xff]  ;;  %v5360_v39 = vld [vmem:[#allocation3 + $0x12a8] sm:$0xff]  ;;  %v5359_v27 = vld [vmem:[#allocation3 + $0x12a0] sm:$0xff] }
 0xd0c   :  { %v6278_v29 = vmax.f32 %v9750_v10, 0.0  ;;  %v9760_v35 = vadd.f32 %v5780_v16, %v5422_v49  ;;  %v5782_v28 = vpop.f32.mrb[122].mxu1  ;;  %6083 = vmatpush1.bf16.msra.mxu1 %v5299_v40  ;;  %v5387_v13 = vld [vmem:[#allocation3 + $0x1380] sm:$0xff]  ;;  %v5397_v3 = vld [vmem:[#allocation3 + $0x13d0] sm:$0xff]  ;;  %v4782_v40 = vld [vmem:[#allocation3 + $0x98] sm:$0xff] }
 0xd0d   :  { %v6279_v61 = vmax.f32 %v9758_v44, 0.0  ;;  %v5783_v0 = vpop.f32.mrb[123].mxu1  ;;  %6084 = vmatprep.subr.bf16.mxu1 %v5310_v36  ;;  %v5379_v54 = vld [vmem:[#allocation3 + $0x1340] sm:$0xff]  ;;  %v5389_v32 = vld [vmem:[#allocation3 + $0x1390] sm:$0xff]  ;;  %v5400_v36 = vld [vmem:[#allocation3 + $0x13e8] sm:$0xff] }
 0xd0e   :  { %5921 = vmatpush1.bf16.msra.mxu0 %v5307_v55  ;;  %v6280_v1 = vmax.f32 %v9760_v35, 0.0  ;;  %v5398_v55 = vld [vmem:[#allocation3 + $0x13d8] sm:$0xff]  ;;  %v4771_v49 = vld [vmem:[#allocation3 + $0x40] sm:$0xff]  ;;  %v4792_v16 = vld [vmem:[#allocation3 + $0xe8] sm:$0xff] }
 0xd0f   :  { %5922 = vmatprep.subr.bf16.mxu0 %v5318_v30  ;;  %v5369_v30 = vld [vmem:[#allocation3 + $0x12f0] sm:$0xff]  ;;  %v4791_v28 = vld [vmem:[#allocation3 + $0xe0] sm:$0xff]  ;;  %v4802_v0 = vld [vmem:[#allocation3 + $0x138] sm:$0xff] }
 0xd10   :  { %6085 = vmatpush1.bf16.msra.mxu1 %v5309_v56  ;;  %v4801_v56 = vld [vmem:[#allocation3 + $0x130] sm:$0xff] }
 0xd11   :  { %6086 = vmatprep.subr.bf16.mxu1 %v5320_v38  ;;  %v4812_v38 = vld [vmem:[#allocation3 + $0x188] sm:$0xff] }
 0xd12   :  { %5923 = vmatpush1.bf16.msra.mxu0 %v5317_v21  ;;  %v4772_v21 = vld [vmem:[#allocation3 + $0x48] sm:$0xff] }
 0xd13   :  { %5924 = vmatprep.subr.bf16.mxu0 %v5328_v59  ;;  %v5390_v59 = vld [vmem:[#allocation3 + $0x1398] sm:$0xff] }
 0xd14   :  { %6087 = vmatpush1.bf16.msra.mxu1 %v5319_v42  ;;  %v4832_v42 = vld [vmem:[#allocation3 + $0x228] sm:$0xff] }
 0xd15   :  { %6088 = vmatprep.subr.bf16.mxu1 %v5330_v4  ;;  %v4831_v4 = vld [vmem:[#allocation3 + $0x220] sm:$0xff] }
 0xd16   :  { %5925 = vmatpush1.bf16.msra.mxu0 %v5327_v41  ;;  %v4781_v41 = vld [vmem:[#allocation3 + $0x90] sm:$0xff] }
 0xd17   :  { %5926 = vmatprep.subr.bf16.mxu0 %v5338_v43  ;;  %v5399_v43 = vld [vmem:[#allocation3 + $0x13e0] sm:$0xff] }
 0xd18   :  { %6089 = vmatpush1.bf16.msra.mxu1 %v5329_v48  ;;  %v4852_v48 = vld [vmem:[#allocation3 + $0x2c8] sm:$0xff] }
 0xd19   :  { %6090 = vmatprep.subr.bf16.mxu1 %v5340_v19  ;;  %v4851_v19 = vld [vmem:[#allocation3 + $0x2c0] sm:$0xff] }
 0xd1a   :  { %5927 = vmatpush1.bf16.msra.mxu0 %v5337_v12  ;;  %v4822_v12 = vld [vmem:[#allocation3 + $0x1d8] sm:$0xff] }
 0xd1b   :  { %5928 = vmatprep.subr.bf16.mxu0 %v5348_v34  ;;  %v4821_v34 = vld [vmem:[#allocation3 + $0x1d0] sm:$0xff] }
 0xd1c   :  { %6091 = vmatpush1.bf16.msra.mxu1 %v5339_v2  ;;  %v4872_v2 = vld [vmem:[#allocation3 + $0x368] sm:$0xff] }
 0xd1d   :  { %6092 = vmatprep.subr.bf16.mxu1 %v5350_v62  ;;  %v4871_v62 = vld [vmem:[#allocation3 + $0x360] sm:$0xff] }
 0xd1e   :  { %5929 = vmatpush1.bf16.msra.mxu0 %v5347_v15  ;;  %v4842_v15 = vld [vmem:[#allocation3 + $0x278] sm:$0xff] }
 0xd1f   :  { %5930 = vmatprep.subr.bf16.mxu0 %v5358_v7  ;;  %v4841_v7 = vld [vmem:[#allocation3 + $0x270] sm:$0xff] }
 0xd20   :  { %6093 = vmatpush1.bf16.msra.mxu1 %v5349_v60  ;;  %v4892_v60 = vld [vmem:[#allocation3 + $0x408] sm:$0xff] }
 0xd21   :  { %6094 = vmatprep.subr.bf16.mxu1 %v5360_v39  ;;  %v4891_v39 = vld [vmem:[#allocation3 + $0x400] sm:$0xff] }
 0xd22   :  { %5931 = vmatpush1.bf16.msra.mxu0 %v5357_v26  ;;  %v4862_v26 = vld [vmem:[#allocation3 + $0x318] sm:$0xff] }
 0xd23   :  { %5932 = vmatprep.subr.bf16.mxu0 %v5368_v33  ;;  %v4861_v33 = vld [vmem:[#allocation3 + $0x310] sm:$0xff] }
 0xd24   :  { %6095 = vmatpush1.bf16.msra.mxu1 %v5359_v27  ;;  %v4912_v27 = vld [vmem:[#allocation3 + $0x4a8] sm:$0xff] }
 0xd25   :  { %6096 = vmatprep.subr.bf16.mxu1 %v5370_v25  ;;  %v4911_v25 = vld [vmem:[#allocation3 + $0x4a0] sm:$0xff] }
 0xd26   :  { %5933 = vmatpush1.bf16.msra.mxu0 %v5367_v22  ;;  %v4882_v22 = vld [vmem:[#allocation3 + $0x3b8] sm:$0xff] }
 0xd27   :  { %5934 = vmatprep.subr.bf16.mxu0 %v5378_v53  ;;  %v4881_v53 = vld [vmem:[#allocation3 + $0x3b0] sm:$0xff] }
 0xd28   :  { %6097 = vmatpush1.bf16.msra.mxu1 %v5369_v30  ;;  %v4932_v30 = vld [vmem:[#allocation3 + $0x548] sm:$0xff] }
 0xd29   :  { %6098 = vmatprep.subr.bf16.mxu1 %v5380_v31  ;;  %v4931_v31 = vld [vmem:[#allocation3 + $0x540] sm:$0xff] }
 0xd2a   :  { %5935 = vmatpush1.bf16.msra.mxu0 %v5377_v5  ;;  %v4902_v5 = vld [vmem:[#allocation3 + $0x458] sm:$0xff] }
 0xd2b   :  { %5936 = vmatprep.subr.bf16.mxu0 %v5388_v6  ;;  %v4901_v6 = vld [vmem:[#allocation3 + $0x450] sm:$0xff] }
 0xd2c   :  { %6099 = vmatpush1.bf16.msra.mxu1 %v5379_v54  ;;  %v4952_v54 = vld [vmem:[#allocation3 + $0x5e8] sm:$0xff] }
 0xd2d   :  { %6100 = vmatprep.subr.bf16.mxu1 %v5390_v59  ;;  %v4951_v59 = vld [vmem:[#allocation3 + $0x5e0] sm:$0xff] }
 0xd2e   :  { %5937 = vmatpush1.bf16.msra.mxu0 %v5387_v13  ;;  %v4922_v13 = vld [vmem:[#allocation3 + $0x4f8] sm:$0xff] }
 0xd2f   :  { %5938 = vmatprep.subr.bf16.mxu0 %v5398_v55  ;;  %v4921_v55 = vld [vmem:[#allocation3 + $0x4f0] sm:$0xff] }
 0xd30   :  { %6101 = vmatpush1.bf16.msra.mxu1 %v5389_v32  ;;  %v4972_v32 = vld [vmem:[#allocation3 + $0x688] sm:$0xff] }
 0xd31   :  { %6102 = vmatprep.subr.bf16.mxu1 %v5400_v36  ;;  %v4971_v36 = vld [vmem:[#allocation3 + $0x680] sm:$0xff] }
 0xd32   :  { %5939 = vmatpush1.bf16.msra.mxu0 %v5397_v3  ;;  %v4942_v3 = vld [vmem:[#allocation3 + $0x598] sm:$0xff] }
 0xd33   :  { %6113 = vmatprep.subr.bf16.mxu0 %v4772_v21  ;;  %v4941_v21 = vld [vmem:[#allocation3 + $0x590] sm:$0xff] }
 0xd34   :  { %6103 = vmatpush1.bf16.msra.mxu1 %v5399_v43  ;;  %v5002_v43 = vld [vmem:[#allocation3 + $0x778] sm:$0xff] }
 0xd35   :  { %5941 = vmatmul.mubr.bf16.vlgmr.msra.gmra.mrb[92].mxu0 %v9724_v9 }
 0xd36   :  { %6114 = vmatpush1.bf16.msra.mxu0 %v4771_v49  ;;  %6145 = vmatprep.mubr.bf16.mxu0 %v9675_v23  ;;  %v4811_v23 = vld [vmem:[#allocation3 + $0x180] sm:$0xff]  ;;  %v4962_v49 = vld [vmem:[#allocation3 + $0x638] sm:$0xff] }
 0xd37   :  { %6115 = vmatprep.subr.bf16.mxu0 %v4782_v40  ;;  %6105 = vmatmul.mubr.bf16.vlgmr.msra.gmra.mrb[124].mxu1 %v9724_v9  ;;  %v4961_v40 = vld [vmem:[#allocation3 + $0x630] sm:$0xff] }
 0xd3a   :  { %6116 = vmatpush1.bf16.msra.mxu0 %v4781_v41  ;;  %v4982_v41 = vld [vmem:[#allocation3 + $0x6d8] sm:$0xff] }
 0xd3b   :  { %6117 = vmatprep.subr.bf16.mxu0 %v4792_v16  ;;  %v4992_v16 = vld [vmem:[#allocation3 + $0x728] sm:$0xff] }
 0xd3e   :  { %6118 = vmatpush1.bf16.msra.mxu0 %v4791_v28  ;;  %v5001_v28 = vld [vmem:[#allocation3 + $0x770] sm:$0xff] }
 0xd3f   :  { %6119 = vmatprep.subr.bf16.mxu0 %v4802_v0  ;;  %v5012_v0 = vld [vmem:[#allocation3 + $0x7c8] sm:$0xff] }
 0xd42   :  { %6120 = vmatpush1.bf16.msra.mxu0 %v4801_v56  ;;  %v5011_v56 = vld [vmem:[#allocation3 + $0x7c0] sm:$0xff] }
 0xd43   :  { %6121 = vmatprep.subr.bf16.mxu0 %v4812_v38  ;;  %v5022_v38 = vld [vmem:[#allocation3 + $0x818] sm:$0xff] }
 0xd46   :  { %6122 = vmatpush1.bf16.msra.mxu0 %v4811_v23  ;;  %v5021_v23 = vld [vmem:[#allocation3 + $0x810] sm:$0xff] }
 0xd47   :  { %6123 = vmatprep.subr.bf16.mxu0 %v4822_v12  ;;  %v5032_v12 = vld [vmem:[#allocation3 + $0x868] sm:$0xff] }
 0xd4a   :  { %6124 = vmatpush1.bf16.msra.mxu0 %v4821_v34  ;;  %v5031_v34 = vld [vmem:[#allocation3 + $0x860] sm:$0xff] }
 0xd4b   :  { %6125 = vmatprep.subr.bf16.mxu0 %v4832_v42  ;;  %v5042_v42 = vld [vmem:[#allocation3 + $0x8b8] sm:$0xff] }
 0xd4e   :  { %6126 = vmatpush1.bf16.msra.mxu0 %v4831_v4  ;;  %v5041_v4 = vld [vmem:[#allocation3 + $0x8b0] sm:$0xff] }
 0xd4f   :  { %6127 = vmatprep.subr.bf16.mxu0 %v4842_v15  ;;  %v5052_v15 = vld [vmem:[#allocation3 + $0x908] sm:$0xff] }
 0xd52   :  { %6128 = vmatpush1.bf16.msra.mxu0 %v4841_v7  ;;  %v5051_v7 = vld [vmem:[#allocation3 + $0x900] sm:$0xff] }
 0xd53   :  { %6129 = vmatprep.subr.bf16.mxu0 %v4852_v48  ;;  %v5062_v48 = vld [vmem:[#allocation3 + $0x958] sm:$0xff] }
 0xd56   :  { %6130 = vmatpush1.bf16.msra.mxu0 %v4851_v19  ;;  %v5061_v19 = vld [vmem:[#allocation3 + $0x950] sm:$0xff] }
 0xd57   :  { %6131 = vmatprep.subr.bf16.mxu0 %v4862_v26  ;;  %v5072_v26 = vld [vmem:[#allocation3 + $0x9a8] sm:$0xff] }
 0xd5a   :  { %6132 = vmatpush1.bf16.msra.mxu0 %v4861_v33  ;;  %v5071_v33 = vld [vmem:[#allocation3 + $0x9a0] sm:$0xff] }
 0xd5b   :  { %6133 = vmatprep.subr.bf16.mxu0 %v4872_v2  ;;  %v5082_v2 = vld [vmem:[#allocation3 + $0x9f8] sm:$0xff] }
 0xd5e   :  { %6134 = vmatpush1.bf16.msra.mxu0 %v4871_v62  ;;  %v5081_v62 = vld [vmem:[#allocation3 + $0x9f0] sm:$0xff] }
 0xd5f   :  { %6135 = vmatprep.subr.bf16.mxu0 %v4882_v22  ;;  %v5092_v22 = vld [vmem:[#allocation3 + $0xa48] sm:$0xff] }
 0xd62   :  { %6136 = vmatpush1.bf16.msra.mxu0 %v4881_v53  ;;  %v5091_v53 = vld [vmem:[#allocation3 + $0xa40] sm:$0xff] }
 0xd63   :  { %6137 = vmatprep.subr.bf16.mxu0 %v4892_v60  ;;  %v5102_v60 = vld [vmem:[#allocation3 + $0xa98] sm:$0xff] }
 0xd66   :  { %6138 = vmatpush1.bf16.msra.mxu0 %v4891_v39  ;;  %v5101_v39 = vld [vmem:[#allocation3 + $0xa90] sm:$0xff] }
 0xd67   :  { %6139 = vmatprep.subr.bf16.mxu0 %v4902_v5  ;;  %v5112_v5 = vld [vmem:[#allocation3 + $0xae8] sm:$0xff] }
 0xd6a   :  { %6140 = vmatpush1.bf16.msra.mxu0 %v4901_v6  ;;  %v5111_v6 = vld [vmem:[#allocation3 + $0xae0] sm:$0xff] }
 0xd6b   :  { %6141 = vmatprep.subr.bf16.mxu0 %v4912_v27  ;;  %v5122_v27 = vld [vmem:[#allocation3 + $0xb38] sm:$0xff] }
 0xd6e   :  { %6142 = vmatpush1.bf16.msra.mxu0 %v4911_v25  ;;  %v5121_v25 = vld [vmem:[#allocation3 + $0xb30] sm:$0xff] }
 0xd6f   :  { %6143 = vmatprep.subr.bf16.mxu0 %v4922_v13  ;;  %v5132_v13 = vld [vmem:[#allocation3 + $0xb88] sm:$0xff] }
 0xd72   :  { %6144 = vmatpush1.bf16.msra.mxu0 %v4921_v55  ;;  %v5131_v55 = vld [vmem:[#allocation3 + $0xb80] sm:$0xff] }
 0xd73   :  { %6154 = vmatprep.subr.bf16.mxu0 %v4932_v30  ;;  %v5142_v30 = vld [vmem:[#allocation3 + $0xbd8] sm:$0xff] }
 0xd75   :  { %6146 = vmatmul.mubr.bf16.vlgmr.msra.gmra.mrb[96].mxu0 %v9682_v63  ;;  %v4981_v63 = vld [vmem:[#allocation3 + $0x6d0] sm:$0xff] }
 0xd76   :  { %6155 = vmatpush1.bf16.msra.mxu0 %v4931_v31  ;;  %6186 = vmatprep.mubr.bf16.mxu0 %v9687_v45  ;;  %v4991_v45 = vld [vmem:[#allocation3 + $0x720] sm:$0xff]  ;;  %v5152_v31 = vld [vmem:[#allocation3 + $0xc28] sm:$0xff] }
 0xd77   :  { %6156 = vmatprep.subr.bf16.mxu0 %v4942_v3  ;;  %v5162_v3 = vld [vmem:[#allocation3 + $0xc78] sm:$0xff] }
 0xd7a   :  { %6157 = vmatpush1.bf16.msra.mxu0 %v4941_v21  ;;  %v5161_v21 = vld [vmem:[#allocation3 + $0xc70] sm:$0xff] }
 0xd7b   :  { %6158 = vmatprep.subr.bf16.mxu0 %v4952_v54  ;;  %v5172_v54 = vld [vmem:[#allocation3 + $0xcc8] sm:$0xff] }
 0xd7e   :  { %6159 = vmatpush1.bf16.msra.mxu0 %v4951_v59  ;;  %v5171_v59 = vld [vmem:[#allocation3 + $0xcc0] sm:$0xff] }
 0xd7f   :  { %6160 = vmatprep.subr.bf16.mxu0 %v4962_v49  ;;  %v5182_v49 = vld [vmem:[#allocation3 + $0xd18] sm:$0xff] }
 0xd82   :  { %6161 = vmatpush1.bf16.msra.mxu0 %v4961_v40  ;;  %v5181_v40 = vld [vmem:[#allocation3 + $0xd10] sm:$0xff] }
 0xd83   :  { %6162 = vmatprep.subr.bf16.mxu0 %v4972_v32  ;;  %v5192_v32 = vld [vmem:[#allocation3 + $0xd68] sm:$0xff] }
 0xd86   :  { %6163 = vmatpush1.bf16.msra.mxu0 %v4971_v36  ;;  %v5191_v36 = vld [vmem:[#allocation3 + $0xd60] sm:$0xff] }
 0xd87   :  { %6164 = vmatprep.subr.bf16.mxu0 %v4982_v41  ;;  %v5202_v41 = vld [vmem:[#allocation3 + $0xdb8] sm:$0xff] }
 0xd8a   :  { %6165 = vmatpush1.bf16.msra.mxu0 %v4981_v63  ;;  %v5201_v63 = vld [vmem:[#allocation3 + $0xdb0] sm:$0xff] }
 0xd8b   :  { %6166 = vmatprep.subr.bf16.mxu0 %v4992_v16  ;;  %v5212_v16 = vld [vmem:[#allocation3 + $0xe08] sm:$0xff] }
 0xd8e   :  { %6167 = vmatpush1.bf16.msra.mxu0 %v4991_v45  ;;  %v5211_v45 = vld [vmem:[#allocation3 + $0xe00] sm:$0xff] }
 0xd8f   :  { %6168 = vmatprep.subr.bf16.mxu0 %v5002_v43  ;;  %v5222_v43 = vld [vmem:[#allocation3 + $0xe58] sm:$0xff] }
 0xd92   :  { %6169 = vmatpush1.bf16.msra.mxu0 %v5001_v28  ;;  %v5221_v28 = vld [vmem:[#allocation3 + $0xe50] sm:$0xff] }
 0xd93   :  { %6170 = vmatprep.subr.bf16.mxu0 %v5012_v0  ;;  %v5232_v0 = vld [vmem:[#allocation3 + $0xea8] sm:$0xff] }
 0xd96   :  { %6171 = vmatpush1.bf16.msra.mxu0 %v5011_v56  ;;  %v5231_v56 = vld [vmem:[#allocation3 + $0xea0] sm:$0xff] }
 0xd97   :  { %6172 = vmatprep.subr.bf16.mxu0 %v5022_v38  ;;  %v5242_v38 = vld [vmem:[#allocation3 + $0xef8] sm:$0xff] }
 0xd9a   :  { %6173 = vmatpush1.bf16.msra.mxu0 %v5021_v23  ;;  %v5241_v23 = vld [vmem:[#allocation3 + $0xef0] sm:$0xff] }
 0xd9b   :  { %6174 = vmatprep.subr.bf16.mxu0 %v5032_v12  ;;  %v5252_v12 = vld [vmem:[#allocation3 + $0xf48] sm:$0xff] }
 0xd9e   :  { %6175 = vmatpush1.bf16.msra.mxu0 %v5031_v34  ;;  %v5251_v34 = vld [vmem:[#allocation3 + $0xf40] sm:$0xff] }
 0xd9f   :  { %6176 = vmatprep.subr.bf16.mxu0 %v5042_v42  ;;  %v5262_v42 = vld [vmem:[#allocation3 + $0xf98] sm:$0xff] }
 0xda2   :  { %6177 = vmatpush1.bf16.msra.mxu0 %v5041_v4  ;;  %v5261_v4 = vld [vmem:[#allocation3 + $0xf90] sm:$0xff] }
 0xda3   :  { %6178 = vmatprep.subr.bf16.mxu0 %v5052_v15  ;;  %v5272_v15 = vld [vmem:[#allocation3 + $0xfe8] sm:$0xff] }
 0xda6   :  { %6179 = vmatpush1.bf16.msra.mxu0 %v5051_v7  ;;  %v5271_v7 = vld [vmem:[#allocation3 + $0xfe0] sm:$0xff] }
 0xda7   :  { %6180 = vmatprep.subr.bf16.mxu0 %v5062_v48  ;;  %v5282_v48 = vld [vmem:[#allocation3 + $0x1038] sm:$0xff] }
 0xdaa   :  { %6181 = vmatpush1.bf16.msra.mxu0 %v5061_v19  ;;  %v5281_v19 = vld [vmem:[#allocation3 + $0x1030] sm:$0xff] }
 0xdab   :  { %6182 = vmatprep.subr.bf16.mxu0 %v5072_v26  ;;  %v5292_v26 = vld [vmem:[#allocation3 + $0x1088] sm:$0xff] }
 0xdae   :  { %6183 = vmatpush1.bf16.msra.mxu0 %v5071_v33  ;;  %v5291_v33 = vld [vmem:[#allocation3 + $0x1080] sm:$0xff] }
 0xdaf   :  { %6184 = vmatprep.subr.bf16.mxu0 %v5082_v2  ;;  %v5302_v2 = vld [vmem:[#allocation3 + $0x10d8] sm:$0xff] }
 0xdb2   :  { %6185 = vmatpush1.bf16.msra.mxu0 %v5081_v62  ;;  %v5301_v62 = vld [vmem:[#allocation3 + $0x10d0] sm:$0xff] }
 0xdb3   :  { %6195 = vmatprep.subr.bf16.mxu0 %v5092_v22 }
 0xdb5   :  { %6187 = vmatmul.mubr.bf16.vlgmr.msra.gmra.mrb[96].mxu0 %v9696_v20  ;;  %v5141_v20 = vld [vmem:[#allocation3 + $0xbd0] sm:$0xff] }
 0xdb6   :  { %6196 = vmatpush1.bf16.msra.mxu0 %v5091_v53  ;;  %6227 = vmatprep.mubr.bf16.mxu0 %v9701_v46  ;;  %v5151_v46 = vld [vmem:[#allocation3 + $0xc20] sm:$0xff]  ;;  %v5312_v53 = vld [vmem:[#allocation3 + $0x1128] sm:$0xff] }
 0xdb7   :  { %6197 = vmatprep.subr.bf16.mxu0 %v5102_v60 }
 0xdba   :  { %6198 = vmatpush1.bf16.msra.mxu0 %v5101_v39 }
 0xdbb   :  { %6199 = vmatprep.subr.bf16.mxu0 %v5112_v5 }
 0xdbe   :  { %6200 = vmatpush1.bf16.msra.mxu0 %v5111_v6 }
 0xdbf   :  { %6201 = vmatprep.subr.bf16.mxu0 %v5122_v27 }
 0xdc2   :  { %6202 = vmatpush1.bf16.msra.mxu0 %v5121_v25 }
 0xdc3   :  { %6203 = vmatprep.subr.bf16.mxu0 %v5132_v13 }
 0xdc6   :  { %6204 = vmatpush1.bf16.msra.mxu0 %v5131_v55  ;;  %v5322_v55 = vld [vmem:[#allocation3 + $0x1178] sm:$0xff] }
 0xdc7   :  { %6205 = vmatprep.subr.bf16.mxu0 %v5142_v30  ;;  %v5434_v30 = vrot.slane %v9742_v37, %v9432_v51 }
 0xdca   :  { %6206 = vmatpush1.bf16.msra.mxu0 %v5141_v20  ;;  %v5332_v20 = vld [vmem:[#allocation3 + $0x11c8] sm:$0xff] }
 0xdcb   :  { %6207 = vmatprep.subr.bf16.mxu0 %v5152_v31  ;;  %v5438_v31 = vrot.slane %v9742_v37, %v9438_v58  ;;  %v5352_v58 = vld [vmem:[#allocation3 + $0x1268] sm:$0xff] }
 0xdce   :  { %6208 = vmatpush1.bf16.msra.mxu0 %v5151_v46 }
 0xdcf   :  { %6209 = vmatprep.subr.bf16.mxu0 %v5162_v3  ;;  %v5331_v3 = vld [vmem:[#allocation3 + $0x11c0] sm:$0xff] }
 0xdd2   :  { %6210 = vmatpush1.bf16.msra.mxu0 %v5161_v21 }
 0xdd3   :  { %6211 = vmatprep.subr.bf16.mxu0 %v5172_v54 }
 0xdd6   :  { %6212 = vmatpush1.bf16.msra.mxu0 %v5171_v59  ;;  %v5342_v59 = vld [vmem:[#allocation3 + $0x1218] sm:$0xff] }
 0xdd7   :  { %6213 = vmatprep.subr.bf16.mxu0 %v5182_v49 }
 0xdda   :  { %6214 = vmatpush1.bf16.msra.mxu0 %v5181_v40 }
 0xddb   :  { %6215 = vmatprep.subr.bf16.mxu0 %v5192_v32 }
 0xdde   :  { %6216 = vmatpush1.bf16.msra.mxu0 %v5191_v36 }
 0xddf   :  { %6217 = vmatprep.subr.bf16.mxu0 %v5202_v41  ;;  %v5341_v41 = vld [vmem:[#allocation3 + $0x1210] sm:$0xff] }
 0xde2   :  { %6218 = vmatpush1.bf16.msra.mxu0 %v5201_v63  ;;  %v5362_v63 = vld [vmem:[#allocation3 + $0x12b8] sm:$0xff] }
 0xde3   :  { %6219 = vmatprep.subr.bf16.mxu0 %v5212_v16  ;;  %v5361_v16 = vld [vmem:[#allocation3 + $0x12b0] sm:$0xff] }
 0xde6   :  { %6220 = vmatpush1.bf16.msra.mxu0 %v5211_v45  ;;  %v5372_v45 = vld [vmem:[#allocation3 + $0x1308] sm:$0xff] }
 0xde7   :  { %6221 = vmatprep.subr.bf16.mxu0 %v5222_v43  ;;  %v5371_v43 = vld [vmem:[#allocation3 + $0x1300] sm:$0xff] }
 0xdea   :  { %6222 = vmatpush1.bf16.msra.mxu0 %v5221_v28  ;;  %v5382_v28 = vld [vmem:[#allocation3 + $0x1358] sm:$0xff] }
 0xdeb   :  { %6223 = vmatprep.subr.bf16.mxu0 %v5232_v0  ;;  %v5381_v0 = vld [vmem:[#allocation3 + $0x1350] sm:$0xff] }
 0xdee   :  { %6224 = vmatpush1.bf16.msra.mxu0 %v5231_v56  ;;  %v5392_v56 = vld [vmem:[#allocation3 + $0x13a8] sm:$0xff] }
 0xdef   :  { %6225 = vmatprep.subr.bf16.mxu0 %v5242_v38  ;;  %v5391_v38 = vld [vmem:[#allocation3 + $0x13a0] sm:$0xff] }
 0xdf2   :  { %6226 = vmatpush1.bf16.msra.mxu0 %v5241_v23  ;;  %v5402_v23 = vld [vmem:[#allocation3 + $0x13f8] sm:$0xff] }
 0xdf3   :  { %6236 = vmatprep.subr.bf16.mxu0 %v5252_v12  ;;  %v5401_v12 = vld [vmem:[#allocation3 + $0x13f0] sm:$0xff] }
 0xdf5   :  { %6228 = vmatmul.mubr.bf16.vlgmr.msra.gmra.mrb[96].mxu0 %v9710_v11  ;;  %v5426_v11 = vrot.slane %v9742_v37, %v9429_v50  ;;  %v5311_v50 = vld [vmem:[#allocation3 + $0x1120] sm:$0xff] }
 0xdf6   :  { %6237 = vmatpush1.bf16.msra.mxu0 %v5251_v34  ;;  %6268 = vmatprep.mubr.bf16.mxu0 %v9715_v24  ;;  %v5430_v24 = vrot.slane %v9742_v37, %v9435_v57  ;;  %v5321_v57 = vld [vmem:[#allocation3 + $0x1170] sm:$0xff]  ;;  %v5351_v37 = vld [vmem:[#allocation3 + $0x1260] sm:$0xff] }
 0xdf7   :  { %6238 = vmatprep.subr.bf16.mxu0 %v5262_v42  ;;  %v5404_v34 = vld [vmem:[#allocation26 + $0x8] sm:$0x3] }
 0xdf8   :  { %v5442_v42 = vrot.slane %v5404_v34, %v9331_v8 }
 0xdfa   :  { %6239 = vmatpush1.bf16.msra.mxu0 %v5261_v4  ;;  %v5446_v4 = vrot.slane %v5404_v34, %v9339_v18 }
 0xdfb   :  { %6240 = vmatprep.subr.bf16.mxu0 %v5272_v15 }
 0xdfe   :  { %6241 = vmatpush1.bf16.msra.mxu0 %v5271_v7 }
 0xdff   :  { %6242 = vmatprep.subr.bf16.mxu0 %v5282_v48 }
 0xe02   :  { %6243 = vmatpush1.bf16.msra.mxu0 %v5281_v19 }
 0xe03   :  { %6244 = vmatprep.subr.bf16.mxu0 %v5292_v26 }
 0xe06   :  { %6245 = vmatpush1.bf16.msra.mxu0 %v5291_v33 }
 0xe07   :  { %6246 = vmatprep.subr.bf16.mxu0 %v5302_v2 }
 0xe08   :  { %v5942_v22 = vpop.f32.mrb[92].mxu0 }
 0xe09   :  { %v9777_v60 = vadd.f32 %v5942_v22, %v5426_v11  ;;  %v5944_v39 = vpop.f32.mrb[93].mxu0 }
 0xe0a   :  { %v9779_v5 = vadd.f32 %v5944_v39, %v5430_v24  ;;  %v5946_v6 = vpop.f32.mrb[94].mxu0  ;;  %6247 = vmatpush1.bf16.msra.mxu0 %v5301_v62  ;;  %v6106_v46 = vpop.f32.mrb[124].mxu1 }
 0xe0b   :  { %v6281_v27 = vmax.f32 %v9777_v60, 0.0  ;;  %v5947_v25 = vpop.f32.mrb[95].mxu0  ;;  %6248 = vmatprep.subr.bf16.mxu0 %v5312_v53  ;;  %v9787_v21 = vadd.f32 %v6106_v46, %v5434_v30  ;;  %v6108_v54 = vpop.f32.mrb[125].mxu1 }
 0xe0c   :  { %v6282_v13 = vmax.f32 %v9779_v5, 0.0  ;;  %v9789_v49 = vadd.f32 %v6108_v54, %v5438_v31  ;;  %v6110_v40 = vpop.f32.mrb[126].mxu1 }
 0xe0d   :  { %v6283_v32 = vmax.f32 %v9787_v21, 0.0  ;;  %v6111_v36 = vpop.f32.mrb[127].mxu1 }
 0xe0e   :  { %6249 = vmatpush1.bf16.msra.mxu0 %v5311_v50  ;;  %v6284_v51 = vmax.f32 %v9789_v49, 0.0 }
 0xe0f   :  { %6250 = vmatprep.subr.bf16.mxu0 %v5322_v55 }
 0xe12   :  { %6251 = vmatpush1.bf16.msra.mxu0 %v5321_v57 }
 0xe13   :  { %6252 = vmatprep.subr.bf16.mxu0 %v5332_v20 }
 0xe16   :  { %6253 = vmatpush1.bf16.msra.mxu0 %v5331_v3 }
 0xe17   :  { %6254 = vmatprep.subr.bf16.mxu0 %v5342_v59 }
 0xe1a   :  { %6255 = vmatpush1.bf16.msra.mxu0 %v5341_v41 }
 0xe1b   :  { %6256 = vmatprep.subr.bf16.mxu0 %v5352_v58 }
 0xe1e   :  { %6257 = vmatpush1.bf16.msra.mxu0 %v5351_v37 }
 0xe1f   :  { %6258 = vmatprep.subr.bf16.mxu0 %v5362_v63 }
 0xe22   :  { %6259 = vmatpush1.bf16.msra.mxu0 %v5361_v16 }
 0xe23   :  { %6260 = vmatprep.subr.bf16.mxu0 %v5372_v45 }
 0xe26   :  { %6261 = vmatpush1.bf16.msra.mxu0 %v5371_v43 }
 0xe27   :  { %6262 = vmatprep.subr.bf16.mxu0 %v5382_v28 }
 0xe2a   :  { %6263 = vmatpush1.bf16.msra.mxu0 %v5381_v0 }
 0xe2b   :  { %6264 = vmatprep.subr.bf16.mxu0 %v5392_v56 }
 0xe2e   :  { %6265 = vmatpush1.bf16.msra.mxu0 %v5391_v38 }
 0xe2f   :  { %6266 = vmatprep.subr.bf16.mxu0 %v5402_v23 }
 0xe32   :  { %6267 = vmatpush1.bf16.msra.mxu0 %v5401_v12 }
 0xe35   :  { %6269 = vmatmul.mubr.bf16.vlgmr.msra.gmra.mrb[96].mxu0 %v9724_v9 }
 0xf08   :  { %v6270_v15 = vpop.f32.mrb[96].mxu0 }
 0xf09   :  { %v9796_v7 = vadd.f32 %v6270_v15, %v5442_v42  ;;  %v6272_v48 = vpop.f32.mrb[97].mxu0 }
 0xf0a   :  { %v9798_v19 = vadd.f32 %v6272_v48, %v5446_v4  ;;  %v6274_v26 = vpop.f32.mrb[98].mxu0 }
 0xf0b   :  { %v6285_v33 = vmax.f32 %v9796_v7, 0.0  ;;  %v6275_v2 = vpop.f32.mrb[99].mxu0 }
 0xf0c   :  { %v6286_v11 = vmax.f32 %v9798_v19, 0.0 }
 0xf0d   :  { %8659 = dma.done.wait [#allocation8 + $0x2], 40960 }
 0xf0e   :  { %8660 = vsyncadd [#allocation8 + $0x2], 4294926336  ;;  %v6292_v9 = vpack.c.bf16 %v6278_v29, %v6278_v29  ;;  %v6302_v24 = vld [vmem:[#allocation4 + $0x8] sm:$0xff]  ;;  %v6304_v62 = vld [vmem:[#allocation4 + $0x18] sm:$0xff] }
 0xf0f   :  { %v6301_v22 = vld [vmem:[#allocation4] sm:$0xff]  ;;  %6643 = vmatprep.subr.bf16.mxu1 %v6302_v24  ;;  %6848 = vmatprep.subr.bf16.mxu0 %v6304_v62  ;;  %v6303_v53 = vld [vmem:[#allocation4 + $0x10] sm:$0xff]  ;;  %v6306_v39 = vld [vmem:[#allocation4 + $0x28] sm:$0xff] }
 0xf10   :  { %6675 = vmatprep.mubr.bf16.mxu1 %v6292_v9  ;;  %6880 = vmatprep.mubr.bf16.mxu0 %v6292_v9  ;;  %v6308_v6 = vld [vmem:[#allocation4 + $0x38] sm:$0xff]  ;;  %v6305_v25 = vld [vmem:[#allocation4 + $0x20] sm:$0xff]  ;;  %v6307_v50 = vld [vmem:[#allocation4 + $0x30] sm:$0xff] }
 0xf11   :  { %6644 = vmatpush1.bf16.msra.mxu1 %v6301_v22  ;;  %6849 = vmatpush1.bf16.msra.mxu0 %v6303_v53  ;;  %v6310_v55 = vld [vmem:[#allocation4 + $0x48] sm:$0xff]  ;;  %v6312_v10 = vld [vmem:[#allocation4 + $0x58] sm:$0xff]  ;;  %v6309_v29 = vld [vmem:[#allocation4 + $0x40] sm:$0xff] }
 0xf12   :  { %6645 = vmatprep.subr.bf16.mxu1 %v6306_v39  ;;  %6850 = vmatprep.subr.bf16.mxu0 %v6308_v6  ;;  %v6311_v57 = vld [vmem:[#allocation4 + $0x50] sm:$0xff]  ;;  %v6314_v30 = vld [vmem:[#allocation4 + $0x68] sm:$0xff]  ;;  %v6316_v20 = vld [vmem:[#allocation4 + $0x78] sm:$0xff] }
 0xf13   :  { %v6313_v31 = vld [vmem:[#allocation4 + $0x60] sm:$0xff]  ;;  %v6315_v46 = vld [vmem:[#allocation4 + $0x70] sm:$0xff]  ;;  %v6318_v3 = vld [vmem:[#allocation4 + $0x88] sm:$0xff] }
 0xf14   :  { %v6320_v54 = vld [vmem:[#allocation4 + $0x98] sm:$0xff]  ;;  %v6317_v59 = vld [vmem:[#allocation4 + $0x80] sm:$0xff]  ;;  %v6319_v40 = vld [vmem:[#allocation4 + $0x90] sm:$0xff] }
 0xf15   :  { %6646 = vmatpush1.bf16.msra.mxu1 %v6305_v25  ;;  %6851 = vmatpush1.bf16.msra.mxu0 %v6307_v50  ;;  %v6322_v36 = vld [vmem:[#allocation4 + $0xa8] sm:$0xff]  ;;  %v6324_v41 = vld [vmem:[#allocation4 + $0xb8] sm:$0xff]  ;;  %v6321_v58 = vld [vmem:[#allocation4 + $0xa0] sm:$0xff] }
 0xf16   :  { %6647 = vmatprep.subr.bf16.mxu1 %v6310_v55  ;;  %6852 = vmatprep.subr.bf16.mxu0 %v6312_v10  ;;  %v6323_v37 = vld [vmem:[#allocation4 + $0xb0] sm:$0xff]  ;;  %v6326_v63 = vld [vmem:[#allocation4 + $0xc8] sm:$0xff]  ;;  %v6328_v16 = vld [vmem:[#allocation4 + $0xd8] sm:$0xff] }
 0xf17   :  { %v6325_v45 = vld [vmem:[#allocation4 + $0xc0] sm:$0xff]  ;;  %v6327_v43 = vld [vmem:[#allocation4 + $0xd0] sm:$0xff]  ;;  %v6330_v28 = vld [vmem:[#allocation4 + $0xe8] sm:$0xff] }
 0xf18   :  { %v6332_v0 = vld [vmem:[#allocation4 + $0xf8] sm:$0xff]  ;;  %v6329_v56 = vld [vmem:[#allocation4 + $0xe0] sm:$0xff]  ;;  %v6331_v38 = vld [vmem:[#allocation4 + $0xf0] sm:$0xff] }
 0xf19   :  { %6648 = vmatpush1.bf16.msra.mxu1 %v6309_v29  ;;  %6853 = vmatpush1.bf16.msra.mxu0 %v6311_v57  ;;  %v6334_v23 = vld [vmem:[#allocation4 + $0x108] sm:$0xff]  ;;  %v6336_v12 = vld [vmem:[#allocation4 + $0x118] sm:$0xff]  ;;  %v6333_v34 = vld [vmem:[#allocation4 + $0x100] sm:$0xff] }
 0xf1a   :  { %6649 = vmatprep.subr.bf16.mxu1 %v6314_v30  ;;  %6854 = vmatprep.subr.bf16.mxu0 %v6316_v20  ;;  %v6335_v42 = vld [vmem:[#allocation4 + $0x110] sm:$0xff]  ;;  %v6338_v4 = vld [vmem:[#allocation4 + $0x128] sm:$0xff]  ;;  %v6340_v15 = vld [vmem:[#allocation4 + $0x138] sm:$0xff] }
 0xf1b   :  { %v6337_v48 = vld [vmem:[#allocation4 + $0x120] sm:$0xff]  ;;  %v6339_v26 = vld [vmem:[#allocation4 + $0x130] sm:$0xff]  ;;  %v6342_v2 = vld [vmem:[#allocation4 + $0x148] sm:$0xff] }
 0xf1c   :  { %v6344_v9 = vld [vmem:[#allocation4 + $0x158] sm:$0xff]  ;;  %v6341_v24 = vld [vmem:[#allocation4 + $0x140] sm:$0xff]  ;;  %v6343_v62 = vld [vmem:[#allocation4 + $0x150] sm:$0xff] }
 0xf1d   :  { %6650 = vmatpush1.bf16.msra.mxu1 %v6313_v31  ;;  %6855 = vmatpush1.bf16.msra.mxu0 %v6315_v46  ;;  %v6346_v22 = vld [vmem:[#allocation4 + $0x168] sm:$0xff]  ;;  %v6348_v53 = vld [vmem:[#allocation4 + $0x178] sm:$0xff]  ;;  %v6345_v39 = vld [vmem:[#allocation4 + $0x160] sm:$0xff] }
 0xf1e   :  { %6651 = vmatprep.subr.bf16.mxu1 %v6318_v3  ;;  %6856 = vmatprep.subr.bf16.mxu0 %v6320_v54  ;;  %v6347_v6 = vld [vmem:[#allocation4 + $0x170] sm:$0xff]  ;;  %v6350_v25 = vld [vmem:[#allocation4 + $0x188] sm:$0xff]  ;;  %v6352_v50 = vld [vmem:[#allocation4 + $0x198] sm:$0xff] }
 0xf1f   :  { %v6349_v55 = vld [vmem:[#allocation4 + $0x180] sm:$0xff]  ;;  %v6351_v10 = vld [vmem:[#allocation4 + $0x190] sm:$0xff]  ;;  %v6354_v29 = vld [vmem:[#allocation4 + $0x1a8] sm:$0xff] }
 0xf20   :  { %v6356_v57 = vld [vmem:[#allocation4 + $0x1b8] sm:$0xff]  ;;  %v6353_v30 = vld [vmem:[#allocation4 + $0x1a0] sm:$0xff]  ;;  %v6355_v20 = vld [vmem:[#allocation4 + $0x1b0] sm:$0xff] }
 0xf21   :  { %6652 = vmatpush1.bf16.msra.mxu1 %v6317_v59  ;;  %6857 = vmatpush1.bf16.msra.mxu0 %v6319_v40  ;;  %v6358_v31 = vld [vmem:[#allocation4 + $0x1c8] sm:$0xff]  ;;  %v6360_v46 = vld [vmem:[#allocation4 + $0x1d8] sm:$0xff]  ;;  %v6357_v3 = vld [vmem:[#allocation4 + $0x1c0] sm:$0xff] }
 0xf22   :  { %6653 = vmatprep.subr.bf16.mxu1 %v6322_v36  ;;  %6858 = vmatprep.subr.bf16.mxu0 %v6324_v41  ;;  %v6359_v54 = vld [vmem:[#allocation4 + $0x1d0] sm:$0xff]  ;;  %v6362_v59 = vld [vmem:[#allocation4 + $0x1e8] sm:$0xff]  ;;  %v6364_v40 = vld [vmem:[#allocation4 + $0x1f8] sm:$0xff] }
 0xf23   :  { %v6361_v36 = vld [vmem:[#allocation4 + $0x1e0] sm:$0xff]  ;;  %v6363_v41 = vld [vmem:[#allocation4 + $0x1f0] sm:$0xff] }
 0xf24   :  { %v6369_v14 = vld [vmem:[#allocation4 + $0x220] sm:$0xff]  ;;  %v6375_v35 = vld [vmem:[#allocation4 + $0x250] sm:$0xff] }
 0xf25   :  { %6654 = vmatpush1.bf16.msra.mxu1 %v6321_v58  ;;  %6859 = vmatpush1.bf16.msra.mxu0 %v6323_v37  ;;  %v6366_v58 = vld [vmem:[#allocation4 + $0x208] sm:$0xff]  ;;  %v6368_v37 = vld [vmem:[#allocation4 + $0x218] sm:$0xff]  ;;  %v6433_v44 = vld [vmem:[#allocation4 + $0x420] sm:$0xff] }
 0xf26   :  { %6655 = vmatprep.subr.bf16.mxu1 %v6326_v63  ;;  %6860 = vmatprep.subr.bf16.mxu0 %v6328_v16  ;;  %v6291_v63 = vpack.c.bf16 %v6277_v47, %v6277_v47  ;;  %v6365_v16 = vld [vmem:[#allocation4 + $0x200] sm:$0xff]  ;;  %v6371_v47 = vld [vmem:[#allocation4 + $0x230] sm:$0xff] }
 0xf27   :  { %v6439_v5 = vld [vmem:[#allocation4 + $0x450] sm:$0xff]  ;;  %v6497_v60 = vld [vmem:[#allocation4 + $0x620] sm:$0xff] }
 0xf28   :  { %v6503_v49 = vld [vmem:[#allocation4 + $0x650] sm:$0xff]  ;;  %v6561_v21 = vld [vmem:[#allocation4 + $0x820] sm:$0xff] }
 0xf29   :  { %6656 = vmatpush1.bf16.msra.mxu1 %v6325_v45  ;;  %6861 = vmatpush1.bf16.msra.mxu0 %v6327_v43  ;;  %v6367_v45 = vld [vmem:[#allocation4 + $0x210] sm:$0xff]  ;;  %v6370_v43 = vld [vmem:[#allocation4 + $0x228] sm:$0xff] }
 0xf2a   :  { %6657 = vmatprep.subr.bf16.mxu1 %v6330_v28  ;;  %6862 = vmatprep.subr.bf16.mxu0 %v6332_v0  ;;  %v6372_v28 = vld [vmem:[#allocation4 + $0x238] sm:$0xff]  ;;  %v6294_v0 = vpack.c.bf16 %v6280_v1, %v6280_v1  ;;  %v6567_v19 = vld [vmem:[#allocation4 + $0x850] sm:$0xff] }
 0xf2b   :  { %v6380_v1 = vld [vmem:[#allocation4 + $0x278] sm:$0xff] }
 0xf2d   :  { %6658 = vmatpush1.bf16.msra.mxu1 %v6329_v56  ;;  %6863 = vmatpush1.bf16.msra.mxu0 %v6331_v38  ;;  %v6374_v56 = vld [vmem:[#allocation4 + $0x248] sm:$0xff]  ;;  %v6376_v38 = vld [vmem:[#allocation4 + $0x258] sm:$0xff] }
 0xf2e   :  { %6659 = vmatprep.subr.bf16.mxu1 %v6334_v23  ;;  %6864 = vmatprep.subr.bf16.mxu0 %v6336_v12  ;;  %v6373_v23 = vld [vmem:[#allocation4 + $0x240] sm:$0xff]  ;;  %v6378_v12 = vld [vmem:[#allocation4 + $0x268] sm:$0xff] }
 0xf31   :  { %6660 = vmatpush1.bf16.msra.mxu1 %v6333_v34  ;;  %6865 = vmatpush1.bf16.msra.mxu0 %v6335_v42  ;;  %v6377_v34 = vld [vmem:[#allocation4 + $0x260] sm:$0xff]  ;;  %v6379_v42 = vld [vmem:[#allocation4 + $0x270] sm:$0xff] }
 0xf32   :  { %6661 = vmatprep.subr.bf16.mxu1 %v6338_v4  ;;  %6866 = vmatprep.subr.bf16.mxu0 %v6340_v15  ;;  %v6382_v4 = vld [vmem:[#allocation4 + $0x288] sm:$0xff]  ;;  %v6384_v15 = vld [vmem:[#allocation4 + $0x298] sm:$0xff] }
 0xf35   :  { %6662 = vmatpush1.bf16.msra.mxu1 %v6337_v48  ;;  %6867 = vmatpush1.bf16.msra.mxu0 %v6339_v26  ;;  %v6381_v48 = vld [vmem:[#allocation4 + $0x280] sm:$0xff]  ;;  %v6383_v26 = vld [vmem:[#allocation4 + $0x290] sm:$0xff] }
 0xf36   :  { %6663 = vmatprep.subr.bf16.mxu1 %v6342_v2  ;;  %6868 = vmatprep.subr.bf16.mxu0 %v6344_v9  ;;  %v6386_v2 = vld [vmem:[#allocation4 + $0x2a8] sm:$0xff]  ;;  %v6388_v9 = vld [vmem:[#allocation4 + $0x2b8] sm:$0xff] }
 0xf39   :  { %6664 = vmatpush1.bf16.msra.mxu1 %v6341_v24  ;;  %6869 = vmatpush1.bf16.msra.mxu0 %v6343_v62  ;;  %v6385_v24 = vld [vmem:[#allocation4 + $0x2a0] sm:$0xff]  ;;  %v6387_v62 = vld [vmem:[#allocation4 + $0x2b0] sm:$0xff] }
 0xf3a   :  { %6665 = vmatprep.subr.bf16.mxu1 %v6346_v22  ;;  %6870 = vmatprep.subr.bf16.mxu0 %v6348_v53  ;;  %v6390_v22 = vld [vmem:[#allocation4 + $0x2c8] sm:$0xff]  ;;  %v6392_v53 = vld [vmem:[#allocation4 + $0x2d8] sm:$0xff] }
 0xf3d   :  { %6666 = vmatpush1.bf16.msra.mxu1 %v6345_v39  ;;  %6871 = vmatpush1.bf16.msra.mxu0 %v6347_v6  ;;  %v6389_v39 = vld [vmem:[#allocation4 + $0x2c0] sm:$0xff]  ;;  %v6391_v6 = vld [vmem:[#allocation4 + $0x2d0] sm:$0xff] }
 0xf3e   :  { %6667 = vmatprep.subr.bf16.mxu1 %v6350_v25  ;;  %6872 = vmatprep.subr.bf16.mxu0 %v6352_v50  ;;  %v6394_v25 = vld [vmem:[#allocation4 + $0x2e8] sm:$0xff]  ;;  %v6396_v50 = vld [vmem:[#allocation4 + $0x2f8] sm:$0xff] }
 0xf41   :  { %6668 = vmatpush1.bf16.msra.mxu1 %v6349_v55  ;;  %6873 = vmatpush1.bf16.msra.mxu0 %v6351_v10  ;;  %v6393_v55 = vld [vmem:[#allocation4 + $0x2e0] sm:$0xff]  ;;  %v6395_v10 = vld [vmem:[#allocation4 + $0x2f0] sm:$0xff] }
 0xf42   :  { %6669 = vmatprep.subr.bf16.mxu1 %v6354_v29  ;;  %6874 = vmatprep.subr.bf16.mxu0 %v6356_v57  ;;  %v6398_v29 = vld [vmem:[#allocation4 + $0x308] sm:$0xff]  ;;  %v6400_v57 = vld [vmem:[#allocation4 + $0x318] sm:$0xff] }
 0xf45   :  { %6670 = vmatpush1.bf16.msra.mxu1 %v6353_v30  ;;  %6875 = vmatpush1.bf16.msra.mxu0 %v6355_v20  ;;  %v6397_v30 = vld [vmem:[#allocation4 + $0x300] sm:$0xff]  ;;  %v6399_v20 = vld [vmem:[#allocation4 + $0x310] sm:$0xff] }
 0xf46   :  { %6671 = vmatprep.subr.bf16.mxu1 %v6358_v31  ;;  %6876 = vmatprep.subr.bf16.mxu0 %v6360_v46  ;;  %v6402_v31 = vld [vmem:[#allocation4 + $0x328] sm:$0xff]  ;;  %v6404_v46 = vld [vmem:[#allocation4 + $0x338] sm:$0xff] }
 0xf49   :  { %6672 = vmatpush1.bf16.msra.mxu1 %v6357_v3  ;;  %6877 = vmatpush1.bf16.msra.mxu0 %v6359_v54  ;;  %v6401_v3 = vld [vmem:[#allocation4 + $0x320] sm:$0xff]  ;;  %v6403_v54 = vld [vmem:[#allocation4 + $0x330] sm:$0xff] }
 0xf4a   :  { %6673 = vmatprep.subr.bf16.mxu1 %v6362_v59  ;;  %6878 = vmatprep.subr.bf16.mxu0 %v6364_v40  ;;  %v6406_v59 = vld [vmem:[#allocation4 + $0x348] sm:$0xff]  ;;  %v6408_v40 = vld [vmem:[#allocation4 + $0x358] sm:$0xff] }
 0xf4d   :  { %6674 = vmatpush1.bf16.msra.mxu1 %v6361_v36  ;;  %6879 = vmatpush1.bf16.msra.mxu0 %v6363_v41  ;;  %v6405_v36 = vld [vmem:[#allocation4 + $0x340] sm:$0xff]  ;;  %v6407_v41 = vld [vmem:[#allocation4 + $0x350] sm:$0xff] }
 0xf4e   :  { %6684 = vmatprep.subr.bf16.mxu1 %v6366_v58  ;;  %6889 = vmatprep.subr.bf16.mxu0 %v6368_v37  ;;  %v6410_v58 = vld [vmem:[#allocation4 + $0x368] sm:$0xff]  ;;  %v6412_v37 = vld [vmem:[#allocation4 + $0x378] sm:$0xff] }
 0xf50   :  { %6676 = vmatmul.mubr.bf16.vlgmr.msra.gmra.mrb[128].mxu1 %v6291_v63  ;;  %6881 = vmatmul.mubr.bf16.vlgmr.msra.gmra.mrb[100].mxu0 %v6291_v63  ;;  %v6409_v63 = vld [vmem:[#allocation4 + $0x360] sm:$0xff] }
 0xf51   :  { %6685 = vmatpush1.bf16.msra.mxu1 %v6365_v16  ;;  %6890 = vmatpush1.bf16.msra.mxu0 %v6367_v45  ;;  %v6411_v16 = vld [vmem:[#allocation4 + $0x370] sm:$0xff]  ;;  %v6414_v45 = vld [vmem:[#allocation4 + $0x388] sm:$0xff] }
 0xf52   :  { %6686 = vmatprep.subr.bf16.mxu1 %v6370_v43  ;;  %6891 = vmatprep.subr.bf16.mxu0 %v6372_v28  ;;  %v6416_v43 = vld [vmem:[#allocation4 + $0x398] sm:$0xff]  ;;  %v6413_v28 = vld [vmem:[#allocation4 + $0x380] sm:$0xff] }
 0xf53   :  { %6716 = vmatprep.mubr.bf16.mxu1 %v6294_v0  ;;  %6921 = vmatprep.mubr.bf16.mxu0 %v6294_v0  ;;  %v6415_v0 = vld [vmem:[#allocation4 + $0x390] sm:$0xff] }
 0xf55   :  { %6687 = vmatpush1.bf16.msra.mxu1 %v6369_v14  ;;  %6892 = vmatpush1.bf16.msra.mxu0 %v6371_v47  ;;  %v6418_v14 = vld [vmem:[#allocation4 + $0x3a8] sm:$0xff]  ;;  %v6420_v47 = vld [vmem:[#allocation4 + $0x3b8] sm:$0xff] }
 0xf56   :  { %6688 = vmatprep.subr.bf16.mxu1 %v6374_v56  ;;  %6893 = vmatprep.subr.bf16.mxu0 %v6376_v38  ;;  %v6417_v56 = vld [vmem:[#allocation4 + $0x3a0] sm:$0xff]  ;;  %v6419_v38 = vld [vmem:[#allocation4 + $0x3b0] sm:$0xff] }
 0xf59   :  { %6689 = vmatpush1.bf16.msra.mxu1 %v6373_v23  ;;  %6894 = vmatpush1.bf16.msra.mxu0 %v6375_v35  ;;  %v6422_v23 = vld [vmem:[#allocation4 + $0x3c8] sm:$0xff]  ;;  %v6424_v35 = vld [vmem:[#allocation4 + $0x3d8] sm:$0xff] }
 0xf5a   :  { %6690 = vmatprep.subr.bf16.mxu1 %v6378_v12  ;;  %6895 = vmatprep.subr.bf16.mxu0 %v6380_v1  ;;  %v6421_v12 = vld [vmem:[#allocation4 + $0x3c0] sm:$0xff]  ;;  %v6423_v1 = vld [vmem:[#allocation4 + $0x3d0] sm:$0xff] }
 0xf5d   :  { %6691 = vmatpush1.bf16.msra.mxu1 %v6377_v34  ;;  %6896 = vmatpush1.bf16.msra.mxu0 %v6379_v42  ;;  %v6426_v34 = vld [vmem:[#allocation4 + $0x3e8] sm:$0xff]  ;;  %v6428_v42 = vld [vmem:[#allocation4 + $0x3f8] sm:$0xff] }
 0xf5e   :  { %6692 = vmatprep.subr.bf16.mxu1 %v6382_v4  ;;  %6897 = vmatprep.subr.bf16.mxu0 %v6384_v15  ;;  %v6425_v4 = vld [vmem:[#allocation4 + $0x3e0] sm:$0xff]  ;;  %v6427_v15 = vld [vmem:[#allocation4 + $0x3f0] sm:$0xff] }
 0xf61   :  { %6693 = vmatpush1.bf16.msra.mxu1 %v6381_v48  ;;  %6898 = vmatpush1.bf16.msra.mxu0 %v6383_v26  ;;  %v6430_v48 = vld [vmem:[#allocation4 + $0x408] sm:$0xff]  ;;  %v6432_v26 = vld [vmem:[#allocation4 + $0x418] sm:$0xff] }
 0xf62   :  { %6694 = vmatprep.subr.bf16.mxu1 %v6386_v2  ;;  %6899 = vmatprep.subr.bf16.mxu0 %v6388_v9  ;;  %v6293_v2 = vpack.c.bf16 %v6279_v61, %v6279_v61  ;;  %v6429_v9 = vld [vmem:[#allocation4 + $0x400] sm:$0xff]  ;;  %v6435_v61 = vld [vmem:[#allocation4 + $0x430] sm:$0xff] }
 0xf65   :  { %6695 = vmatpush1.bf16.msra.mxu1 %v6385_v24  ;;  %6900 = vmatpush1.bf16.msra.mxu0 %v6387_v62  ;;  %v6431_v24 = vld [vmem:[#allocation4 + $0x410] sm:$0xff]  ;;  %v6434_v62 = vld [vmem:[#allocation4 + $0x428] sm:$0xff] }
 0xf66   :  { %6696 = vmatprep.subr.bf16.mxu1 %v6390_v22  ;;  %6901 = vmatprep.subr.bf16.mxu0 %v6392_v53  ;;  %v6436_v22 = vld [vmem:[#allocation4 + $0x438] sm:$0xff]  ;;  %v6296_v53 = vpack.c.bf16 %v6282_v13, %v6282_v13 }
 0xf67   :  { %v6444_v13 = vld [vmem:[#allocation4 + $0x478] sm:$0xff] }
 0xf69   :  { %6697 = vmatpush1.bf16.msra.mxu1 %v6389_v39  ;;  %6902 = vmatpush1.bf16.msra.mxu0 %v6391_v6  ;;  %v6438_v39 = vld [vmem:[#allocation4 + $0x448] sm:$0xff]  ;;  %v6440_v6 = vld [vmem:[#allocation4 + $0x458] sm:$0xff] }
 0xf6a   :  { %6698 = vmatprep.subr.bf16.mxu1 %v6394_v25  ;;  %6903 = vmatprep.subr.bf16.mxu0 %v6396_v50  ;;  %v6437_v25 = vld [vmem:[#allocation4 + $0x440] sm:$0xff]  ;;  %v6442_v50 = vld [vmem:[#allocation4 + $0x468] sm:$0xff] }
 0xf6d   :  { %6699 = vmatpush1.bf16.msra.mxu1 %v6393_v55  ;;  %6904 = vmatpush1.bf16.msra.mxu0 %v6395_v10  ;;  %v6441_v55 = vld [vmem:[#allocation4 + $0x460] sm:$0xff]  ;;  %v6443_v10 = vld [vmem:[#allocation4 + $0x470] sm:$0xff] }
 0xf6e   :  { %6700 = vmatprep.subr.bf16.mxu1 %v6398_v29  ;;  %6905 = vmatprep.subr.bf16.mxu0 %v6400_v57  ;;  %v6446_v29 = vld [vmem:[#allocation4 + $0x488] sm:$0xff]  ;;  %v6448_v57 = vld [vmem:[#allocation4 + $0x498] sm:$0xff] }
 0xf71   :  { %6701 = vmatpush1.bf16.msra.mxu1 %v6397_v30  ;;  %6906 = vmatpush1.bf16.msra.mxu0 %v6399_v20  ;;  %v6445_v30 = vld [vmem:[#allocation4 + $0x480] sm:$0xff]  ;;  %v6447_v20 = vld [vmem:[#allocation4 + $0x490] sm:$0xff] }
 0xf72   :  { %6702 = vmatprep.subr.bf16.mxu1 %v6402_v31  ;;  %6907 = vmatprep.subr.bf16.mxu0 %v6404_v46  ;;  %v6450_v31 = vld [vmem:[#allocation4 + $0x4a8] sm:$0xff]  ;;  %v6452_v46 = vld [vmem:[#allocation4 + $0x4b8] sm:$0xff] }
 0xf75   :  { %6703 = vmatpush1.bf16.msra.mxu1 %v6401_v3  ;;  %6908 = vmatpush1.bf16.msra.mxu0 %v6403_v54  ;;  %v6449_v3 = vld [vmem:[#allocation4 + $0x4a0] sm:$0xff]  ;;  %v6451_v54 = vld [vmem:[#allocation4 + $0x4b0] sm:$0xff] }
 0xf76   :  { %6704 = vmatprep.subr.bf16.mxu1 %v6406_v59  ;;  %6909 = vmatprep.subr.bf16.mxu0 %v6408_v40  ;;  %v6454_v59 = vld [vmem:[#allocation4 + $0x4c8] sm:$0xff]  ;;  %v6456_v40 = vld [vmem:[#allocation4 + $0x4d8] sm:$0xff] }
 0xf79   :  { %6705 = vmatpush1.bf16.msra.mxu1 %v6405_v36  ;;  %6910 = vmatpush1.bf16.msra.mxu0 %v6407_v41  ;;  %v6453_v36 = vld [vmem:[#allocation4 + $0x4c0] sm:$0xff]  ;;  %v6455_v41 = vld [vmem:[#allocation4 + $0x4d0] sm:$0xff] }
 0xf7a   :  { %6706 = vmatprep.subr.bf16.mxu1 %v6410_v58  ;;  %6911 = vmatprep.subr.bf16.mxu0 %v6412_v37  ;;  %v6458_v58 = vld [vmem:[#allocation4 + $0x4e8] sm:$0xff]  ;;  %v6460_v37 = vld [vmem:[#allocation4 + $0x4f8] sm:$0xff] }
 0xf7d   :  { %6707 = vmatpush1.bf16.msra.mxu1 %v6409_v63  ;;  %6912 = vmatpush1.bf16.msra.mxu0 %v6411_v16  ;;  %v6457_v63 = vld [vmem:[#allocation4 + $0x4e0] sm:$0xff]  ;;  %v6459_v16 = vld [vmem:[#allocation4 + $0x4f0] sm:$0xff] }
 0xf7e   :  { %6708 = vmatprep.subr.bf16.mxu1 %v6414_v45  ;;  %6913 = vmatprep.subr.bf16.mxu0 %v6416_v43  ;;  %v6462_v45 = vld [vmem:[#allocation4 + $0x508] sm:$0xff]  ;;  %v6464_v43 = vld [vmem:[#allocation4 + $0x518] sm:$0xff] }
 0xf81   :  { %6709 = vmatpush1.bf16.msra.mxu1 %v6413_v28  ;;  %6914 = vmatpush1.bf16.msra.mxu0 %v6415_v0  ;;  %v6461_v28 = vld [vmem:[#allocation4 + $0x500] sm:$0xff]  ;;  %v6463_v0 = vld [vmem:[#allocation4 + $0x510] sm:$0xff] }
 0xf82   :  { %6710 = vmatprep.subr.bf16.mxu1 %v6418_v14  ;;  %6915 = vmatprep.subr.bf16.mxu0 %v6420_v47  ;;  %v6466_v14 = vld [vmem:[#allocation4 + $0x528] sm:$0xff]  ;;  %v6468_v47 = vld [vmem:[#allocation4 + $0x538] sm:$0xff] }
 0xf85   :  { %6711 = vmatpush1.bf16.msra.mxu1 %v6417_v56  ;;  %6916 = vmatpush1.bf16.msra.mxu0 %v6419_v38  ;;  %v6465_v56 = vld [vmem:[#allocation4 + $0x520] sm:$0xff]  ;;  %v6467_v38 = vld [vmem:[#allocation4 + $0x530] sm:$0xff] }
 0xf86   :  { %6712 = vmatprep.subr.bf16.mxu1 %v6422_v23  ;;  %6917 = vmatprep.subr.bf16.mxu0 %v6424_v35  ;;  %v6470_v23 = vld [vmem:[#allocation4 + $0x548] sm:$0xff]  ;;  %v6472_v35 = vld [vmem:[#allocation4 + $0x558] sm:$0xff] }
 0xf89   :  { %6713 = vmatpush1.bf16.msra.mxu1 %v6421_v12  ;;  %6918 = vmatpush1.bf16.msra.mxu0 %v6423_v1  ;;  %v6469_v12 = vld [vmem:[#allocation4 + $0x540] sm:$0xff]  ;;  %v6471_v1 = vld [vmem:[#allocation4 + $0x550] sm:$0xff] }
 0xf8a   :  { %6714 = vmatprep.subr.bf16.mxu1 %v6426_v34  ;;  %6919 = vmatprep.subr.bf16.mxu0 %v6428_v42  ;;  %v6474_v34 = vld [vmem:[#allocation4 + $0x568] sm:$0xff]  ;;  %v6476_v42 = vld [vmem:[#allocation4 + $0x578] sm:$0xff] }
 0xf8d   :  { %6715 = vmatpush1.bf16.msra.mxu1 %v6425_v4  ;;  %6920 = vmatpush1.bf16.msra.mxu0 %v6427_v15  ;;  %v6473_v4 = vld [vmem:[#allocation4 + $0x560] sm:$0xff]  ;;  %v6475_v15 = vld [vmem:[#allocation4 + $0x570] sm:$0xff] }
 0xf8e   :  { %6725 = vmatprep.subr.bf16.mxu1 %v6430_v48  ;;  %6930 = vmatprep.subr.bf16.mxu0 %v6432_v26  ;;  %v6478_v48 = vld [vmem:[#allocation4 + $0x588] sm:$0xff]  ;;  %v6480_v26 = vld [vmem:[#allocation4 + $0x598] sm:$0xff] }
 0xf90   :  { %6717 = vmatmul.mubr.bf16.vlgmr.msra.gmra.mrb[128].mxu1 %v6293_v2  ;;  %6922 = vmatmul.mubr.bf16.vlgmr.msra.gmra.mrb[100].mxu0 %v6293_v2  ;;  %v6477_v2 = vld [vmem:[#allocation4 + $0x580] sm:$0xff] }
 0xf91   :  { %6726 = vmatpush1.bf16.msra.mxu1 %v6429_v9  ;;  %6931 = vmatpush1.bf16.msra.mxu0 %v6431_v24  ;;  %v6479_v9 = vld [vmem:[#allocation4 + $0x590] sm:$0xff]  ;;  %v6482_v24 = vld [vmem:[#allocation4 + $0x5a8] sm:$0xff] }
 0xf92   :  { %6727 = vmatprep.subr.bf16.mxu1 %v6434_v62  ;;  %6932 = vmatprep.subr.bf16.mxu0 %v6436_v22  ;;  %v6484_v62 = vld [vmem:[#allocation4 + $0x5b8] sm:$0xff]  ;;  %v6481_v22 = vld [vmem:[#allocation4 + $0x5a0] sm:$0xff] }
 0xf93   :  { %6757 = vmatprep.mubr.bf16.mxu1 %v6296_v53  ;;  %6962 = vmatprep.mubr.bf16.mxu0 %v6296_v53  ;;  %v6483_v53 = vld [vmem:[#allocation4 + $0x5b0] sm:$0xff] }
 0xf95   :  { %6728 = vmatpush1.bf16.msra.mxu1 %v6433_v44  ;;  %6933 = vmatpush1.bf16.msra.mxu0 %v6435_v61  ;;  %v6486_v44 = vld [vmem:[#allocation4 + $0x5c8] sm:$0xff]  ;;  %v6488_v61 = vld [vmem:[#allocation4 + $0x5d8] sm:$0xff] }
 0xf96   :  { %6729 = vmatprep.subr.bf16.mxu1 %v6438_v39  ;;  %6934 = vmatprep.subr.bf16.mxu0 %v6440_v6  ;;  %v6485_v39 = vld [vmem:[#allocation4 + $0x5c0] sm:$0xff]  ;;  %v6487_v6 = vld [vmem:[#allocation4 + $0x5d0] sm:$0xff] }
 0xf99   :  { %6730 = vmatpush1.bf16.msra.mxu1 %v6437_v25  ;;  %6935 = vmatpush1.bf16.msra.mxu0 %v6439_v5  ;;  %v6490_v25 = vld [vmem:[#allocation4 + $0x5e8] sm:$0xff]  ;;  %v6492_v5 = vld [vmem:[#allocation4 + $0x5f8] sm:$0xff] }
 0xf9a   :  { %6731 = vmatprep.subr.bf16.mxu1 %v6442_v50  ;;  %6936 = vmatprep.subr.bf16.mxu0 %v6444_v13  ;;  %v6489_v50 = vld [vmem:[#allocation4 + $0x5e0] sm:$0xff]  ;;  %v6491_v13 = vld [vmem:[#allocation4 + $0x5f0] sm:$0xff] }
 0xf9d   :  { %6732 = vmatpush1.bf16.msra.mxu1 %v6441_v55  ;;  %6937 = vmatpush1.bf16.msra.mxu0 %v6443_v10  ;;  %v6494_v55 = vld [vmem:[#allocation4 + $0x608] sm:$0xff]  ;;  %v6496_v10 = vld [vmem:[#allocation4 + $0x618] sm:$0xff] }
 0xf9e   :  { %6733 = vmatprep.subr.bf16.mxu1 %v6446_v29  ;;  %6938 = vmatprep.subr.bf16.mxu0 %v6448_v57  ;;  %v6295_v29 = vpack.c.bf16 %v6281_v27, %v6281_v27  ;;  %v6493_v57 = vld [vmem:[#allocation4 + $0x600] sm:$0xff]  ;;  %v6499_v27 = vld [vmem:[#allocation4 + $0x630] sm:$0xff] }
 0xfa1   :  { %6734 = vmatpush1.bf16.msra.mxu1 %v6445_v30  ;;  %6939 = vmatpush1.bf16.msra.mxu0 %v6447_v20  ;;  %v6495_v30 = vld [vmem:[#allocation4 + $0x610] sm:$0xff]  ;;  %v6498_v20 = vld [vmem:[#allocation4 + $0x628] sm:$0xff] }
 0xfa2   :  { %6735 = vmatprep.subr.bf16.mxu1 %v6450_v31  ;;  %6940 = vmatprep.subr.bf16.mxu0 %v6452_v46  ;;  %v6500_v31 = vld [vmem:[#allocation4 + $0x638] sm:$0xff]  ;;  %v6298_v46 = vpack.c.bf16 %v6284_v51, %v6284_v51 }
 0xfa3   :  { %v6508_v51 = vld [vmem:[#allocation4 + $0x678] sm:$0xff] }
 0xfa5   :  { %6736 = vmatpush1.bf16.msra.mxu1 %v6449_v3  ;;  %6941 = vmatpush1.bf16.msra.mxu0 %v6451_v54  ;;  %v6502_v3 = vld [vmem:[#allocation4 + $0x648] sm:$0xff]  ;;  %v6504_v54 = vld [vmem:[#allocation4 + $0x658] sm:$0xff] }
 0xfa6   :  { %6737 = vmatprep.subr.bf16.mxu1 %v6454_v59  ;;  %6942 = vmatprep.subr.bf16.mxu0 %v6456_v40  ;;  %v6501_v59 = vld [vmem:[#allocation4 + $0x640] sm:$0xff]  ;;  %v6506_v40 = vld [vmem:[#allocation4 + $0x668] sm:$0xff] }
 0xfa9   :  { %6738 = vmatpush1.bf16.msra.mxu1 %v6453_v36  ;;  %6943 = vmatpush1.bf16.msra.mxu0 %v6455_v41  ;;  %v6505_v36 = vld [vmem:[#allocation4 + $0x660] sm:$0xff]  ;;  %v6507_v41 = vld [vmem:[#allocation4 + $0x670] sm:$0xff] }
 0xfaa   :  { %6739 = vmatprep.subr.bf16.mxu1 %v6458_v58  ;;  %6944 = vmatprep.subr.bf16.mxu0 %v6460_v37  ;;  %v6510_v58 = vld [vmem:[#allocation4 + $0x688] sm:$0xff]  ;;  %v6512_v37 = vld [vmem:[#allocation4 + $0x698] sm:$0xff] }
 0xfad   :  { %6740 = vmatpush1.bf16.msra.mxu1 %v6457_v63  ;;  %6945 = vmatpush1.bf16.msra.mxu0 %v6459_v16  ;;  %v6509_v63 = vld [vmem:[#allocation4 + $0x680] sm:$0xff]  ;;  %v6511_v16 = vld [vmem:[#allocation4 + $0x690] sm:$0xff] }
 0xfae   :  { %6741 = vmatprep.subr.bf16.mxu1 %v6462_v45  ;;  %6946 = vmatprep.subr.bf16.mxu0 %v6464_v43  ;;  %v6514_v45 = vld [vmem:[#allocation4 + $0x6a8] sm:$0xff]  ;;  %v6516_v43 = vld [vmem:[#allocation4 + $0x6b8] sm:$0xff] }
 0xfb1   :  { %6742 = vmatpush1.bf16.msra.mxu1 %v6461_v28  ;;  %6947 = vmatpush1.bf16.msra.mxu0 %v6463_v0  ;;  %v6513_v28 = vld [vmem:[#allocation4 + $0x6a0] sm:$0xff]  ;;  %v6515_v0 = vld [vmem:[#allocation4 + $0x6b0] sm:$0xff] }
 0xfb2   :  { %6743 = vmatprep.subr.bf16.mxu1 %v6466_v14  ;;  %6948 = vmatprep.subr.bf16.mxu0 %v6468_v47  ;;  %v6518_v14 = vld [vmem:[#allocation4 + $0x6c8] sm:$0xff]  ;;  %v6520_v47 = vld [vmem:[#allocation4 + $0x6d8] sm:$0xff] }
 0xfb5   :  { %6744 = vmatpush1.bf16.msra.mxu1 %v6465_v56  ;;  %6949 = vmatpush1.bf16.msra.mxu0 %v6467_v38  ;;  %v6517_v56 = vld [vmem:[#allocation4 + $0x6c0] sm:$0xff]  ;;  %v6519_v38 = vld [vmem:[#allocation4 + $0x6d0] sm:$0xff] }
 0xfb6   :  { %6745 = vmatprep.subr.bf16.mxu1 %v6470_v23  ;;  %6950 = vmatprep.subr.bf16.mxu0 %v6472_v35  ;;  %v6522_v23 = vld [vmem:[#allocation4 + $0x6e8] sm:$0xff]  ;;  %v6524_v35 = vld [vmem:[#allocation4 + $0x6f8] sm:$0xff] }
 0xfb9   :  { %6746 = vmatpush1.bf16.msra.mxu1 %v6469_v12  ;;  %6951 = vmatpush1.bf16.msra.mxu0 %v6471_v1  ;;  %v6521_v12 = vld [vmem:[#allocation4 + $0x6e0] sm:$0xff]  ;;  %v6523_v1 = vld [vmem:[#allocation4 + $0x6f0] sm:$0xff] }
 0xfba   :  { %6747 = vmatprep.subr.bf16.mxu1 %v6474_v34  ;;  %6952 = vmatprep.subr.bf16.mxu0 %v6476_v42  ;;  %v6526_v34 = vld [vmem:[#allocation4 + $0x708] sm:$0xff]  ;;  %v6528_v42 = vld [vmem:[#allocation4 + $0x718] sm:$0xff] }
 0xfbd   :  { %6748 = vmatpush1.bf16.msra.mxu1 %v6473_v4  ;;  %6953 = vmatpush1.bf16.msra.mxu0 %v6475_v15  ;;  %v6525_v4 = vld [vmem:[#allocation4 + $0x700] sm:$0xff]  ;;  %v6527_v15 = vld [vmem:[#allocation4 + $0x710] sm:$0xff] }
 0xfbe   :  { %6749 = vmatprep.subr.bf16.mxu1 %v6478_v48  ;;  %6954 = vmatprep.subr.bf16.mxu0 %v6480_v26  ;;  %v6530_v48 = vld [vmem:[#allocation4 + $0x728] sm:$0xff]  ;;  %v6532_v26 = vld [vmem:[#allocation4 + $0x738] sm:$0xff] }
 0xfc1   :  { %6750 = vmatpush1.bf16.msra.mxu1 %v6477_v2  ;;  %6955 = vmatpush1.bf16.msra.mxu0 %v6479_v9  ;;  %v6529_v2 = vld [vmem:[#allocation4 + $0x720] sm:$0xff]  ;;  %v6531_v9 = vld [vmem:[#allocation4 + $0x730] sm:$0xff] }
 0xfc2   :  { %6751 = vmatprep.subr.bf16.mxu1 %v6482_v24  ;;  %6956 = vmatprep.subr.bf16.mxu0 %v6484_v62  ;;  %v6534_v24 = vld [vmem:[#allocation4 + $0x748] sm:$0xff]  ;;  %v6536_v62 = vld [vmem:[#allocation4 + $0x758] sm:$0xff] }
 0xfc5   :  { %6752 = vmatpush1.bf16.msra.mxu1 %v6481_v22  ;;  %6957 = vmatpush1.bf16.msra.mxu0 %v6483_v53  ;;  %v6533_v22 = vld [vmem:[#allocation4 + $0x740] sm:$0xff]  ;;  %v6535_v53 = vld [vmem:[#allocation4 + $0x750] sm:$0xff] }
 0xfc6   :  { %6753 = vmatprep.subr.bf16.mxu1 %v6486_v44  ;;  %6958 = vmatprep.subr.bf16.mxu0 %v6488_v61  ;;  %v6538_v44 = vld [vmem:[#allocation4 + $0x768] sm:$0xff]  ;;  %v6540_v61 = vld [vmem:[#allocation4 + $0x778] sm:$0xff] }
 0xfc9   :  { %6754 = vmatpush1.bf16.msra.mxu1 %v6485_v39  ;;  %6959 = vmatpush1.bf16.msra.mxu0 %v6487_v6  ;;  %v6537_v39 = vld [vmem:[#allocation4 + $0x760] sm:$0xff]  ;;  %v6539_v6 = vld [vmem:[#allocation4 + $0x770] sm:$0xff] }
 0xfca   :  { %6755 = vmatprep.subr.bf16.mxu1 %v6490_v25  ;;  %6960 = vmatprep.subr.bf16.mxu0 %v6492_v5  ;;  %v6542_v25 = vld [vmem:[#allocation4 + $0x788] sm:$0xff]  ;;  %v6544_v5 = vld [vmem:[#allocation4 + $0x798] sm:$0xff] }
 0xfcd   :  { %6756 = vmatpush1.bf16.msra.mxu1 %v6489_v50  ;;  %6961 = vmatpush1.bf16.msra.mxu0 %v6491_v13  ;;  %v6541_v50 = vld [vmem:[#allocation4 + $0x780] sm:$0xff]  ;;  %v6543_v13 = vld [vmem:[#allocation4 + $0x790] sm:$0xff] }
 0xfce   :  { %6766 = vmatprep.subr.bf16.mxu1 %v6494_v55  ;;  %6971 = vmatprep.subr.bf16.mxu0 %v6496_v10  ;;  %v6546_v55 = vld [vmem:[#allocation4 + $0x7a8] sm:$0xff]  ;;  %v6548_v10 = vld [vmem:[#allocation4 + $0x7b8] sm:$0xff] }
 0xfd0   :  { %6758 = vmatmul.mubr.bf16.vlgmr.msra.gmra.mrb[128].mxu1 %v6295_v29  ;;  %6963 = vmatmul.mubr.bf16.vlgmr.msra.gmra.mrb[100].mxu0 %v6295_v29  ;;  %v6545_v29 = vld [vmem:[#allocation4 + $0x7a0] sm:$0xff] }
 0xfd1   :  { %6767 = vmatpush1.bf16.msra.mxu1 %v6493_v57  ;;  %6972 = vmatpush1.bf16.msra.mxu0 %v6495_v30  ;;  %v6547_v57 = vld [vmem:[#allocation4 + $0x7b0] sm:$0xff]  ;;  %v6550_v30 = vld [vmem:[#allocation4 + $0x7c8] sm:$0xff] }
 0xfd2   :  { %6768 = vmatprep.subr.bf16.mxu1 %v6498_v20  ;;  %6973 = vmatprep.subr.bf16.mxu0 %v6500_v31  ;;  %v6552_v20 = vld [vmem:[#allocation4 + $0x7d8] sm:$0xff]  ;;  %v6549_v31 = vld [vmem:[#allocation4 + $0x7c0] sm:$0xff] }
 0xfd3   :  { %6798 = vmatprep.mubr.bf16.mxu1 %v6298_v46  ;;  %7003 = vmatprep.mubr.bf16.mxu0 %v6298_v46  ;;  %v6551_v46 = vld [vmem:[#allocation4 + $0x7d0] sm:$0xff] }
 0xfd5   :  { %6769 = vmatpush1.bf16.msra.mxu1 %v6497_v60  ;;  %6974 = vmatpush1.bf16.msra.mxu0 %v6499_v27  ;;  %v6554_v60 = vld [vmem:[#allocation4 + $0x7e8] sm:$0xff]  ;;  %v6556_v27 = vld [vmem:[#allocation4 + $0x7f8] sm:$0xff] }
 0xfd6   :  { %6770 = vmatprep.subr.bf16.mxu1 %v6502_v3  ;;  %6975 = vmatprep.subr.bf16.mxu0 %v6504_v54  ;;  %v6553_v3 = vld [vmem:[#allocation4 + $0x7e0] sm:$0xff]  ;;  %v6555_v54 = vld [vmem:[#allocation4 + $0x7f0] sm:$0xff] }
 0xfd9   :  { %6771 = vmatpush1.bf16.msra.mxu1 %v6501_v59  ;;  %6976 = vmatpush1.bf16.msra.mxu0 %v6503_v49  ;;  %v6558_v59 = vld [vmem:[#allocation4 + $0x808] sm:$0xff]  ;;  %v6560_v49 = vld [vmem:[#allocation4 + $0x818] sm:$0xff] }
 0xfda   :  { %6772 = vmatprep.subr.bf16.mxu1 %v6506_v40  ;;  %6977 = vmatprep.subr.bf16.mxu0 %v6508_v51  ;;  %v6297_v40 = vpack.c.bf16 %v6283_v32, %v6283_v32  ;;  %v6557_v51 = vld [vmem:[#allocation4 + $0x800] sm:$0xff]  ;;  %v6563_v32 = vld [vmem:[#allocation4 + $0x830] sm:$0xff] }
 0xfdd   :  { %6773 = vmatpush1.bf16.msra.mxu1 %v6505_v36  ;;  %6978 = vmatpush1.bf16.msra.mxu0 %v6507_v41  ;;  %v6559_v36 = vld [vmem:[#allocation4 + $0x810] sm:$0xff]  ;;  %v6562_v41 = vld [vmem:[#allocation4 + $0x828] sm:$0xff] }
 0xfde   :  { %6774 = vmatprep.subr.bf16.mxu1 %v6510_v58  ;;  %6979 = vmatprep.subr.bf16.mxu0 %v6512_v37  ;;  %v6564_v58 = vld [vmem:[#allocation4 + $0x838] sm:$0xff]  ;;  %v6300_v37 = vpack.c.bf16 %v6286_v11, %v6286_v11 }
 0xfdf   :  { %v6572_v11 = vld [vmem:[#allocation4 + $0x878] sm:$0xff] }
 0xfe1   :  { %6775 = vmatpush1.bf16.msra.mxu1 %v6509_v63  ;;  %6980 = vmatpush1.bf16.msra.mxu0 %v6511_v16  ;;  %v6566_v63 = vld [vmem:[#allocation4 + $0x848] sm:$0xff]  ;;  %v6568_v16 = vld [vmem:[#allocation4 + $0x858] sm:$0xff] }
 0xfe2   :  { %6776 = vmatprep.subr.bf16.mxu1 %v6514_v45  ;;  %6981 = vmatprep.subr.bf16.mxu0 %v6516_v43  ;;  %v6565_v45 = vld [vmem:[#allocation4 + $0x840] sm:$0xff]  ;;  %v6570_v43 = vld [vmem:[#allocation4 + $0x868] sm:$0xff] }
 0xfe5   :  { %6777 = vmatpush1.bf16.msra.mxu1 %v6513_v28  ;;  %6982 = vmatpush1.bf16.msra.mxu0 %v6515_v0  ;;  %v6569_v28 = vld [vmem:[#allocation4 + $0x860] sm:$0xff]  ;;  %v6571_v0 = vld [vmem:[#allocation4 + $0x870] sm:$0xff] }
 0xfe6   :  { %6778 = vmatprep.subr.bf16.mxu1 %v6518_v14  ;;  %6983 = vmatprep.subr.bf16.mxu0 %v6520_v47  ;;  %v6574_v14 = vld [vmem:[#allocation4 + $0x888] sm:$0xff]  ;;  %v6576_v47 = vld [vmem:[#allocation4 + $0x898] sm:$0xff] }
 0xfe9   :  { %6779 = vmatpush1.bf16.msra.mxu1 %v6517_v56  ;;  %6984 = vmatpush1.bf16.msra.mxu0 %v6519_v38  ;;  %v6573_v56 = vld [vmem:[#allocation4 + $0x880] sm:$0xff]  ;;  %v6575_v38 = vld [vmem:[#allocation4 + $0x890] sm:$0xff] }
 0xfea   :  { %6780 = vmatprep.subr.bf16.mxu1 %v6522_v23  ;;  %6985 = vmatprep.subr.bf16.mxu0 %v6524_v35  ;;  %v6578_v23 = vld [vmem:[#allocation4 + $0x8a8] sm:$0xff]  ;;  %v6580_v35 = vld [vmem:[#allocation4 + $0x8b8] sm:$0xff] }
 0xfed   :  { %6781 = vmatpush1.bf16.msra.mxu1 %v6521_v12  ;;  %6986 = vmatpush1.bf16.msra.mxu0 %v6523_v1  ;;  %v6577_v12 = vld [vmem:[#allocation4 + $0x8a0] sm:$0xff]  ;;  %v6579_v1 = vld [vmem:[#allocation4 + $0x8b0] sm:$0xff] }
 0xfee   :  { %6782 = vmatprep.subr.bf16.mxu1 %v6526_v34  ;;  %6987 = vmatprep.subr.bf16.mxu0 %v6528_v42  ;;  %v6582_v34 = vld [vmem:[#allocation4 + $0x8c8] sm:$0xff]  ;;  %v6584_v42 = vld [vmem:[#allocation4 + $0x8d8] sm:$0xff] }
 0xff1   :  { %6783 = vmatpush1.bf16.msra.mxu1 %v6525_v4  ;;  %6988 = vmatpush1.bf16.msra.mxu0 %v6527_v15  ;;  %v6581_v4 = vld [vmem:[#allocation4 + $0x8c0] sm:$0xff]  ;;  %v6583_v15 = vld [vmem:[#allocation4 + $0x8d0] sm:$0xff] }
 0xff2   :  { %6784 = vmatprep.subr.bf16.mxu1 %v6530_v48  ;;  %6989 = vmatprep.subr.bf16.mxu0 %v6532_v26  ;;  %v6586_v48 = vld [vmem:[#allocation4 + $0x8e8] sm:$0xff]  ;;  %v6588_v26 = vld [vmem:[#allocation4 + $0x8f8] sm:$0xff] }
 0xff5   :  { %6785 = vmatpush1.bf16.msra.mxu1 %v6529_v2  ;;  %6990 = vmatpush1.bf16.msra.mxu0 %v6531_v9  ;;  %v6585_v2 = vld [vmem:[#allocation4 + $0x8e0] sm:$0xff]  ;;  %v6587_v9 = vld [vmem:[#allocation4 + $0x8f0] sm:$0xff] }
 0xff6   :  { %6786 = vmatprep.subr.bf16.mxu1 %v6534_v24  ;;  %6991 = vmatprep.subr.bf16.mxu0 %v6536_v62  ;;  %v6590_v24 = vld [vmem:[#allocation4 + $0x908] sm:$0xff]  ;;  %v6592_v62 = vld [vmem:[#allocation4 + $0x918] sm:$0xff] }
 0xff9   :  { %6787 = vmatpush1.bf16.msra.mxu1 %v6533_v22  ;;  %6992 = vmatpush1.bf16.msra.mxu0 %v6535_v53  ;;  %v6589_v22 = vld [vmem:[#allocation4 + $0x900] sm:$0xff]  ;;  %v6591_v53 = vld [vmem:[#allocation4 + $0x910] sm:$0xff] }
 0xffa   :  { %6788 = vmatprep.subr.bf16.mxu1 %v6538_v44  ;;  %6993 = vmatprep.subr.bf16.mxu0 %v6540_v61  ;;  %v6594_v44 = vld [vmem:[#allocation4 + $0x928] sm:$0xff]  ;;  %v6596_v61 = vld [vmem:[#allocation4 + $0x938] sm:$0xff] }
 0xffd   :  { %6789 = vmatpush1.bf16.msra.mxu1 %v6537_v39  ;;  %6994 = vmatpush1.bf16.msra.mxu0 %v6539_v6  ;;  %v6593_v39 = vld [vmem:[#allocation4 + $0x920] sm:$0xff]  ;;  %v6595_v6 = vld [vmem:[#allocation4 + $0x930] sm:$0xff] }
 0xffe   :  { %6790 = vmatprep.subr.bf16.mxu1 %v6542_v25  ;;  %6995 = vmatprep.subr.bf16.mxu0 %v6544_v5  ;;  %v6598_v25 = vld [vmem:[#allocation4 + $0x948] sm:$0xff]  ;;  %v6600_v5 = vld [vmem:[#allocation4 + $0x958] sm:$0xff] }
0x1001   :  { %6791 = vmatpush1.bf16.msra.mxu1 %v6541_v50  ;;  %6996 = vmatpush1.bf16.msra.mxu0 %v6543_v13  ;;  %v6597_v50 = vld [vmem:[#allocation4 + $0x940] sm:$0xff]  ;;  %v6599_v13 = vld [vmem:[#allocation4 + $0x950] sm:$0xff] }
0x1002   :  { %6792 = vmatprep.subr.bf16.mxu1 %v6546_v55  ;;  %6997 = vmatprep.subr.bf16.mxu0 %v6548_v10  ;;  %v6602_v55 = vld [vmem:[#allocation4 + $0x968] sm:$0xff]  ;;  %v6604_v10 = vld [vmem:[#allocation4 + $0x978] sm:$0xff] }
0x1005   :  { %6793 = vmatpush1.bf16.msra.mxu1 %v6545_v29  ;;  %6998 = vmatpush1.bf16.msra.mxu0 %v6547_v57  ;;  %v6601_v29 = vld [vmem:[#allocation4 + $0x960] sm:$0xff]  ;;  %v6603_v57 = vld [vmem:[#allocation4 + $0x970] sm:$0xff] }
0x1006   :  { %6794 = vmatprep.subr.bf16.mxu1 %v6550_v30  ;;  %6999 = vmatprep.subr.bf16.mxu0 %v6552_v20  ;;  %v6606_v30 = vld [vmem:[#allocation4 + $0x988] sm:$0xff]  ;;  %v6608_v20 = vld [vmem:[#allocation4 + $0x998] sm:$0xff] }
0x1009   :  { %6795 = vmatpush1.bf16.msra.mxu1 %v6549_v31  ;;  %7000 = vmatpush1.bf16.msra.mxu0 %v6551_v46  ;;  %v6605_v31 = vld [vmem:[#allocation4 + $0x980] sm:$0xff]  ;;  %v6607_v46 = vld [vmem:[#allocation4 + $0x990] sm:$0xff] }
0x100a   :  { %6796 = vmatprep.subr.bf16.mxu1 %v6554_v60  ;;  %7001 = vmatprep.subr.bf16.mxu0 %v6556_v27  ;;  %v6610_v60 = vld [vmem:[#allocation4 + $0x9a8] sm:$0xff]  ;;  %v6612_v27 = vld [vmem:[#allocation4 + $0x9b8] sm:$0xff] }
0x100d   :  { %6797 = vmatpush1.bf16.msra.mxu1 %v6553_v3  ;;  %7002 = vmatpush1.bf16.msra.mxu0 %v6555_v54  ;;  %v6609_v3 = vld [vmem:[#allocation4 + $0x9a0] sm:$0xff]  ;;  %v6611_v54 = vld [vmem:[#allocation4 + $0x9b0] sm:$0xff] }
0x100e   :  { %6807 = vmatprep.subr.bf16.mxu1 %v6558_v59  ;;  %7012 = vmatprep.subr.bf16.mxu0 %v6560_v49  ;;  %v6614_v59 = vld [vmem:[#allocation4 + $0x9c8] sm:$0xff]  ;;  %v6616_v49 = vld [vmem:[#allocation4 + $0x9d8] sm:$0xff] }
0x1010   :  { %6799 = vmatmul.mubr.bf16.vlgmr.msra.gmra.mrb[128].mxu1 %v6297_v40  ;;  %7004 = vmatmul.mubr.bf16.vlgmr.msra.gmra.mrb[100].mxu0 %v6297_v40  ;;  %v6613_v40 = vld [vmem:[#allocation4 + $0x9c0] sm:$0xff] }
0x1011   :  { %6808 = vmatpush1.bf16.msra.mxu1 %v6557_v51  ;;  %7013 = vmatpush1.bf16.msra.mxu0 %v6559_v36  ;;  %v6615_v51 = vld [vmem:[#allocation4 + $0x9d0] sm:$0xff]  ;;  %v6618_v36 = vld [vmem:[#allocation4 + $0x9e8] sm:$0xff] }
0x1012   :  { %6809 = vmatprep.subr.bf16.mxu1 %v6562_v41  ;;  %7014 = vmatprep.subr.bf16.mxu0 %v6564_v58  ;;  %v6620_v41 = vld [vmem:[#allocation4 + $0x9f8] sm:$0xff]  ;;  %v6617_v58 = vld [vmem:[#allocation4 + $0x9e0] sm:$0xff] }
0x1013   :  { %6839 = vmatprep.mubr.bf16.mxu1 %v6300_v37  ;;  %7044 = vmatprep.mubr.bf16.mxu0 %v6300_v37  ;;  %v6619_v37 = vld [vmem:[#allocation4 + $0x9f0] sm:$0xff] }
0x1015   :  { %6810 = vmatpush1.bf16.msra.mxu1 %v6561_v21  ;;  %7015 = vmatpush1.bf16.msra.mxu0 %v6563_v32  ;;  %v6299_v21 = vpack.c.bf16 %v6285_v33, %v6285_v33  ;;  %v6621_v32 = vld [vmem:[#allocation28] sm:$0xf] }
0x1016   :  { %6811 = vmatprep.subr.bf16.mxu1 %v6566_v63  ;;  %7016 = vmatprep.subr.bf16.mxu0 %v6568_v16  ;;  %v6626_v63 = vrot.slane %v6621_v32, %v9331_v8  ;;  %v6634_v16 = vrot.slane %v6621_v32, %v9334_v52 }
0x1019   :  { %6812 = vmatpush1.bf16.msra.mxu1 %v6565_v45  ;;  %7017 = vmatpush1.bf16.msra.mxu0 %v6567_v19  ;;  %v6630_v45 = vrot.slane %v6621_v32, %v9339_v18  ;;  %v6638_v19 = vrot.slane %v6621_v32, %v9342_v17 }
0x101a   :  { %6813 = vmatprep.subr.bf16.mxu1 %v6570_v43  ;;  %7018 = vmatprep.subr.bf16.mxu0 %v6572_v11 }
0x101d   :  { %6814 = vmatpush1.bf16.msra.mxu1 %v6569_v28  ;;  %7019 = vmatpush1.bf16.msra.mxu0 %v6571_v0 }
0x101e   :  { %6815 = vmatprep.subr.bf16.mxu1 %v6574_v14  ;;  %7020 = vmatprep.subr.bf16.mxu0 %v6576_v47 }
0x1021   :  { %6816 = vmatpush1.bf16.msra.mxu1 %v6573_v56  ;;  %7021 = vmatpush1.bf16.msra.mxu0 %v6575_v38 }
0x1022   :  { %6817 = vmatprep.subr.bf16.mxu1 %v6578_v23  ;;  %7022 = vmatprep.subr.bf16.mxu0 %v6580_v35 }
0x1025   :  { %6818 = vmatpush1.bf16.msra.mxu1 %v6577_v12  ;;  %7023 = vmatpush1.bf16.msra.mxu0 %v6579_v1 }
0x1026   :  { %6819 = vmatprep.subr.bf16.mxu1 %v6582_v34  ;;  %7024 = vmatprep.subr.bf16.mxu0 %v6584_v42 }
0x1029   :  { %6820 = vmatpush1.bf16.msra.mxu1 %v6581_v4  ;;  %7025 = vmatpush1.bf16.msra.mxu0 %v6583_v15 }
0x102a   :  { %6821 = vmatprep.subr.bf16.mxu1 %v6586_v48  ;;  %7026 = vmatprep.subr.bf16.mxu0 %v6588_v26 }
0x102d   :  { %6822 = vmatpush1.bf16.msra.mxu1 %v6585_v2  ;;  %7027 = vmatpush1.bf16.msra.mxu0 %v6587_v9 }
0x102e   :  { %6823 = vmatprep.subr.bf16.mxu1 %v6590_v24  ;;  %7028 = vmatprep.subr.bf16.mxu0 %v6592_v62 }
0x1031   :  { %6824 = vmatpush1.bf16.msra.mxu1 %v6589_v22  ;;  %7029 = vmatpush1.bf16.msra.mxu0 %v6591_v53 }
0x1032   :  { %6825 = vmatprep.subr.bf16.mxu1 %v6594_v44  ;;  %7030 = vmatprep.subr.bf16.mxu0 %v6596_v61 }
0x1035   :  { %6826 = vmatpush1.bf16.msra.mxu1 %v6593_v39  ;;  %7031 = vmatpush1.bf16.msra.mxu0 %v6595_v6 }
0x1036   :  { %6827 = vmatprep.subr.bf16.mxu1 %v6598_v25  ;;  %7032 = vmatprep.subr.bf16.mxu0 %v6600_v5 }
0x1039   :  { %6828 = vmatpush1.bf16.msra.mxu1 %v6597_v50  ;;  %7033 = vmatpush1.bf16.msra.mxu0 %v6599_v13 }
0x103a   :  { %6829 = vmatprep.subr.bf16.mxu1 %v6602_v55  ;;  %7034 = vmatprep.subr.bf16.mxu0 %v6604_v10 }
0x103d   :  { %6830 = vmatpush1.bf16.msra.mxu1 %v6601_v29  ;;  %7035 = vmatpush1.bf16.msra.mxu0 %v6603_v57 }
0x103e   :  { %6831 = vmatprep.subr.bf16.mxu1 %v6606_v30  ;;  %7036 = vmatprep.subr.bf16.mxu0 %v6608_v20 }
0x1041   :  { %6832 = vmatpush1.bf16.msra.mxu1 %v6605_v31  ;;  %7037 = vmatpush1.bf16.msra.mxu0 %v6607_v46 }
0x1042   :  { %6833 = vmatprep.subr.bf16.mxu1 %v6610_v60  ;;  %7038 = vmatprep.subr.bf16.mxu0 %v6612_v27 }
0x1045   :  { %6834 = vmatpush1.bf16.msra.mxu1 %v6609_v3  ;;  %7039 = vmatpush1.bf16.msra.mxu0 %v6611_v54 }
0x1046   :  { %6835 = vmatprep.subr.bf16.mxu1 %v6614_v59  ;;  %7040 = vmatprep.subr.bf16.mxu0 %v6616_v49 }
0x1049   :  { %6836 = vmatpush1.bf16.msra.mxu1 %v6613_v40  ;;  %7041 = vmatpush1.bf16.msra.mxu0 %v6615_v51 }
0x104a   :  { %6837 = vmatprep.subr.bf16.mxu1 %v6618_v36  ;;  %7042 = vmatprep.subr.bf16.mxu0 %v6620_v41 }
0x104d   :  { %6838 = vmatpush1.bf16.msra.mxu1 %v6617_v58  ;;  %7043 = vmatpush1.bf16.msra.mxu0 %v6619_v37 }
0x1050   :  { %6840 = vmatmul.mubr.bf16.vlgmr.msra.gmra.mrb[128].mxu1 %v6299_v21  ;;  %7045 = vmatmul.mubr.bf16.vlgmr.msra.gmra.mrb[100].mxu0 %v6299_v21 }
0x1123   :  { %v6841_v43 = vpop.f32.mrb[128].mxu1  ;;  %v7046_v11 = vpop.f32.mrb[100].mxu0 }
0x1124   :  { %v9836_v28 = vadd.f32 %v6841_v43, %v6626_v63  ;;  %v9838_v7 = vadd.f32 %v7046_v11, %v6634_v16  ;;  %v6843_v33 = vpop.f32.mrb[129].mxu1  ;;  %v7048_v0 = vpop.f32.mrb[101].mxu0 }
0x1125   :  { %v7979_v14 = vadd.f32 %v6843_v33, %v6630_v45  ;;  %v9840_v47 = vadd.f32 %v7048_v0, %v6638_v19  ;;  %v6845_v56 = vpop.f32.mrb[130].mxu1  ;;  %v7050_v38 = vpop.f32.mrb[102].mxu0 }
0x1126   :  { %v7053_v23 = vmax.f32 %v9836_v28, 0.0  ;;  %v7055_v35 = vmax.f32 %v9838_v7, 0.0  ;;  %v6846_v12 = vpop.f32.mrb[131].mxu1  ;;  %v7051_v1 = vpop.f32.mrb[103].mxu0 }
0x1127   :  { %v7054_v34 = vmax.f32 %v7979_v14, 0.0  ;;  %v7056_v42 = vmax.f32 %v9840_v47, 0.0 }
0x1128   :  { %8661 = dma.done.wait [#allocation8 + $0x3], 16384 }
0x1129   :  { %8662 = vsyncadd [#allocation8 + $0x3], 4294950912  ;;  %v9845_v4 = vpack.c.bf16 %v7054_v34, %v7054_v34  ;;  %v7066_v15 = vld [vmem:[#allocation5 + $0x8] sm:$0xff]  ;;  %v7065_v48 = vld [vmem:[#allocation5] sm:$0xff]  ;;  %v9851_v36 = vpack.c.bf16 %v7053_v23, %v7053_v23  ;;  %v9856_v41 = vpack.c.bf16 %v7056_v42, %v7056_v42 }
0x112a   :  { %v7070_v26 = vld [vmem:[#allocation5 + $0x28] sm:$0xff]  ;;  %7215 = vmatprep.subr.bf16.mxu1 %v7066_v15  ;;  %v7069_v2 = vld [vmem:[#allocation5 + $0x20] sm:$0xff]  ;;  %v7079_v7 = vld [vmem:[#allocation5 + $0x70] sm:$0xff] }
0x112b   :  { %7247 = vmatprep.mubr.bf16.mxu1 %v9845_v4  ;;  %7216 = vmatpush1.bf16.msra.mxu1 %v7065_v48  ;;  %v7074_v9 = vld [vmem:[#allocation5 + $0x48] sm:$0xff]  ;;  %v7073_v24 = vld [vmem:[#allocation5 + $0x40] sm:$0xff] }
0x112c   :  { %7217 = vmatprep.subr.bf16.mxu1 %v7070_v26  ;;  %v7078_v62 = vld [vmem:[#allocation5 + $0x68] sm:$0xff]  ;;  %v7077_v22 = vld [vmem:[#allocation5 + $0x60] sm:$0xff] }
0x112d   :  { %v7082_v53 = vld [vmem:[#allocation5 + $0x88] sm:$0xff]  ;;  %v7081_v44 = vld [vmem:[#allocation5 + $0x80] sm:$0xff] }
0x112e   :  { %v7086_v61 = vld [vmem:[#allocation5 + $0xa8] sm:$0xff]  ;;  %v7085_v39 = vld [vmem:[#allocation5 + $0xa0] sm:$0xff] }
0x112f   :  { %7218 = vmatpush1.bf16.msra.mxu1 %v7069_v2  ;;  %v7090_v6 = vld [vmem:[#allocation5 + $0xc8] sm:$0xff]  ;;  %v7089_v25 = vld [vmem:[#allocation5 + $0xc0] sm:$0xff] }
0x1130   :  { %7219 = vmatprep.subr.bf16.mxu1 %v7074_v9  ;;  %v7094_v5 = vld [vmem:[#allocation5 + $0xe8] sm:$0xff]  ;;  %v7093_v50 = vld [vmem:[#allocation5 + $0xe0] sm:$0xff] }
0x1131   :  { %v7098_v13 = vld [vmem:[#allocation5 + $0x108] sm:$0xff]  ;;  %v7097_v55 = vld [vmem:[#allocation5 + $0x100] sm:$0xff] }
0x1132   :  { %v7102_v10 = vld [vmem:[#allocation5 + $0x128] sm:$0xff]  ;;  %v7101_v29 = vld [vmem:[#allocation5 + $0x120] sm:$0xff] }
0x1133   :  { %7220 = vmatpush1.bf16.msra.mxu1 %v7073_v24  ;;  %v7106_v57 = vld [vmem:[#allocation5 + $0x148] sm:$0xff]  ;;  %v7105_v30 = vld [vmem:[#allocation5 + $0x140] sm:$0xff] }
0x1134   :  { %7221 = vmatprep.subr.bf16.mxu1 %v7078_v62  ;;  %v7110_v20 = vld [vmem:[#allocation5 + $0x168] sm:$0xff]  ;;  %v7109_v31 = vld [vmem:[#allocation5 + $0x160] sm:$0xff] }
0x1135   :  { %v7114_v46 = vld [vmem:[#allocation5 + $0x188] sm:$0xff]  ;;  %v7113_v60 = vld [vmem:[#allocation5 + $0x180] sm:$0xff] }
0x1136   :  { %v7118_v27 = vld [vmem:[#allocation5 + $0x1a8] sm:$0xff]  ;;  %v7117_v3 = vld [vmem:[#allocation5 + $0x1a0] sm:$0xff] }
0x1137   :  { %7222 = vmatpush1.bf16.msra.mxu1 %v7077_v22  ;;  %v7122_v54 = vld [vmem:[#allocation5 + $0x1c8] sm:$0xff]  ;;  %v7121_v59 = vld [vmem:[#allocation5 + $0x1c0] sm:$0xff] }
0x1138   :  { %7223 = vmatprep.subr.bf16.mxu1 %v7082_v53  ;;  %v7126_v49 = vld [vmem:[#allocation5 + $0x1e8] sm:$0xff]  ;;  %v7125_v40 = vld [vmem:[#allocation5 + $0x1e0] sm:$0xff] }
0x1139   :  { %v7130_v51 = vld [vmem:[#allocation5 + $0x208] sm:$0xff]  ;;  %v7129_v58 = vld [vmem:[#allocation5 + $0x200] sm:$0xff] }
0x113a   :  { %v7134_v37 = vld [vmem:[#allocation5 + $0x228] sm:$0xff]  ;;  %v7133_v21 = vld [vmem:[#allocation5 + $0x220] sm:$0xff] }
0x113b   :  { %7224 = vmatpush1.bf16.msra.mxu1 %v7081_v44  ;;  %v7138_v32 = vld [vmem:[#allocation5 + $0x248] sm:$0xff]  ;;  %v7137_v63 = vld [vmem:[#allocation5 + $0x240] sm:$0xff]  ;;  %v7068_v44 = vld [vmem:[#allocation5 + $0x18] sm:$0xff] }
0x113c   :  { %7225 = vmatprep.subr.bf16.mxu1 %v7086_v61  ;;  %v7142_v16 = vld [vmem:[#allocation5 + $0x268] sm:$0xff]  ;;  %v7141_v45 = vld [vmem:[#allocation5 + $0x260] sm:$0xff]  ;;  %v9863_v61 = vpack.c.bf16 %v7055_v35, %v7055_v35  ;;  %v7084_v35 = vld [vmem:[#allocation5 + $0x98] sm:$0xff] }
0x113d   :  { %v7146_v19 = vld [vmem:[#allocation5 + $0x288] sm:$0xff]  ;;  %v7145_v43 = vld [vmem:[#allocation5 + $0x280] sm:$0xff] }
0x113e   :  { %v7150_v11 = vld [vmem:[#allocation5 + $0x2a8] sm:$0xff]  ;;  %v7149_v28 = vld [vmem:[#allocation5 + $0x2a0] sm:$0xff] }
0x113f   :  { %7226 = vmatpush1.bf16.msra.mxu1 %v7085_v39  ;;  %v7154_v33 = vld [vmem:[#allocation5 + $0x2c8] sm:$0xff]  ;;  %v7153_v0 = vld [vmem:[#allocation5 + $0x2c0] sm:$0xff]  ;;  %v7067_v39 = vld [vmem:[#allocation5 + $0x10] sm:$0xff] }
0x1140   :  { %7227 = vmatprep.subr.bf16.mxu1 %v7090_v6  ;;  %v7158_v14 = vld [vmem:[#allocation5 + $0x2e8] sm:$0xff]  ;;  %v7157_v47 = vld [vmem:[#allocation5 + $0x2e0] sm:$0xff]  ;;  %v7072_v6 = vld [vmem:[#allocation5 + $0x38] sm:$0xff] }
0x1141   :  { %v7162_v56 = vld [vmem:[#allocation5 + $0x308] sm:$0xff]  ;;  %v7161_v38 = vld [vmem:[#allocation5 + $0x300] sm:$0xff] }
0x1142   :  { %v7166_v23 = vld [vmem:[#allocation5 + $0x328] sm:$0xff]  ;;  %v7165_v12 = vld [vmem:[#allocation5 + $0x320] sm:$0xff] }
0x1143   :  { %7228 = vmatpush1.bf16.msra.mxu1 %v7089_v25  ;;  %v7170_v1 = vld [vmem:[#allocation5 + $0x348] sm:$0xff]  ;;  %v7169_v34 = vld [vmem:[#allocation5 + $0x340] sm:$0xff]  ;;  %v7071_v25 = vld [vmem:[#allocation5 + $0x30] sm:$0xff] }
0x1144   :  { %7229 = vmatprep.subr.bf16.mxu1 %v7094_v5  ;;  %v7174_v42 = vld [vmem:[#allocation5 + $0x368] sm:$0xff]  ;;  %v7173_v15 = vld [vmem:[#allocation5 + $0x360] sm:$0xff]  ;;  %v7076_v5 = vld [vmem:[#allocation5 + $0x58] sm:$0xff] }
0x1145   :  { %v7178_v48 = vld [vmem:[#allocation5 + $0x388] sm:$0xff]  ;;  %v7177_v26 = vld [vmem:[#allocation5 + $0x380] sm:$0xff] }
0x1146   :  { %v7182_v2 = vld [vmem:[#allocation5 + $0x3a8] sm:$0xff]  ;;  %v7181_v9 = vld [vmem:[#allocation5 + $0x3a0] sm:$0xff] }
0x1147   :  { %7230 = vmatpush1.bf16.msra.mxu1 %v7093_v50  ;;  %v7186_v24 = vld [vmem:[#allocation5 + $0x3c8] sm:$0xff]  ;;  %v7185_v62 = vld [vmem:[#allocation5 + $0x3c0] sm:$0xff]  ;;  %v7075_v50 = vld [vmem:[#allocation5 + $0x50] sm:$0xff] }
0x1148   :  { %7231 = vmatprep.subr.bf16.mxu1 %v7098_v13  ;;  %v7190_v22 = vld [vmem:[#allocation5 + $0x3e8] sm:$0xff]  ;;  %v7189_v53 = vld [vmem:[#allocation5 + $0x3e0] sm:$0xff]  ;;  %v7080_v13 = vld [vmem:[#allocation5 + $0x78] sm:$0xff] }
0x114b   :  { %7232 = vmatpush1.bf16.msra.mxu1 %v7097_v55  ;;  %v7083_v55 = vld [vmem:[#allocation5 + $0x90] sm:$0xff] }
0x114c   :  { %7233 = vmatprep.subr.bf16.mxu1 %v7102_v10  ;;  %v7088_v10 = vld [vmem:[#allocation5 + $0xb8] sm:$0xff] }
0x114f   :  { %7234 = vmatpush1.bf16.msra.mxu1 %v7101_v29  ;;  %v7087_v29 = vld [vmem:[#allocation5 + $0xb0] sm:$0xff] }
0x1150   :  { %7235 = vmatprep.subr.bf16.mxu1 %v7106_v57  ;;  %v7092_v57 = vld [vmem:[#allocation5 + $0xd8] sm:$0xff] }
0x1153   :  { %7236 = vmatpush1.bf16.msra.mxu1 %v7105_v30  ;;  %v7096_v30 = vld [vmem:[#allocation5 + $0xf8] sm:$0xff] }
0x1154   :  { %7237 = vmatprep.subr.bf16.mxu1 %v7110_v20  ;;  %v7095_v20 = vld [vmem:[#allocation5 + $0xf0] sm:$0xff] }
0x1157   :  { %7238 = vmatpush1.bf16.msra.mxu1 %v7109_v31  ;;  %v7100_v31 = vld [vmem:[#allocation5 + $0x118] sm:$0xff] }
0x1158   :  { %7239 = vmatprep.subr.bf16.mxu1 %v7114_v46  ;;  %v7099_v46 = vld [vmem:[#allocation5 + $0x110] sm:$0xff] }
0x115b   :  { %7240 = vmatpush1.bf16.msra.mxu1 %v7113_v60  ;;  %v7104_v60 = vld [vmem:[#allocation5 + $0x138] sm:$0xff] }
0x115c   :  { %7241 = vmatprep.subr.bf16.mxu1 %v7118_v27  ;;  %v7103_v27 = vld [vmem:[#allocation5 + $0x130] sm:$0xff] }
0x115f   :  { %7242 = vmatpush1.bf16.msra.mxu1 %v7117_v3  ;;  %v7108_v3 = vld [vmem:[#allocation5 + $0x158] sm:$0xff] }
0x1160   :  { %7243 = vmatprep.subr.bf16.mxu1 %v7122_v54  ;;  %v7107_v54 = vld [vmem:[#allocation5 + $0x150] sm:$0xff] }
0x1163   :  { %7244 = vmatpush1.bf16.msra.mxu1 %v7121_v59  ;;  %v7112_v59 = vld [vmem:[#allocation5 + $0x178] sm:$0xff] }
0x1164   :  { %7245 = vmatprep.subr.bf16.mxu1 %v7126_v49  ;;  %v7111_v49 = vld [vmem:[#allocation5 + $0x170] sm:$0xff] }
0x1167   :  { %7246 = vmatpush1.bf16.msra.mxu1 %v7125_v40  ;;  %v7116_v40 = vld [vmem:[#allocation5 + $0x198] sm:$0xff] }
0x1168   :  { %7256 = vmatprep.subr.bf16.mxu1 %v7130_v51  ;;  %v7115_v51 = vld [vmem:[#allocation5 + $0x190] sm:$0xff] }
0x116a   :  { %7248 = vmatmul.mubr.bf16.vlgmr.msra.gmra.mrb[132].mxu1 %v9851_v36 }
0x116b   :  { %7257 = vmatpush1.bf16.msra.mxu1 %v7129_v58  ;;  %7288 = vmatprep.mubr.bf16.mxu1 %v9856_v41  ;;  %v7120_v58 = vld [vmem:[#allocation5 + $0x1b8] sm:$0xff] }
0x116c   :  { %7258 = vmatprep.subr.bf16.mxu1 %v7134_v37  ;;  %v7119_v37 = vld [vmem:[#allocation5 + $0x1b0] sm:$0xff] }
0x116f   :  { %7259 = vmatpush1.bf16.msra.mxu1 %v7133_v21  ;;  %v7124_v21 = vld [vmem:[#allocation5 + $0x1d8] sm:$0xff] }
0x1170   :  { %7260 = vmatprep.subr.bf16.mxu1 %v7138_v32  ;;  %v7123_v32 = vld [vmem:[#allocation5 + $0x1d0] sm:$0xff] }
0x1173   :  { %7261 = vmatpush1.bf16.msra.mxu1 %v7137_v63  ;;  %v7128_v63 = vld [vmem:[#allocation5 + $0x1f8] sm:$0xff] }
0x1174   :  { %7262 = vmatprep.subr.bf16.mxu1 %v7142_v16  ;;  %v7127_v16 = vld [vmem:[#allocation5 + $0x1f0] sm:$0xff] }
0x1177   :  { %7263 = vmatpush1.bf16.msra.mxu1 %v7141_v45  ;;  %v7132_v45 = vld [vmem:[#allocation5 + $0x218] sm:$0xff] }
0x1178   :  { %7264 = vmatprep.subr.bf16.mxu1 %v7146_v19  ;;  %v7131_v19 = vld [vmem:[#allocation5 + $0x210] sm:$0xff] }
0x117b   :  { %7265 = vmatpush1.bf16.msra.mxu1 %v7145_v43  ;;  %v7136_v43 = vld [vmem:[#allocation5 + $0x238] sm:$0xff] }
0x117c   :  { %7266 = vmatprep.subr.bf16.mxu1 %v7150_v11  ;;  %v7135_v11 = vld [vmem:[#allocation5 + $0x230] sm:$0xff] }
0x117f   :  { %7267 = vmatpush1.bf16.msra.mxu1 %v7149_v28  ;;  %v7140_v28 = vld [vmem:[#allocation5 + $0x258] sm:$0xff] }
0x1180   :  { %7268 = vmatprep.subr.bf16.mxu1 %v7154_v33  ;;  %v7139_v33 = vld [vmem:[#allocation5 + $0x250] sm:$0xff] }
0x1183   :  { %7269 = vmatpush1.bf16.msra.mxu1 %v7153_v0  ;;  %v7144_v0 = vld [vmem:[#allocation5 + $0x278] sm:$0xff] }
0x1184   :  { %7270 = vmatprep.subr.bf16.mxu1 %v7158_v14  ;;  %v7143_v14 = vld [vmem:[#allocation5 + $0x270] sm:$0xff] }
0x1187   :  { %7271 = vmatpush1.bf16.msra.mxu1 %v7157_v47  ;;  %v7148_v47 = vld [vmem:[#allocation5 + $0x298] sm:$0xff] }
0x1188   :  { %7272 = vmatprep.subr.bf16.mxu1 %v7162_v56  ;;  %v7147_v56 = vld [vmem:[#allocation5 + $0x290] sm:$0xff] }
0x118b   :  { %7273 = vmatpush1.bf16.msra.mxu1 %v7161_v38  ;;  %v7152_v38 = vld [vmem:[#allocation5 + $0x2b8] sm:$0xff] }
0x118c   :  { %7274 = vmatprep.subr.bf16.mxu1 %v7166_v23  ;;  %v7156_v23 = vld [vmem:[#allocation5 + $0x2d8] sm:$0xff] }
0x118f   :  { %7275 = vmatpush1.bf16.msra.mxu1 %v7165_v12  ;;  %v7160_v12 = vld [vmem:[#allocation5 + $0x2f8] sm:$0xff] }
0x1190   :  { %7276 = vmatprep.subr.bf16.mxu1 %v7170_v1  ;;  %v7159_v1 = vld [vmem:[#allocation5 + $0x2f0] sm:$0xff] }
0x1193   :  { %7277 = vmatpush1.bf16.msra.mxu1 %v7169_v34  ;;  %v7164_v34 = vld [vmem:[#allocation5 + $0x318] sm:$0xff] }
0x1194   :  { %7278 = vmatprep.subr.bf16.mxu1 %v7174_v42  ;;  %v7163_v42 = vld [vmem:[#allocation5 + $0x310] sm:$0xff] }
0x1197   :  { %7279 = vmatpush1.bf16.msra.mxu1 %v7173_v15  ;;  %v7168_v15 = vld [vmem:[#allocation5 + $0x338] sm:$0xff] }
0x1198   :  { %7280 = vmatprep.subr.bf16.mxu1 %v7178_v48  ;;  %v7167_v48 = vld [vmem:[#allocation5 + $0x330] sm:$0xff] }
0x119b   :  { %7281 = vmatpush1.bf16.msra.mxu1 %v7177_v26  ;;  %v7172_v26 = vld [vmem:[#allocation5 + $0x358] sm:$0xff] }
0x119c   :  { %7282 = vmatprep.subr.bf16.mxu1 %v7182_v2  ;;  %v7171_v2 = vld [vmem:[#allocation5 + $0x350] sm:$0xff] }
0x119f   :  { %7283 = vmatpush1.bf16.msra.mxu1 %v7181_v9  ;;  %v7176_v9 = vld [vmem:[#allocation5 + $0x378] sm:$0xff] }
0x11a0   :  { %7284 = vmatprep.subr.bf16.mxu1 %v7186_v24  ;;  %v7175_v24 = vld [vmem:[#allocation5 + $0x370] sm:$0xff] }
0x11a3   :  { %7285 = vmatpush1.bf16.msra.mxu1 %v7185_v62  ;;  %v7180_v62 = vld [vmem:[#allocation5 + $0x398] sm:$0xff] }
0x11a4   :  { %7286 = vmatprep.subr.bf16.mxu1 %v7190_v22  ;;  %v7179_v22 = vld [vmem:[#allocation5 + $0x390] sm:$0xff] }
0x11a7   :  { %7287 = vmatpush1.bf16.msra.mxu1 %v7189_v53  ;;  %v7184_v53 = vld [vmem:[#allocation5 + $0x3b8] sm:$0xff] }
0x11a8   :  { %7297 = vmatprep.subr.bf16.mxu1 %v7068_v44  ;;  %v7183_v44 = vld [vmem:[#allocation5 + $0x3b0] sm:$0xff] }
0x11aa   :  { %7289 = vmatmul.mubr.bf16.vlgmr.msra.gmra.mrb[132].mxu1 %v9863_v61 }
0x11ab   :  { %7298 = vmatpush1.bf16.msra.mxu1 %v7067_v39  ;;  %7329 = vmatprep.mubr.bf16.mxu1 %v9845_v4  ;;  %v7091_v4 = vld [vmem:[#allocation5 + $0xd0] sm:$0xff]  ;;  %v7188_v39 = vld [vmem:[#allocation5 + $0x3d8] sm:$0xff] }
0x11ac   :  { %7299 = vmatprep.subr.bf16.mxu1 %v7072_v6  ;;  %v7187_v6 = vld [vmem:[#allocation5 + $0x3d0] sm:$0xff] }
0x11af   :  { %7300 = vmatpush1.bf16.msra.mxu1 %v7071_v25  ;;  %v7192_v25 = vld [vmem:[#allocation5 + $0x3f8] sm:$0xff] }
0x11b0   :  { %7301 = vmatprep.subr.bf16.mxu1 %v7076_v5  ;;  %v7191_v5 = vld [vmem:[#allocation5 + $0x3f0] sm:$0xff] }
0x11b3   :  { %7302 = vmatpush1.bf16.msra.mxu1 %v7075_v50  ;;  %v7193_v50 = vld [vmem:[#allocation29] sm:$0xf] }
0x11b4   :  { %7303 = vmatprep.subr.bf16.mxu1 %v7080_v13  ;;  %v7198_v13 = vrot.slane %v7193_v50, %v9331_v8 }
0x11b7   :  { %7304 = vmatpush1.bf16.msra.mxu1 %v7079_v7  ;;  %v7202_v7 = vrot.slane %v7193_v50, %v9339_v18 }
0x11b8   :  { %7305 = vmatprep.subr.bf16.mxu1 %v7084_v35 }
0x11bb   :  { %7306 = vmatpush1.bf16.msra.mxu1 %v7083_v55 }
0x11bc   :  { %7307 = vmatprep.subr.bf16.mxu1 %v7088_v10 }
0x11bf   :  { %7308 = vmatpush1.bf16.msra.mxu1 %v7087_v29 }
0x11c0   :  { %7309 = vmatprep.subr.bf16.mxu1 %v7092_v57 }
0x11c3   :  { %7310 = vmatpush1.bf16.msra.mxu1 %v7091_v4 }
0x11c4   :  { %7311 = vmatprep.subr.bf16.mxu1 %v7096_v30 }
0x11c7   :  { %7312 = vmatpush1.bf16.msra.mxu1 %v7095_v20 }
0x11c8   :  { %7313 = vmatprep.subr.bf16.mxu1 %v7100_v31  ;;  %v7206_v31 = vrot.slane %v7193_v50, %v9334_v52 }
0x11cb   :  { %7314 = vmatpush1.bf16.msra.mxu1 %v7099_v46  ;;  %v7210_v46 = vrot.slane %v7193_v50, %v9342_v17 }
0x11cc   :  { %7315 = vmatprep.subr.bf16.mxu1 %v7104_v60 }
0x11cf   :  { %7316 = vmatpush1.bf16.msra.mxu1 %v7103_v27 }
0x11d0   :  { %7317 = vmatprep.subr.bf16.mxu1 %v7108_v3 }
0x11d3   :  { %7318 = vmatpush1.bf16.msra.mxu1 %v7107_v54 }
0x11d4   :  { %7319 = vmatprep.subr.bf16.mxu1 %v7112_v59 }
0x11d7   :  { %7320 = vmatpush1.bf16.msra.mxu1 %v7111_v49 }
0x11d8   :  { %7321 = vmatprep.subr.bf16.mxu1 %v7116_v40 }
0x11db   :  { %7322 = vmatpush1.bf16.msra.mxu1 %v7115_v51 }
0x11dc   :  { %7323 = vmatprep.subr.bf16.mxu1 %v7120_v58 }
0x11df   :  { %7324 = vmatpush1.bf16.msra.mxu1 %v7119_v37 }
0x11e0   :  { %7325 = vmatprep.subr.bf16.mxu1 %v7124_v21 }
0x11e3   :  { %7326 = vmatpush1.bf16.msra.mxu1 %v7123_v32 }
0x11e4   :  { %7327 = vmatprep.subr.bf16.mxu1 %v7128_v63 }
0x11e7   :  { %7328 = vmatpush1.bf16.msra.mxu1 %v7127_v16 }
0x11e8   :  { %7338 = vmatprep.subr.bf16.mxu1 %v7132_v45 }
0x11ea   :  { %7330 = vmatmul.mubr.bf16.vlgmr.msra.gmra.mrb[136].mxu1 %v9851_v36  ;;  %v7151_v36 = vld [vmem:[#allocation5 + $0x2b0] sm:$0xff] }
0x11eb   :  { %7339 = vmatpush1.bf16.msra.mxu1 %v7131_v19  ;;  %7370 = vmatprep.mubr.bf16.mxu1 %v9856_v41  ;;  %v7155_v41 = vld [vmem:[#allocation5 + $0x2d0] sm:$0xff] }
0x11ec   :  { %7340 = vmatprep.subr.bf16.mxu1 %v7136_v43 }
0x11ef   :  { %7341 = vmatpush1.bf16.msra.mxu1 %v7135_v11 }
0x11f0   :  { %7342 = vmatprep.subr.bf16.mxu1 %v7140_v28 }
0x11f3   :  { %7343 = vmatpush1.bf16.msra.mxu1 %v7139_v33 }
0x11f4   :  { %7344 = vmatprep.subr.bf16.mxu1 %v7144_v0 }
0x11f7   :  { %7345 = vmatpush1.bf16.msra.mxu1 %v7143_v14 }
0x11f8   :  { %7346 = vmatprep.subr.bf16.mxu1 %v7148_v47 }
0x11fb   :  { %7347 = vmatpush1.bf16.msra.mxu1 %v7147_v56 }
0x11fc   :  { %7348 = vmatprep.subr.bf16.mxu1 %v7152_v38 }
0x11ff   :  { %7349 = vmatpush1.bf16.msra.mxu1 %v7151_v36 }
0x1200   :  { %7350 = vmatprep.subr.bf16.mxu1 %v7156_v23 }
0x1203   :  { %7351 = vmatpush1.bf16.msra.mxu1 %v7155_v41 }
0x1204   :  { %7352 = vmatprep.subr.bf16.mxu1 %v7160_v12 }
0x1207   :  { %7353 = vmatpush1.bf16.msra.mxu1 %v7159_v1 }
0x1208   :  { %7354 = vmatprep.subr.bf16.mxu1 %v7164_v34 }
0x120b   :  { %7355 = vmatpush1.bf16.msra.mxu1 %v7163_v42 }
0x120c   :  { %7356 = vmatprep.subr.bf16.mxu1 %v7168_v15 }
0x120f   :  { %7357 = vmatpush1.bf16.msra.mxu1 %v7167_v48 }
0x1210   :  { %7358 = vmatprep.subr.bf16.mxu1 %v7172_v26 }
0x1213   :  { %7359 = vmatpush1.bf16.msra.mxu1 %v7171_v2 }
0x1214   :  { %7360 = vmatprep.subr.bf16.mxu1 %v7176_v9 }
0x1217   :  { %7361 = vmatpush1.bf16.msra.mxu1 %v7175_v24 }
0x1218   :  { %7362 = vmatprep.subr.bf16.mxu1 %v7180_v62 }
0x121b   :  { %7363 = vmatpush1.bf16.msra.mxu1 %v7179_v22 }
0x121c   :  { %7364 = vmatprep.subr.bf16.mxu1 %v7184_v53 }
0x121f   :  { %7365 = vmatpush1.bf16.msra.mxu1 %v7183_v44 }
0x1220   :  { %7366 = vmatprep.subr.bf16.mxu1 %v7188_v39 }
0x1223   :  { %7367 = vmatpush1.bf16.msra.mxu1 %v7187_v6 }
0x1224   :  { %7368 = vmatprep.subr.bf16.mxu1 %v7192_v25 }
0x1227   :  { %7369 = vmatpush1.bf16.msra.mxu1 %v7191_v5 }
0x122a   :  { %7371 = vmatmul.mubr.bf16.vlgmr.msra.gmra.mrb[136].mxu1 %v9863_v61 }
0x127d   :  { %v7290_v35 = vpop.f32.mrb[132].mxu1 }
0x127e   :  { %v9872_v55 = vadd.f32 %v7290_v35, %v7198_v13  ;;  %v7292_v10 = vpop.f32.mrb[133].mxu1 }
0x127f   :  { %v7983_v29 = vadd.f32 %v7292_v10, %v7202_v7  ;;  %v7294_v57 = vpop.f32.mrb[134].mxu1 }
0x1280   :  { %v7379_v4 = vmax.f32 %v9872_v55, 0.0  ;;  %v7295_v30 = vpop.f32.mrb[135].mxu1 }
0x1281   :  { %v7380_v20 = vmax.f32 %v7983_v29, 0.0 }
0x12fd   :  { %v7372_v61 = vpop.f32.mrb[136].mxu1 }
0x12fe   :  { %v9877_v60 = vadd.f32 %v7372_v61, %v7206_v31  ;;  %v7374_v27 = vpop.f32.mrb[137].mxu1 }
0x12ff   :  { %v9879_v3 = vadd.f32 %v7374_v27, %v7210_v46  ;;  %v7376_v54 = vpop.f32.mrb[138].mxu1 }
0x1300   :  { %v7381_v59 = vmax.f32 %v9877_v60, 0.0  ;;  %v7377_v49 = vpop.f32.mrb[139].mxu1 }
0x1301   :  { %v7382_v40 = vmax.f32 %v9879_v3, 0.0 }
0x1302   :  { %8663 = dma.done.wait [#allocation8 + $0x4], 8192 }
0x1303   :  { %8664 = vsyncadd [#allocation8 + $0x4], 4294959104  ;;  %v7387_v51 = vpack.c.bf16 %v7380_v20, %v7380_v20  ;;  %v7391_v58 = vld [vmem:[#allocation6 + $0x8] sm:$0xff]  ;;  %v7390_v52 = vld [vmem:[#allocation6] sm:$0xff]  ;;  %v7386_v22 = vpack.c.bf16 %v7379_v4, %v7379_v4  ;;  %v7389_v53 = vpack.c.bf16 %v7382_v40, %v7382_v40 }
0x1304   :  { %v7393_v37 = vld [vmem:[#allocation6 + $0x18] sm:$0xff]  ;;  %7466 = vmatprep.subr.bf16.mxu0 %v7391_v58  ;;  %v7392_v17 = vld [vmem:[#allocation6 + $0x10] sm:$0xff]  ;;  %v7395_v21 = vld [vmem:[#allocation6 + $0x28] sm:$0xff] }
0x1305   :  { %7498 = vmatprep.mubr.bf16.mxu0 %v7387_v51  ;;  %7467 = vmatpush1.bf16.msra.mxu0 %v7390_v52  ;;  %v7394_v32 = vld [vmem:[#allocation6 + $0x20] sm:$0xff]  ;;  %v7397_v63 = vld [vmem:[#allocation6 + $0x38] sm:$0xff]  ;;  %v7396_v16 = vld [vmem:[#allocation6 + $0x30] sm:$0xff] }
0x1306   :  { %7468 = vmatprep.subr.bf16.mxu0 %v7393_v37  ;;  %v7399_v45 = vld [vmem:[#allocation6 + $0x48] sm:$0xff]  ;;  %v7398_v19 = vld [vmem:[#allocation6 + $0x40] sm:$0xff]  ;;  %v7401_v43 = vld [vmem:[#allocation6 + $0x58] sm:$0xff] }
0x1307   :  { %v7400_v11 = vld [vmem:[#allocation6 + $0x50] sm:$0xff]  ;;  %v7403_v28 = vld [vmem:[#allocation6 + $0x68] sm:$0xff]  ;;  %v7402_v33 = vld [vmem:[#allocation6 + $0x60] sm:$0xff] }
0x1308   :  { %v7405_v0 = vld [vmem:[#allocation6 + $0x78] sm:$0xff]  ;;  %v7404_v14 = vld [vmem:[#allocation6 + $0x70] sm:$0xff]  ;;  %v7407_v47 = vld [vmem:[#allocation6 + $0x88] sm:$0xff] }
0x1309   :  { %7469 = vmatpush1.bf16.msra.mxu0 %v7392_v17  ;;  %v7406_v56 = vld [vmem:[#allocation6 + $0x80] sm:$0xff]  ;;  %v7409_v38 = vld [vmem:[#allocation6 + $0x98] sm:$0xff]  ;;  %v7408_v36 = vld [vmem:[#allocation6 + $0x90] sm:$0xff] }
0x130a   :  { %7470 = vmatprep.subr.bf16.mxu0 %v7395_v21  ;;  %v7411_v23 = vld [vmem:[#allocation6 + $0xa8] sm:$0xff]  ;;  %v7410_v41 = vld [vmem:[#allocation6 + $0xa0] sm:$0xff]  ;;  %v7413_v12 = vld [vmem:[#allocation6 + $0xb8] sm:$0xff] }
0x130b   :  { %v7412_v1 = vld [vmem:[#allocation6 + $0xb0] sm:$0xff]  ;;  %v7415_v34 = vld [vmem:[#allocation6 + $0xc8] sm:$0xff]  ;;  %v7414_v42 = vld [vmem:[#allocation6 + $0xc0] sm:$0xff] }
0x130c   :  { %v7417_v15 = vld [vmem:[#allocation6 + $0xd8] sm:$0xff]  ;;  %v7416_v48 = vld [vmem:[#allocation6 + $0xd0] sm:$0xff]  ;;  %v7419_v26 = vld [vmem:[#allocation6 + $0xe8] sm:$0xff] }
0x130d   :  { %7471 = vmatpush1.bf16.msra.mxu0 %v7394_v32  ;;  %v7418_v2 = vld [vmem:[#allocation6 + $0xe0] sm:$0xff]  ;;  %v7421_v9 = vld [vmem:[#allocation6 + $0xf8] sm:$0xff]  ;;  %v7420_v24 = vld [vmem:[#allocation6 + $0xf0] sm:$0xff] }
0x130e   :  { %7472 = vmatprep.subr.bf16.mxu0 %v7397_v63  ;;  %v7423_v62 = vld [vmem:[#allocation6 + $0x108] sm:$0xff]  ;;  %v7422_v44 = vld [vmem:[#allocation6 + $0x100] sm:$0xff]  ;;  %v7425_v39 = vld [vmem:[#allocation6 + $0x118] sm:$0xff]  ;;  %v7388_v63 = vpack.c.bf16 %v7381_v59, %v7381_v59 }
0x130f   :  { %v7424_v6 = vld [vmem:[#allocation6 + $0x110] sm:$0xff]  ;;  %v7427_v25 = vld [vmem:[#allocation6 + $0x128] sm:$0xff]  ;;  %v7426_v5 = vld [vmem:[#allocation6 + $0x120] sm:$0xff] }
0x1310   :  { %v7429_v50 = vld [vmem:[#allocation6 + $0x138] sm:$0xff]  ;;  %v7428_v13 = vld [vmem:[#allocation6 + $0x130] sm:$0xff]  ;;  %v7431_v7 = vld [vmem:[#allocation6 + $0x148] sm:$0xff] }
0x1311   :  { %7473 = vmatpush1.bf16.msra.mxu0 %v7396_v16  ;;  %v7430_v35 = vld [vmem:[#allocation6 + $0x140] sm:$0xff]  ;;  %v7433_v55 = vld [vmem:[#allocation6 + $0x158] sm:$0xff]  ;;  %v7432_v10 = vld [vmem:[#allocation6 + $0x150] sm:$0xff] }
0x1312   :  { %7474 = vmatprep.subr.bf16.mxu0 %v7399_v45  ;;  %v7435_v29 = vld [vmem:[#allocation6 + $0x168] sm:$0xff]  ;;  %v7434_v57 = vld [vmem:[#allocation6 + $0x160] sm:$0xff]  ;;  %v7437_v4 = vld [vmem:[#allocation6 + $0x178] sm:$0xff] }
0x1313   :  { %v7436_v30 = vld [vmem:[#allocation6 + $0x170] sm:$0xff]  ;;  %v7439_v20 = vld [vmem:[#allocation6 + $0x188] sm:$0xff]  ;;  %v7438_v31 = vld [vmem:[#allocation6 + $0x180] sm:$0xff] }
0x1314   :  { %v7441_v46 = vld [vmem:[#allocation6 + $0x198] sm:$0xff]  ;;  %v7440_v61 = vld [vmem:[#allocation6 + $0x190] sm:$0xff]  ;;  %v7443_v27 = vld [vmem:[#allocation6 + $0x1a8] sm:$0xff] }
0x1315   :  { %7475 = vmatpush1.bf16.msra.mxu0 %v7398_v19  ;;  %v7442_v3 = vld [vmem:[#allocation6 + $0x1a0] sm:$0xff]  ;;  %v7445_v54 = vld [vmem:[#allocation6 + $0x1b8] sm:$0xff]  ;;  %v7444_v49 = vld [vmem:[#allocation6 + $0x1b0] sm:$0xff] }
0x1316   :  { %7476 = vmatprep.subr.bf16.mxu0 %v7401_v43  ;;  %v7447_v40 = vld [vmem:[#allocation6 + $0x1c8] sm:$0xff]  ;;  %v7446_v51 = vld [vmem:[#allocation6 + $0x1c0] sm:$0xff]  ;;  %v7449_v58 = vld [vmem:[#allocation6 + $0x1d8] sm:$0xff] }
0x1317   :  { %v7448_v52 = vld [vmem:[#allocation6 + $0x1d0] sm:$0xff]  ;;  %v7451_v37 = vld [vmem:[#allocation6 + $0x1e8] sm:$0xff]  ;;  %v7450_v17 = vld [vmem:[#allocation6 + $0x1e0] sm:$0xff] }
0x1318   :  { %v7453_v21 = vld [vmem:[#allocation6 + $0x1f8] sm:$0xff]  ;;  %v7452_v32 = vld [vmem:[#allocation6 + $0x1f0] sm:$0xff]  ;;  %v7454_v16 = vld [vmem:[#allocation31] sm:$0x3] }
0x1319   :  { %7477 = vmatpush1.bf16.msra.mxu0 %v7400_v11  ;;  %v7459_v45 = vrot.slane %v7454_v16, %v9331_v8  ;;  %v7463_v19 = vrot.slane %v7454_v16, %v9339_v18 }
0x131a   :  { %7478 = vmatprep.subr.bf16.mxu0 %v7403_v28 }
0x131d   :  { %7479 = vmatpush1.bf16.msra.mxu0 %v7402_v33 }
0x131e   :  { %7480 = vmatprep.subr.bf16.mxu0 %v7405_v0 }
0x1321   :  { %7481 = vmatpush1.bf16.msra.mxu0 %v7404_v14 }
0x1322   :  { %7482 = vmatprep.subr.bf16.mxu0 %v7407_v47 }
0x1325   :  { %7483 = vmatpush1.bf16.msra.mxu0 %v7406_v56 }
0x1326   :  { %7484 = vmatprep.subr.bf16.mxu0 %v7409_v38 }
0x1329   :  { %7485 = vmatpush1.bf16.msra.mxu0 %v7408_v36 }
0x132a   :  { %7486 = vmatprep.subr.bf16.mxu0 %v7411_v23 }
0x132d   :  { %7487 = vmatpush1.bf16.msra.mxu0 %v7410_v41 }
0x132e   :  { %7488 = vmatprep.subr.bf16.mxu0 %v7413_v12 }
0x1331   :  { %7489 = vmatpush1.bf16.msra.mxu0 %v7412_v1 }
0x1332   :  { %7490 = vmatprep.subr.bf16.mxu0 %v7415_v34 }
0x1335   :  { %7491 = vmatpush1.bf16.msra.mxu0 %v7414_v42 }
0x1336   :  { %7492 = vmatprep.subr.bf16.mxu0 %v7417_v15 }
0x1339   :  { %7493 = vmatpush1.bf16.msra.mxu0 %v7416_v48 }
0x133a   :  { %7494 = vmatprep.subr.bf16.mxu0 %v7419_v26 }
0x133d   :  { %7495 = vmatpush1.bf16.msra.mxu0 %v7418_v2 }
0x133e   :  { %7496 = vmatprep.subr.bf16.mxu0 %v7421_v9 }
0x1341   :  { %7497 = vmatpush1.bf16.msra.mxu0 %v7420_v24 }
0x1342   :  { %7507 = vmatprep.subr.bf16.mxu0 %v7423_v62 }
0x1344   :  { %7499 = vmatmul.mubr.bf16.vlgmr.msra.gmra.mrb[104].mxu0 %v7386_v22 }
0x1345   :  { %7508 = vmatpush1.bf16.msra.mxu0 %v7422_v44  ;;  %7539 = vmatprep.mubr.bf16.mxu0 %v7389_v53 }
0x1346   :  { %7509 = vmatprep.subr.bf16.mxu0 %v7425_v39 }
0x1349   :  { %7510 = vmatpush1.bf16.msra.mxu0 %v7424_v6 }
0x134a   :  { %7511 = vmatprep.subr.bf16.mxu0 %v7427_v25 }
0x134d   :  { %7512 = vmatpush1.bf16.msra.mxu0 %v7426_v5 }
0x134e   :  { %7513 = vmatprep.subr.bf16.mxu0 %v7429_v50 }
0x1351   :  { %7514 = vmatpush1.bf16.msra.mxu0 %v7428_v13 }
0x1352   :  { %7515 = vmatprep.subr.bf16.mxu0 %v7431_v7 }
0x1355   :  { %7516 = vmatpush1.bf16.msra.mxu0 %v7430_v35 }
0x1356   :  { %7517 = vmatprep.subr.bf16.mxu0 %v7433_v55 }
0x1359   :  { %7518 = vmatpush1.bf16.msra.mxu0 %v7432_v10 }
0x135a   :  { %7519 = vmatprep.subr.bf16.mxu0 %v7435_v29 }
0x135d   :  { %7520 = vmatpush1.bf16.msra.mxu0 %v7434_v57 }
0x135e   :  { %7521 = vmatprep.subr.bf16.mxu0 %v7437_v4 }
0x1361   :  { %7522 = vmatpush1.bf16.msra.mxu0 %v7436_v30 }
0x1362   :  { %7523 = vmatprep.subr.bf16.mxu0 %v7439_v20 }
0x1365   :  { %7524 = vmatpush1.bf16.msra.mxu0 %v7438_v31 }
0x1366   :  { %7525 = vmatprep.subr.bf16.mxu0 %v7441_v46 }
0x1369   :  { %7526 = vmatpush1.bf16.msra.mxu0 %v7440_v61 }
0x136a   :  { %7527 = vmatprep.subr.bf16.mxu0 %v7443_v27 }
0x136d   :  { %7528 = vmatpush1.bf16.msra.mxu0 %v7442_v3 }
0x136e   :  { %7529 = vmatprep.subr.bf16.mxu0 %v7445_v54 }
0x1371   :  { %7530 = vmatpush1.bf16.msra.mxu0 %v7444_v49 }
0x1372   :  { %7531 = vmatprep.subr.bf16.mxu0 %v7447_v40 }
0x1375   :  { %7532 = vmatpush1.bf16.msra.mxu0 %v7446_v51 }
0x1376   :  { %7533 = vmatprep.subr.bf16.mxu0 %v7449_v58 }
0x1379   :  { %7534 = vmatpush1.bf16.msra.mxu0 %v7448_v52 }
0x137a   :  { %7535 = vmatprep.subr.bf16.mxu0 %v7451_v37 }
0x137d   :  { %7536 = vmatpush1.bf16.msra.mxu0 %v7450_v17 }
0x137e   :  { %7537 = vmatprep.subr.bf16.mxu0 %v7453_v21 }
0x1381   :  { %7538 = vmatpush1.bf16.msra.mxu0 %v7452_v32 }
0x1384   :  { %7540 = vmatmul.mubr.bf16.vlgmr.msra.gmra.mrb[104].mxu0 %v7388_v63 }
0x1457   :  { %v7541_v43 = vpop.f32.mrb[104].mxu0 }
0x1458   :  { %v7986_v11 = vadd.f32 %v7541_v43, %v7459_v45  ;;  %v7543_v28 = vpop.f32.mrb[105].mxu0 }
0x1459   :  { %v7987_v33 = vadd.f32 %v7543_v28, %v7463_v19  ;;  %v7545_v0 = vpop.f32.mrb[106].mxu0 }
0x145a   :  { %v7548_v14 = vmax.f32 %v7986_v11, 0.0  ;;  %v7546_v47 = vpop.f32.mrb[107].mxu0 }
0x145b   :  { %v7549_v56 = vmax.f32 %v7987_v33, 0.0 }
0x145c   :  { %8665 = dma.done.wait [#allocation8 + $0x5], 2048 }
0x145d   :  { %8666 = vsyncadd [#allocation8 + $0x5], 4294965248  ;;  %v7555_v60 = vpack.c.bf16 %v7549_v56, %v7549_v56  ;;  %v7564_v59 = vld [vmem:[#allocation7 + $0x40] sm:$0xff]  ;;  %v7565_v36 = vld [vmem:[#allocation7 + $0x48] sm:$0xff]  ;;  %v7554_v24 = vpack.c.bf16 %v7548_v14, %v7548_v14  ;;  %s9946_s7 = sld [smem:[#allocation71_spill]] }
0x145e   :  { %v7556_v38 = vld [vmem:[#allocation7] sm:$0xff]  ;;  %7848 = vmatprep.subr.bf16.mxu1 %v7564_v59  ;;  %v7557_v8 = vld [vmem:[#allocation7 + $0x8] sm:$0xff]  ;;  %v7566_v18 = vld [vmem:[#allocation7 + $0x50] sm:$0xff] }
0x145f   :  { %7611 = vmatprep.mubr.bf16.mxu1 %v7555_v60  ;;  %7849 = vmatpush3.bf16.msra.mxu1 %v7556_v38  ;;  %v7558_v23 = vld [vmem:[#allocation7 + $0x10] sm:$0xff]  ;;  %v7567_v41 = vld [vmem:[#allocation7 + $0x58] sm:$0xff]  ;;  %v7568_v1 = vld [vmem:[#allocation7 + $0x60] sm:$0xff] }
0x1460   :  { %7850 = vmatprep.subr.bf16.mxu1 %v7565_v36  ;;  %v7559_v12 = vld [vmem:[#allocation7 + $0x18] sm:$0xff]  ;;  %v7560_v34 = vld [vmem:[#allocation7 + $0x20] sm:$0xff]  ;;  %v7569_v42 = vld [vmem:[#allocation7 + $0x68] sm:$0xff] }
0x1461   :  { %v7561_v15 = vld [vmem:[#allocation7 + $0x28] sm:$0xff]  ;;  %v7570_v48 = vld [vmem:[#allocation7 + $0x70] sm:$0xff]  ;;  %v7571_v2 = vld [vmem:[#allocation7 + $0x78] sm:$0xff] }
0x1462   :  { %v7562_v26 = vld [vmem:[#allocation7 + $0x30] sm:$0xff]  ;;  %v7563_v9 = vld [vmem:[#allocation7 + $0x38] sm:$0xff] }
0x1463   :  { %7851 = vmatpush3.bf16.msra.mxu1 %v7557_v8  ;;  %v7796_v22 = vld [vmem:[#allocation32] ss:$0 sm:$0xff] }
0x1464   :  { %7852 = vmatprep.subr.bf16.mxu1 %v7566_v18 }
0x1467   :  { %7853 = vmatpush3.bf16.msra.mxu1 %v7558_v23 }
0x1468   :  { %7854 = vmatprep.subr.bf16.mxu1 %v7567_v41 }
0x146b   :  { %7855 = vmatpush3.bf16.msra.mxu1 %v7559_v12 }
0x146c   :  { %7856 = vmatprep.subr.bf16.mxu1 %v7568_v1 }
0x146f   :  { %7857 = vmatpush3.bf16.msra.mxu1 %v7560_v34 }
0x1470   :  { %7858 = vmatprep.subr.bf16.mxu1 %v7569_v42 }
0x1473   :  { %7859 = vmatpush3.bf16.msra.mxu1 %v7561_v15 }
0x1474   :  { %7860 = vmatprep.subr.bf16.mxu1 %v7570_v48 }
0x1477   :  { %7861 = vmatpush3.bf16.msra.mxu1 %v7562_v26 }
0x1478   :  { %7862 = vmatprep.subr.bf16.mxu1 %v7571_v2 }
0x147b   :  { %7863 = vmatpush3.bf16.msra.mxu1 %v7563_v9 }
0x147e   :  { %7612 = vmatmul.mubr.bf16.vlgmr.msra.gmra.mrb[140].mxu1 %v7554_v24 }
0x1551   :  { %v7864_v62 = vpop.f32.mrb[140].mxu1 }
0x1552   :  { %v7865_v53 = vpop.f32.mrb[141].mxu1 }
0x1553   :  { %v7866_v44 = vadd.f32 %v7865_v53, %v7864_v62  ;;  %v7867_v39 = vpop.f32.mrb[142].mxu1 }
0x1554   :  { %v7868_v6 = vpop.f32.mrb[143].mxu1 }
0x1555   :  { %v7614_v25 = vadd.f32 %v7866_v44, %v7796_v22 }
0x1557   :  { %7619 = vst [vmem:[%s9946_s7] sm:$0x3] %v7614_v25 }
0x1558   :  { %7624 = vsyncpa [#allocation10], 1 }
0x1559   :  { %7625 = vsyncpa [#allocation12], 1 }
0x155a   :  { %7626 = vsyncpa [#allocation15], 1 }
0x155b   :  { %7627 = vsyncpa [#allocation18], 1 }
0x155c   :  { %7628 = vsyncpa [#allocation21], 1 }
0x155d   :  { %7629 = vsyncpa [#allocation24], 1 }
0x155e   :  { %7630 = vsyncpa [#allocation27], 1 }
0x155f   :  { %7631 = vsyncpa [#allocation30], 1 }
0x1560   :  { %7632 = vsyncpa [#allocation33], 1 }
0x1561   :  { %7633 = vsyncmov [#allocation8] }
0x1564   :  { %s7634_s5 = vpop.sfrf %7633 }
0x1565   :  { %p7797_p10 = scmp.ne.s32.totalorder %s7634_s5, 0 }
0x1567   :  { %7638 = shalt.err (%p7797_p10)  }
0x1568   :  { %7640 = vsyncmov [#allocation8 + $0x1] }
0x156b   :  { %s7641_s27 = vpop.sfrf %7640 }
0x156c   :  { %p7798_p11 = scmp.ne.s32.totalorder %s7641_s27, 0 }
0x156e   :  { %7645 = shalt.err (%p7798_p11)  }
0x156f   :  { %7647 = vsyncmov [#allocation8 + $0x2] }
0x1572   :  { %s7648_s4 = vpop.sfrf %7647 }
0x1573   :  { %p7799_p12 = scmp.ne.s32.totalorder %s7648_s4, 0 }
0x1575   :  { %7652 = shalt.err (%p7799_p12)  }
0x1576   :  { %7654 = vsyncmov [#allocation8 + $0x3] }
0x1579   :  { %s7655_s19 = vpop.sfrf %7654 }
0x157a   :  { %p7800_p13 = scmp.ne.s32.totalorder %s7655_s19, 0 }
0x157c   :  { %7659 = shalt.err (%p7800_p13)  }
0x157d   :  { %7661 = vsyncmov [#allocation8 + $0x4] }
0x1580   :  { %s7662_s29 = vpop.sfrf %7661 }
0x1581   :  { %p7801_p0 = scmp.ne.s32.totalorder %s7662_s29, 0 }
0x1583   :  { %7666 = shalt.err (%p7801_p0)  }
0x1584   :  { %7668 = vsyncmov [#allocation8 + $0x5] }
0x1587   :  { %s7669_s2 = vpop.sfrf %7668 }
0x1588   :  { %p7802_p1 = scmp.ne.s32.totalorder %s7669_s2, 0 }
0x158a   :  { %7673 = shalt.err (%p7802_p1)  }

</bundles_post_ra>
